<compile_context>
chip_gen: v7x
topology: tpu7x:2x2x1
jax: 0.10.0
libtpu: 0.0.40
codegen_flags: <defaults>
</compile_context>

<pallas_src>
import math
import functools

import numpy as np
import jax
import jax.numpy as jnp
from jax import lax
from jax.experimental import pallas as pl
from jax.experimental.pallas import tpu as pltpu


def _layernorm(x, gamma, beta, eps=1e-5):
    # PyTorch LayerNorm: biased variance, eps inside sqrt.
    mean = jnp.mean(x, axis=-1, keepdims=True)
    var = jnp.mean((x - mean) ** 2, axis=-1, keepdims=True)
    return (x - mean) * lax.rsqrt(var + eps) * gamma + beta


def transformer_encoder_kernel(x_ref,
                               ln0_g_ref, ln0_b_ref,
                               wqkv_ref, bqkv_ref,
                               wo_ref, bo_ref,
                               ln1_g_ref, ln1_b_ref,
                               w1_ref, b1_ref,
                               w2_ref, b2_ref,
                               o_ref,
                               *, num_heads, seq_len, model_dim):
    H, N, D = num_heads, seq_len, model_dim
    dh = D // H
    scale = 1.0 / math.sqrt(dh)

    xblk = x_ref[...]                              # (Bt, N*D) or (Bt, N, D) f32
    Bt = xblk.shape[0]
    R = Bt * N
    x2 = xblk.reshape(R, D)

    # ---- LayerNorm 0 (pre-attention, f32) ----
    xn = _layernorm(x2, ln0_g_ref[...], ln0_b_ref[...])
    xn_b = xn.astype(jnp.bfloat16)                 # bf16 MXU inputs, f32 accumulation

    # ---- Fused QKV projection: one lane-dense (R, D) x (D, 3D) matmul ----
    qkv = jnp.dot(xn_b, wqkv_ref[...],
                  preferred_element_type=jnp.float32) + bqkv_ref[...]
    qkv_b = qkv.astype(jnp.bfloat16)

    # Head-major relayout via static lane slices + leading-axis stack (cheap concat)
    # so scores / softmax / PV run ONCE batched over (head, sequence) instead of an
    # H-way unrolled loop.
    def split_heads(col_off):
        return jnp.stack(
            [qkv_b[:, col_off + h * dh: col_off + (h + 1) * dh] for h in range(H)],
            axis=0).reshape(H * Bt, N, dh)

    q = split_heads(0)
    k = split_heads(D)
    v = split_heads(2 * D)

    # ---- Attention core, batched over H*Bt (K-transpose folded into contraction) ----
    s = jnp.einsum('bnd,bmd->bnm', q, k,
                   preferred_element_type=jnp.float32) * scale
    s = s - jnp.max(s, axis=-1, keepdims=True)
    p = jnp.exp(s)
    p = p * pl.reciprocal(jnp.sum(p, axis=-1, keepdims=True), approx=True)

    a = jnp.einsum('bnm,bmd->bnd', p.astype(jnp.bfloat16), v,
                   preferred_element_type=jnp.float32)           # (H*Bt, N, dh)

    # Re-assemble concat-heads layout (R, D); ONE fused output projection (K = D).
    a = a.reshape(H, R, dh)
    a_cat = jnp.concatenate([a[h] for h in range(H)], axis=-1)   # (R, D)
    attn = jnp.dot(a_cat.astype(jnp.bfloat16), wo_ref[...],
                   preferred_element_type=jnp.float32) + bo_ref[...]

    # dropout -> identity (eval semantics)
    out1 = x2 + attn

    # ---- LayerNorm 1 + position-wise FFN ----
    # TODO(synk): for very large D on v7x (64 MiB VMEM), tile the FFN hidden dim (4D)
    # in column chunks so h1 and both FFN weights never co-reside at full width.
    yn = _layernorm(out1, ln1_g_ref[...], ln1_b_ref[...])
    h1 = jnp.dot(yn.astype(jnp.bfloat16), w1_ref[...],
                 preferred_element_type=jnp.float32) + b1_ref[...]
    h1 = 0.5 * h1 * (1.0 + lax.erf(h1 * (1.0 / math.sqrt(2.0))))  # exact (erf) GELU
    h2 = jnp.dot(h1.astype(jnp.bfloat16), w2_ref[...],
                 preferred_element_type=jnp.float32) + b2_ref[...]

    # TODO(synk): optionally store bf16 output to halve HBM writeback on v7x.
    o_ref[...] = (out1 + h2).reshape(o_ref.shape)


def _vmem_budget_bytes():
    """~85% of physical VMEM when queryable; conservative fallback otherwise."""
    try:
        return int(0.85 * pltpu.get_tpu_info().vmem_capacity_bytes)
    except Exception:
        return 48 * 1024 * 1024  # safe for v7x (64 MiB/TC) and below


def _vmem_estimate_bytes(Bt, N, D, H):
    """Rough working-set estimate for one grid step (activations + weights)."""
    R = Bt * N
    f32, bf16 = 4, 2
    io = 2 * (2 * R * D * f32)                         # x + out blocks, double-buffered
    weights = bf16 * D * D * (3 + 1 + 4 + 4) + f32 * (12 * D + 16)  # single-buffered
    scratch = f32 * (3 * R * D                         # fused qkv
                     + 2 * H * Bt * N * N              # scores + probs
                     + 2 * R * 4 * D                   # FFN hidden
                     + 6 * R * D)                      # residuals / layernorm temps
    return io + weights + scratch


def _choose_block_batch(B, N, D, H, budget, target_rows=512):
    """Largest divisor Bt of B s.t. Bt*N <= target_rows and the working set fits;
    prefer >= 2 grid steps so v7x can shard the batch axis across both cores."""
    divisors = [bt for bt in range(1, B + 1) if B % bt == 0]

    def ok(bt):
        return bt * N <= target_rows and _vmem_estimate_bytes(bt, N, D, H) <= budget

    for want_multi_step in (True, False):
        cands = [bt for bt in divisors
                 if ok(bt) and (not want_multi_step or B // bt >= 2)]
        if cands:
            return max(cands)
    return 1


def transformer_encoder(x, packed, num_heads, block_batch=None):
    """x: (B, N, D) float32.  packed: dict from pack_params()."""
    B, N, D = x.shape
    budget = _vmem_budget_bytes()
    Bt = block_batch if block_batch is not None else _choose_block_batch(
        B, N, D, num_heads, budget)
    assert B % Bt == 0
    grid = (B // Bt,)

    kernel = functools.partial(transformer_encoder_kernel,
                               num_heads=num_heads, seq_len=N, model_dim=D)

    weight_names = ("ln0_g", "ln0_b", "wqkv", "bqkv", "wo", "bo",
                    "ln1_g", "ln1_b", "w1", "b1", "w2", "b2")
    weights = tuple(packed[k] for k in weight_names)

    est = _vmem_estimate_bytes(Bt, N, D, num_heads)
    vmem_limit = int(min(budget, max(32 * 1024 * 1024, 2 * est)))

    # Lane-dense I/O blocks (flatten trailing (N, D) -> N*D) when legal & useful.
    flat_ok = (N * D) % 128 == 0 and (Bt % 8 == 0 or Bt == B)

    def build_and_run(flat, single_buffer_weights):
        if flat:
            xin = x.reshape(B, N * D)
            io_spec = pl.BlockSpec((Bt, N * D), lambda b: (b, 0))
            out_struct = jax.ShapeDtypeStruct((B, N * D), jnp.float32)
        else:
            xin = x
            io_spec = pl.BlockSpec((Bt, N, D), lambda b: (b, 0, 0))
            out_struct = jax.ShapeDtypeStruct((B, N, D), jnp.float32)

        if single_buffer_weights:
            def wspec(a):
                return pl.BlockSpec(a.shape, (lambda b, _n=a.ndim: (0,) * _n),
                                    pipeline_mode=pl.Buffered(1))
        else:
            def wspec(a):
                return pl.BlockSpec(a.shape, (lambda b, _n=a.ndim: (0,) * _n))

        call = pl.pallas_call(
            kernel,
            out_shape=out_struct,
            grid_spec=pltpu.PrefetchScalarGridSpec(
                num_scalar_prefetch=0,
                grid=grid,
                in_specs=[io_spec] + [wspec(a) for a in weights],
                out_specs=io_spec),
            compiler_params=pltpu.CompilerParams(
                dimension_semantics=("parallel",),
                vmem_limit_bytes=vmem_limit))
        return call(xin, *weights)

    # Try most-optimized configuration first; gracefully fall back if an optional
    # feature (flat layout reshape, single-buffered weights) fails to lower on the
    # running jax/Mosaic build.  The (False, False) config is the known-good one.
    configs = ([(True, True), (True, False)] if flat_ok else []) + \
              [(False, True), (False, False)]
    last_err = None
    for flat, single in configs:
        try:
            out = build_and_run(flat, single)
            return out.reshape(B, N, D)
        except Exception as e:  # pragma: no cover - defensive fallback
            last_err = e
    raise last_err


def init_params(key, attention_dim):
    """Deterministic synthetic f32 parameters in PyTorch layouts."""
    D = attention_dim
    ks = jax.random.split(key, 6)
    s = 0.02
    w_in = jax.random.normal(ks[0], (3 * D, D), jnp.float32) * s   # in_proj_weight
    b_in = jax.random.normal(ks[1], (3 * D,), jnp.float32) * s
    w_out = jax.random.normal(ks[2], (D, D), jnp.float32) * s      # out_proj.weight
    b_out = jnp.zeros((D,), jnp.float32)
    w1 = jax.random.normal(ks[3], (4 * D, D), jnp.float32) * s     # linear_layers[0]
    b1 = jax.random.normal(ks[4], (4 * D,), jnp.float32) * s
    w2 = jax.random.normal(ks[5], (D, 4 * D), jnp.float32) * s     # linear_layers[1]
    b2 = jnp.zeros((D,), jnp.float32)
    return dict(
        ln0_g=jnp.ones((D,), jnp.float32), ln0_b=jnp.zeros((D,), jnp.float32),
        ln1_g=jnp.ones((D,), jnp.float32), ln1_b=jnp.zeros((D,), jnp.float32),
        w_in=w_in, b_in=b_in, w_out=w_out, b_out=b_out,
        w1=w1, b1=b1, w2=w2, b2=b2,
    )


def pack_params(p, num_heads):
    """Torch-layout f32 params -> kernel layout: weights pre-transposed to (in, out)
    and cast to bf16.  QKV is packed as one (D, 3D) matrix so the kernel can run a
    single fused projection; head splitting happens in-kernel via static slices."""
    del num_heads  # heads are split inside the kernel
    row = lambda v: v.reshape(1, -1)
    return dict(
        ln0_g=row(p["ln0_g"]), ln0_b=row(p["ln0_b"]),
        ln1_g=row(p["ln1_g"]), ln1_b=row(p["ln1_b"]),
        wqkv=p["w_in"].T.astype(jnp.bfloat16),      # (D, 3D), columns = [Q | K | V]
        bqkv=row(p["b_in"]),                        # (1, 3D) f32
        wo=p["w_out"].T.astype(jnp.bfloat16),       # (D, D)
        bo=row(p["b_out"]),
        w1=p["w1"].T.astype(jnp.bfloat16), b1=row(p["b1"]),
        w2=p["w2"].T.astype(jnp.bfloat16), b2=row(p["b2"]),
    )


def reference_forward(x, p, num_heads):
    """Pure-JAX f32 reference mirroring the PyTorch forward (dropout = identity)."""
    B, N, D = x.shape
    dh = D // num_heads
    xn = _layernorm(x, p["ln0_g"], p["ln0_b"])
    qkv = xn @ p["w_in"].T + p["b_in"]
    q, k, v = qkv[..., :D], qkv[..., D:2 * D], qkv[..., 2 * D:]
    q = q.reshape(B, N, num_heads, dh).transpose(0, 2, 1, 3)
    k = k.reshape(B, N, num_heads, dh).transpose(0, 2, 1, 3)
    v = v.reshape(B, N, num_heads, dh).transpose(0, 2, 1, 3)
    s = jnp.einsum("bhqd,bhkd->bhqk", q, k) / math.sqrt(dh)
    pr = jax.nn.softmax(s, axis=-1)
    a = jnp.einsum("bhqk,bhkd->bhqd", pr, v).transpose(0, 2, 1, 3).reshape(B, N, D)
    a = a @ p["w_out"].T + p["b_out"]
    out1 = x + a
    yn = _layernorm(out1, p["ln1_g"], p["ln1_b"])
    h1 = yn @ p["w1"].T + p["b1"]
    h1 = 0.5 * h1 * (1.0 + lax.erf(h1 / math.sqrt(2.0)))
    h2 = h1 @ p["w2"].T + p["b2"]
    return out1 + h2


if __name__ == "__main__":
    # batch, num_patches, attention_dim, heads (small, but B gives a 2-step grid
    # with an 8-aligned, lane-dense (8, 256) block).
    B, N, D, H = 16, 8, 32, 4
    key = jax.random.PRNGKey(0)
    kx, kp = jax.random.split(key)
    x = jax.random.normal(kx, (B, N, D), jnp.float32)
    params = init_params(kp, D)
    packed = pack_params(params, H)

    out = transformer_encoder(x, packed, H)
    out = jax.block_until_ready(out)

    ref = reference_forward(x, params, H)
    assert out.shape == (B, N, D)
    # bf16 matmul inputs + approximate reciprocal -> looser tolerance than pure f32.
    np.testing.assert_allclose(np.asarray(out), np.asarray(ref), rtol=2e-2, atol=2e-2)
    print("KERNEL_OK")
</pallas_src>

<mosaic_0001>
module attributes {stable_mosaic.version = 11 : i64} {
  func.func @transformer_encoder_kernel(%arg0: i32, %arg1: memref<8x256xf32, #tpu.memory_space<vmem>>, %arg2: memref<1x32xf32, #tpu.memory_space<vmem>>, %arg3: memref<1x32xf32, #tpu.memory_space<vmem>>, %arg4: memref<32x96xbf16, #tpu.memory_space<vmem>>, %arg5: memref<1x96xf32, #tpu.memory_space<vmem>>, %arg6: memref<32x32xbf16, #tpu.memory_space<vmem>>, %arg7: memref<1x32xf32, #tpu.memory_space<vmem>>, %arg8: memref<1x32xf32, #tpu.memory_space<vmem>>, %arg9: memref<1x32xf32, #tpu.memory_space<vmem>>, %arg10: memref<32x128xbf16, #tpu.memory_space<vmem>>, %arg11: memref<1x128xf32, #tpu.memory_space<vmem>>, %arg12: memref<128x32xbf16, #tpu.memory_space<vmem>>, %arg13: memref<1x32xf32, #tpu.memory_space<vmem>>, %arg14: memref<8x256xf32, #tpu.memory_space<vmem>>) attributes {dimension_semantics = [#tpu.dimension_semantics<parallel>], iteration_bounds = array<i64: 2>, scalar_prefetch = 0 : i64, scratch_operands = 0 : i64, tpu.core_type = #tpu.core_type<tc>, window_params = [{transform_indices = @transform_0, window_bounds = array<i64: 8, 256>}, {pipeline_mode = #tpu.pipeline_mode<synchronous>, transform_indices = @transform_1, window_bounds = array<i64: 1, 32>}, {pipeline_mode = #tpu.pipeline_mode<synchronous>, transform_indices = @transform_2, window_bounds = array<i64: 1, 32>}, {pipeline_mode = #tpu.pipeline_mode<synchronous>, transform_indices = @transform_3, window_bounds = array<i64: 32, 96>}, {pipeline_mode = #tpu.pipeline_mode<synchronous>, transform_indices = @transform_4, window_bounds = array<i64: 1, 96>}, {pipeline_mode = #tpu.pipeline_mode<synchronous>, transform_indices = @transform_5, window_bounds = array<i64: 32, 32>}, {pipeline_mode = #tpu.pipeline_mode<synchronous>, transform_indices = @transform_6, window_bounds = array<i64: 1, 32>}, {pipeline_mode = #tpu.pipeline_mode<synchronous>, transform_indices = @transform_7, window_bounds = array<i64: 1, 32>}, {pipeline_mode = #tpu.pipeline_mode<synchronous>, transform_indices = @transform_8, window_bounds = array<i64: 1, 32>}, {pipeline_mode = #tpu.pipeline_mode<synchronous>, transform_indices = @transform_9, window_bounds = array<i64: 32, 128>}, {pipeline_mode = #tpu.pipeline_mode<synchronous>, transform_indices = @transform_10, window_bounds = array<i64: 1, 128>}, {pipeline_mode = #tpu.pipeline_mode<synchronous>, transform_indices = @transform_11, window_bounds = array<i64: 128, 32>}, {pipeline_mode = #tpu.pipeline_mode<synchronous>, transform_indices = @transform_12, window_bounds = array<i64: 1, 32>}, {transform_indices = @transform_13, window_bounds = array<i64: 8, 256>}]} {
    %c0 = arith.constant 0 : index
    %c0_0 = arith.constant 0 : index
    %0 = vector.load %arg1[%c0, %c0_0] : memref<8x256xf32, #tpu.memory_space<vmem>>, vector<8x256xf32>
    %1 = vector.shape_cast %0 : vector<8x256xf32> to vector<64x32xf32>
    %c0_1 = arith.constant 0 : index
    %c0_2 = arith.constant 0 : index
    %2 = vector.load %arg2[%c0_1, %c0_2] : memref<1x32xf32, #tpu.memory_space<vmem>>, vector<1x32xf32>
    %c0_3 = arith.constant 0 : index
    %c0_4 = arith.constant 0 : index
    %3 = vector.load %arg3[%c0_3, %c0_4] : memref<1x32xf32, #tpu.memory_space<vmem>>, vector<1x32xf32>
    %cst = arith.constant dense<0.000000e+00> : vector<64xf32>
    %4 = vector.multi_reduction <add>, %1, %cst [1] : vector<64x32xf32> to vector<64xf32>
    %5 = vector.shape_cast %4 : vector<64xf32> to vector<64x1xf32>
    %cst_5 = arith.constant 3.200000e+01 : f32
    %6 = vector.broadcast %cst_5 : f32 to vector<64x1xf32>
    %7 = arith.divf %5, %6 : vector<64x1xf32>
    %8 = vector.broadcast %7 : vector<64x1xf32> to vector<64x32xf32>
    %9 = arith.subf %1, %8 : vector<64x32xf32>
    %10 = arith.mulf %9, %9 : vector<64x32xf32>
    %cst_6 = arith.constant dense<0.000000e+00> : vector<64xf32>
    %11 = vector.multi_reduction <add>, %10, %cst_6 [1] : vector<64x32xf32> to vector<64xf32>
    %12 = vector.shape_cast %11 : vector<64xf32> to vector<64x1xf32>
    %cst_7 = arith.constant 3.200000e+01 : f32
    %13 = vector.broadcast %cst_7 : f32 to vector<64x1xf32>
    %14 = arith.divf %12, %13 : vector<64x1xf32>
    %15 = vector.broadcast %7 : vector<64x1xf32> to vector<64x32xf32>
    %16 = arith.subf %1, %15 : vector<64x32xf32>
    %cst_8 = arith.constant 9.99999974E-6 : f32
    %17 = vector.broadcast %cst_8 : f32 to vector<64x1xf32>
    %18 = arith.addf %14, %17 : vector<64x1xf32>
    %19 = math.rsqrt %18 : vector<64x1xf32>
    %20 = vector.broadcast %19 : vector<64x1xf32> to vector<64x32xf32>
    %21 = arith.mulf %16, %20 : vector<64x32xf32>
    %22 = vector.broadcast %2 : vector<1x32xf32> to vector<64x32xf32>
    %23 = arith.mulf %21, %22 : vector<64x32xf32>
    %24 = vector.broadcast %3 : vector<1x32xf32> to vector<64x32xf32>
    %25 = arith.addf %23, %24 : vector<64x32xf32>
    %26 = arith.truncf %25 : vector<64x32xf32> to vector<64x32xbf16>
    %c0_9 = arith.constant 0 : index
    %c0_10 = arith.constant 0 : index
    %27 = vector.load %arg4[%c0_9, %c0_10] : memref<32x96xbf16, #tpu.memory_space<vmem>>, vector<32x96xbf16>
    %cst_11 = arith.constant dense<0.000000e+00> : vector<64x96xf32>
    %28 = tpu.matmul %26, %27, %cst_11 {dimension_numbers = #tpu.dot_dimension_numbers<[1], [0], [0], [1], [0, 0, 1, 1], [], []>} : vector<64x32xbf16>, vector<32x96xbf16>, vector<64x96xf32> -> vector<64x96xf32>
    %c0_12 = arith.constant 0 : index
    %c0_13 = arith.constant 0 : index
    %29 = vector.load %arg5[%c0_12, %c0_13] : memref<1x96xf32, #tpu.memory_space<vmem>>, vector<1x96xf32>
    %30 = vector.broadcast %29 : vector<1x96xf32> to vector<64x96xf32>
    %31 = arith.addf %28, %30 : vector<64x96xf32>
    %32 = arith.truncf %31 : vector<64x96xf32> to vector<64x96xbf16>
    %33 = vector.extract_strided_slice %32 {offsets = [0, 0], sizes = [64, 8], strides = [1, 1]} : vector<64x96xbf16> to vector<64x8xbf16>
    %34 = vector.extract_strided_slice %32 {offsets = [0, 8], sizes = [64, 8], strides = [1, 1]} : vector<64x96xbf16> to vector<64x8xbf16>
    %35 = vector.extract_strided_slice %32 {offsets = [0, 16], sizes = [64, 8], strides = [1, 1]} : vector<64x96xbf16> to vector<64x8xbf16>
    %36 = vector.extract_strided_slice %32 {offsets = [0, 24], sizes = [64, 8], strides = [1, 1]} : vector<64x96xbf16> to vector<64x8xbf16>
    %37 = vector.shape_cast %33 : vector<64x8xbf16> to vector<1x64x8xbf16>
    %38 = vector.shape_cast %34 : vector<64x8xbf16> to vector<1x64x8xbf16>
    %39 = vector.shape_cast %35 : vector<64x8xbf16> to vector<1x64x8xbf16>
    %40 = vector.shape_cast %36 : vector<64x8xbf16> to vector<1x64x8xbf16>
    %41 = tpu.concatenate %37, %38, %39, %40 in 0 : vector<1x64x8xbf16>, vector<1x64x8xbf16>, vector<1x64x8xbf16>, vector<1x64x8xbf16> -> vector<4x64x8xbf16>
    %42 = vector.shape_cast %41 : vector<4x64x8xbf16> to vector<32x8x8xbf16>
    %43 = vector.extract_strided_slice %32 {offsets = [0, 32], sizes = [64, 8], strides = [1, 1]} : vector<64x96xbf16> to vector<64x8xbf16>
    %44 = vector.extract_strided_slice %32 {offsets = [0, 40], sizes = [64, 8], strides = [1, 1]} : vector<64x96xbf16> to vector<64x8xbf16>
    %45 = vector.extract_strided_slice %32 {offsets = [0, 48], sizes = [64, 8], strides = [1, 1]} : vector<64x96xbf16> to vector<64x8xbf16>
    %46 = vector.extract_strided_slice %32 {offsets = [0, 56], sizes = [64, 8], strides = [1, 1]} : vector<64x96xbf16> to vector<64x8xbf16>
    %47 = vector.shape_cast %43 : vector<64x8xbf16> to vector<1x64x8xbf16>
    %48 = vector.shape_cast %44 : vector<64x8xbf16> to vector<1x64x8xbf16>
    %49 = vector.shape_cast %45 : vector<64x8xbf16> to vector<1x64x8xbf16>
    %50 = vector.shape_cast %46 : vector<64x8xbf16> to vector<1x64x8xbf16>
    %51 = tpu.concatenate %47, %48, %49, %50 in 0 : vector<1x64x8xbf16>, vector<1x64x8xbf16>, vector<1x64x8xbf16>, vector<1x64x8xbf16> -> vector<4x64x8xbf16>
    %52 = vector.shape_cast %51 : vector<4x64x8xbf16> to vector<32x8x8xbf16>
    %53 = vector.extract_strided_slice %32 {offsets = [0, 64], sizes = [64, 8], strides = [1, 1]} : vector<64x96xbf16> to vector<64x8xbf16>
    %54 = vector.extract_strided_slice %32 {offsets = [0, 72], sizes = [64, 8], strides = [1, 1]} : vector<64x96xbf16> to vector<64x8xbf16>
    %55 = vector.extract_strided_slice %32 {offsets = [0, 80], sizes = [64, 8], strides = [1, 1]} : vector<64x96xbf16> to vector<64x8xbf16>
    %56 = vector.extract_strided_slice %32 {offsets = [0, 88], sizes = [64, 8], strides = [1, 1]} : vector<64x96xbf16> to vector<64x8xbf16>
    %57 = vector.shape_cast %53 : vector<64x8xbf16> to vector<1x64x8xbf16>
    %58 = vector.shape_cast %54 : vector<64x8xbf16> to vector<1x64x8xbf16>
    %59 = vector.shape_cast %55 : vector<64x8xbf16> to vector<1x64x8xbf16>
    %60 = vector.shape_cast %56 : vector<64x8xbf16> to vector<1x64x8xbf16>
    %61 = tpu.concatenate %57, %58, %59, %60 in 0 : vector<1x64x8xbf16>, vector<1x64x8xbf16>, vector<1x64x8xbf16>, vector<1x64x8xbf16> -> vector<4x64x8xbf16>
    %62 = vector.shape_cast %61 : vector<4x64x8xbf16> to vector<32x8x8xbf16>
    "tpu.trace_start"() <{level = 10 : i32, message = "bnd,bmd->bnm"}> : () -> ()
    %cst_14 = arith.constant dense<0.000000e+00> : vector<32x8x8xf32>
    %63 = tpu.matmul %42, %52, %cst_14 {dimension_numbers = #tpu.dot_dimension_numbers<[2], [2], [1], [1], [0, 0, 0, 1, 1, 1], [0], [0]>} : vector<32x8x8xbf16>, vector<32x8x8xbf16>, vector<32x8x8xf32> -> vector<32x8x8xf32>
    "tpu.trace_stop"() : () -> ()
    %cst_15 = arith.constant 0.353553385 : f32
    %64 = vector.broadcast %cst_15 : f32 to vector<32x8x8xf32>
    %65 = arith.mulf %63, %64 : vector<32x8x8xf32>
    %cst_16 = arith.constant dense<0xFF800000> : vector<32x8xf32>
    %66 = vector.multi_reduction <maximumf>, %65, %cst_16 [2] : vector<32x8x8xf32> to vector<32x8xf32>
    %67 = vector.shape_cast %66 : vector<32x8xf32> to vector<32x8x1xf32>
    %68 = vector.broadcast %67 : vector<32x8x1xf32> to vector<32x8x8xf32>
    %69 = arith.subf %65, %68 : vector<32x8x8xf32>
    %70 = math.exp %69 : vector<32x8x8xf32>
    %cst_17 = arith.constant dense<0.000000e+00> : vector<32x8xf32>
    %71 = vector.multi_reduction <add>, %70, %cst_17 [2] : vector<32x8x8xf32> to vector<32x8xf32>
    %72 = vector.shape_cast %71 : vector<32x8xf32> to vector<32x8x1xf32>
    %73 = tpu.reciprocal %72 {approx = true} : vector<32x8x1xf32> -> vector<32x8x1xf32>
    %74 = vector.broadcast %73 : vector<32x8x1xf32> to vector<32x8x8xf32>
    %75 = arith.mulf %70, %74 : vector<32x8x8xf32>
    %76 = arith.truncf %75 : vector<32x8x8xf32> to vector<32x8x8xbf16>
    "tpu.trace_start"() <{level = 10 : i32, message = "bnm,bmd->bnd"}> : () -> ()
    %cst_18 = arith.constant dense<0.000000e+00> : vector<32x8x8xf32>
    %77 = tpu.matmul %76, %62, %cst_18 {dimension_numbers = #tpu.dot_dimension_numbers<[2], [1], [1], [2], [0, 0, 0, 1, 1, 2], [0], [0]>} : vector<32x8x8xbf16>, vector<32x8x8xbf16>, vector<32x8x8xf32> -> vector<32x8x8xf32>
    "tpu.trace_stop"() : () -> ()
    %78 = vector.shape_cast %77 : vector<32x8x8xf32> to vector<4x64x8xf32>
    %79 = vector.extract_strided_slice %78 {offsets = [0, 0, 0], sizes = [1, 64, 8], strides = [1, 1, 1]} : vector<4x64x8xf32> to vector<1x64x8xf32>
    %80 = vector.shape_cast %79 : vector<1x64x8xf32> to vector<64x8xf32>
    %81 = vector.extract_strided_slice %78 {offsets = [1, 0, 0], sizes = [1, 64, 8], strides = [1, 1, 1]} : vector<4x64x8xf32> to vector<1x64x8xf32>
    %82 = vector.shape_cast %81 : vector<1x64x8xf32> to vector<64x8xf32>
    %83 = vector.extract_strided_slice %78 {offsets = [2, 0, 0], sizes = [1, 64, 8], strides = [1, 1, 1]} : vector<4x64x8xf32> to vector<1x64x8xf32>
    %84 = vector.shape_cast %83 : vector<1x64x8xf32> to vector<64x8xf32>
    %85 = vector.extract_strided_slice %78 {offsets = [3, 0, 0], sizes = [1, 64, 8], strides = [1, 1, 1]} : vector<4x64x8xf32> to vector<1x64x8xf32>
    %86 = vector.shape_cast %85 : vector<1x64x8xf32> to vector<64x8xf32>
    %87 = tpu.concatenate %80, %82, %84, %86 in 1 : vector<64x8xf32>, vector<64x8xf32>, vector<64x8xf32>, vector<64x8xf32> -> vector<64x32xf32>
    %88 = arith.truncf %87 : vector<64x32xf32> to vector<64x32xbf16>
    %c0_19 = arith.constant 0 : index
    %c0_20 = arith.constant 0 : index
    %89 = vector.load %arg6[%c0_19, %c0_20] : memref<32x32xbf16, #tpu.memory_space<vmem>>, vector<32x32xbf16>
    %cst_21 = arith.constant dense<0.000000e+00> : vector<64x32xf32>
    %90 = tpu.matmul %88, %89, %cst_21 {dimension_numbers = #tpu.dot_dimension_numbers<[1], [0], [0], [1], [0, 0, 1, 1], [], []>} : vector<64x32xbf16>, vector<32x32xbf16>, vector<64x32xf32> -> vector<64x32xf32>
    %c0_22 = arith.constant 0 : index
    %c0_23 = arith.constant 0 : index
    %91 = vector.load %arg7[%c0_22, %c0_23] : memref<1x32xf32, #tpu.memory_space<vmem>>, vector<1x32xf32>
    %92 = vector.broadcast %91 : vector<1x32xf32> to vector<64x32xf32>
    %93 = arith.addf %90, %92 : vector<64x32xf32>
    %94 = arith.addf %1, %93 : vector<64x32xf32>
    %c0_24 = arith.constant 0 : index
    %c0_25 = arith.constant 0 : index
    %95 = vector.load %arg8[%c0_24, %c0_25] : memref<1x32xf32, #tpu.memory_space<vmem>>, vector<1x32xf32>
    %c0_26 = arith.constant 0 : index
    %c0_27 = arith.constant 0 : index
    %96 = vector.load %arg9[%c0_26, %c0_27] : memref<1x32xf32, #tpu.memory_space<vmem>>, vector<1x32xf32>
    %cst_28 = arith.constant dense<0.000000e+00> : vector<64xf32>
    %97 = vector.multi_reduction <add>, %94, %cst_28 [1] : vector<64x32xf32> to vector<64xf32>
    %98 = vector.shape_cast %97 : vector<64xf32> to vector<64x1xf32>
    %cst_29 = arith.constant 3.200000e+01 : f32
    %99 = vector.broadcast %cst_29 : f32 to vector<64x1xf32>
    %100 = arith.divf %98, %99 : vector<64x1xf32>
    %101 = vector.broadcast %100 : vector<64x1xf32> to vector<64x32xf32>
    %102 = arith.subf %94, %101 : vector<64x32xf32>
    %103 = arith.mulf %102, %102 : vector<64x32xf32>
    %cst_30 = arith.constant dense<0.000000e+00> : vector<64xf32>
    %104 = vector.multi_reduction <add>, %103, %cst_30 [1] : vector<64x32xf32> to vector<64xf32>
    %105 = vector.shape_cast %104 : vector<64xf32> to vector<64x1xf32>
    %cst_31 = arith.constant 3.200000e+01 : f32
    %106 = vector.broadcast %cst_31 : f32 to vector<64x1xf32>
    %107 = arith.divf %105, %106 : vector<64x1xf32>
    %108 = vector.broadcast %100 : vector<64x1xf32> to vector<64x32xf32>
    %109 = arith.subf %94, %108 : vector<64x32xf32>
    %cst_32 = arith.constant 9.99999974E-6 : f32
    %110 = vector.broadcast %cst_32 : f32 to vector<64x1xf32>
    %111 = arith.addf %107, %110 : vector<64x1xf32>
    %112 = math.rsqrt %111 : vector<64x1xf32>
    %113 = vector.broadcast %112 : vector<64x1xf32> to vector<64x32xf32>
    %114 = arith.mulf %109, %113 : vector<64x32xf32>
    %115 = vector.broadcast %95 : vector<1x32xf32> to vector<64x32xf32>
    %116 = arith.mulf %114, %115 : vector<64x32xf32>
    %117 = vector.broadcast %96 : vector<1x32xf32> to vector<64x32xf32>
    %118 = arith.addf %116, %117 : vector<64x32xf32>
    %119 = arith.truncf %118 : vector<64x32xf32> to vector<64x32xbf16>
    %c0_33 = arith.constant 0 : index
    %c0_34 = arith.constant 0 : index
    %120 = vector.load %arg10[%c0_33, %c0_34] : memref<32x128xbf16, #tpu.memory_space<vmem>>, vector<32x128xbf16>
    %cst_35 = arith.constant dense<0.000000e+00> : vector<64x128xf32>
    %121 = tpu.matmul %119, %120, %cst_35 {dimension_numbers = #tpu.dot_dimension_numbers<[1], [0], [0], [1], [0, 0, 1, 1], [], []>} : vector<64x32xbf16>, vector<32x128xbf16>, vector<64x128xf32> -> vector<64x128xf32>
    %c0_36 = arith.constant 0 : index
    %c0_37 = arith.constant 0 : index
    %122 = vector.load %arg11[%c0_36, %c0_37] : memref<1x128xf32, #tpu.memory_space<vmem>>, vector<1x128xf32>
    %123 = vector.broadcast %122 : vector<1x128xf32> to vector<64x128xf32>
    %124 = arith.addf %121, %123 : vector<64x128xf32>
    %cst_38 = arith.constant 5.000000e-01 : f32
    %125 = vector.broadcast %cst_38 : f32 to vector<64x128xf32>
    %126 = arith.mulf %125, %124 : vector<64x128xf32>
    %cst_39 = arith.constant 0.707106769 : f32
    %127 = vector.broadcast %cst_39 : f32 to vector<64x128xf32>
    %128 = arith.mulf %124, %127 : vector<64x128xf32>
    %129 = math.erf %128 : vector<64x128xf32>
    %cst_40 = arith.constant 1.000000e+00 : f32
    %130 = vector.broadcast %cst_40 : f32 to vector<64x128xf32>
    %131 = arith.addf %130, %129 : vector<64x128xf32>
    %132 = arith.mulf %126, %131 : vector<64x128xf32>
    %133 = arith.truncf %132 : vector<64x128xf32> to vector<64x128xbf16>
    %c0_41 = arith.constant 0 : index
    %c0_42 = arith.constant 0 : index
    %134 = vector.load %arg12[%c0_41, %c0_42] : memref<128x32xbf16, #tpu.memory_space<vmem>>, vector<128x32xbf16>
    %cst_43 = arith.constant dense<0.000000e+00> : vector<64x32xf32>
    %135 = tpu.matmul %133, %134, %cst_43 {dimension_numbers = #tpu.dot_dimension_numbers<[1], [0], [0], [1], [0, 0, 1, 1], [], []>} : vector<64x128xbf16>, vector<128x32xbf16>, vector<64x32xf32> -> vector<64x32xf32>
    %c0_44 = arith.constant 0 : index
    %c0_45 = arith.constant 0 : index
    %136 = vector.load %arg13[%c0_44, %c0_45] : memref<1x32xf32, #tpu.memory_space<vmem>>, vector<1x32xf32>
    %137 = vector.broadcast %136 : vector<1x32xf32> to vector<64x32xf32>
    %138 = arith.addf %135, %137 : vector<64x32xf32>
    %139 = arith.addf %94, %138 : vector<64x32xf32>
    %140 = vector.shape_cast %139 : vector<64x32xf32> to vector<8x256xf32>
    %c0_46 = arith.constant 0 : index
    %c0_47 = arith.constant 0 : index
    %141 = vector.load %arg14[%c0_46, %c0_47] : memref<8x256xf32, #tpu.memory_space<vmem>>, vector<8x256xf32>
    tpu.vector_store %arg14[%c0_46, %c0_47], %140 {strides = array<i32>} : memref<8x256xf32, #tpu.memory_space<vmem>>, vector<8x256xf32>,
    return
  }
  func.func @transform_0(%arg0: i32) -> (i32, i32) {
    %c0_i32 = arith.constant 0 : i32
    %c0_i32_0 = arith.constant 0 : i32
    return %arg0, %c0_i32 : i32, i32
  }
  func.func @transform_1(%arg0: i32) -> (i32, i32) {
    %c0_i32 = arith.constant 0 : i32
    %c0_i32_0 = arith.constant 0 : i32
    %c0_i32_1 = arith.constant 0 : i32
    return %c0_i32, %c0_i32_0 : i32, i32
  }
  func.func @transform_2(%arg0: i32) -> (i32, i32) {
    %c0_i32 = arith.constant 0 : i32
    %c0_i32_0 = arith.constant 0 : i32
    %c0_i32_1 = arith.constant 0 : i32
    return %c0_i32, %c0_i32_0 : i32, i32
  }
  func.func @transform_3(%arg0: i32) -> (i32, i32) {
    %c0_i32 = arith.constant 0 : i32
    %c0_i32_0 = arith.constant 0 : i32
    %c0_i32_1 = arith.constant 0 : i32
    return %c0_i32, %c0_i32_0 : i32, i32
  }
  func.func @transform_4(%arg0: i32) -> (i32, i32) {
    %c0_i32 = arith.constant 0 : i32
    %c0_i32_0 = arith.constant 0 : i32
    %c0_i32_1 = arith.constant 0 : i32
    return %c0_i32, %c0_i32_0 : i32, i32
  }
  func.func @transform_5(%arg0: i32) -> (i32, i32) {
    %c0_i32 = arith.constant 0 : i32
    %c0_i32_0 = arith.constant 0 : i32
    %c0_i32_1 = arith.constant 0 : i32
    return %c0_i32, %c0_i32_0 : i32, i32
  }
  func.func @transform_6(%arg0: i32) -> (i32, i32) {
    %c0_i32 = arith.constant 0 : i32
    %c0_i32_0 = arith.constant 0 : i32
    %c0_i32_1 = arith.constant 0 : i32
    return %c0_i32, %c0_i32_0 : i32, i32
  }
  func.func @transform_7(%arg0: i32) -> (i32, i32) {
    %c0_i32 = arith.constant 0 : i32
    %c0_i32_0 = arith.constant 0 : i32
    %c0_i32_1 = arith.constant 0 : i32
    return %c0_i32, %c0_i32_0 : i32, i32
  }
  func.func @transform_8(%arg0: i32) -> (i32, i32) {
    %c0_i32 = arith.constant 0 : i32
    %c0_i32_0 = arith.constant 0 : i32
    %c0_i32_1 = arith.constant 0 : i32
    return %c0_i32, %c0_i32_0 : i32, i32
  }
  func.func @transform_9(%arg0: i32) -> (i32, i32) {
    %c0_i32 = arith.constant 0 : i32
    %c0_i32_0 = arith.constant 0 : i32
    %c0_i32_1 = arith.constant 0 : i32
    return %c0_i32, %c0_i32_0 : i32, i32
  }
  func.func @transform_10(%arg0: i32) -> (i32, i32) {
    %c0_i32 = arith.constant 0 : i32
    %c0_i32_0 = arith.constant 0 : i32
    %c0_i32_1 = arith.constant 0 : i32
    return %c0_i32, %c0_i32_0 : i32, i32
  }
  func.func @transform_11(%arg0: i32) -> (i32, i32) {
    %c0_i32 = arith.constant 0 : i32
    %c0_i32_0 = arith.constant 0 : i32
    %c0_i32_1 = arith.constant 0 : i32
    return %c0_i32, %c0_i32_0 : i32, i32
  }
  func.func @transform_12(%arg0: i32) -> (i32, i32) {
    %c0_i32 = arith.constant 0 : i32
    %c0_i32_0 = arith.constant 0 : i32
    %c0_i32_1 = arith.constant 0 : i32
    return %c0_i32, %c0_i32_0 : i32, i32
  }
  func.func @transform_13(%arg0: i32) -> (i32, i32) {
    %c0_i32 = arith.constant 0 : i32
    %c0_i32_0 = arith.constant 0 : i32
    return %arg0, %c0_i32 : i32, i32
  }
}

module attributes {stable_mosaic.version = 11 : i64} {
  func.func @transformer_encoder_kernel(%arg0: i32, %arg1: memref<8x256xf32, #tpu.memory_space<vmem>>, %arg2: memref<1x32xf32, #tpu.memory_space<vmem>>, %arg3: memref<1x32xf32, #tpu.memory_space<vmem>>, %arg4: memref<32x96xbf16, #tpu.memory_space<vmem>>, %arg5: memref<1x96xf32, #tpu.memory_space<vmem>>, %arg6: memref<32x32xbf16, #tpu.memory_space<vmem>>, %arg7: memref<1x32xf32, #tpu.memory_space<vmem>>, %arg8: memref<1x32xf32, #tpu.memory_space<vmem>>, %arg9: memref<1x32xf32, #tpu.memory_space<vmem>>, %arg10: memref<32x128xbf16, #tpu.memory_space<vmem>>, %arg11: memref<1x128xf32, #tpu.memory_space<vmem>>, %arg12: memref<128x32xbf16, #tpu.memory_space<vmem>>, %arg13: memref<1x32xf32, #tpu.memory_space<vmem>>, %arg14: memref<8x256xf32, #tpu.memory_space<vmem>>) attributes {dimension_semantics = [#tpu.dimension_semantics<parallel>], iteration_bounds = array<i64: 2>, scalar_prefetch = 0 : i64, scratch_operands = 0 : i64, tpu.core_type = #tpu.core_type<tc>, window_params = [{transform_indices = @transform_0, window_bounds = array<i64: 8, 256>}, {pipeline_mode = #tpu.pipeline_mode<synchronous>, transform_indices = @transform_1, window_bounds = array<i64: 1, 32>}, {pipeline_mode = #tpu.pipeline_mode<synchronous>, transform_indices = @transform_2, window_bounds = array<i64: 1, 32>}, {pipeline_mode = #tpu.pipeline_mode<synchronous>, transform_indices = @transform_3, window_bounds = array<i64: 32, 96>}, {pipeline_mode = #tpu.pipeline_mode<synchronous>, transform_indices = @transform_4, window_bounds = array<i64: 1, 96>}, {pipeline_mode = #tpu.pipeline_mode<synchronous>, transform_indices = @transform_5, window_bounds = array<i64: 32, 32>}, {pipeline_mode = #tpu.pipeline_mode<synchronous>, transform_indices = @transform_6, window_bounds = array<i64: 1, 32>}, {pipeline_mode = #tpu.pipeline_mode<synchronous>, transform_indices = @transform_7, window_bounds = array<i64: 1, 32>}, {pipeline_mode = #tpu.pipeline_mode<synchronous>, transform_indices = @transform_8, window_bounds = array<i64: 1, 32>}, {pipeline_mode = #tpu.pipeline_mode<synchronous>, transform_indices = @transform_9, window_bounds = array<i64: 32, 128>}, {pipeline_mode = #tpu.pipeline_mode<synchronous>, transform_indices = @transform_10, window_bounds = array<i64: 1, 128>}, {pipeline_mode = #tpu.pipeline_mode<synchronous>, transform_indices = @transform_11, window_bounds = array<i64: 128, 32>}, {pipeline_mode = #tpu.pipeline_mode<synchronous>, transform_indices = @transform_12, window_bounds = array<i64: 1, 32>}, {transform_indices = @transform_13, window_bounds = array<i64: 8, 256>}]} {
    %c0 = arith.constant 0 : index
    %c0_0 = arith.constant 0 : index
    %0 = vector.load %arg1[%c0, %c0_0] : memref<8x256xf32, #tpu.memory_space<vmem>>, vector<8x256xf32>
    %1 = vector.shape_cast %0 : vector<8x256xf32> to vector<64x32xf32>
    %c0_1 = arith.constant 0 : index
    %c0_2 = arith.constant 0 : index
    %2 = vector.load %arg2[%c0_1, %c0_2] : memref<1x32xf32, #tpu.memory_space<vmem>>, vector<1x32xf32>
    %c0_3 = arith.constant 0 : index
    %c0_4 = arith.constant 0 : index
    %3 = vector.load %arg3[%c0_3, %c0_4] : memref<1x32xf32, #tpu.memory_space<vmem>>, vector<1x32xf32>
    %cst = arith.constant dense<0.000000e+00> : vector<64xf32>
    %4 = vector.multi_reduction <add>, %1, %cst [1] : vector<64x32xf32> to vector<64xf32>
    %5 = vector.shape_cast %4 : vector<64xf32> to vector<64x1xf32>
    %cst_5 = arith.constant 3.200000e+01 : f32
    %6 = vector.broadcast %cst_5 : f32 to vector<64x1xf32>
    %7 = arith.divf %5, %6 : vector<64x1xf32>
    %8 = vector.broadcast %7 : vector<64x1xf32> to vector<64x32xf32>
    %9 = arith.subf %1, %8 : vector<64x32xf32>
    %10 = arith.mulf %9, %9 : vector<64x32xf32>
    %cst_6 = arith.constant dense<0.000000e+00> : vector<64xf32>
    %11 = vector.multi_reduction <add>, %10, %cst_6 [1] : vector<64x32xf32> to vector<64xf32>
    %12 = vector.shape_cast %11 : vector<64xf32> to vector<64x1xf32>
    %cst_7 = arith.constant 3.200000e+01 : f32
    %13 = vector.broadcast %cst_7 : f32 to vector<64x1xf32>
    %14 = arith.divf %12, %13 : vector<64x1xf32>
    %15 = vector.broadcast %7 : vector<64x1xf32> to vector<64x32xf32>
    %16 = arith.subf %1, %15 : vector<64x32xf32>
    %cst_8 = arith.constant 9.99999974E-6 : f32
    %17 = vector.broadcast %cst_8 : f32 to vector<64x1xf32>
    %18 = arith.addf %14, %17 : vector<64x1xf32>
    %19 = math.rsqrt %18 : vector<64x1xf32>
    %20 = vector.broadcast %19 : vector<64x1xf32> to vector<64x32xf32>
    %21 = arith.mulf %16, %20 : vector<64x32xf32>
    %22 = vector.broadcast %2 : vector<1x32xf32> to vector<64x32xf32>
    %23 = arith.mulf %21, %22 : vector<64x32xf32>
    %24 = vector.broadcast %3 : vector<1x32xf32> to vector<64x32xf32>
    %25 = arith.addf %23, %24 : vector<64x32xf32>
    %26 = arith.truncf %25 : vector<64x32xf32> to vector<64x32xbf16>
    %c0_9 = arith.constant 0 : index
    %c0_10 = arith.constant 0 : index
    %27 = vector.load %arg4[%c0_9, %c0_10] : memref<32x96xbf16, #tpu.memory_space<vmem>>, vector<32x96xbf16>
    %cst_11 = arith.constant dense<0.000000e+00> : vector<64x96xf32>
    %28 = tpu.matmul %26, %27, %cst_11 {dimension_numbers = #tpu.dot_dimension_numbers<[1], [0], [0], [1], [0, 0, 1, 1], [], []>} : vector<64x32xbf16>, vector<32x96xbf16>, vector<64x96xf32> -> vector<64x96xf32>
    %c0_12 = arith.constant 0 : index
    %c0_13 = arith.constant 0 : index
    %29 = vector.load %arg5[%c0_12, %c0_13] : memref<1x96xf32, #tpu.memory_space<vmem>>, vector<1x96xf32>
    %30 = vector.broadcast %29 : vector<1x96xf32> to vector<64x96xf32>
    %31 = arith.addf %28, %30 : vector<64x96xf32>
    %32 = arith.truncf %31 : vector<64x96xf32> to vector<64x96xbf16>
    %33 = vector.extract_strided_slice %32 {offsets = [0, 0], sizes = [64, 8], strides = [1, 1]} : vector<64x96xbf16> to vector<64x8xbf16>
    %34 = vector.extract_strided_slice %32 {offsets = [0, 8], sizes = [64, 8], strides = [1, 1]} : vector<64x96xbf16> to vector<64x8xbf16>
    %35 = vector.extract_strided_slice %32 {offsets = [0, 16], sizes = [64, 8], strides = [1, 1]} : vector<64x96xbf16> to vector<64x8xbf16>
    %36 = vector.extract_strided_slice %32 {offsets = [0, 24], sizes = [64, 8], strides = [1, 1]} : vector<64x96xbf16> to vector<64x8xbf16>
    %37 = vector.shape_cast %33 : vector<64x8xbf16> to vector<1x64x8xbf16>
    %38 = vector.shape_cast %34 : vector<64x8xbf16> to vector<1x64x8xbf16>
    %39 = vector.shape_cast %35 : vector<64x8xbf16> to vector<1x64x8xbf16>
    %40 = vector.shape_cast %36 : vector<64x8xbf16> to vector<1x64x8xbf16>
    %41 = tpu.concatenate %37, %38, %39, %40 in 0 : vector<1x64x8xbf16>, vector<1x64x8xbf16>, vector<1x64x8xbf16>, vector<1x64x8xbf16> -> vector<4x64x8xbf16>
    %42 = vector.shape_cast %41 : vector<4x64x8xbf16> to vector<32x8x8xbf16>
    %43 = vector.extract_strided_slice %32 {offsets = [0, 32], sizes = [64, 8], strides = [1, 1]} : vector<64x96xbf16> to vector<64x8xbf16>
    %44 = vector.extract_strided_slice %32 {offsets = [0, 40], sizes = [64, 8], strides = [1, 1]} : vector<64x96xbf16> to vector<64x8xbf16>
    %45 = vector.extract_strided_slice %32 {offsets = [0, 48], sizes = [64, 8], strides = [1, 1]} : vector<64x96xbf16> to vector<64x8xbf16>
    %46 = vector.extract_strided_slice %32 {offsets = [0, 56], sizes = [64, 8], strides = [1, 1]} : vector<64x96xbf16> to vector<64x8xbf16>
    %47 = vector.shape_cast %43 : vector<64x8xbf16> to vector<1x64x8xbf16>
    %48 = vector.shape_cast %44 : vector<64x8xbf16> to vector<1x64x8xbf16>
    %49 = vector.shape_cast %45 : vector<64x8xbf16> to vector<1x64x8xbf16>
    %50 = vector.shape_cast %46 : vector<64x8xbf16> to vector<1x64x8xbf16>
    %51 = tpu.concatenate %47, %48, %49, %50 in 0 : vector<1x64x8xbf16>, vector<1x64x8xbf16>, vector<1x64x8xbf16>, vector<1x64x8xbf16> -> vector<4x64x8xbf16>
    %52 = vector.shape_cast %51 : vector<4x64x8xbf16> to vector<32x8x8xbf16>
    %53 = vector.extract_strided_slice %32 {offsets = [0, 64], sizes = [64, 8], strides = [1, 1]} : vector<64x96xbf16> to vector<64x8xbf16>
    %54 = vector.extract_strided_slice %32 {offsets = [0, 72], sizes = [64, 8], strides = [1, 1]} : vector<64x96xbf16> to vector<64x8xbf16>
    %55 = vector.extract_strided_slice %32 {offsets = [0, 80], sizes = [64, 8], strides = [1, 1]} : vector<64x96xbf16> to vector<64x8xbf16>
    %56 = vector.extract_strided_slice %32 {offsets = [0, 88], sizes = [64, 8], strides = [1, 1]} : vector<64x96xbf16> to vector<64x8xbf16>
    %57 = vector.shape_cast %53 : vector<64x8xbf16> to vector<1x64x8xbf16>
    %58 = vector.shape_cast %54 : vector<64x8xbf16> to vector<1x64x8xbf16>
    %59 = vector.shape_cast %55 : vector<64x8xbf16> to vector<1x64x8xbf16>
    %60 = vector.shape_cast %56 : vector<64x8xbf16> to vector<1x64x8xbf16>
    %61 = tpu.concatenate %57, %58, %59, %60 in 0 : vector<1x64x8xbf16>, vector<1x64x8xbf16>, vector<1x64x8xbf16>, vector<1x64x8xbf16> -> vector<4x64x8xbf16>
    %62 = vector.shape_cast %61 : vector<4x64x8xbf16> to vector<32x8x8xbf16>
    "tpu.trace_start"() <{level = 10 : i32, message = "bnd,bmd->bnm"}> : () -> ()
    %cst_14 = arith.constant dense<0.000000e+00> : vector<32x8x8xf32>
    %63 = tpu.matmul %42, %52, %cst_14 {dimension_numbers = #tpu.dot_dimension_numbers<[2], [2], [1], [1], [0, 0, 0, 1, 1, 1], [0], [0]>} : vector<32x8x8xbf16>, vector<32x8x8xbf16>, vector<32x8x8xf32> -> vector<32x8x8xf32>
    "tpu.trace_stop"() : () -> ()
    %cst_15 = arith.constant 0.353553385 : f32
    %64 = vector.broadcast %cst_15 : f32 to vector<32x8x8xf32>
    %65 = arith.mulf %63, %64 : vector<32x8x8xf32>
    %cst_16 = arith.constant dense<0xFF800000> : vector<32x8xf32>
    %66 = vector.multi_reduction <maximumf>, %65, %cst_16 [2] : vector<32x8x8xf32> to vector<32x8xf32>
    %67 = vector.shape_cast %66 : vector<32x8xf32> to vector<32x8x1xf32>
    %68 = vector.broadcast %67 : vector<32x8x1xf32> to vector<32x8x8xf32>
    %69 = arith.subf %65, %68 : vector<32x8x8xf32>
    %70 = math.exp %69 : vector<32x8x8xf32>
    %cst_17 = arith.constant dense<0.000000e+00> : vector<32x8xf32>
    %71 = vector.multi_reduction <add>, %70, %cst_17 [2] : vector<32x8x8xf32> to vector<32x8xf32>
    %72 = vector.shape_cast %71 : vector<32x8xf32> to vector<32x8x1xf32>
    %73 = tpu.reciprocal %72 {approx = true} : vector<32x8x1xf32> -> vector<32x8x1xf32>
    %74 = vector.broadcast %73 : vector<32x8x1xf32> to vector<32x8x8xf32>
    %75 = arith.mulf %70, %74 : vector<32x8x8xf32>
    %76 = arith.truncf %75 : vector<32x8x8xf32> to vector<32x8x8xbf16>
    "tpu.trace_start"() <{level = 10 : i32, message = "bnm,bmd->bnd"}> : () -> ()
    %cst_18 = arith.constant dense<0.000000e+00> : vector<32x8x8xf32>
    %77 = tpu.matmul %76, %62, %cst_18 {dimension_numbers = #tpu.dot_dimension_numbers<[2], [1], [1], [2], [0, 0, 0, 1, 1, 2], [0], [0]>} : vector<32x8x8xbf16>, vector<32x8x8xbf16>, vector<32x8x8xf32> -> vector<32x8x8xf32>
    "tpu.trace_stop"() : () -> ()
    %78 = vector.shape_cast %77 : vector<32x8x8xf32> to vector<4x64x8xf32>
    %79 = vector.extract_strided_slice %78 {offsets = [0, 0, 0], sizes = [1, 64, 8], strides = [1, 1, 1]} : vector<4x64x8xf32> to vector<1x64x8xf32>
    %80 = vector.shape_cast %79 : vector<1x64x8xf32> to vector<64x8xf32>
    %81 = vector.extract_strided_slice %78 {offsets = [1, 0, 0], sizes = [1, 64, 8], strides = [1, 1, 1]} : vector<4x64x8xf32> to vector<1x64x8xf32>
    %82 = vector.shape_cast %81 : vector<1x64x8xf32> to vector<64x8xf32>
    %83 = vector.extract_strided_slice %78 {offsets = [2, 0, 0], sizes = [1, 64, 8], strides = [1, 1, 1]} : vector<4x64x8xf32> to vector<1x64x8xf32>
    %84 = vector.shape_cast %83 : vector<1x64x8xf32> to vector<64x8xf32>
    %85 = vector.extract_strided_slice %78 {offsets = [3, 0, 0], sizes = [1, 64, 8], strides = [1, 1, 1]} : vector<4x64x8xf32> to vector<1x64x8xf32>
    %86 = vector.shape_cast %85 : vector<1x64x8xf32> to vector<64x8xf32>
    %87 = tpu.concatenate %80, %82, %84, %86 in 1 : vector<64x8xf32>, vector<64x8xf32>, vector<64x8xf32>, vector<64x8xf32> -> vector<64x32xf32>
    %88 = arith.truncf %87 : vector<64x32xf32> to vector<64x32xbf16>
    %c0_19 = arith.constant 0 : index
    %c0_20 = arith.constant 0 : index
    %89 = vector.load %arg6[%c0_19, %c0_20] : memref<32x32xbf16, #tpu.memory_space<vmem>>, vector<32x32xbf16>
    %cst_21 = arith.constant dense<0.000000e+00> : vector<64x32xf32>
    %90 = tpu.matmul %88, %89, %cst_21 {dimension_numbers = #tpu.dot_dimension_numbers<[1], [0], [0], [1], [0, 0, 1, 1], [], []>} : vector<64x32xbf16>, vector<32x32xbf16>, vector<64x32xf32> -> vector<64x32xf32>
    %c0_22 = arith.constant 0 : index
    %c0_23 = arith.constant 0 : index
    %91 = vector.load %arg7[%c0_22, %c0_23] : memref<1x32xf32, #tpu.memory_space<vmem>>, vector<1x32xf32>
    %92 = vector.broadcast %91 : vector<1x32xf32> to vector<64x32xf32>
    %93 = arith.addf %90, %92 : vector<64x32xf32>
    %94 = arith.addf %1, %93 : vector<64x32xf32>
    %c0_24 = arith.constant 0 : index
    %c0_25 = arith.constant 0 : index
    %95 = vector.load %arg8[%c0_24, %c0_25] : memref<1x32xf32, #tpu.memory_space<vmem>>, vector<1x32xf32>
    %c0_26 = arith.constant 0 : index
    %c0_27 = arith.constant 0 : index
    %96 = vector.load %arg9[%c0_26, %c0_27] : memref<1x32xf32, #tpu.memory_space<vmem>>, vector<1x32xf32>
    %cst_28 = arith.constant dense<0.000000e+00> : vector<64xf32>
    %97 = vector.multi_reduction <add>, %94, %cst_28 [1] : vector<64x32xf32> to vector<64xf32>
    %98 = vector.shape_cast %97 : vector<64xf32> to vector<64x1xf32>
    %cst_29 = arith.constant 3.200000e+01 : f32
    %99 = vector.broadcast %cst_29 : f32 to vector<64x1xf32>
    %100 = arith.divf %98, %99 : vector<64x1xf32>
    %101 = vector.broadcast %100 : vector<64x1xf32> to vector<64x32xf32>
    %102 = arith.subf %94, %101 : vector<64x32xf32>
    %103 = arith.mulf %102, %102 : vector<64x32xf32>
    %cst_30 = arith.constant dense<0.000000e+00> : vector<64xf32>
    %104 = vector.multi_reduction <add>, %103, %cst_30 [1] : vector<64x32xf32> to vector<64xf32>
    %105 = vector.shape_cast %104 : vector<64xf32> to vector<64x1xf32>
    %cst_31 = arith.constant 3.200000e+01 : f32
    %106 = vector.broadcast %cst_31 : f32 to vector<64x1xf32>
    %107 = arith.divf %105, %106 : vector<64x1xf32>
    %108 = vector.broadcast %100 : vector<64x1xf32> to vector<64x32xf32>
    %109 = arith.subf %94, %108 : vector<64x32xf32>
    %cst_32 = arith.constant 9.99999974E-6 : f32
    %110 = vector.broadcast %cst_32 : f32 to vector<64x1xf32>
    %111 = arith.addf %107, %110 : vector<64x1xf32>
    %112 = math.rsqrt %111 : vector<64x1xf32>
    %113 = vector.broadcast %112 : vector<64x1xf32> to vector<64x32xf32>
    %114 = arith.mulf %109, %113 : vector<64x32xf32>
    %115 = vector.broadcast %95 : vector<1x32xf32> to vector<64x32xf32>
    %116 = arith.mulf %114, %115 : vector<64x32xf32>
    %117 = vector.broadcast %96 : vector<1x32xf32> to vector<64x32xf32>
    %118 = arith.addf %116, %117 : vector<64x32xf32>
    %119 = arith.truncf %118 : vector<64x32xf32> to vector<64x32xbf16>
    %c0_33 = arith.constant 0 : index
    %c0_34 = arith.constant 0 : index
    %120 = vector.load %arg10[%c0_33, %c0_34] : memref<32x128xbf16, #tpu.memory_space<vmem>>, vector<32x128xbf16>
    %cst_35 = arith.constant dense<0.000000e+00> : vector<64x128xf32>
    %121 = tpu.matmul %119, %120, %cst_35 {dimension_numbers = #tpu.dot_dimension_numbers<[1], [0], [0], [1], [0, 0, 1, 1], [], []>} : vector<64x32xbf16>, vector<32x128xbf16>, vector<64x128xf32> -> vector<64x128xf32>
    %c0_36 = arith.constant 0 : index
    %c0_37 = arith.constant 0 : index
    %122 = vector.load %arg11[%c0_36, %c0_37] : memref<1x128xf32, #tpu.memory_space<vmem>>, vector<1x128xf32>
    %123 = vector.broadcast %122 : vector<1x128xf32> to vector<64x128xf32>
    %124 = arith.addf %121, %123 : vector<64x128xf32>
    %cst_38 = arith.constant 5.000000e-01 : f32
    %125 = vector.broadcast %cst_38 : f32 to vector<64x128xf32>
    %126 = arith.mulf %125, %124 : vector<64x128xf32>
    %cst_39 = arith.constant 0.707106769 : f32
    %127 = vector.broadcast %cst_39 : f32 to vector<64x128xf32>
    %128 = arith.mulf %124, %127 : vector<64x128xf32>
    %129 = math.erf %128 : vector<64x128xf32>
    %cst_40 = arith.constant 1.000000e+00 : f32
    %130 = vector.broadcast %cst_40 : f32 to vector<64x128xf32>
    %131 = arith.addf %130, %129 : vector<64x128xf32>
    %132 = arith.mulf %126, %131 : vector<64x128xf32>
    %133 = arith.truncf %132 : vector<64x128xf32> to vector<64x128xbf16>
    %c0_41 = arith.constant 0 : index
    %c0_42 = arith.constant 0 : index
    %134 = vector.load %arg12[%c0_41, %c0_42] : memref<128x32xbf16, #tpu.memory_space<vmem>>, vector<128x32xbf16>
    %cst_43 = arith.constant dense<0.000000e+00> : vector<64x32xf32>
    %135 = tpu.matmul %133, %134, %cst_43 {dimension_numbers = #tpu.dot_dimension_numbers<[1], [0], [0], [1], [0, 0, 1, 1], [], []>} : vector<64x128xbf16>, vector<128x32xbf16>, vector<64x32xf32> -> vector<64x32xf32>
    %c0_44 = arith.constant 0 : index
    %c0_45 = arith.constant 0 : index
    %136 = vector.load %arg13[%c0_44, %c0_45] : memref<1x32xf32, #tpu.memory_space<vmem>>, vector<1x32xf32>
    %137 = vector.broadcast %136 : vector<1x32xf32> to vector<64x32xf32>
    %138 = arith.addf %135, %137 : vector<64x32xf32>
    %139 = arith.addf %94, %138 : vector<64x32xf32>
    %140 = vector.shape_cast %139 : vector<64x32xf32> to vector<8x256xf32>
    %c0_46 = arith.constant 0 : index
    %c0_47 = arith.constant 0 : index
    %141 = vector.load %arg14[%c0_46, %c0_47] : memref<8x256xf32, #tpu.memory_space<vmem>>, vector<8x256xf32>
    tpu.vector_store %arg14[%c0_46, %c0_47], %140 {strides = array<i32>} : memref<8x256xf32, #tpu.memory_space<vmem>>, vector<8x256xf32>,
    return
  }
  func.func @transform_0(%arg0: i32) -> (i32, i32) {
    %c0_i32 = arith.constant 0 : i32
    %c0_i32_0 = arith.constant 0 : i32
    return %arg0, %c0_i32 : i32, i32
  }
  func.func @transform_1(%arg0: i32) -> (i32, i32) {
    %c0_i32 = arith.constant 0 : i32
    %c0_i32_0 = arith.constant 0 : i32
    %c0_i32_1 = arith.constant 0 : i32
    return %c0_i32, %c0_i32_0 : i32, i32
  }
  func.func @transform_2(%arg0: i32) -> (i32, i32) {
    %c0_i32 = arith.constant 0 : i32
    %c0_i32_0 = arith.constant 0 : i32
    %c0_i32_1 = arith.constant 0 : i32
    return %c0_i32, %c0_i32_0 : i32, i32
  }
  func.func @transform_3(%arg0: i32) -> (i32, i32) {
    %c0_i32 = arith.constant 0 : i32
    %c0_i32_0 = arith.constant 0 : i32
    %c0_i32_1 = arith.constant 0 : i32
    return %c0_i32, %c0_i32_0 : i32, i32
  }
  func.func @transform_4(%arg0: i32) -> (i32, i32) {
    %c0_i32 = arith.constant 0 : i32
    %c0_i32_0 = arith.constant 0 : i32
    %c0_i32_1 = arith.constant 0 : i32
    return %c0_i32, %c0_i32_0 : i32, i32
  }
  func.func @transform_5(%arg0: i32) -> (i32, i32) {
    %c0_i32 = arith.constant 0 : i32
    %c0_i32_0 = arith.constant 0 : i32
    %c0_i32_1 = arith.constant 0 : i32
    return %c0_i32, %c0_i32_0 : i32, i32
  }
  func.func @transform_6(%arg0: i32) -> (i32, i32) {
    %c0_i32 = arith.constant 0 : i32
    %c0_i32_0 = arith.constant 0 : i32
    %c0_i32_1 = arith.constant 0 : i32
    return %c0_i32, %c0_i32_0 : i32, i32
  }
  func.func @transform_7(%arg0: i32) -> (i32, i32) {
    %c0_i32 = arith.constant 0 : i32
    %c0_i32_0 = arith.constant 0 : i32
    %c0_i32_1 = arith.constant 0 : i32
    return %c0_i32, %c0_i32_0 : i32, i32
  }
  func.func @transform_8(%arg0: i32) -> (i32, i32) {
    %c0_i32 = arith.constant 0 : i32
    %c0_i32_0 = arith.constant 0 : i32
    %c0_i32_1 = arith.constant 0 : i32
    return %c0_i32, %c0_i32_0 : i32, i32
  }
  func.func @transform_9(%arg0: i32) -> (i32, i32) {
    %c0_i32 = arith.constant 0 : i32
    %c0_i32_0 = arith.constant 0 : i32
    %c0_i32_1 = arith.constant 0 : i32
    return %c0_i32, %c0_i32_0 : i32, i32
  }
  func.func @transform_10(%arg0: i32) -> (i32, i32) {
    %c0_i32 = arith.constant 0 : i32
    %c0_i32_0 = arith.constant 0 : i32
    %c0_i32_1 = arith.constant 0 : i32
    return %c0_i32, %c0_i32_0 : i32, i32
  }
  func.func @transform_11(%arg0: i32) -> (i32, i32) {
    %c0_i32 = arith.constant 0 : i32
    %c0_i32_0 = arith.constant 0 : i32
    %c0_i32_1 = arith.constant 0 : i32
    return %c0_i32, %c0_i32_0 : i32, i32
  }
  func.func @transform_12(%arg0: i32) -> (i32, i32) {
    %c0_i32 = arith.constant 0 : i32
    %c0_i32_0 = arith.constant 0 : i32
    %c0_i32_1 = arith.constant 0 : i32
    return %c0_i32, %c0_i32_0 : i32, i32
  }
  func.func @transform_13(%arg0: i32) -> (i32, i32) {
    %c0_i32 = arith.constant 0 : i32
    %c0_i32_0 = arith.constant 0 : i32
    return %arg0, %c0_i32 : i32, i32
  }
}

module attributes {stable_mosaic.version = 11 : i64} {
  func.func @transformer_encoder_kernel(%arg0: i32, %arg1: memref<8x8x32xf32, #tpu.memory_space<vmem>>, %arg2: memref<1x32xf32, #tpu.memory_space<vmem>>, %arg3: memref<1x32xf32, #tpu.memory_space<vmem>>, %arg4: memref<32x96xbf16, #tpu.memory_space<vmem>>, %arg5: memref<1x96xf32, #tpu.memory_space<vmem>>, %arg6: memref<32x32xbf16, #tpu.memory_space<vmem>>, %arg7: memref<1x32xf32, #tpu.memory_space<vmem>>, %arg8: memref<1x32xf32, #tpu.memory_space<vmem>>, %arg9: memref<1x32xf32, #tpu.memory_space<vmem>>, %arg10: memref<32x128xbf16, #tpu.memory_space<vmem>>, %arg11: memref<1x128xf32, #tpu.memory_space<vmem>>, %arg12: memref<128x32xbf16, #tpu.memory_space<vmem>>, %arg13: memref<1x32xf32, #tpu.memory_space<vmem>>, %arg14: memref<8x8x32xf32, #tpu.memory_space<vmem>>) attributes {dimension_semantics = [#tpu.dimension_semantics<parallel>], iteration_bounds = array<i64: 2>, scalar_prefetch = 0 : i64, scratch_operands = 0 : i64, tpu.core_type = #tpu.core_type<tc>, window_params = [{transform_indices = @transform_0, window_bounds = array<i64: 8, 8, 32>}, {pipeline_mode = #tpu.pipeline_mode<synchronous>, transform_indices = @transform_1, window_bounds = array<i64: 1, 32>}, {pipeline_mode = #tpu.pipeline_mode<synchronous>, transform_indices = @transform_2, window_bounds = array<i64: 1, 32>}, {pipeline_mode = #tpu.pipeline_mode<synchronous>, transform_indices = @transform_3, window_bounds = array<i64: 32, 96>}, {pipeline_mode = #tpu.pipeline_mode<synchronous>, transform_indices = @transform_4, window_bounds = array<i64: 1, 96>}, {pipeline_mode = #tpu.pipeline_mode<synchronous>, transform_indices = @transform_5, window_bounds = array<i64: 32, 32>}, {pipeline_mode = #tpu.pipeline_mode<synchronous>, transform_indices = @transform_6, window_bounds = array<i64: 1, 32>}, {pipeline_mode = #tpu.pipeline_mode<synchronous>, transform_indices = @transform_7, window_bounds = array<i64: 1, 32>}, {pipeline_mode = #tpu.pipeline_mode<synchronous>, transform_indices = @transform_8, window_bounds = array<i64: 1, 32>}, {pipeline_mode = #tpu.pipeline_mode<synchronous>, transform_indices = @transform_9, window_bounds = array<i64: 32, 128>}, {pipeline_mode = #tpu.pipeline_mode<synchronous>, transform_indices = @transform_10, window_bounds = array<i64: 1, 128>}, {pipeline_mode = #tpu.pipeline_mode<synchronous>, transform_indices = @transform_11, window_bounds = array<i64: 128, 32>}, {pipeline_mode = #tpu.pipeline_mode<synchronous>, transform_indices = @transform_12, window_bounds = array<i64: 1, 32>}, {transform_indices = @transform_13, window_bounds = array<i64: 8, 8, 32>}]} {
    %c0 = arith.constant 0 : index
    %c0_0 = arith.constant 0 : index
    %c0_1 = arith.constant 0 : index
    %0 = vector.load %arg1[%c0, %c0_0, %c0_1] : memref<8x8x32xf32, #tpu.memory_space<vmem>>, vector<8x8x32xf32>
    %1 = vector.shape_cast %0 : vector<8x8x32xf32> to vector<64x32xf32>
    %c0_2 = arith.constant 0 : index
    %c0_3 = arith.constant 0 : index
    %2 = vector.load %arg2[%c0_2, %c0_3] : memref<1x32xf32, #tpu.memory_space<vmem>>, vector<1x32xf32>
    %c0_4 = arith.constant 0 : index
    %c0_5 = arith.constant 0 : index
    %3 = vector.load %arg3[%c0_4, %c0_5] : memref<1x32xf32, #tpu.memory_space<vmem>>, vector<1x32xf32>
    %cst = arith.constant dense<0.000000e+00> : vector<64xf32>
    %4 = vector.multi_reduction <add>, %1, %cst [1] : vector<64x32xf32> to vector<64xf32>
    %5 = vector.shape_cast %4 : vector<64xf32> to vector<64x1xf32>
    %cst_6 = arith.constant 3.200000e+01 : f32
    %6 = vector.broadcast %cst_6 : f32 to vector<64x1xf32>
    %7 = arith.divf %5, %6 : vector<64x1xf32>
    %8 = vector.broadcast %7 : vector<64x1xf32> to vector<64x32xf32>
    %9 = arith.subf %1, %8 : vector<64x32xf32>
    %10 = arith.mulf %9, %9 : vector<64x32xf32>
    %cst_7 = arith.constant dense<0.000000e+00> : vector<64xf32>
    %11 = vector.multi_reduction <add>, %10, %cst_7 [1] : vector<64x32xf32> to vector<64xf32>
    %12 = vector.shape_cast %11 : vector<64xf32> to vector<64x1xf32>
    %cst_8 = arith.constant 3.200000e+01 : f32
    %13 = vector.broadcast %cst_8 : f32 to vector<64x1xf32>
    %14 = arith.divf %12, %13 : vector<64x1xf32>
    %15 = vector.broadcast %7 : vector<64x1xf32> to vector<64x32xf32>
    %16 = arith.subf %1, %15 : vector<64x32xf32>
    %cst_9 = arith.constant 9.99999974E-6 : f32
    %17 = vector.broadcast %cst_9 : f32 to vector<64x1xf32>
    %18 = arith.addf %14, %17 : vector<64x1xf32>
    %19 = math.rsqrt %18 : vector<64x1xf32>
    %20 = vector.broadcast %19 : vector<64x1xf32> to vector<64x32xf32>
    %21 = arith.mulf %16, %20 : vector<64x32xf32>
    %22 = vector.broadcast %2 : vector<1x32xf32> to vector<64x32xf32>
    %23 = arith.mulf %21, %22 : vector<64x32xf32>
    %24 = vector.broadcast %3 : vector<1x32xf32> to vector<64x32xf32>
    %25 = arith.addf %23, %24 : vector<64x32xf32>
    %26 = arith.truncf %25 : vector<64x32xf32> to vector<64x32xbf16>
    %c0_10 = arith.constant 0 : index
    %c0_11 = arith.constant 0 : index
    %27 = vector.load %arg4[%c0_10, %c0_11] : memref<32x96xbf16, #tpu.memory_space<vmem>>, vector<32x96xbf16>
    %cst_12 = arith.constant dense<0.000000e+00> : vector<64x96xf32>
    %28 = tpu.matmul %26, %27, %cst_12 {dimension_numbers = #tpu.dot_dimension_numbers<[1], [0], [0], [1], [0, 0, 1, 1], [], []>} : vector<64x32xbf16>, vector<32x96xbf16>, vector<64x96xf32> -> vector<64x96xf32>
    %c0_13 = arith.constant 0 : index
    %c0_14 = arith.constant 0 : index
    %29 = vector.load %arg5[%c0_13, %c0_14] : memref<1x96xf32, #tpu.memory_space<vmem>>, vector<1x96xf32>
    %30 = vector.broadcast %29 : vector<1x96xf32> to vector<64x96xf32>
    %31 = arith.addf %28, %30 : vector<64x96xf32>
    %32 = arith.truncf %31 : vector<64x96xf32> to vector<64x96xbf16>
    %33 = vector.extract_strided_slice %32 {offsets = [0, 0], sizes = [64, 8], strides = [1, 1]} : vector<64x96xbf16> to vector<64x8xbf16>
    %34 = vector.extract_strided_slice %32 {offsets = [0, 8], sizes = [64, 8], strides = [1, 1]} : vector<64x96xbf16> to vector<64x8xbf16>
    %35 = vector.extract_strided_slice %32 {offsets = [0, 16], sizes = [64, 8], strides = [1, 1]} : vector<64x96xbf16> to vector<64x8xbf16>
    %36 = vector.extract_strided_slice %32 {offsets = [0, 24], sizes = [64, 8], strides = [1, 1]} : vector<64x96xbf16> to vector<64x8xbf16>
    %37 = vector.shape_cast %33 : vector<64x8xbf16> to vector<1x64x8xbf16>
    %38 = vector.shape_cast %34 : vector<64x8xbf16> to vector<1x64x8xbf16>
    %39 = vector.shape_cast %35 : vector<64x8xbf16> to vector<1x64x8xbf16>
    %40 = vector.shape_cast %36 : vector<64x8xbf16> to vector<1x64x8xbf16>
    %41 = tpu.concatenate %37, %38, %39, %40 in 0 : vector<1x64x8xbf16>, vector<1x64x8xbf16>, vector<1x64x8xbf16>, vector<1x64x8xbf16> -> vector<4x64x8xbf16>
    %42 = vector.shape_cast %41 : vector<4x64x8xbf16> to vector<32x8x8xbf16>
    %43 = vector.extract_strided_slice %32 {offsets = [0, 32], sizes = [64, 8], strides = [1, 1]} : vector<64x96xbf16> to vector<64x8xbf16>
    %44 = vector.extract_strided_slice %32 {offsets = [0, 40], sizes = [64, 8], strides = [1, 1]} : vector<64x96xbf16> to vector<64x8xbf16>
    %45 = vector.extract_strided_slice %32 {offsets = [0, 48], sizes = [64, 8], strides = [1, 1]} : vector<64x96xbf16> to vector<64x8xbf16>
    %46 = vector.extract_strided_slice %32 {offsets = [0, 56], sizes = [64, 8], strides = [1, 1]} : vector<64x96xbf16> to vector<64x8xbf16>
    %47 = vector.shape_cast %43 : vector<64x8xbf16> to vector<1x64x8xbf16>
    %48 = vector.shape_cast %44 : vector<64x8xbf16> to vector<1x64x8xbf16>
    %49 = vector.shape_cast %45 : vector<64x8xbf16> to vector<1x64x8xbf16>
    %50 = vector.shape_cast %46 : vector<64x8xbf16> to vector<1x64x8xbf16>
    %51 = tpu.concatenate %47, %48, %49, %50 in 0 : vector<1x64x8xbf16>, vector<1x64x8xbf16>, vector<1x64x8xbf16>, vector<1x64x8xbf16> -> vector<4x64x8xbf16>
    %52 = vector.shape_cast %51 : vector<4x64x8xbf16> to vector<32x8x8xbf16>
    %53 = vector.extract_strided_slice %32 {offsets = [0, 64], sizes = [64, 8], strides = [1, 1]} : vector<64x96xbf16> to vector<64x8xbf16>
    %54 = vector.extract_strided_slice %32 {offsets = [0, 72], sizes = [64, 8], strides = [1, 1]} : vector<64x96xbf16> to vector<64x8xbf16>
    %55 = vector.extract_strided_slice %32 {offsets = [0, 80], sizes = [64, 8], strides = [1, 1]} : vector<64x96xbf16> to vector<64x8xbf16>
    %56 = vector.extract_strided_slice %32 {offsets = [0, 88], sizes = [64, 8], strides = [1, 1]} : vector<64x96xbf16> to vector<64x8xbf16>
    %57 = vector.shape_cast %53 : vector<64x8xbf16> to vector<1x64x8xbf16>
    %58 = vector.shape_cast %54 : vector<64x8xbf16> to vector<1x64x8xbf16>
    %59 = vector.shape_cast %55 : vector<64x8xbf16> to vector<1x64x8xbf16>
    %60 = vector.shape_cast %56 : vector<64x8xbf16> to vector<1x64x8xbf16>
    %61 = tpu.concatenate %57, %58, %59, %60 in 0 : vector<1x64x8xbf16>, vector<1x64x8xbf16>, vector<1x64x8xbf16>, vector<1x64x8xbf16> -> vector<4x64x8xbf16>
    %62 = vector.shape_cast %61 : vector<4x64x8xbf16> to vector<32x8x8xbf16>
    "tpu.trace_start"() <{level = 10 : i32, message = "bnd,bmd->bnm"}> : () -> ()
    %cst_15 = arith.constant dense<0.000000e+00> : vector<32x8x8xf32>
    %63 = tpu.matmul %42, %52, %cst_15 {dimension_numbers = #tpu.dot_dimension_numbers<[2], [2], [1], [1], [0, 0, 0, 1, 1, 1], [0], [0]>} : vector<32x8x8xbf16>, vector<32x8x8xbf16>, vector<32x8x8xf32> -> vector<32x8x8xf32>
    "tpu.trace_stop"() : () -> ()
    %cst_16 = arith.constant 0.353553385 : f32
    %64 = vector.broadcast %cst_16 : f32 to vector<32x8x8xf32>
    %65 = arith.mulf %63, %64 : vector<32x8x8xf32>
    %cst_17 = arith.constant dense<0xFF800000> : vector<32x8xf32>
    %66 = vector.multi_reduction <maximumf>, %65, %cst_17 [2] : vector<32x8x8xf32> to vector<32x8xf32>
    %67 = vector.shape_cast %66 : vector<32x8xf32> to vector<32x8x1xf32>
    %68 = vector.broadcast %67 : vector<32x8x1xf32> to vector<32x8x8xf32>
    %69 = arith.subf %65, %68 : vector<32x8x8xf32>
    %70 = math.exp %69 : vector<32x8x8xf32>
    %cst_18 = arith.constant dense<0.000000e+00> : vector<32x8xf32>
    %71 = vector.multi_reduction <add>, %70, %cst_18 [2] : vector<32x8x8xf32> to vector<32x8xf32>
    %72 = vector.shape_cast %71 : vector<32x8xf32> to vector<32x8x1xf32>
    %73 = tpu.reciprocal %72 {approx = true} : vector<32x8x1xf32> -> vector<32x8x1xf32>
    %74 = vector.broadcast %73 : vector<32x8x1xf32> to vector<32x8x8xf32>
    %75 = arith.mulf %70, %74 : vector<32x8x8xf32>
    %76 = arith.truncf %75 : vector<32x8x8xf32> to vector<32x8x8xbf16>
    "tpu.trace_start"() <{level = 10 : i32, message = "bnm,bmd->bnd"}> : () -> ()
    %cst_19 = arith.constant dense<0.000000e+00> : vector<32x8x8xf32>
    %77 = tpu.matmul %76, %62, %cst_19 {dimension_numbers = #tpu.dot_dimension_numbers<[2], [1], [1], [2], [0, 0, 0, 1, 1, 2], [0], [0]>} : vector<32x8x8xbf16>, vector<32x8x8xbf16>, vector<32x8x8xf32> -> vector<32x8x8xf32>
    "tpu.trace_stop"() : () -> ()
    %78 = vector.shape_cast %77 : vector<32x8x8xf32> to vector<4x64x8xf32>
    %79 = vector.extract_strided_slice %78 {offsets = [0, 0, 0], sizes = [1, 64, 8], strides = [1, 1, 1]} : vector<4x64x8xf32> to vector<1x64x8xf32>
    %80 = vector.shape_cast %79 : vector<1x64x8xf32> to vector<64x8xf32>
    %81 = vector.extract_strided_slice %78 {offsets = [1, 0, 0], sizes = [1, 64, 8], strides = [1, 1, 1]} : vector<4x64x8xf32> to vector<1x64x8xf32>
    %82 = vector.shape_cast %81 : vector<1x64x8xf32> to vector<64x8xf32>
    %83 = vector.extract_strided_slice %78 {offsets = [2, 0, 0], sizes = [1, 64, 8], strides = [1, 1, 1]} : vector<4x64x8xf32> to vector<1x64x8xf32>
    %84 = vector.shape_cast %83 : vector<1x64x8xf32> to vector<64x8xf32>
    %85 = vector.extract_strided_slice %78 {offsets = [3, 0, 0], sizes = [1, 64, 8], strides = [1, 1, 1]} : vector<4x64x8xf32> to vector<1x64x8xf32>
    %86 = vector.shape_cast %85 : vector<1x64x8xf32> to vector<64x8xf32>
    %87 = tpu.concatenate %80, %82, %84, %86 in 1 : vector<64x8xf32>, vector<64x8xf32>, vector<64x8xf32>, vector<64x8xf32> -> vector<64x32xf32>
    %88 = arith.truncf %87 : vector<64x32xf32> to vector<64x32xbf16>
    %c0_20 = arith.constant 0 : index
    %c0_21 = arith.constant 0 : index
    %89 = vector.load %arg6[%c0_20, %c0_21] : memref<32x32xbf16, #tpu.memory_space<vmem>>, vector<32x32xbf16>
    %cst_22 = arith.constant dense<0.000000e+00> : vector<64x32xf32>
    %90 = tpu.matmul %88, %89, %cst_22 {dimension_numbers = #tpu.dot_dimension_numbers<[1], [0], [0], [1], [0, 0, 1, 1], [], []>} : vector<64x32xbf16>, vector<32x32xbf16>, vector<64x32xf32> -> vector<64x32xf32>
    %c0_23 = arith.constant 0 : index
    %c0_24 = arith.constant 0 : index
    %91 = vector.load %arg7[%c0_23, %c0_24] : memref<1x32xf32, #tpu.memory_space<vmem>>, vector<1x32xf32>
    %92 = vector.broadcast %91 : vector<1x32xf32> to vector<64x32xf32>
    %93 = arith.addf %90, %92 : vector<64x32xf32>
    %94 = arith.addf %1, %93 : vector<64x32xf32>
    %c0_25 = arith.constant 0 : index
    %c0_26 = arith.constant 0 : index
    %95 = vector.load %arg8[%c0_25, %c0_26] : memref<1x32xf32, #tpu.memory_space<vmem>>, vector<1x32xf32>
    %c0_27 = arith.constant 0 : index
    %c0_28 = arith.constant 0 : index
    %96 = vector.load %arg9[%c0_27, %c0_28] : memref<1x32xf32, #tpu.memory_space<vmem>>, vector<1x32xf32>
    %cst_29 = arith.constant dense<0.000000e+00> : vector<64xf32>
    %97 = vector.multi_reduction <add>, %94, %cst_29 [1] : vector<64x32xf32> to vector<64xf32>
    %98 = vector.shape_cast %97 : vector<64xf32> to vector<64x1xf32>
    %cst_30 = arith.constant 3.200000e+01 : f32
    %99 = vector.broadcast %cst_30 : f32 to vector<64x1xf32>
    %100 = arith.divf %98, %99 : vector<64x1xf32>
    %101 = vector.broadcast %100 : vector<64x1xf32> to vector<64x32xf32>
    %102 = arith.subf %94, %101 : vector<64x32xf32>
    %103 = arith.mulf %102, %102 : vector<64x32xf32>
    %cst_31 = arith.constant dense<0.000000e+00> : vector<64xf32>
    %104 = vector.multi_reduction <add>, %103, %cst_31 [1] : vector<64x32xf32> to vector<64xf32>
    %105 = vector.shape_cast %104 : vector<64xf32> to vector<64x1xf32>
    %cst_32 = arith.constant 3.200000e+01 : f32
    %106 = vector.broadcast %cst_32 : f32 to vector<64x1xf32>
    %107 = arith.divf %105, %106 : vector<64x1xf32>
    %108 = vector.broadcast %100 : vector<64x1xf32> to vector<64x32xf32>
    %109 = arith.subf %94, %108 : vector<64x32xf32>
    %cst_33 = arith.constant 9.99999974E-6 : f32
    %110 = vector.broadcast %cst_33 : f32 to vector<64x1xf32>
    %111 = arith.addf %107, %110 : vector<64x1xf32>
    %112 = math.rsqrt %111 : vector<64x1xf32>
    %113 = vector.broadcast %112 : vector<64x1xf32> to vector<64x32xf32>
    %114 = arith.mulf %109, %113 : vector<64x32xf32>
    %115 = vector.broadcast %95 : vector<1x32xf32> to vector<64x32xf32>
    %116 = arith.mulf %114, %115 : vector<64x32xf32>
    %117 = vector.broadcast %96 : vector<1x32xf32> to vector<64x32xf32>
    %118 = arith.addf %116, %117 : vector<64x32xf32>
    %119 = arith.truncf %118 : vector<64x32xf32> to vector<64x32xbf16>
    %c0_34 = arith.constant 0 : index
    %c0_35 = arith.constant 0 : index
    %120 = vector.load %arg10[%c0_34, %c0_35] : memref<32x128xbf16, #tpu.memory_space<vmem>>, vector<32x128xbf16>
    %cst_36 = arith.constant dense<0.000000e+00> : vector<64x128xf32>
    %121 = tpu.matmul %119, %120, %cst_36 {dimension_numbers = #tpu.dot_dimension_numbers<[1], [0], [0], [1], [0, 0, 1, 1], [], []>} : vector<64x32xbf16>, vector<32x128xbf16>, vector<64x128xf32> -> vector<64x128xf32>
    %c0_37 = arith.constant 0 : index
    %c0_38 = arith.constant 0 : index
    %122 = vector.load %arg11[%c0_37, %c0_38] : memref<1x128xf32, #tpu.memory_space<vmem>>, vector<1x128xf32>
    %123 = vector.broadcast %122 : vector<1x128xf32> to vector<64x128xf32>
    %124 = arith.addf %121, %123 : vector<64x128xf32>
    %cst_39 = arith.constant 5.000000e-01 : f32
    %125 = vector.broadcast %cst_39 : f32 to vector<64x128xf32>
    %126 = arith.mulf %125, %124 : vector<64x128xf32>
    %cst_40 = arith.constant 0.707106769 : f32
    %127 = vector.broadcast %cst_40 : f32 to vector<64x128xf32>
    %128 = arith.mulf %124, %127 : vector<64x128xf32>
    %129 = math.erf %128 : vector<64x128xf32>
    %cst_41 = arith.constant 1.000000e+00 : f32
    %130 = vector.broadcast %cst_41 : f32 to vector<64x128xf32>
    %131 = arith.addf %130, %129 : vector<64x128xf32>
    %132 = arith.mulf %126, %131 : vector<64x128xf32>
    %133 = arith.truncf %132 : vector<64x128xf32> to vector<64x128xbf16>
    %c0_42 = arith.constant 0 : index
    %c0_43 = arith.constant 0 : index
    %134 = vector.load %arg12[%c0_42, %c0_43] : memref<128x32xbf16, #tpu.memory_space<vmem>>, vector<128x32xbf16>
    %cst_44 = arith.constant dense<0.000000e+00> : vector<64x32xf32>
    %135 = tpu.matmul %133, %134, %cst_44 {dimension_numbers = #tpu.dot_dimension_numbers<[1], [0], [0], [1], [0, 0, 1, 1], [], []>} : vector<64x128xbf16>, vector<128x32xbf16>, vector<64x32xf32> -> vector<64x32xf32>
    %c0_45 = arith.constant 0 : index
    %c0_46 = arith.constant 0 : index
    %136 = vector.load %arg13[%c0_45, %c0_46] : memref<1x32xf32, #tpu.memory_space<vmem>>, vector<1x32xf32>
    %137 = vector.broadcast %136 : vector<1x32xf32> to vector<64x32xf32>
    %138 = arith.addf %135, %137 : vector<64x32xf32>
    %139 = arith.addf %94, %138 : vector<64x32xf32>
    %140 = vector.shape_cast %139 : vector<64x32xf32> to vector<8x8x32xf32>
    %c0_47 = arith.constant 0 : index
    %c0_48 = arith.constant 0 : index
    %c0_49 = arith.constant 0 : index
    %141 = vector.load %arg14[%c0_47, %c0_48, %c0_49] : memref<8x8x32xf32, #tpu.memory_space<vmem>>, vector<8x8x32xf32>
    tpu.vector_store %arg14[%c0_47, %c0_48, %c0_49], %140 {strides = array<i32>} : memref<8x8x32xf32, #tpu.memory_space<vmem>>, vector<8x8x32xf32>,
    return
  }
  func.func @transform_0(%arg0: i32) -> (i32, i32, i32) {
    %c0_i32 = arith.constant 0 : i32
    %c0_i32_0 = arith.constant 0 : i32
    %c0_i32_1 = arith.constant 0 : i32
    return %arg0, %c0_i32, %c0_i32_0 : i32, i32, i32
  }
  func.func @transform_1(%arg0: i32) -> (i32, i32) {
    %c0_i32 = arith.constant 0 : i32
    %c0_i32_0 = arith.constant 0 : i32
    %c0_i32_1 = arith.constant 0 : i32
    return %c0_i32, %c0_i32_0 : i32, i32
  }
  func.func @transform_2(%arg0: i32) -> (i32, i32) {
    %c0_i32 = arith.constant 0 : i32
    %c0_i32_0 = arith.constant 0 : i32
    %c0_i32_1 = arith.constant 0 : i32
    return %c0_i32, %c0_i32_0 : i32, i32
  }
  func.func @transform_3(%arg0: i32) -> (i32, i32) {
    %c0_i32 = arith.constant 0 : i32
    %c0_i32_0 = arith.constant 0 : i32
    %c0_i32_1 = arith.constant 0 : i32
    return %c0_i32, %c0_i32_0 : i32, i32
  }
  func.func @transform_4(%arg0: i32) -> (i32, i32) {
    %c0_i32 = arith.constant 0 : i32
    %c0_i32_0 = arith.constant 0 : i32
    %c0_i32_1 = arith.constant 0 : i32
    return %c0_i32, %c0_i32_0 : i32, i32
  }
  func.func @transform_5(%arg0: i32) -> (i32, i32) {
    %c0_i32 = arith.constant 0 : i32
    %c0_i32_0 = arith.constant 0 : i32
    %c0_i32_1 = arith.constant 0 : i32
    return %c0_i32, %c0_i32_0 : i32, i32
  }
  func.func @transform_6(%arg0: i32) -> (i32, i32) {
    %c0_i32 = arith.constant 0 : i32
    %c0_i32_0 = arith.constant 0 : i32
    %c0_i32_1 = arith.constant 0 : i32
    return %c0_i32, %c0_i32_0 : i32, i32
  }
  func.func @transform_7(%arg0: i32) -> (i32, i32) {
    %c0_i32 = arith.constant 0 : i32
    %c0_i32_0 = arith.constant 0 : i32
    %c0_i32_1 = arith.constant 0 : i32
    return %c0_i32, %c0_i32_0 : i32, i32
  }
  func.func @transform_8(%arg0: i32) -> (i32, i32) {
    %c0_i32 = arith.constant 0 : i32
    %c0_i32_0 = arith.constant 0 : i32
    %c0_i32_1 = arith.constant 0 : i32
    return %c0_i32, %c0_i32_0 : i32, i32
  }
  func.func @transform_9(%arg0: i32) -> (i32, i32) {
    %c0_i32 = arith.constant 0 : i32
    %c0_i32_0 = arith.constant 0 : i32
    %c0_i32_1 = arith.constant 0 : i32
    return %c0_i32, %c0_i32_0 : i32, i32
  }
  func.func @transform_10(%arg0: i32) -> (i32, i32) {
    %c0_i32 = arith.constant 0 : i32
    %c0_i32_0 = arith.constant 0 : i32
    %c0_i32_1 = arith.constant 0 : i32
    return %c0_i32, %c0_i32_0 : i32, i32
  }
  func.func @transform_11(%arg0: i32) -> (i32, i32) {
    %c0_i32 = arith.constant 0 : i32
    %c0_i32_0 = arith.constant 0 : i32
    %c0_i32_1 = arith.constant 0 : i32
    return %c0_i32, %c0_i32_0 : i32, i32
  }
  func.func @transform_12(%arg0: i32) -> (i32, i32) {
    %c0_i32 = arith.constant 0 : i32
    %c0_i32_0 = arith.constant 0 : i32
    %c0_i32_1 = arith.constant 0 : i32
    return %c0_i32, %c0_i32_0 : i32, i32
  }
  func.func @transform_13(%arg0: i32) -> (i32, i32, i32) {
    %c0_i32 = arith.constant 0 : i32
    %c0_i32_0 = arith.constant 0 : i32
    %c0_i32_1 = arith.constant 0 : i32
    return %arg0, %c0_i32, %c0_i32_0 : i32, i32, i32
  }
}

module attributes {stable_mosaic.version = 11 : i64} {
  func.func @transformer_encoder_kernel(%arg0: i32, %arg1: memref<8x8x32xf32, #tpu.memory_space<vmem>>, %arg2: memref<1x32xf32, #tpu.memory_space<vmem>>, %arg3: memref<1x32xf32, #tpu.memory_space<vmem>>, %arg4: memref<32x96xbf16, #tpu.memory_space<vmem>>, %arg5: memref<1x96xf32, #tpu.memory_space<vmem>>, %arg6: memref<32x32xbf16, #tpu.memory_space<vmem>>, %arg7: memref<1x32xf32, #tpu.memory_space<vmem>>, %arg8: memref<1x32xf32, #tpu.memory_space<vmem>>, %arg9: memref<1x32xf32, #tpu.memory_space<vmem>>, %arg10: memref<32x128xbf16, #tpu.memory_space<vmem>>, %arg11: memref<1x128xf32, #tpu.memory_space<vmem>>, %arg12: memref<128x32xbf16, #tpu.memory_space<vmem>>, %arg13: memref<1x32xf32, #tpu.memory_space<vmem>>, %arg14: memref<8x8x32xf32, #tpu.memory_space<vmem>>) attributes {dimension_semantics = [#tpu.dimension_semantics<parallel>], iteration_bounds = array<i64: 2>, scalar_prefetch = 0 : i64, scratch_operands = 0 : i64, tpu.core_type = #tpu.core_type<tc>, window_params = [{transform_indices = @transform_0, window_bounds = array<i64: 8, 8, 32>}, {pipeline_mode = #tpu.pipeline_mode<synchronous>, transform_indices = @transform_1, window_bounds = array<i64: 1, 32>}, {pipeline_mode = #tpu.pipeline_mode<synchronous>, transform_indices = @transform_2, window_bounds = array<i64: 1, 32>}, {pipeline_mode = #tpu.pipeline_mode<synchronous>, transform_indices = @transform_3, window_bounds = array<i64: 32, 96>}, {pipeline_mode = #tpu.pipeline_mode<synchronous>, transform_indices = @transform_4, window_bounds = array<i64: 1, 96>}, {pipeline_mode = #tpu.pipeline_mode<synchronous>, transform_indices = @transform_5, window_bounds = array<i64: 32, 32>}, {pipeline_mode = #tpu.pipeline_mode<synchronous>, transform_indices = @transform_6, window_bounds = array<i64: 1, 32>}, {pipeline_mode = #tpu.pipeline_mode<synchronous>, transform_indices = @transform_7, window_bounds = array<i64: 1, 32>}, {pipeline_mode = #tpu.pipeline_mode<synchronous>, transform_indices = @transform_8, window_bounds = array<i64: 1, 32>}, {pipeline_mode = #tpu.pipeline_mode<synchronous>, transform_indices = @transform_9, window_bounds = array<i64: 32, 128>}, {pipeline_mode = #tpu.pipeline_mode<synchronous>, transform_indices = @transform_10, window_bounds = array<i64: 1, 128>}, {pipeline_mode = #tpu.pipeline_mode<synchronous>, transform_indices = @transform_11, window_bounds = array<i64: 128, 32>}, {pipeline_mode = #tpu.pipeline_mode<synchronous>, transform_indices = @transform_12, window_bounds = array<i64: 1, 32>}, {transform_indices = @transform_13, window_bounds = array<i64: 8, 8, 32>}]} {
    %c0 = arith.constant 0 : index
    %c0_0 = arith.constant 0 : index
    %c0_1 = arith.constant 0 : index
    %0 = vector.load %arg1[%c0, %c0_0, %c0_1] : memref<8x8x32xf32, #tpu.memory_space<vmem>>, vector<8x8x32xf32>
    %1 = vector.shape_cast %0 : vector<8x8x32xf32> to vector<64x32xf32>
    %c0_2 = arith.constant 0 : index
    %c0_3 = arith.constant 0 : index
    %2 = vector.load %arg2[%c0_2, %c0_3] : memref<1x32xf32, #tpu.memory_space<vmem>>, vector<1x32xf32>
    %c0_4 = arith.constant 0 : index
    %c0_5 = arith.constant 0 : index
    %3 = vector.load %arg3[%c0_4, %c0_5] : memref<1x32xf32, #tpu.memory_space<vmem>>, vector<1x32xf32>
    %cst = arith.constant dense<0.000000e+00> : vector<64xf32>
    %4 = vector.multi_reduction <add>, %1, %cst [1] : vector<64x32xf32> to vector<64xf32>
    %5 = vector.shape_cast %4 : vector<64xf32> to vector<64x1xf32>
    %cst_6 = arith.constant 3.200000e+01 : f32
    %6 = vector.broadcast %cst_6 : f32 to vector<64x1xf32>
    %7 = arith.divf %5, %6 : vector<64x1xf32>
    %8 = vector.broadcast %7 : vector<64x1xf32> to vector<64x32xf32>
    %9 = arith.subf %1, %8 : vector<64x32xf32>
    %10 = arith.mulf %9, %9 : vector<64x32xf32>
    %cst_7 = arith.constant dense<0.000000e+00> : vector<64xf32>
    %11 = vector.multi_reduction <add>, %10, %cst_7 [1] : vector<64x32xf32> to vector<64xf32>
    %12 = vector.shape_cast %11 : vector<64xf32> to vector<64x1xf32>
    %cst_8 = arith.constant 3.200000e+01 : f32
    %13 = vector.broadcast %cst_8 : f32 to vector<64x1xf32>
    %14 = arith.divf %12, %13 : vector<64x1xf32>
    %15 = vector.broadcast %7 : vector<64x1xf32> to vector<64x32xf32>
    %16 = arith.subf %1, %15 : vector<64x32xf32>
    %cst_9 = arith.constant 9.99999974E-6 : f32
    %17 = vector.broadcast %cst_9 : f32 to vector<64x1xf32>
    %18 = arith.addf %14, %17 : vector<64x1xf32>
    %19 = math.rsqrt %18 : vector<64x1xf32>
    %20 = vector.broadcast %19 : vector<64x1xf32> to vector<64x32xf32>
    %21 = arith.mulf %16, %20 : vector<64x32xf32>
    %22 = vector.broadcast %2 : vector<1x32xf32> to vector<64x32xf32>
    %23 = arith.mulf %21, %22 : vector<64x32xf32>
    %24 = vector.broadcast %3 : vector<1x32xf32> to vector<64x32xf32>
    %25 = arith.addf %23, %24 : vector<64x32xf32>
    %26 = arith.truncf %25 : vector<64x32xf32> to vector<64x32xbf16>
    %c0_10 = arith.constant 0 : index
    %c0_11 = arith.constant 0 : index
    %27 = vector.load %arg4[%c0_10, %c0_11] : memref<32x96xbf16, #tpu.memory_space<vmem>>, vector<32x96xbf16>
    %cst_12 = arith.constant dense<0.000000e+00> : vector<64x96xf32>
    %28 = tpu.matmul %26, %27, %cst_12 {dimension_numbers = #tpu.dot_dimension_numbers<[1], [0], [0], [1], [0, 0, 1, 1], [], []>} : vector<64x32xbf16>, vector<32x96xbf16>, vector<64x96xf32> -> vector<64x96xf32>
    %c0_13 = arith.constant 0 : index
    %c0_14 = arith.constant 0 : index
    %29 = vector.load %arg5[%c0_13, %c0_14] : memref<1x96xf32, #tpu.memory_space<vmem>>, vector<1x96xf32>
    %30 = vector.broadcast %29 : vector<1x96xf32> to vector<64x96xf32>
    %31 = arith.addf %28, %30 : vector<64x96xf32>
    %32 = arith.truncf %31 : vector<64x96xf32> to vector<64x96xbf16>
    %33 = vector.extract_strided_slice %32 {offsets = [0, 0], sizes = [64, 8], strides = [1, 1]} : vector<64x96xbf16> to vector<64x8xbf16>
    %34 = vector.extract_strided_slice %32 {offsets = [0, 8], sizes = [64, 8], strides = [1, 1]} : vector<64x96xbf16> to vector<64x8xbf16>
    %35 = vector.extract_strided_slice %32 {offsets = [0, 16], sizes = [64, 8], strides = [1, 1]} : vector<64x96xbf16> to vector<64x8xbf16>
    %36 = vector.extract_strided_slice %32 {offsets = [0, 24], sizes = [64, 8], strides = [1, 1]} : vector<64x96xbf16> to vector<64x8xbf16>
    %37 = vector.shape_cast %33 : vector<64x8xbf16> to vector<1x64x8xbf16>
    %38 = vector.shape_cast %34 : vector<64x8xbf16> to vector<1x64x8xbf16>
    %39 = vector.shape_cast %35 : vector<64x8xbf16> to vector<1x64x8xbf16>
    %40 = vector.shape_cast %36 : vector<64x8xbf16> to vector<1x64x8xbf16>
    %41 = tpu.concatenate %37, %38, %39, %40 in 0 : vector<1x64x8xbf16>, vector<1x64x8xbf16>, vector<1x64x8xbf16>, vector<1x64x8xbf16> -> vector<4x64x8xbf16>
    %42 = vector.shape_cast %41 : vector<4x64x8xbf16> to vector<32x8x8xbf16>
    %43 = vector.extract_strided_slice %32 {offsets = [0, 32], sizes = [64, 8], strides = [1, 1]} : vector<64x96xbf16> to vector<64x8xbf16>
    %44 = vector.extract_strided_slice %32 {offsets = [0, 40], sizes = [64, 8], strides = [1, 1]} : vector<64x96xbf16> to vector<64x8xbf16>
    %45 = vector.extract_strided_slice %32 {offsets = [0, 48], sizes = [64, 8], strides = [1, 1]} : vector<64x96xbf16> to vector<64x8xbf16>
    %46 = vector.extract_strided_slice %32 {offsets = [0, 56], sizes = [64, 8], strides = [1, 1]} : vector<64x96xbf16> to vector<64x8xbf16>
    %47 = vector.shape_cast %43 : vector<64x8xbf16> to vector<1x64x8xbf16>
    %48 = vector.shape_cast %44 : vector<64x8xbf16> to vector<1x64x8xbf16>
    %49 = vector.shape_cast %45 : vector<64x8xbf16> to vector<1x64x8xbf16>
    %50 = vector.shape_cast %46 : vector<64x8xbf16> to vector<1x64x8xbf16>
    %51 = tpu.concatenate %47, %48, %49, %50 in 0 : vector<1x64x8xbf16>, vector<1x64x8xbf16>, vector<1x64x8xbf16>, vector<1x64x8xbf16> -> vector<4x64x8xbf16>
    %52 = vector.shape_cast %51 : vector<4x64x8xbf16> to vector<32x8x8xbf16>
    %53 = vector.extract_strided_slice %32 {offsets = [0, 64], sizes = [64, 8], strides = [1, 1]} : vector<64x96xbf16> to vector<64x8xbf16>
    %54 = vector.extract_strided_slice %32 {offsets = [0, 72], sizes = [64, 8], strides = [1, 1]} : vector<64x96xbf16> to vector<64x8xbf16>
    %55 = vector.extract_strided_slice %32 {offsets = [0, 80], sizes = [64, 8], strides = [1, 1]} : vector<64x96xbf16> to vector<64x8xbf16>
    %56 = vector.extract_strided_slice %32 {offsets = [0, 88], sizes = [64, 8], strides = [1, 1]} : vector<64x96xbf16> to vector<64x8xbf16>
    %57 = vector.shape_cast %53 : vector<64x8xbf16> to vector<1x64x8xbf16>
    %58 = vector.shape_cast %54 : vector<64x8xbf16> to vector<1x64x8xbf16>
    %59 = vector.shape_cast %55 : vector<64x8xbf16> to vector<1x64x8xbf16>
    %60 = vector.shape_cast %56 : vector<64x8xbf16> to vector<1x64x8xbf16>
    %61 = tpu.concatenate %57, %58, %59, %60 in 0 : vector<1x64x8xbf16>, vector<1x64x8xbf16>, vector<1x64x8xbf16>, vector<1x64x8xbf16> -> vector<4x64x8xbf16>
    %62 = vector.shape_cast %61 : vector<4x64x8xbf16> to vector<32x8x8xbf16>
    "tpu.trace_start"() <{level = 10 : i32, message = "bnd,bmd->bnm"}> : () -> ()
    %cst_15 = arith.constant dense<0.000000e+00> : vector<32x8x8xf32>
    %63 = tpu.matmul %42, %52, %cst_15 {dimension_numbers = #tpu.dot_dimension_numbers<[2], [2], [1], [1], [0, 0, 0, 1, 1, 1], [0], [0]>} : vector<32x8x8xbf16>, vector<32x8x8xbf16>, vector<32x8x8xf32> -> vector<32x8x8xf32>
    "tpu.trace_stop"() : () -> ()
    %cst_16 = arith.constant 0.353553385 : f32
    %64 = vector.broadcast %cst_16 : f32 to vector<32x8x8xf32>
    %65 = arith.mulf %63, %64 : vector<32x8x8xf32>
    %cst_17 = arith.constant dense<0xFF800000> : vector<32x8xf32>
    %66 = vector.multi_reduction <maximumf>, %65, %cst_17 [2] : vector<32x8x8xf32> to vector<32x8xf32>
    %67 = vector.shape_cast %66 : vector<32x8xf32> to vector<32x8x1xf32>
    %68 = vector.broadcast %67 : vector<32x8x1xf32> to vector<32x8x8xf32>
    %69 = arith.subf %65, %68 : vector<32x8x8xf32>
    %70 = math.exp %69 : vector<32x8x8xf32>
    %cst_18 = arith.constant dense<0.000000e+00> : vector<32x8xf32>
    %71 = vector.multi_reduction <add>, %70, %cst_18 [2] : vector<32x8x8xf32> to vector<32x8xf32>
    %72 = vector.shape_cast %71 : vector<32x8xf32> to vector<32x8x1xf32>
    %73 = tpu.reciprocal %72 {approx = true} : vector<32x8x1xf32> -> vector<32x8x1xf32>
    %74 = vector.broadcast %73 : vector<32x8x1xf32> to vector<32x8x8xf32>
    %75 = arith.mulf %70, %74 : vector<32x8x8xf32>
    %76 = arith.truncf %75 : vector<32x8x8xf32> to vector<32x8x8xbf16>
    "tpu.trace_start"() <{level = 10 : i32, message = "bnm,bmd->bnd"}> : () -> ()
    %cst_19 = arith.constant dense<0.000000e+00> : vector<32x8x8xf32>
    %77 = tpu.matmul %76, %62, %cst_19 {dimension_numbers = #tpu.dot_dimension_numbers<[2], [1], [1], [2], [0, 0, 0, 1, 1, 2], [0], [0]>} : vector<32x8x8xbf16>, vector<32x8x8xbf16>, vector<32x8x8xf32> -> vector<32x8x8xf32>
    "tpu.trace_stop"() : () -> ()
    %78 = vector.shape_cast %77 : vector<32x8x8xf32> to vector<4x64x8xf32>
    %79 = vector.extract_strided_slice %78 {offsets = [0, 0, 0], sizes = [1, 64, 8], strides = [1, 1, 1]} : vector<4x64x8xf32> to vector<1x64x8xf32>
    %80 = vector.shape_cast %79 : vector<1x64x8xf32> to vector<64x8xf32>
    %81 = vector.extract_strided_slice %78 {offsets = [1, 0, 0], sizes = [1, 64, 8], strides = [1, 1, 1]} : vector<4x64x8xf32> to vector<1x64x8xf32>
    %82 = vector.shape_cast %81 : vector<1x64x8xf32> to vector<64x8xf32>
    %83 = vector.extract_strided_slice %78 {offsets = [2, 0, 0], sizes = [1, 64, 8], strides = [1, 1, 1]} : vector<4x64x8xf32> to vector<1x64x8xf32>
    %84 = vector.shape_cast %83 : vector<1x64x8xf32> to vector<64x8xf32>
    %85 = vector.extract_strided_slice %78 {offsets = [3, 0, 0], sizes = [1, 64, 8], strides = [1, 1, 1]} : vector<4x64x8xf32> to vector<1x64x8xf32>
    %86 = vector.shape_cast %85 : vector<1x64x8xf32> to vector<64x8xf32>
    %87 = tpu.concatenate %80, %82, %84, %86 in 1 : vector<64x8xf32>, vector<64x8xf32>, vector<64x8xf32>, vector<64x8xf32> -> vector<64x32xf32>
    %88 = arith.truncf %87 : vector<64x32xf32> to vector<64x32xbf16>
    %c0_20 = arith.constant 0 : index
    %c0_21 = arith.constant 0 : index
    %89 = vector.load %arg6[%c0_20, %c0_21] : memref<32x32xbf16, #tpu.memory_space<vmem>>, vector<32x32xbf16>
    %cst_22 = arith.constant dense<0.000000e+00> : vector<64x32xf32>
    %90 = tpu.matmul %88, %89, %cst_22 {dimension_numbers = #tpu.dot_dimension_numbers<[1], [0], [0], [1], [0, 0, 1, 1], [], []>} : vector<64x32xbf16>, vector<32x32xbf16>, vector<64x32xf32> -> vector<64x32xf32>
    %c0_23 = arith.constant 0 : index
    %c0_24 = arith.constant 0 : index
    %91 = vector.load %arg7[%c0_23, %c0_24] : memref<1x32xf32, #tpu.memory_space<vmem>>, vector<1x32xf32>
    %92 = vector.broadcast %91 : vector<1x32xf32> to vector<64x32xf32>
    %93 = arith.addf %90, %92 : vector<64x32xf32>
    %94 = arith.addf %1, %93 : vector<64x32xf32>
    %c0_25 = arith.constant 0 : index
    %c0_26 = arith.constant 0 : index
    %95 = vector.load %arg8[%c0_25, %c0_26] : memref<1x32xf32, #tpu.memory_space<vmem>>, vector<1x32xf32>
    %c0_27 = arith.constant 0 : index
    %c0_28 = arith.constant 0 : index
    %96 = vector.load %arg9[%c0_27, %c0_28] : memref<1x32xf32, #tpu.memory_space<vmem>>, vector<1x32xf32>
    %cst_29 = arith.constant dense<0.000000e+00> : vector<64xf32>
    %97 = vector.multi_reduction <add>, %94, %cst_29 [1] : vector<64x32xf32> to vector<64xf32>
    %98 = vector.shape_cast %97 : vector<64xf32> to vector<64x1xf32>
    %cst_30 = arith.constant 3.200000e+01 : f32
    %99 = vector.broadcast %cst_30 : f32 to vector<64x1xf32>
    %100 = arith.divf %98, %99 : vector<64x1xf32>
    %101 = vector.broadcast %100 : vector<64x1xf32> to vector<64x32xf32>
    %102 = arith.subf %94, %101 : vector<64x32xf32>
    %103 = arith.mulf %102, %102 : vector<64x32xf32>
    %cst_31 = arith.constant dense<0.000000e+00> : vector<64xf32>
    %104 = vector.multi_reduction <add>, %103, %cst_31 [1] : vector<64x32xf32> to vector<64xf32>
    %105 = vector.shape_cast %104 : vector<64xf32> to vector<64x1xf32>
    %cst_32 = arith.constant 3.200000e+01 : f32
    %106 = vector.broadcast %cst_32 : f32 to vector<64x1xf32>
    %107 = arith.divf %105, %106 : vector<64x1xf32>
    %108 = vector.broadcast %100 : vector<64x1xf32> to vector<64x32xf32>
    %109 = arith.subf %94, %108 : vector<64x32xf32>
    %cst_33 = arith.constant 9.99999974E-6 : f32
    %110 = vector.broadcast %cst_33 : f32 to vector<64x1xf32>
    %111 = arith.addf %107, %110 : vector<64x1xf32>
    %112 = math.rsqrt %111 : vector<64x1xf32>
    %113 = vector.broadcast %112 : vector<64x1xf32> to vector<64x32xf32>
    %114 = arith.mulf %109, %113 : vector<64x32xf32>
    %115 = vector.broadcast %95 : vector<1x32xf32> to vector<64x32xf32>
    %116 = arith.mulf %114, %115 : vector<64x32xf32>
    %117 = vector.broadcast %96 : vector<1x32xf32> to vector<64x32xf32>
    %118 = arith.addf %116, %117 : vector<64x32xf32>
    %119 = arith.truncf %118 : vector<64x32xf32> to vector<64x32xbf16>
    %c0_34 = arith.constant 0 : index
    %c0_35 = arith.constant 0 : index
    %120 = vector.load %arg10[%c0_34, %c0_35] : memref<32x128xbf16, #tpu.memory_space<vmem>>, vector<32x128xbf16>
    %cst_36 = arith.constant dense<0.000000e+00> : vector<64x128xf32>
    %121 = tpu.matmul %119, %120, %cst_36 {dimension_numbers = #tpu.dot_dimension_numbers<[1], [0], [0], [1], [0, 0, 1, 1], [], []>} : vector<64x32xbf16>, vector<32x128xbf16>, vector<64x128xf32> -> vector<64x128xf32>
    %c0_37 = arith.constant 0 : index
    %c0_38 = arith.constant 0 : index
    %122 = vector.load %arg11[%c0_37, %c0_38] : memref<1x128xf32, #tpu.memory_space<vmem>>, vector<1x128xf32>
    %123 = vector.broadcast %122 : vector<1x128xf32> to vector<64x128xf32>
    %124 = arith.addf %121, %123 : vector<64x128xf32>
    %cst_39 = arith.constant 5.000000e-01 : f32
    %125 = vector.broadcast %cst_39 : f32 to vector<64x128xf32>
    %126 = arith.mulf %125, %124 : vector<64x128xf32>
    %cst_40 = arith.constant 0.707106769 : f32
    %127 = vector.broadcast %cst_40 : f32 to vector<64x128xf32>
    %128 = arith.mulf %124, %127 : vector<64x128xf32>
    %129 = math.erf %128 : vector<64x128xf32>
    %cst_41 = arith.constant 1.000000e+00 : f32
    %130 = vector.broadcast %cst_41 : f32 to vector<64x128xf32>
    %131 = arith.addf %130, %129 : vector<64x128xf32>
    %132 = arith.mulf %126, %131 : vector<64x128xf32>
    %133 = arith.truncf %132 : vector<64x128xf32> to vector<64x128xbf16>
    %c0_42 = arith.constant 0 : index
    %c0_43 = arith.constant 0 : index
    %134 = vector.load %arg12[%c0_42, %c0_43] : memref<128x32xbf16, #tpu.memory_space<vmem>>, vector<128x32xbf16>
    %cst_44 = arith.constant dense<0.000000e+00> : vector<64x32xf32>
    %135 = tpu.matmul %133, %134, %cst_44 {dimension_numbers = #tpu.dot_dimension_numbers<[1], [0], [0], [1], [0, 0, 1, 1], [], []>} : vector<64x128xbf16>, vector<128x32xbf16>, vector<64x32xf32> -> vector<64x32xf32>
    %c0_45 = arith.constant 0 : index
    %c0_46 = arith.constant 0 : index
    %136 = vector.load %arg13[%c0_45, %c0_46] : memref<1x32xf32, #tpu.memory_space<vmem>>, vector<1x32xf32>
    %137 = vector.broadcast %136 : vector<1x32xf32> to vector<64x32xf32>
    %138 = arith.addf %135, %137 : vector<64x32xf32>
    %139 = arith.addf %94, %138 : vector<64x32xf32>
    %140 = vector.shape_cast %139 : vector<64x32xf32> to vector<8x8x32xf32>
    %c0_47 = arith.constant 0 : index
    %c0_48 = arith.constant 0 : index
    %c0_49 = arith.constant 0 : index
    %141 = vector.load %arg14[%c0_47, %c0_48, %c0_49] : memref<8x8x32xf32, #tpu.memory_space<vmem>>, vector<8x8x32xf32>
    tpu.vector_store %arg14[%c0_47, %c0_48, %c0_49], %140 {strides = array<i32>} : memref<8x8x32xf32, #tpu.memory_space<vmem>>, vector<8x8x32xf32>,
    return
  }
  func.func @transform_0(%arg0: i32) -> (i32, i32, i32) {
    %c0_i32 = arith.constant 0 : i32
    %c0_i32_0 = arith.constant 0 : i32
    %c0_i32_1 = arith.constant 0 : i32
    return %arg0, %c0_i32, %c0_i32_0 : i32, i32, i32
  }
  func.func @transform_1(%arg0: i32) -> (i32, i32) {
    %c0_i32 = arith.constant 0 : i32
    %c0_i32_0 = arith.constant 0 : i32
    %c0_i32_1 = arith.constant 0 : i32
    return %c0_i32, %c0_i32_0 : i32, i32
  }
  func.func @transform_2(%arg0: i32) -> (i32, i32) {
    %c0_i32 = arith.constant 0 : i32
    %c0_i32_0 = arith.constant 0 : i32
    %c0_i32_1 = arith.constant 0 : i32
    return %c0_i32, %c0_i32_0 : i32, i32
  }
  func.func @transform_3(%arg0: i32) -> (i32, i32) {
    %c0_i32 = arith.constant 0 : i32
    %c0_i32_0 = arith.constant 0 : i32
    %c0_i32_1 = arith.constant 0 : i32
    return %c0_i32, %c0_i32_0 : i32, i32
  }
  func.func @transform_4(%arg0: i32) -> (i32, i32) {
    %c0_i32 = arith.constant 0 : i32
    %c0_i32_0 = arith.constant 0 : i32
    %c0_i32_1 = arith.constant 0 : i32
    return %c0_i32, %c0_i32_0 : i32, i32
  }
  func.func @transform_5(%arg0: i32) -> (i32, i32) {
    %c0_i32 = arith.constant 0 : i32
    %c0_i32_0 = arith.constant 0 : i32
    %c0_i32_1 = arith.constant 0 : i32
    return %c0_i32, %c0_i32_0 : i32, i32
  }
  func.func @transform_6(%arg0: i32) -> (i32, i32) {
    %c0_i32 = arith.constant 0 : i32
    %c0_i32_0 = arith.constant 0 : i32
    %c0_i32_1 = arith.constant 0 : i32
    return %c0_i32, %c0_i32_0 : i32, i32
  }
  func.func @transform_7(%arg0: i32) -> (i32, i32) {
    %c0_i32 = arith.constant 0 : i32
    %c0_i32_0 = arith.constant 0 : i32
    %c0_i32_1 = arith.constant 0 : i32
    return %c0_i32, %c0_i32_0 : i32, i32
  }
  func.func @transform_8(%arg0: i32) -> (i32, i32) {
    %c0_i32 = arith.constant 0 : i32
    %c0_i32_0 = arith.constant 0 : i32
    %c0_i32_1 = arith.constant 0 : i32
    return %c0_i32, %c0_i32_0 : i32, i32
  }
  func.func @transform_9(%arg0: i32) -> (i32, i32) {
    %c0_i32 = arith.constant 0 : i32
    %c0_i32_0 = arith.constant 0 : i32
    %c0_i32_1 = arith.constant 0 : i32
    return %c0_i32, %c0_i32_0 : i32, i32
  }
  func.func @transform_10(%arg0: i32) -> (i32, i32) {
    %c0_i32 = arith.constant 0 : i32
    %c0_i32_0 = arith.constant 0 : i32
    %c0_i32_1 = arith.constant 0 : i32
    return %c0_i32, %c0_i32_0 : i32, i32
  }
  func.func @transform_11(%arg0: i32) -> (i32, i32) {
    %c0_i32 = arith.constant 0 : i32
    %c0_i32_0 = arith.constant 0 : i32
    %c0_i32_1 = arith.constant 0 : i32
    return %c0_i32, %c0_i32_0 : i32, i32
  }
  func.func @transform_12(%arg0: i32) -> (i32, i32) {
    %c0_i32 = arith.constant 0 : i32
    %c0_i32_0 = arith.constant 0 : i32
    %c0_i32_1 = arith.constant 0 : i32
    return %c0_i32, %c0_i32_0 : i32, i32
  }
  func.func @transform_13(%arg0: i32) -> (i32, i32, i32) {
    %c0_i32 = arith.constant 0 : i32
    %c0_i32_0 = arith.constant 0 : i32
    %c0_i32_1 = arith.constant 0 : i32
    return %arg0, %c0_i32, %c0_i32_0 : i32, i32, i32
  }
}

</mosaic_0001>

<bundles_post_ra>
// kernel: tpu_custom_call.1
= control target key start
LH: loop header
LB: loop body
LE: loop exit
PB: predicated region body
PF: predicated region fallthrough
CT: control target
= control target key end

     0   :  { %18 = vsyncpa [#allocation3], 0  ;;  %s7776_s0 = inlined_call_operand.hbm [shape: f32[16,8,32], index: 0, kind: input, shape index: {}]   ;;  %s7777_s1 = inlined_call_operand.vmem [shape: f32[1,32], index: 1, kind: input, shape index: {}]   ;;  %s7778_s2 = inlined_call_operand.vmem [shape: f32[1,32], index: 2, kind: input, shape index: {}]   ;;  %s7779_s3 = inlined_call_operand.vmem [shape: bf16[32,96], index: 3, kind: input, shape index: {}]   ;;  %s7780_s4 = inlined_call_operand.vmem [shape: f32[1,96], index: 4, kind: input, shape index: {}]   ;;  %s7781_s5 = inlined_call_operand.vmem [shape: bf16[32,32], index: 5, kind: input, shape index: {}]   ;;  %s7782_s6 = inlined_call_operand.vmem [shape: f32[1,32], index: 6, kind: input, shape index: {}]   ;;  %s7783_s7 = inlined_call_operand.vmem [shape: f32[1,32], index: 7, kind: input, shape index: {}]   ;;  %s7784_s8 = inlined_call_operand.vmem [shape: f32[1,32], index: 8, kind: input, shape index: {}]   ;;  %s7785_s9 = inlined_call_operand.vmem [shape: bf16[32,128], index: 9, kind: input, shape index: {}]   ;;  %s7786_s10 = inlined_call_operand.vmem [shape: f32[1,128], index: 10, kind: input, shape index: {}]   ;;  %s7787_s11 = inlined_call_operand.vmem [shape: bf16[128,32], index: 11, kind: input, shape index: {}]   ;;  %s7788_s12 = inlined_call_operand.vmem [shape: f32[1,32], index: 12, kind: input, shape index: {}]   ;;  %s7789_s13 = inlined_call_operand.hbm [shape: f32[16,8,32], index: 13, kind: output, shape index: {}]  }
   0x1   :  { %20 = vsyncpa [#allocation3 + $0x1], 0 }
   0x2   :  { %21 = vsyncpa [#allocation4], 0 }
   0x3   :  { %23 = vsyncpa [#allocation4 + $0x1], 0  ;;  %s6307_s25 = smov 0   ;;  %s6309_s26 = smov 0  }
   0x4   :  { %s6311_s27 = smov 0   ;;  %s6313_s28 = smov 0  }
   0x5 LB: > { %7799 = sst [smem:[#allocation8_spill]] %s6208_s25  ;;  %s6328_s29 = sadd.s32 4294967295, %s6220_s28   ;;  %s6220_s28 = sphi %s6313_s28, %s7829_s28   ;;  %s6216_s27 = sphi %s6311_s27, %s7831_s27   ;;  %s6212_s26 = sphi %s6309_s26, %s7833_s26   ;;  %s6208_s25 = sphi %s6307_s25, %s7832_s25  }
   0x6   : > { %7800 = sst [smem:[#allocation9_spill]] %s6216_s27  ;;  %s5051_s30 = sadd.s32 4294967294, %s6220_s28  }
   0x7   : > { %s6332_s14 = sadd.s32 1, %s6220_s28   ;;  %s36_s15 = sadd.s32 1, %s6216_s27 }
   0x8   : > { %7801 = sst [smem:[#allocation10_spill]] %s6332_s14  ;;  %s33_s16 = ssub.s32 %s6220_s28, %s6332_s14 }
   0x9   : > { %p43_p0 = scmp.ne.s32.totalorder %s6216_s27, %s6212_s26  ;;  %p34_p1 = scmp.eq.s32.totalorder %s33_s16, 0 }
   0xa   : > { %p44_p2 = scmp.eq.s32.totalorder %s6220_s28, 0  ;;  %p49_p3 = scmp.ne.s32.totalorder %s6212_s26, %s6208_s25 }
   0xb   : > { %p50_p4 = scmp.eq.s32.totalorder %s6328_s29, 0  ;;  %p325_p7 = scmp.eq.s32.totalorder %s6328_s29, 1 }
   0xc   : > { %s6344_s17 = scalar_select %p34_p1, %s6216_s27, %s36_s15  }
   0xd   : > { %p6346_p5 = por %p44_p2, %p43_p0  ;;  %p6350_p6 = por %p50_p4, %p49_p3 }
   0xe   : > { %7802 = sst [smem:[#allocation11_spill]] %s6344_s17  ;;  %p331_p8 = scmp.eq.s32.totalorder %s5051_s30, 1 }
   0xf   : > { %p5819_p10 = scmp.lt.s32.totalorder %s6220_s28, 2  ;;  %p6357_p11 = por %p325_p7, %p43_p0 }
  0x10   : > { %p6361_p12 = por %p331_p8, %p49_p3  ;;  %s387_s22 = sand.u32 1, %s6216_s27  }
  0x11   : > { %s7805_s20 = scalar_select %p6357_p11, 1, 0 }
  0x12   : > { %s7806_s21 = scalar_select %p6361_p12, 1, 0 }
  0x13   : > { %s5195_s23 = sshll.u32 %s6220_s28, 10  ;;  %s5054_s24 = sshll.u32 %s387_s22, 6 }
  0x14   : > { %s6370_s17 = scalar_lea.hbm %s7776_s0, %s5195_s23  ;;  %s391_s30 = scalar_lea.vmem [#allocation2], %s5054_s24 }
  0x15   : > { %s398_s14 = sshll.u32 %s391_s30, 4  ;;  %p6374_p13 = pnand %p5819_p10, %p6346_p5  ;;  %s6378_s14 = int_to_ptr.vmem [resolvable:$true] %s398_s14 }
  0x16   : > { %s6380_s27 = scalar_lea.sflag [#allocation3], %s387_s22  ;;  %s6124_s15 = scalar_lea.hbm %s6370_s17, 1024 }
  0x17   : > { %p6125_p0 = scmp.ne.s32.totalorder %s6370_s17, %s6124_s15  ;;  %p6126_p1 = pneg %p6374_p13 }
  0x18   : > { %s6129_s24 = scalar_lea.hbm %s7776_s0, 2048  ;;  %p6130_p4 = scmp.lt.u32.totalorder %s6370_s17, %s7776_s0 }
  0x19   : > { %p6127_p2 = pnand %p6126_p1, %p6125_p0  ;;  %p6131_p5 = scmp.lt.u32.totalorder %s6129_s24, %s6124_s15 }
  0x1a   : > { %p6133_p8 = scmp.lt.u32.totalorder %s6124_s15, %s6370_s17 }
  0x1b   : > { %p6128_p3 = pneg %p6127_p2  ;;  %p6132_p7 = por %p6131_p5, %p6130_p4 }
  0x1d   : > { %p6134_p10 = por %p6133_p8, %p6132_p7 }
  0x1f   : > { %p6135_p9 = pnand %p6134_p10, %p6128_p3 }
  0x21   : > { %6138 = shalt.err (!%p6135_p9)
}
  0x22   : > { %s6139_s22 = scalar_lea.vmem %s6378_s14, 1024  ;;  %s6222_s23 = smov [#allocation2]  }
  0x23   : > { %p6140_p0 = scmp.ne.s32.totalorder %s6378_s14, %s6139_s22  ;;  %s6144_s18 = sshll.u32 %s6222_s23, 4  ;;  %s6145_s18 = int_to_ptr.vmem [resolvable:$false] %s6144_s18 }
  0x24   : > { %s6146_s16 = scalar_lea.vmem %s6145_s18, 2048  ;;  %p6147_p11 = scmp.lt.s32.totalorder %s6378_s14, %s6145_s18 }
  0x25   : > { %p6142_p2 = pnand %p6140_p0, %p6126_p1  ;;  %p6148_p4 = scmp.lt.s32.totalorder %s6146_s16, %s6139_s22 }
  0x27   : > { %p6143_p12 = pneg %p6142_p2  ;;  %p6149_p5 = por %p6148_p4, %p6147_p11 }
  0x29   : > { %p6150_p7 = pnand %p6149_p5, %p6143_p12 }
  0x2b   : > { %6153 = shalt.err (!%p6150_p7)
}
  0x2c   : > { %s6223_s15 = smov 128   ;;  %s6224_s24 = smov 8  }
  0x2d   : > { %5814 = dma.hbm_to_vmem [thread:$0]  (!%p6374_p13), %s6370_s17, 1024, %s6378_s14, %s6380_s27, %s6223_s15, %s6223_s15, %s6224_s24  }
  0x2e   : > { %p5057_p9 = scmp.ge.s32.totalorder %s6220_s28, 1  ;;  %p406_p1 = scmp.lt.s32.totalorder %s6220_s28, 3 }
  0x30   : > { %p407_p3 = pnand %p5057_p9, %p406_p1 }
  0x32   : > { %410 = sbr.rel (%p407_p3) target bundleno = 2929 (0xb71), region = 72 }
  0x39   : > { %s6411_s30 = sand.u32 1, %s6212_s26  }
  0x3a   : > { %s5058_s22 = sshll.u32 %s6411_s30, 6  ;;  %s413_s23 = scalar_lea.sflag [#allocation3], %s6411_s30 }
  0x3b   : > { %s6417_s18 = scalar_lea.vmem [#allocation2], %s5058_s22 }
  0x3c   : > { %6199 = dma.done.wait (%p6350_p6), %s413_s23, 1024  }
  0x3d   : > { %6201 = vsyncadd (%p6350_p6), %s413_s23, 4294966272  ;;  %vm472_vm0 = vcmask 261120   ;;  %v462_v0 = vld [vmem:[%s6417_s18] sm:$0xff]  ;;  %v464_v1 = vld [vmem:[%s6417_s18 + $0x10] sm:$0xff]  ;;  %s6225_s27 = smov 120   ;;  %vm6227_vm1 = vmmov 0  }
  0x3e   : > { %v463_v2 = vld [vmem:[%s6417_s18 + $0x8] sm:$0xff]  ;;  %v473_v3 = vsel %vm472_vm0, %v462_v0, 0.0  ;;  %v479_v4 = vsel %vm472_vm0, %v464_v1, 0.0  ;;  %v465_v5 = vld [vmem:[%s6417_s18 + $0x18] sm:$0xff]  ;;  %v466_v6 = vld [vmem:[%s6417_s18 + $0x20] sm:$0xff]  ;;  %s6228_s14 = smov 112  }
  0x3f   : > { %v467_v7 = vld [vmem:[%s6417_s18 + $0x28] sm:$0xff]  ;;  %474 = vadd.xlane.f32.xlu0 %v473_v3  ;;  %480 = vadd.xlane.f32.xlu1 %v479_v4  ;;  %v476_v8 = vsel %vm472_vm0, %v463_v2, 0.0  ;;  %v482_v9 = vsel %vm472_vm0, %v465_v5, 0.0  ;;  %v485_v10 = vsel %vm472_vm0, %v466_v6, 0.0  ;;  %v468_v12 = vld [vmem:[%s6417_s18 + $0x30] sm:$0xff]  ;;  %v469_v13 = vld [vmem:[%s6417_s18 + $0x38] sm:$0xff] }
  0x40   : > { %v488_v11 = vsel %vm472_vm0, %v467_v7, 0.0  ;;  %v491_v14 = vsel %vm472_vm0, %v468_v12, 0.0  ;;  %v494_v15 = vsel %vm472_vm0, %v469_v13, 0.0  ;;  %v5926_v56 = vld [vmem:[%s7779_s3] sm:$0xff]   ;;  %v5927_v57 = vld [vmem:[%s7779_s3 + $0x8] sm:$0xff]   ;;  %s6229_s17 = smov 96  }
  0x41   : > { %5363 = vmatprep.subr.bf16.mxu1 %v5926_v56  ;;  %s6230_s19 = smov 104   ;;  %vm808_vm2 = vcmask 64512   ;;  %s6231_s16 = smov 64   ;;  %vm2764_vm3 = vcmask 1043456   ;;  %vm4400_vm4 = vcmask 130048   ;;  %vm4409_vm5 = vcmask 195584  }
  0x42   : > { %5364 = vmatpush3.bf16.msra.mxu1 %v5926_v56  ;;  %s6232_s15 = smov 8   ;;  %s6233_s24 = smov 16  }
  0x43   : > { %477 = vadd.xlane.f32.xlu0 %v476_v8  ;;  %483 = vadd.xlane.f32.xlu1 %v482_v9  ;;  %s5204_s23 = sshll.u32 %s6328_s29, 10  ;;  %s4965_s29 = scalar_lea.sflag [#allocation4], %s6411_s30 }
  0x44   : > { %5365 = vmatprep.subr.bf16.mxu1 %v5927_v57  ;;  %p7825_p11 = scmp.ne.s32.totalorder %s7805_s20, 0 }
  0x46   : > { %5366 = vmatpush3.bf16.msra.mxu1 %v5927_v57 }
  0x47   : > { %486 = vadd.xlane.f32.xlu0 %v485_v10  ;;  %489 = vadd.xlane.f32.xlu1 %v488_v11 }
  0x4b   : > { %492 = vadd.xlane.f32.xlu0 %v491_v14  ;;  %495 = vadd.xlane.f32.xlu1 %v494_v15 }
  0xcc   : > { %v475_v16 = vpop.xlane.xlu0 %474  ;;  %v481_v17 = vpop.xlane.xlu1 %480 }
  0xcd   : > { %v498_v18 = vmul.f32 0.03125, %v475_v16  ;;  %v500_v19 = vmul.f32 0.03125, %v481_v17 }
  0xcf   : > { %v6439_v20 = vsub.f32 %v462_v0, %v498_v18  ;;  %v6441_v21 = vsub.f32 %v464_v1, %v500_v19  ;;  %v5060_v19 = vld [vmem:[%s7777_s1] ss:$0 sm:$0xff] }
  0xd0   : > { %v478_v22 = vpop.xlane.xlu0 %477  ;;  %v484_v23 = vpop.xlane.xlu1 %483 }
  0xd1   : > { %v499_v24 = vmul.f32 0.03125, %v478_v22  ;;  %v501_v25 = vmul.f32 0.03125, %v484_v23  ;;  %v514_v26 = vmul.f32 %v6439_v20, %v6439_v20  ;;  %v516_v27 = vmul.f32 %v6441_v21, %v6441_v21 }
  0xd3   : > { %v6447_v28 = vsub.f32 %v463_v2, %v499_v24  ;;  %v6449_v29 = vsub.f32 %v465_v5, %v501_v25  ;;  %v522_v30 = vsel %vm472_vm0, %v514_v26, 0.0  ;;  %v528_v33 = vsel %vm472_vm0, %v516_v27, 0.0  ;;  %v5061_v27 = vld [vmem:[%s7778_s2] ss:$0 sm:$0xff] }
  0xd4   : > { %523 = vadd.xlane.f32.xlu0 %v522_v30  ;;  %v487_v31 = vpop.xlane.xlu0 %486  ;;  %v490_v32 = vpop.xlane.xlu1 %489 }
  0xd5   : > { %v502_v34 = vmul.f32 0.03125, %v487_v31  ;;  %v503_v35 = vmul.f32 0.03125, %v490_v32  ;;  %v515_v36 = vmul.f32 %v6447_v28, %v6447_v28  ;;  %v517_v37 = vmul.f32 %v6449_v29, %v6449_v29 }
  0xd7   : > { %v6457_v38 = vsub.f32 %v466_v6, %v502_v34  ;;  %v6459_v39 = vsub.f32 %v467_v7, %v503_v35  ;;  %v525_v40 = vsel %vm472_vm0, %v515_v36, 0.0  ;;  %v531_v43 = vsel %vm472_vm0, %v517_v37, 0.0 }
  0xd8   : > { %529 = vadd.xlane.f32.xlu0 %v528_v33  ;;  %526 = vadd.xlane.f32.xlu1 %v525_v40  ;;  %v493_v41 = vpop.xlane.xlu0 %492  ;;  %v496_v42 = vpop.xlane.xlu1 %495 }
  0xd9   : > { %v504_v44 = vmul.f32 0.03125, %v493_v41  ;;  %v505_v45 = vmul.f32 0.03125, %v496_v42  ;;  %v518_v46 = vmul.f32 %v6457_v38, %v6457_v38  ;;  %v519_v47 = vmul.f32 %v6459_v39, %v6459_v39 }
  0xdb   : > { %v6467_v48 = vsub.f32 %v468_v12, %v504_v44  ;;  %v6469_v49 = vsub.f32 %v469_v13, %v505_v45  ;;  %v534_v50 = vsel %vm472_vm0, %v518_v46, 0.0  ;;  %v537_v51 = vsel %vm472_vm0, %v519_v47, 0.0 }
  0xdc   : > { %532 = vadd.xlane.f32.xlu1 %v531_v43  ;;  %535 = vadd.xlane.f32.xlu0 %v534_v50 }
  0xdd   : > { %v520_v52 = vmul.f32 %v6467_v48, %v6467_v48  ;;  %v521_v53 = vmul.f32 %v6469_v49, %v6469_v49 }
  0xdf   : > { %v540_v54 = vsel %vm472_vm0, %v520_v52, 0.0  ;;  %v543_v55 = vsel %vm472_vm0, %v521_v53, 0.0 }
  0xe0   : > { %538 = vadd.xlane.f32.xlu1 %v537_v51  ;;  %541 = vadd.xlane.f32.xlu0 %v540_v54 }
  0xe4   : > { %544 = vadd.xlane.f32.xlu1 %v543_v55 }
 0x161   : > { %v524_v58 = vpop.xlane.xlu0 %523 }
 0x162   : > { %v546_v59 = vmul.f32 0.03125, %v524_v58  ;;  %v5062_v58 = vld [vmem:[%s7780_s4] ss:$0 sm:$0xff] }
 0x164   : > { %v554_v60 = vadd.f32 1e-05, %v546_v59 }
 0x165   : > { %v527_v61 = vpop.xlane.xlu1 %526  ;;  %v530_v62 = vpop.xlane.xlu0 %529 }
 0x166   : > { %5940 = vrsqrt.f32 %v554_v60  ;;  %v547_v63 = vmul.f32 0.03125, %v527_v61  ;;  %v548_v0 = vmul.f32 0.03125, %v530_v62 }
 0x168   : > { %v555_v1 = vadd.f32 1e-05, %v547_v63  ;;  %v556_v2 = vadd.f32 1e-05, %v548_v0 }
 0x169   : > { %v533_v3 = vpop.xlane.xlu1 %532  ;;  %v536_v4 = vpop.xlane.xlu0 %535 }
 0x16a   : > { %5942 = vrsqrt.f32 %v555_v1  ;;  %v549_v5 = vmul.f32 0.03125, %v533_v3  ;;  %v550_v6 = vmul.f32 0.03125, %v536_v4  ;;  %v7795_v4 = vmov 0.0  }
 0x16b   : > { %5944 = vrsqrt.f32 %v556_v2  ;;  %5375 = vmatprep.subr.bf16.mxu1 %v7795_v4  ;;  %5387 = vmatprep.subr.bf16.mxu0 %v7795_v4 }
 0x16c   : > { %v557_v7 = vadd.f32 1e-05, %v549_v5  ;;  %v558_v8 = vadd.f32 1e-05, %v550_v6  ;;  %5389 = vmatprep.mubr.msk.bf16.mxu0 %vm6227_vm1, %v7795_v4 }
 0x16d   : > { %v539_v9 = vpop.xlane.xlu1 %538  ;;  %v542_v10 = vpop.xlane.xlu0 %541 }
 0x16e   : > { %5946 = vrsqrt.f32 %v557_v7  ;;  %v551_v11 = vmul.f32 0.03125, %v539_v9  ;;  %v552_v12 = vmul.f32 0.03125, %v542_v10 }
 0x16f   : > { %5948 = vrsqrt.f32 %v558_v8 }
 0x170   : > { %v5941_v13 = vpop.eup %5940  ;;  %v559_v14 = vadd.f32 1e-05, %v551_v11  ;;  %v560_v15 = vadd.f32 1e-05, %v552_v12 }
 0x171   : > { %v545_v16 = vpop.xlane.xlu1 %544  ;;  %v570_v17 = vmul.f32 %v5941_v13, %v6439_v20 }
 0x172   : > { %5950 = vrsqrt.f32 %v559_v14  ;;  %v553_v18 = vmul.f32 0.03125, %v545_v16 }
 0x173   : > { %5952 = vrsqrt.f32 %v560_v15  ;;  %v584_v26 = vmul.f32 %v5060_v19, %v570_v17 }
 0x174   : > { %v5943_v22 = vpop.eup %5942  ;;  %v561_v23 = vadd.f32 1e-05, %v553_v18 }
 0x175   : > { %v5945_v24 = vpop.eup %5944  ;;  %v571_v25 = vmul.f32 %v5943_v22, %v6447_v28  ;;  %v598_v33 = vadd.f32 %v5061_v27, %v584_v26 }
 0x176   : > { %5954 = vrsqrt.f32 %v561_v23  ;;  %v572_v20 = vmul.f32 %v5945_v24, %v6441_v21 }
 0x177   : > { %v585_v30 = vmul.f32 %v5060_v19, %v571_v25 }
 0x178   : > { %v5947_v31 = vpop.eup %5946  ;;  %v586_v36 = vmul.f32 %v5060_v19, %v572_v20 }
 0x179   : > { %v5949_v32 = vpop.eup %5948  ;;  %v599_v34 = vadd.f32 %v5061_v27, %v585_v30  ;;  %v573_v35 = vmul.f32 %v5947_v31, %v6449_v29 }
 0x17a   : > { %v574_v37 = vmul.f32 %v5949_v32, %v6457_v38  ;;  %v600_v43 = vadd.f32 %v5061_v27, %v586_v36 }
 0x17b   : > { %v606_v40 = vpack.c.bf16 %v599_v34, %v598_v33  ;;  %v587_v28 = vmul.f32 %v5060_v19, %v573_v35 }
 0x17c   : > { %v5951_v41 = vpop.eup %5950  ;;  %v588_v45 = vmul.f32 %v5060_v19, %v574_v37 }
 0x17d   : > { %v5953_v42 = vpop.eup %5952  ;;  %5367 = vmatprep.mubr.msk.bf16.mxu1 %vm472_vm0, %v606_v40  ;;  %v601_v44 = vadd.f32 %v5061_v27, %v587_v28  ;;  %v575_v21 = vmul.f32 %v5951_v41, %v6459_v39 }
 0x17e   : > { %v576_v46 = vmul.f32 %v5953_v42, %v6467_v48  ;;  %v602_v29 = vadd.f32 %v5061_v27, %v588_v45 }
 0x17f   : > { %v607_v47 = vpack.c.bf16 %v601_v44, %v600_v43  ;;  %v589_v50 = vmul.f32 %v5060_v19, %v575_v21 }
 0x180   : > { %v5955_v51 = vpop.eup %5954  ;;  %v590_v53 = vmul.f32 %v5060_v19, %v576_v46 }
 0x181   : > { %5368 = vmatmul.mubr.msk.bf16.vlgmr.msra.gmra.mrb[0].mxu1 %vm472_vm0, %v607_v47  ;;  %v603_v38 = vadd.f32 %v5061_v27, %v589_v50  ;;  %v577_v52 = vmul.f32 %v5955_v51, %v6469_v49 }
 0x182   : > { %v604_v56 = vadd.f32 %v5061_v27, %v590_v53 }
 0x183   : > { %v608_v54 = vpack.c.bf16 %v603_v38, %v602_v29  ;;  %v591_v55 = vmul.f32 %v5060_v19, %v577_v52 }
 0x185   : > { %5371 = vmatprep.mubr.msk.bf16.mxu1 %vm472_vm0, %v608_v54  ;;  %v605_v57 = vadd.f32 %v5061_v27, %v591_v55 }
 0x187   : > { %v609_v39 = vpack.c.bf16 %v605_v57, %v604_v56 }
 0x189   : > { %5372 = vmatmul.mubr.msk.bf16.gmra.mrb[4].mxu1 %vm472_vm0, %v609_v39 }
 0x18a   : > { %5377 = vmatprep.mubr.msk.bf16.mxu1 %vm6227_vm1, %v7795_v4 }
 0x254   : > { %v5369_v48 = vpop.f32.mrb[0].mxu1 }
 0x255   : > { %v679_v59 = vpop.f32.mrb[1].mxu1  ;;  %v688_v61 = vadd.f32 %v5369_v48, %v5062_v58 }
 0x256   : > { %v5370_v60 = vpop.f32.mrb[2].mxu1  ;;  %v680_v63 = vadd.f32 %v5062_v58, %v679_v59 }
 0x257   : > { %v691_v62 = vadd.f32 %v5370_v60, %v5062_v58  ;;  %v682_v49 = vpop.f32.mrb[3].mxu1  ;;  %v6529_v18 = vpack.c.bf16 %v688_v61, %v688_v61 }
 0x258   : > { %v683_v0 = vadd.f32 %v5062_v58, %v682_v49  ;;  %v6515_v14 = vpack.c.bf16 %v680_v63, %v680_v63 }
 0x259   : > { %v711_v1 = vpack.c.bf16 %v691_v62, %v688_v61  ;;  %v6519_v15 = vpack.c.bf16 %v691_v62, %v691_v62 }
 0x25a   : > { %v710_v2 = vpack.c.bf16 %v683_v0, %v680_v63  ;;  %v6521_v16 = vpack.c.bf16 %v683_v0, %v683_v0 }
 0x25b   : > { %720 = vrot.lane.b32.xlu1 %v711_v1, %s6225_s27 }
 0x25c   : > { %718 = vrot.lane.b32.xlu0 %v710_v2, %s6225_s27  ;;  %v5373_v3 = vpop.f32.mrb[4].mxu1 }
 0x25d   : > { %v695_v5 = vpop.f32.mrb[5].mxu1  ;;  %v704_v7 = vadd.f32 %v5373_v3, %v5062_v58 }
 0x25e   : > { %v5374_v6 = vpop.f32.mrb[6].mxu1  ;;  %v696_v10 = vadd.f32 %v5062_v58, %v695_v5 }
 0x25f   : > { %v707_v8 = vadd.f32 %v5374_v6, %v5062_v58  ;;  %v698_v9 = vpop.f32.mrb[7].mxu1  ;;  %v6543_v23 = vpack.c.bf16 %v704_v7, %v704_v7 }
 0x260   : > { %v699_v11 = vadd.f32 %v5062_v58, %v698_v9  ;;  %v6527_v17 = vpack.c.bf16 %v696_v10, %v696_v10 }
 0x261   : > { %v6508_v12 = vpack.c.bf16 %v707_v8, %v704_v7  ;;  %v6535_v19 = vpack.c.bf16 %v707_v8, %v707_v8 }
 0x262   : > { %v712_v13 = vpack.c.bf16 %v699_v11, %v696_v10  ;;  %v6537_v22 = vpack.c.bf16 %v699_v11, %v699_v11 }
 0x263   : > { %724 = vrot.lane.b32.xlu0 %v6508_v12, %s6225_s27 }
 0x264   : > { %722 = vrot.lane.b32.xlu1 %v712_v13, %s6225_s27 }
 0x267   : > { %726 = vrot.lane.b32.xlu0 %v710_v2, %s6228_s14 }
 0x268   : > { %806 = vrot.lane.b32.xlu1 %v6515_v14, %s6229_s17 }
 0x26b   : > { %951 = vrot.lane.b32.xlu0 %v6519_v15, %s6229_s17 }
 0x26c   : > { %855 = vrot.lane.b32.xlu1 %v6521_v16, %s6229_s17 }
 0x26f   : > { %999 = vrot.lane.b32.xlu0 %v6527_v17, %s6229_s17 }
 0x270   : > { %903 = vrot.lane.b32.xlu1 %v6529_v18, %s6229_s17 }
 0x273   : > { %730 = vrot.lane.b32.xlu0 %v712_v13, %s6228_s14 }
 0x274   : > { %728 = vrot.lane.b32.xlu1 %v711_v1, %s6228_s14 }
 0x277   : > { %1143 = vrot.lane.b32.xlu0 %v6535_v19, %s6229_s17 }
 0x278   : > { %1047 = vrot.lane.b32.xlu1 %v6537_v22, %s6229_s17 }
 0x27c   : > { %1095 = vrot.lane.b32.xlu1 %v6543_v23, %s6229_s17 }
 0x280   : > { %732 = vrot.lane.b32.xlu1 %v6508_v12, %s6228_s14  ;;  %s7725_s14 = scalar_lea.hbm %s7789_s13, %s5204_s23 }
 0x2cd   : > { %v721_v27 = vpop.permute.xlu1 %720 }
 0x2ce   : > { %v719_v24 = vpop.permute.xlu0 %718  ;;  %v6556_v20 = vcombine.low %v721_v27, %v721_v27  ;;  %v6561_v32 = vcombine.high %v721_v27, %v721_v27 }
 0x2cf   : > { %v6548_v25 = vcombine.low %v719_v24, %v719_v24  ;;  %v6550_v26 = vcombine.high %v719_v24, %v719_v24 }
 0x2d1   : > { %1239 = vrot.lane.b32.xlu1 %v6550_v26, %s6229_s17  ;;  %1191 = vrot.lane.b32.xlu0 %v6548_v25, %s6229_s17 }
 0x2d5   : > { %1287 = vrot.lane.b32.xlu1 %v6556_v20, %s6229_s17  ;;  %734 = vrot.lane.b32.xlu0 %v710_v2, %s6230_s19  ;;  %v725_v30 = vpop.permute.xlu0 %724 }
 0x2d6   : > { %v723_v31 = vpop.permute.xlu1 %722  ;;  %v6576_v28 = vcombine.low %v725_v30, %v725_v30  ;;  %v6581_v43 = vcombine.high %v725_v30, %v725_v30 }
 0x2d7   : > { %v6566_v35 = vcombine.low %v723_v31, %v723_v31  ;;  %v6568_v36 = vcombine.high %v723_v31, %v723_v31 }
 0x2d9   : > { %736 = vrot.lane.b32.xlu1 %v711_v1, %s6230_s19  ;;  %1335 = vrot.lane.b32.xlu0 %v6561_v32, %s6229_s17  ;;  %v727_v33 = vpop.permute.xlu0 %726 }
 0x2da   : > { %v807_v34 = vpop.permute.xlu1 %806  ;;  %v6594_v47 = vcombine.low %v727_v33, %v727_v33  ;;  %v6596_v50 = vcombine.high %v727_v33, %v727_v33 }
 0x2db   : > { %v813_v37 = vsel %vm808_vm2, %v807_v34, 0 }
 0x2dc   : > { %5376 = vmatpush3.bf16.xpose.msra.mxu1 %v813_v37 }
 0x2dd   : > { %1431 = vrot.lane.b32.xlu1 %v6568_v36, %s6229_s17  ;;  %1383 = vrot.lane.b32.xlu0 %v6566_v35, %s6229_s17  ;;  %v952_v41 = vpop.permute.xlu0 %951 }
 0x2de   : > { %v856_v40 = vpop.permute.xlu1 %855  ;;  %5381 = vmatprep.subr.bf16.mxu1 %v7795_v4  ;;  %v957_v29 = vsel %vm808_vm2, %v952_v41, 0 }
 0x2df   : > { %v861_v44 = vsel %vm808_vm2, %v856_v40, 0 }
 0x2e1   : > { %738 = vrot.lane.b32.xlu0 %v712_v13, %s6230_s19  ;;  %1479 = vrot.lane.b32.xlu1 %v6576_v28, %s6229_s17  ;;  %v1000_v45 = vpop.permute.xlu0 %999 }
 0x2e2   : > { %v904_v42 = vpop.permute.xlu1 %903  ;;  %v1005_v38 = vsel %vm808_vm2, %v1000_v45, 0 }
 0x2e3   : > { %5378 = vmatmul.mubr.msk.bf16.vlgmr.msra.gmra.mrb[8].mxu1 %vm808_vm2, %v6515_v14  ;;  %v909_v21 = vsel %vm808_vm2, %v904_v42, 0 }
 0x2e4   : > { %5382 = vmatpush3.bf16.xpose.msra.mxu1 %v861_v44  ;;  %5388 = vmatpush3.bf16.xpose.msra.mxu0 %v909_v21 }
 0x2e5   : > { %1527 = vrot.lane.b32.xlu0 %v6581_v43, %s6229_s17  ;;  %740 = vrot.lane.b32.xlu1 %v6508_v12, %s6230_s19  ;;  %v731_v54 = vpop.permute.xlu0 %730  ;;  %s6235_s19 = smov [#allocation5]  }
 0x2e6   : > { %v729_v46 = vpop.permute.xlu1 %728  ;;  %5383 = vmatprep.mubr.msk.bf16.mxu1 %vm6227_vm1, %v7795_v4  ;;  %5393 = vmatprep.subr.bf16.mxu1 %v7795_v4  ;;  %v6621_v56 = vcombine.low %v731_v54, %v731_v54  ;;  %v6623_v57 = vcombine.high %v731_v54, %v731_v54 }
 0x2e7   : > { %5399 = vmatprep.subr.bf16.mxu0 %v7795_v4  ;;  %v6605_v52 = vcombine.low %v729_v46, %v729_v46  ;;  %v6607_v53 = vcombine.high %v729_v46, %v729_v46 }
 0x2e9   : > { %1623 = vrot.lane.b32.xlu1 %v6596_v50, %s6229_s17  ;;  %1575 = vrot.lane.b32.xlu0 %v6594_v47, %s6229_s17  ;;  %v1144_v61 = vpop.permute.xlu0 %1143 }
 0x2ea   : > { %v1048_v51 = vpop.permute.xlu1 %1047  ;;  %v1149_v62 = vsel %vm808_vm2, %v1144_v61, 0 }
 0x2eb   : > { %5384 = vmatmul.mubr.msk.bf16.vlgmr.msra.gmra.mrb[12].mxu1 %vm808_vm2, %v6521_v16  ;;  %5390 = vmatmul.mubr.msk.bf16.vlgmr.msra.gmra.mrb[0].mxu0 %vm808_vm2, %v6529_v18  ;;  %v1053_v48 = vsel %vm808_vm2, %v1048_v51, 0 }
 0x2ec   : > { %5394 = vmatpush3.bf16.xpose.msra.mxu1 %v957_v29  ;;  %5400 = vmatpush3.bf16.xpose.msra.mxu0 %v1005_v38 }
 0x2ed   : > { %1719 = vrot.lane.b32.xlu1 %v6607_v53, %s6229_s17  ;;  %1671 = vrot.lane.b32.xlu0 %v6605_v52, %s6229_s17 }
 0x2ee   : > { %v1096_v55 = vpop.permute.xlu1 %1095  ;;  %5395 = vmatprep.mubr.msk.bf16.mxu1 %vm6227_vm1, %v7795_v4  ;;  %5401 = vmatprep.mubr.msk.bf16.mxu0 %vm6227_vm1, %v7795_v4 }
 0x2ef   : > { %5405 = vmatprep.subr.bf16.mxu1 %v7795_v4  ;;  %5411 = vmatprep.subr.bf16.mxu0 %v7795_v4  ;;  %v1101_v58 = vsel %vm808_vm2, %v1096_v55, 0 }
 0x2f1   : > { %1815 = vrot.lane.b32.xlu1 %v6623_v57, %s6229_s17  ;;  %1767 = vrot.lane.b32.xlu0 %v6621_v56, %s6229_s17 }
 0x2f2   : > { %v733_v39 = vpop.permute.xlu1 %732 }
 0x2f3   : > { %v6633_v59 = vcombine.low %v733_v39, %v733_v39  ;;  %v6635_v60 = vcombine.high %v733_v39, %v733_v39  ;;  %5396 = vmatmul.mubr.msk.bf16.vlgmr.msra.gmra.mrb[16].mxu1 %vm808_vm2, %v6519_v15  ;;  %5402 = vmatmul.mubr.msk.bf16.vlgmr.msra.gmra.mrb[4].mxu0 %vm808_vm2, %v6527_v17 }
 0x2f4   : > { %5406 = vmatpush3.bf16.xpose.msra.mxu1 %v1053_v48  ;;  %5412 = vmatpush3.bf16.xpose.msra.mxu0 %v1101_v58 }
 0x2f5   : > { %1911 = vrot.lane.b32.xlu1 %v6635_v60, %s6229_s17  ;;  %1863 = vrot.lane.b32.xlu0 %v6633_v59, %s6229_s17 }
 0x2f6   : > { %5407 = vmatprep.mubr.msk.bf16.mxu1 %vm6227_vm1, %v7795_v4  ;;  %5413 = vmatprep.mubr.msk.bf16.mxu0 %vm6227_vm1, %v7795_v4 }
 0x2f7   : > { %5417 = vmatprep.subr.bf16.mxu1 %v7795_v4  ;;  %5423 = vmatprep.subr.bf16.mxu0 %v7795_v4 }
 0x2fb   : > { %5408 = vmatmul.mubr.msk.bf16.vlgmr.msra.gmra.mrb[20].mxu1 %vm808_vm2, %v6537_v22  ;;  %5414 = vmatmul.mubr.msk.bf16.vlgmr.msra.gmra.mrb[8].mxu0 %vm808_vm2, %v6543_v23 }
 0x2fc   : > { %5418 = vmatpush3.bf16.xpose.msra.mxu1 %v1149_v62  ;;  %5419 = vmatprep.mubr.msk.bf16.mxu1 %vm6227_vm1, %v7795_v4 }
 0x2fd   : > { %5429 = vmatprep.subr.bf16.mxu1 %v7795_v4  ;;  %5425 = vmatprep.mubr.msk.bf16.mxu0 %vm6227_vm1, %v7795_v4 }
 0x303   : > { %5420 = vmatmul.mubr.msk.bf16.vlgmr.msra.gmra.mrb[24].mxu1 %vm808_vm2, %v6535_v19 }
 0x304   : > { %5431 = vmatprep.mubr.msk.bf16.mxu1 %vm6227_vm1, %v7795_v4 }
 0x343   : > { %v1240_v49 = vpop.permute.xlu1 %1239  ;;  %v1192_v63 = vpop.permute.xlu0 %1191 }
 0x344   : > { %v1245_v0 = vsel %vm808_vm2, %v1240_v49, 0  ;;  %v1197_v1 = vsel %vm808_vm2, %v1192_v63, 0 }
 0x345   : > { %5424 = vmatpush3.bf16.xpose.msra.mxu0 %v1197_v1  ;;  %5430 = vmatpush3.bf16.xpose.msra.mxu1 %v1245_v0 }
 0x346   : > { %5435 = vmatprep.subr.bf16.mxu0 %v7795_v4  ;;  %5441 = vmatprep.subr.bf16.mxu1 %v7795_v4 }
 0x347   : > { %v1288_v2 = vpop.permute.xlu1 %1287  ;;  %v735_v3 = vpop.permute.xlu0 %734 }
 0x348   : > { %v6669_v5 = vcombine.low %v735_v3, %v735_v3  ;;  %v6671_v6 = vcombine.high %v735_v3, %v735_v3  ;;  %v1293_v9 = vsel %vm808_vm2, %v1288_v2, 0 }
 0x34a   : > { %2007 = vrot.lane.b32.xlu1 %v6671_v6, %s6229_s17  ;;  %1959 = vrot.lane.b32.xlu0 %v6669_v5, %s6229_s17 }
 0x34b   : > { %v737_v7 = vpop.permute.xlu1 %736  ;;  %v1336_v8 = vpop.permute.xlu0 %1335 }
 0x34c   : > { %v6678_v10 = vcombine.low %v737_v7, %v737_v7  ;;  %v6680_v11 = vcombine.high %v737_v7, %v737_v7  ;;  %v1341_v12 = vsel %vm808_vm2, %v1336_v8, 0  ;;  %5426 = vmatmul.mubr.msk.bf16.vlgmr.msra.gmra.mrb[12].mxu0 %vm808_vm2, %v6548_v25  ;;  %5432 = vmatmul.mubr.msk.bf16.vlgmr.msra.gmra.mrb[28].mxu1 %vm808_vm2, %v6550_v26 }
 0x34d   : > { %5436 = vmatpush3.bf16.xpose.msra.mxu0 %v1293_v9  ;;  %5442 = vmatpush3.bf16.xpose.msra.mxu1 %v1341_v12 }
 0x34e   : > { %2103 = vrot.lane.b32.xlu1 %v6680_v11, %s6229_s17  ;;  %2055 = vrot.lane.b32.xlu0 %v6678_v10, %s6229_s17 }
 0x34f   : > { %v1432_v13 = vpop.permute.xlu1 %1431  ;;  %v1384_v24 = vpop.permute.xlu0 %1383  ;;  %5437 = vmatprep.mubr.msk.bf16.mxu0 %vm6227_vm1, %v7795_v4  ;;  %5443 = vmatprep.mubr.msk.bf16.mxu1 %vm6227_vm1, %v7795_v4 }
 0x350   : > { %5447 = vmatprep.subr.bf16.mxu0 %v7795_v4  ;;  %5453 = vmatprep.subr.bf16.mxu1 %v7795_v4  ;;  %v1437_v31 = vsel %vm808_vm2, %v1432_v13, 0  ;;  %v1389_v33 = vsel %vm808_vm2, %v1384_v24, 0 }
 0x353   : > { %v1480_v27 = vpop.permute.xlu1 %1479  ;;  %v739_v30 = vpop.permute.xlu0 %738 }
 0x354   : > { %v6699_v34 = vcombine.low %v739_v30, %v739_v30  ;;  %v6701_v37 = vcombine.high %v739_v30, %v739_v30  ;;  %5438 = vmatmul.mubr.msk.bf16.vlgmr.msra.gmra.mrb[16].mxu0 %vm808_vm2, %v6556_v20  ;;  %5444 = vmatmul.mubr.msk.bf16.vlgmr.msra.gmra.mrb[32].mxu1 %vm808_vm2, %v6561_v32  ;;  %v1485_v21 = vsel %vm808_vm2, %v1480_v27, 0 }
 0x355   : > { %5448 = vmatpush3.bf16.xpose.msra.mxu0 %v1389_v33  ;;  %5454 = vmatpush3.bf16.xpose.msra.mxu1 %v1437_v31 }
 0x356   : > { %2199 = vrot.lane.b32.xlu1 %v6701_v37, %s6229_s17  ;;  %2151 = vrot.lane.b32.xlu0 %v6699_v34, %s6229_s17 }
 0x357   : > { %v741_v40 = vpop.permute.xlu1 %740  ;;  %5449 = vmatprep.mubr.msk.bf16.mxu0 %vm6227_vm1, %v7795_v4  ;;  %5455 = vmatprep.mubr.msk.bf16.mxu1 %vm6227_vm1, %v7795_v4  ;;  %v1528_v44 = vpop.permute.xlu0 %1527 }
 0x358   : > { %v6715_v41 = vcombine.low %v741_v40, %v741_v40  ;;  %v6717_v42 = vcombine.high %v741_v40, %v741_v40  ;;  %5459 = vmatprep.subr.bf16.mxu0 %v7795_v4  ;;  %5465 = vmatprep.subr.bf16.mxu1 %v7795_v4  ;;  %v1533_v45 = vsel %vm808_vm2, %v1528_v44, 0 }
 0x35a   : > { %7808 = vst [vmem:[#allocation12_spill] sm:$0xff] %v6715_v41  ;;  %7809 = vst [vmem:[#allocation13_spill] sm:$0xff] %v6717_v42  ;;  %2295 = vrot.lane.b32.xlu1 %v6717_v42, %s6229_s17  ;;  %2247 = vrot.lane.b32.xlu0 %v6715_v41, %s6229_s17  ;;  %s6234_s17 = smov 24  }
 0x35b   : > { %v1624_v46 = vpop.permute.xlu1 %1623  ;;  %v1576_v51 = vpop.permute.xlu0 %1575 }
 0x35c   : > { %5450 = vmatmul.mubr.msk.bf16.vlgmr.msra.gmra.mrb[20].mxu0 %vm808_vm2, %v6566_v35  ;;  %5456 = vmatmul.mubr.msk.bf16.vlgmr.msra.gmra.mrb[36].mxu1 %vm808_vm2, %v6568_v36 }
 0x35d   : > { %5460 = vmatpush3.bf16.xpose.msra.mxu0 %v1485_v21  ;;  %5466 = vmatpush3.bf16.xpose.msra.mxu1 %v1533_v45 }
 0x35e   : > { %2808 = vrot.lane.b32.xlu1 %v6521_v16, %s6231_s16  ;;  %2759 = vrot.lane.b32.xlu0 %v6515_v14, %s6231_s16  ;;  %v1629_v14 = vsel %vm808_vm2, %v1624_v46, 0  ;;  %v1581_v16 = vsel %vm808_vm2, %v1576_v51, 0 }
 0x35f   : > { %5461 = vmatprep.mubr.msk.bf16.mxu0 %vm6227_vm1, %v7795_v4  ;;  %5467 = vmatprep.mubr.msk.bf16.mxu1 %vm6227_vm1, %v7795_v4 }
 0x360   : > { %5471 = vmatprep.subr.bf16.mxu0 %v7795_v4  ;;  %5477 = vmatprep.subr.bf16.mxu1 %v7795_v4 }
 0x362   : > { %2904 = vrot.lane.b32.xlu1 %v6519_v15, %s6231_s16  ;;  %2856 = vrot.lane.b32.xlu0 %v6529_v18, %s6231_s16  ;;  %v1720_v15 = vpop.permute.xlu1 %1719  ;;  %v1672_v18 = vpop.permute.xlu0 %1671 }
 0x364   : > { %5462 = vmatmul.mubr.msk.bf16.vlgmr.msra.gmra.mrb[24].mxu0 %vm808_vm2, %v6576_v28  ;;  %5468 = vmatmul.mubr.msk.bf16.vlgmr.msra.gmra.mrb[40].mxu1 %vm808_vm2, %v6581_v43 }
 0x365   : > { %5472 = vmatpush3.bf16.xpose.msra.mxu0 %v1581_v16  ;;  %5478 = vmatpush3.bf16.xpose.msra.mxu1 %v1629_v14 }
 0x366   : > { %3000 = vrot.lane.b32.xlu1 %v6537_v22, %s6231_s16  ;;  %2952 = vrot.lane.b32.xlu0 %v6527_v17, %s6231_s16  ;;  %v1725_v17 = vsel %vm808_vm2, %v1720_v15, 0  ;;  %v1677_v22 = vsel %vm808_vm2, %v1672_v18, 0 }
 0x367   : > { %5473 = vmatprep.mubr.msk.bf16.mxu0 %vm6227_vm1, %v7795_v4  ;;  %5479 = vmatprep.mubr.msk.bf16.mxu1 %vm6227_vm1, %v7795_v4 }
 0x368   : > { %5483 = vmatprep.subr.bf16.mxu0 %v7795_v4  ;;  %5489 = vmatprep.subr.bf16.mxu1 %v7795_v4 }
 0x36a   : > { %3096 = vrot.lane.b32.xlu1 %v6535_v19, %s6231_s16  ;;  %3048 = vrot.lane.b32.xlu0 %v6543_v23, %s6231_s16  ;;  %v1816_v19 = vpop.permute.xlu1 %1815  ;;  %v1768_v23 = vpop.permute.xlu0 %1767 }
 0x36c   : > { %5474 = vmatmul.mubr.msk.bf16.vlgmr.msra.gmra.mrb[28].mxu0 %vm808_vm2, %v6594_v47  ;;  %5480 = vmatmul.mubr.msk.bf16.vlgmr.msra.gmra.mrb[44].mxu1 %vm808_vm2, %v6596_v50 }
 0x36d   : > { %5484 = vmatpush3.bf16.xpose.msra.mxu0 %v1677_v22  ;;  %5490 = vmatpush3.bf16.xpose.msra.mxu1 %v1725_v17 }
 0x36e   : > { %3192 = vrot.lane.b32.xlu1 %v6550_v26, %s6231_s16  ;;  %3144 = vrot.lane.b32.xlu0 %v6548_v25, %s6231_s16  ;;  %v1821_v25 = vsel %vm808_vm2, %v1816_v19, 0  ;;  %v1773_v26 = vsel %vm808_vm2, %v1768_v23, 0 }
 0x36f   : > { %5485 = vmatprep.mubr.msk.bf16.mxu0 %vm6227_vm1, %v7795_v4  ;;  %5491 = vmatprep.mubr.msk.bf16.mxu1 %vm6227_vm1, %v7795_v4 }
 0x370   : > { %5495 = vmatprep.subr.bf16.mxu0 %v7795_v4  ;;  %5501 = vmatprep.subr.bf16.mxu1 %v7795_v4 }
 0x372   : > { %3288 = vrot.lane.b32.xlu1 %v6561_v32, %s6231_s16  ;;  %3240 = vrot.lane.b32.xlu0 %v6556_v20, %s6231_s16  ;;  %v1912_v20 = vpop.permute.xlu1 %1911  ;;  %v1864_v32 = vpop.permute.xlu0 %1863 }
 0x374   : > { %5486 = vmatmul.mubr.msk.bf16.vlgmr.msra.gmra.mrb[32].mxu0 %vm808_vm2, %v6605_v52  ;;  %5492 = vmatmul.mubr.msk.bf16.vlgmr.msra.gmra.mrb[48].mxu1 %vm808_vm2, %v6607_v53 }
 0x375   : > { %5496 = vmatpush3.bf16.xpose.msra.mxu0 %v1773_v26  ;;  %5502 = vmatpush3.bf16.xpose.msra.mxu1 %v1821_v25 }
 0x376   : > { %3480 = vrot.lane.b32.xlu1 %v6581_v43, %s6231_s16  ;;  %3432 = vrot.lane.b32.xlu0 %v6576_v28, %s6231_s16  ;;  %v1917_v28 = vsel %vm808_vm2, %v1912_v20, 0  ;;  %v1869_v43 = vsel %vm808_vm2, %v1864_v32, 0 }
 0x377   : > { %5497 = vmatprep.mubr.msk.bf16.mxu0 %vm6227_vm1, %v7795_v4  ;;  %5503 = vmatprep.mubr.msk.bf16.mxu1 %vm6227_vm1, %v7795_v4 }
 0x378   : > { %5507 = vmatprep.subr.bf16.mxu0 %v7795_v4  ;;  %5513 = vmatprep.subr.bf16.mxu1 %v7795_v4 }
 0x37a   : > { %3576 = vrot.lane.b32.xlu1 %v6596_v50, %s6231_s16  ;;  %3528 = vrot.lane.b32.xlu0 %v6594_v47, %s6231_s16 }
 0x37c   : > { %5498 = vmatmul.mubr.msk.bf16.vlgmr.msra.gmra.mrb[36].mxu0 %vm808_vm2, %v6621_v56  ;;  %5504 = vmatmul.mubr.msk.bf16.vlgmr.msra.gmra.mrb[52].mxu1 %vm808_vm2, %v6623_v57 }
 0x37d   : > { %5508 = vmatpush3.bf16.xpose.msra.mxu0 %v1869_v43  ;;  %5514 = vmatpush3.bf16.xpose.msra.mxu1 %v1917_v28 }
 0x37e   : > { %3672 = vrot.lane.b32.xlu1 %v6607_v53, %s6231_s16  ;;  %3624 = vrot.lane.b32.xlu0 %v6605_v52, %s6231_s16 }
 0x37f   : > { %5509 = vmatprep.mubr.msk.bf16.mxu0 %vm6227_vm1, %v7795_v4  ;;  %5515 = vmatprep.mubr.msk.bf16.mxu1 %vm6227_vm1, %v7795_v4 }
 0x380   : > { %5519 = vmatprep.subr.bf16.mxu0 %v7795_v4  ;;  %5525 = vmatprep.subr.bf16.mxu1 %v7795_v4 }
 0x382   : > { %3864 = vrot.lane.b32.xlu1 %v6635_v60, %s6231_s16  ;;  %3816 = vrot.lane.b32.xlu0 %v6633_v59, %s6231_s16 }
 0x384   : > { %5510 = vmatmul.mubr.msk.bf16.vlgmr.msra.gmra.mrb[40].mxu0 %vm808_vm2, %v6633_v59  ;;  %5516 = vmatmul.mubr.msk.bf16.vlgmr.msra.gmra.mrb[56].mxu1 %vm808_vm2, %v6635_v60 }
 0x385   : > { %5521 = vmatprep.mubr.msk.bf16.mxu0 %vm6227_vm1, %v7795_v4  ;;  %5527 = vmatprep.mubr.msk.bf16.mxu1 %vm6227_vm1, %v7795_v4 }
 0x386   : > { %3384 = vrot.lane.b32.xlu1 %v6568_v36, %s6231_s16  ;;  %3336 = vrot.lane.b32.xlu0 %v6566_v35, %s6231_s16 }
 0x38a   : > { %3768 = vrot.lane.b32.xlu1 %v6623_v57, %s6231_s16  ;;  %3720 = vrot.lane.b32.xlu0 %v6621_v56, %s6231_s16 }
 0x3b6   : > { %v849_v47 = vpop.f32.mrb[8].mxu1 }
 0x3b7   : > { %v5379_v50 = vpop.f32.mrb[9].mxu1  ;;  %v6849_v60 = vmul.f32 0.35355338, %v849_v47 }
 0x3b8   : > { %v852_v29 = vpop.f32.mrb[10].mxu1 }
 0x3b9   : > { %v5380_v38 = vpop.f32.mrb[11].mxu1  ;;  %v2375_v3 = vsel %vm808_vm2, %v6849_v60, -inf }
 0x3bc   : > { %v2008_v52 = vpop.permute.xlu1 %2007  ;;  %v1960_v53 = vpop.permute.xlu0 %1959 }
 0x3bd   : > { %v2013_v54 = vsel %vm808_vm2, %v2008_v52, 0  ;;  %v1965_v55 = vsel %vm808_vm2, %v1960_v53, 0 }
 0x3be   : > { %v897_v36 = vpop.f32.mrb[12].mxu1  ;;  %v945_v39 = vpop.f32.mrb[0].mxu0  ;;  %5520 = vmatpush3.bf16.xpose.msra.mxu0 %v1965_v55  ;;  %5526 = vmatpush3.bf16.xpose.msra.mxu1 %v2013_v54 }
 0x3bf   : > { %v6843_v35 = vmul.f32 0.35355338, %v897_v36  ;;  %v6845_v57 = vmul.f32 0.35355338, %v945_v39  ;;  %v5385_v48 = vpop.f32.mrb[13].mxu1  ;;  %v5391_v56 = vpop.f32.mrb[1].mxu0  ;;  %5531 = vmatprep.subr.bf16.mxu0 %v7795_v4  ;;  %5537 = vmatprep.subr.bf16.mxu1 %v7795_v4 }
 0x3c0   : > { %v900_v58 = vpop.f32.mrb[14].mxu1  ;;  %v948_v59 = vpop.f32.mrb[2].mxu0 }
 0x3c1   : > { %v2056_v61 = vpop.permute.xlu0 %2055  ;;  %v2378_v62 = vsel %vm808_vm2, %v6843_v35, -inf  ;;  %v2381_v49 = vsel %vm808_vm2, %v6845_v57, -inf  ;;  %v5386_v63 = vpop.f32.mrb[15].mxu1 }
 0x3c2   : > { %v5392_v0 = vpop.f32.mrb[3].mxu0  ;;  %2379 = vmax.xlane.f32.xlu1 %v2378_v62  ;;  %2382 = vmax.xlane.f32.xlu0 %v2381_v49  ;;  %v2104_v1 = vpop.permute.xlu1 %2103  ;;  %v2061_v2 = vsel %vm808_vm2, %v2056_v61, 0 }
 0x3c3   : > { %v2109_v7 = vsel %vm808_vm2, %v2104_v1, 0 }
 0x3c5   : > { %5522 = vmatmul.mubr.msk.bf16.vlgmr.msra.gmra.mrb[44].mxu0 %vm808_vm2, %v6669_v5  ;;  %5528 = vmatmul.mubr.msk.bf16.vlgmr.msra.gmra.mrb[60].mxu1 %vm808_vm2, %v6671_v6 }
 0x3c6   : > { %v993_v8 = vpop.f32.mrb[16].mxu1  ;;  %v1041_v9 = vpop.f32.mrb[4].mxu0  ;;  %2376 = vmax.xlane.f32.xlu0 %v2375_v3  ;;  %5532 = vmatpush3.bf16.xpose.msra.mxu0 %v2061_v2 }
 0x3c7   : > { %v6863_v12 = vmul.f32 0.35355338, %v1041_v9  ;;  %5538 = vmatpush3.bf16.xpose.msra.mxu1 %v2109_v7  ;;  %v5397_v13 = vpop.f32.mrb[17].mxu1  ;;  %v5403_v24 = vpop.f32.mrb[5].mxu0  ;;  %5533 = vmatprep.mubr.msk.bf16.mxu0 %vm6227_vm1, %v7795_v4  ;;  %v6870_v31 = vmul.f32 0.35355338, %v993_v8 }
 0x3c8   : > { %v996_v27 = vpop.f32.mrb[18].mxu1  ;;  %v1044_v30 = vpop.f32.mrb[6].mxu0  ;;  %5539 = vmatprep.mubr.msk.bf16.mxu1 %vm6227_vm1, %v7795_v4  ;;  %5543 = vmatprep.subr.bf16.mxu0 %v7795_v4 }
 0x3c9   : > { %v2387_v33 = vsel %vm808_vm2, %v6863_v12, -inf  ;;  %5549 = vmatprep.subr.bf16.mxu1 %v7795_v4  ;;  %v5398_v40 = vpop.f32.mrb[19].mxu1  ;;  %v5404_v44 = vpop.f32.mrb[7].mxu0  ;;  %v2384_v46 = vsel %vm808_vm2, %v6870_v31, -inf }
 0x3ca   : > { %2388 = vmax.xlane.f32.xlu0 %v2387_v33  ;;  %v2200_v21 = vpop.permute.xlu1 %2199  ;;  %v2152_v45 = vpop.permute.xlu0 %2151 }
 0x3cb   : > { %v2205_v51 = vsel %vm808_vm2, %v2200_v21, 0  ;;  %v2157_v14 = vsel %vm808_vm2, %v2152_v45, 0 }
 0x3cd   : > { %5534 = vmatmul.mubr.msk.bf16.vlgmr.msra.gmra.mrb[48].mxu0 %vm808_vm2, %v6678_v10 }
 0x3ce   : > { %5540 = vmatmul.mubr.msk.bf16.vlgmr.msra.gmra.mrb[64].mxu1 %vm808_vm2, %v6680_v11  ;;  %v1089_v16 = vpop.f32.mrb[20].mxu1  ;;  %v1137_v15 = vpop.f32.mrb[8].mxu0  ;;  %2385 = vmax.xlane.f32.xlu0 %v2384_v46 }
 0x3cf   : > { %v6883_v18 = vmul.f32 0.35355338, %v1089_v16  ;;  %v6885_v17 = vmul.f32 0.35355338, %v1137_v15  ;;  %5544 = vmatpush3.bf16.xpose.msra.mxu0 %v2157_v14  ;;  %5550 = vmatpush3.bf16.xpose.msra.mxu1 %v2205_v51  ;;  %v5409_v22 = vpop.f32.mrb[21].mxu1  ;;  %v5415_v19 = vpop.f32.mrb[9].mxu0 }
 0x3d0   : > { %v1092_v23 = vpop.f32.mrb[22].mxu1  ;;  %v1140_v25 = vpop.f32.mrb[10].mxu0  ;;  %5545 = vmatprep.mubr.msk.bf16.mxu0 %vm6227_vm1, %v7795_v4  ;;  %5551 = vmatprep.mubr.msk.bf16.mxu1 %vm6227_vm1, %v7795_v4 }
 0x3d1   : > { %v2390_v26 = vsel %vm808_vm2, %v6883_v18, -inf  ;;  %v2393_v20 = vsel %vm808_vm2, %v6885_v17, -inf  ;;  %5555 = vmatprep.subr.bf16.mxu0 %v7795_v4  ;;  %5561 = vmatprep.subr.bf16.mxu1 %v7795_v4  ;;  %v5410_v32 = vpop.f32.mrb[23].mxu1  ;;  %v5416_v28 = vpop.f32.mrb[11].mxu0 }
 0x3d2   : > { %2391 = vmax.xlane.f32.xlu1 %v2390_v26  ;;  %2394 = vmax.xlane.f32.xlu0 %v2393_v20  ;;  %v2296_v43 = vpop.permute.xlu1 %2295  ;;  %v2248_v47 = vpop.permute.xlu0 %2247 }
 0x3d3   : > { %v2301_v50 = vsel %vm808_vm2, %v2296_v43, 0  ;;  %v2253_v29 = vsel %vm808_vm2, %v2248_v47, 0 }
 0x3d6   : > { %5546 = vmatmul.mubr.msk.bf16.vlgmr.msra.gmra.mrb[52].mxu0 %vm808_vm2, %v6699_v34  ;;  %5552 = vmatmul.mubr.msk.bf16.vlgmr.msra.gmra.mrb[68].mxu1 %vm808_vm2, %v6701_v37  ;;  %v1185_v38 = vpop.f32.mrb[24].mxu1  ;;  %v2809_v39 = vpop.permute.xlu1 %2808 }
 0x3d7   : > { %v6903_v52 = vmul.f32 0.35355338, %v1185_v38  ;;  %5556 = vmatpush3.bf16.xpose.msra.mxu0 %v2253_v29  ;;  %5562 = vmatpush3.bf16.xpose.msra.mxu1 %v2301_v50  ;;  %v5421_v53 = vpop.f32.mrb[25].mxu1  ;;  %v2760_v48 = vpop.permute.xlu0 %2759  ;;  %v2814_v56 = vsel %vm2764_vm3, %v2809_v39, 0 }
 0x3d8   : > { %v1188_v54 = vpop.f32.mrb[26].mxu1  ;;  %5557 = vmatprep.mubr.msk.bf16.mxu0 %vm6227_vm1, %v7795_v4  ;;  %5563 = vmatprep.mubr.msk.bf16.mxu1 %vm6227_vm1, %v7795_v4  ;;  %v2766_v58 = vsel %vm2764_vm3, %v2760_v48, 0 }
 0x3d9   : > { %v2396_v55 = vsel %vm808_vm2, %v6903_v52, -inf  ;;  %5567 = vmatprep.subr.bf16.mxu0 %v7795_v4  ;;  %5573 = vmatprep.subr.bf16.mxu1 %v7795_v4  ;;  %v5422_v36 = vpop.f32.mrb[27].mxu1 }
 0x3da   : > { %2397 = vmax.xlane.f32.xlu1 %v2396_v55  ;;  %v6925_v59 = vpop.permute.xlu1 %2904 }
 0x3db   : > { %v6927_v61 = vpop.permute.xlu0 %2856 }
 0x3de   : > { %5558 = vmatmul.mubr.msk.bf16.vlgmr.msra.gmra.mrb[56].mxu0 %vm808_vm2, %v6715_v41  ;;  %5564 = vmatmul.mubr.msk.bf16.vlgmr.msra.gmra.mrb[72].mxu1 %vm808_vm2, %v6717_v42  ;;  %v6929_v62 = vpop.permute.xlu1 %3000 }
 0x3df   : > { %5568 = vmatpush3.bf16.msra.mxu0 %v2766_v58  ;;  %5574 = vmatpush3.bf16.msra.mxu1 %v2814_v56  ;;  %v6931_v49 = vpop.permute.xlu0 %2952 }
 0x3e0   : > { %5575 = vmatprep.mubr.msk.bf16.mxu1 %vm6227_vm1, %v7795_v4  ;;  %5585 = vmatprep.subr.bf16.mxu1 %v7795_v4 }
 0x3e1   : > { %5569 = vmatprep.mubr.msk.bf16.mxu0 %vm6227_vm1, %v7795_v4  ;;  %5579 = vmatprep.subr.bf16.mxu0 %v7795_v4 }
 0x3e2   : > { %v6933_v63 = vpop.permute.xlu1 %3096 }
 0x3e3   : > { %v6935_v0 = vpop.permute.xlu0 %3048 }
 0x3e6   : > { %v6937_v1 = vpop.permute.xlu1 %3192 }
 0x3e7   : > { %v6939_v2 = vpop.permute.xlu0 %3144 }
 0x3ea   : > { %v6941_v3 = vpop.permute.xlu1 %3288 }
 0x3eb   : > { %v6943_v7 = vpop.permute.xlu0 %3240 }
 0x3ee   : > { %v6953_v51 = vpop.permute.xlu1 %3480 }
 0x3ef   : > { %v6955_v14 = vpop.permute.xlu0 %3432 }
 0x3f2   : > { %v6965_v50 = vpop.permute.xlu1 %3576 }
 0x3f3   : > { %v6967_v29 = vpop.permute.xlu0 %3528 }
 0x41f   : > { %v1233_v8 = vpop.f32.mrb[12].mxu0  ;;  %v1281_v9 = vpop.f32.mrb[28].mxu1 }
 0x420   : > { %v6945_v13 = vmul.f32 0.35355338, %v1233_v8  ;;  %v6947_v24 = vmul.f32 0.35355338, %v1281_v9  ;;  %v5427_v27 = vpop.f32.mrb[13].mxu0  ;;  %v5433_v30 = vpop.f32.mrb[29].mxu1 }
 0x421   : > { %v1236_v33 = vpop.f32.mrb[14].mxu0  ;;  %v1284_v40 = vpop.f32.mrb[30].mxu1 }
 0x422   : > { %v5428_v44 = vpop.f32.mrb[15].mxu0  ;;  %v5434_v21 = vpop.f32.mrb[31].mxu1  ;;  %v2402_v45 = vsel %vm808_vm2, %v6947_v24, -inf  ;;  %v2399_v46 = vsel %vm808_vm2, %v6945_v13, -inf }
 0x423   : > { %2403 = vmax.xlane.f32.xlu1 %v2402_v45  ;;  %2400 = vmax.xlane.f32.xlu0 %v2399_v46  ;;  %v6977_v30 = vpop.permute.xlu1 %3672  ;;  %v6979_v33 = vpop.permute.xlu0 %3624 }
 0x424   : > { %7810 = vst [vmem:[#allocation14_spill] sm:$0xff] %v6977_v30  ;;  %7811 = vst [vmem:[#allocation15_spill] sm:$0xff] %v6979_v33 }
 0x427   : > { %v1329_v16 = vpop.f32.mrb[16].mxu0  ;;  %v1377_v15 = vpop.f32.mrb[32].mxu1 }
 0x428   : > { %v6957_v22 = vmul.f32 0.35355338, %v1329_v16  ;;  %v6959_v19 = vmul.f32 0.35355338, %v1377_v15  ;;  %v5439_v23 = vpop.f32.mrb[17].mxu0  ;;  %v5445_v25 = vpop.f32.mrb[33].mxu1 }
 0x429   : > { %v1332_v26 = vpop.f32.mrb[18].mxu0  ;;  %v1380_v20 = vpop.f32.mrb[34].mxu1 }
 0x42a   : > { %v5440_v32 = vpop.f32.mrb[19].mxu0  ;;  %v5446_v28 = vpop.f32.mrb[35].mxu1  ;;  %v2408_v43 = vsel %vm808_vm2, %v6959_v19, -inf  ;;  %v2405_v47 = vsel %vm808_vm2, %v6957_v22, -inf }
 0x42b   : > { %2409 = vmax.xlane.f32.xlu1 %v2408_v43  ;;  %2406 = vmax.xlane.f32.xlu0 %v2405_v47  ;;  %v6989_v28 = vpop.permute.xlu1 %3864  ;;  %v6991_v43 = vpop.permute.xlu0 %3816 }
 0x42c   : > { %7812 = vst [vmem:[#allocation16_spill] sm:$0xff] %v6989_v28  ;;  %7813 = vst [vmem:[#allocation17_spill] sm:$0xff] %v6991_v43 }
 0x42f   : > { %v1425_v38 = vpop.f32.mrb[20].mxu0  ;;  %v1473_v53 = vpop.f32.mrb[36].mxu1 }
 0x430   : > { %v6969_v54 = vmul.f32 0.35355338, %v1425_v38  ;;  %v6971_v55 = vmul.f32 0.35355338, %v1473_v53  ;;  %v5451_v36 = vpop.f32.mrb[21].mxu0  ;;  %v5457_v39 = vpop.f32.mrb[37].mxu1 }
 0x431   : > { %v1428_v48 = vpop.f32.mrb[22].mxu0  ;;  %v1476_v56 = vpop.f32.mrb[38].mxu1 }
 0x432   : > { %v5452_v58 = vpop.f32.mrb[23].mxu0  ;;  %v5458_v8 = vpop.f32.mrb[39].mxu1  ;;  %v2414_v9 = vsel %vm808_vm2, %v6971_v55, -inf  ;;  %v2411_v27 = vsel %vm808_vm2, %v6969_v54, -inf }
 0x433   : > { %2415 = vmax.xlane.f32.xlu1 %v2414_v9  ;;  %2412 = vmax.xlane.f32.xlu0 %v2411_v27 }
 0x437   : > { %v1521_v40 = vpop.f32.mrb[24].mxu0  ;;  %v1569_v44 = vpop.f32.mrb[40].mxu1 }
 0x438   : > { %v6981_v21 = vmul.f32 0.35355338, %v1521_v40  ;;  %v6983_v45 = vmul.f32 0.35355338, %v1569_v44  ;;  %v5463_v46 = vpop.f32.mrb[25].mxu0  ;;  %v5469_v16 = vpop.f32.mrb[41].mxu1 }
 0x439   : > { %v1524_v15 = vpop.f32.mrb[26].mxu0  ;;  %v1572_v23 = vpop.f32.mrb[42].mxu1 }
 0x43a   : > { %v5464_v25 = vpop.f32.mrb[27].mxu0  ;;  %v5470_v26 = vpop.f32.mrb[43].mxu1  ;;  %v2417_v20 = vsel %vm808_vm2, %v6981_v21, -inf  ;;  %v2420_v32 = vsel %vm808_vm2, %v6983_v45, -inf }
 0x43b   : > { %2418 = vmax.xlane.f32.xlu0 %v2417_v20  ;;  %2421 = vmax.xlane.f32.xlu1 %v2420_v32  ;;  %v7001_v44 = vpop.permute.xlu1 %3384  ;;  %v7003_v46 = vpop.permute.xlu0 %3336 }
 0x43f   : > { %v1617_v47 = vpop.f32.mrb[28].mxu0  ;;  %v1665_v38 = vpop.f32.mrb[44].mxu1 }
 0x440   : > { %v6993_v53 = vmul.f32 0.35355338, %v1617_v47  ;;  %v6995_v36 = vmul.f32 0.35355338, %v1665_v38  ;;  %v5475_v39 = vpop.f32.mrb[29].mxu0  ;;  %v5481_v48 = vpop.f32.mrb[45].mxu1 }
 0x441   : > { %v1620_v56 = vpop.f32.mrb[30].mxu0  ;;  %v1668_v58 = vpop.f32.mrb[46].mxu1 }
 0x442   : > { %v5476_v8 = vpop.f32.mrb[31].mxu0  ;;  %v5482_v9 = vpop.f32.mrb[47].mxu1  ;;  %v2426_v27 = vsel %vm808_vm2, %v6995_v36, -inf  ;;  %v2423_v40 = vsel %vm808_vm2, %v6993_v53, -inf }
 0x443   : > { %2427 = vmax.xlane.f32.xlu1 %v2426_v27  ;;  %2424 = vmax.xlane.f32.xlu0 %v2423_v40  ;;  %v7009_v48 = vpop.permute.xlu1 %3768  ;;  %v7011_v56 = vpop.permute.xlu0 %3720 }
 0x444   : > { %7814 = vst [vmem:[#allocation18_spill] sm:$0xff] %v7009_v48  ;;  %7815 = vst [vmem:[#allocation19_spill] sm:$0xff] %v7011_v56 }
 0x447   : > { %v1713_v16 = vpop.f32.mrb[32].mxu0  ;;  %v1761_v15 = vpop.f32.mrb[48].mxu1 }
 0x448   : > { %v7005_v23 = vmul.f32 0.35355338, %v1761_v15  ;;  %v5487_v25 = vpop.f32.mrb[33].mxu0  ;;  %v5493_v26 = vpop.f32.mrb[49].mxu1 }
 0x449   : > { %v1716_v20 = vpop.f32.mrb[34].mxu0  ;;  %v1764_v32 = vpop.f32.mrb[50].mxu1 }
 0x44a   : > { %v5488_v47 = vpop.f32.mrb[35].mxu0  ;;  %v5494_v38 = vpop.f32.mrb[51].mxu1  ;;  %v2432_v39 = vsel %vm808_vm2, %v7005_v23, -inf }
 0x44b   : > { %2433 = vmax.xlane.f32.xlu1 %v2432_v39 }
 0x44f   : > { %v2380_v58 = vpop.xlane.xlu1 %2379  ;;  %v1809_v8 = vpop.f32.mrb[36].mxu0 }
 0x450   : > { %v2472_v9 = vsub.f32 %v6843_v35, %v2380_v58  ;;  %v1857_v27 = vpop.f32.mrb[52].mxu1  ;;  %v2383_v40 = vpop.xlane.xlu0 %2382 }
 0x451   : > { %v2473_v15 = vsub.f32 %v6845_v57, %v2383_v40  ;;  %v5499_v25 = vpop.f32.mrb[37].mxu0  ;;  %v5505_v26 = vpop.f32.mrb[53].mxu1 }
 0x452   : > { %v2505_v20 = vmul.f32 1.442695, %v2472_v9  ;;  %v1812_v32 = vpop.f32.mrb[38].mxu0  ;;  %v1860_v47 = vpop.f32.mrb[54].mxu1 }
 0x453   : > { %v2507_v38 = vmul.f32 1.442695, %v2473_v15  ;;  %v5500_v4 = vpop.f32.mrb[39].mxu0  ;;  %v5506_v43 = vpop.f32.mrb[55].mxu1 }
 0x454   : > { %5956 = vpow2.f32 %v2505_v20  ;;  %v2377_v39 = vpop.xlane.xlu0 %2376 }
 0x455   : > { %5958 = vpow2.f32 %v2507_v38  ;;  %v2471_v41 = vsub.f32 %v6849_v60, %v2377_v39  ;;  %v7024_v60 = vmul.f32 0.35355338, %v1857_v27 }
 0x457   : > { %v2503_v56 = vmul.f32 1.442695, %v2471_v41  ;;  %v1905_v28 = vpop.f32.mrb[40].mxu0  ;;  %v7016_v35 = vpop.f32.mrb[56].mxu1  ;;  %v2438_v27 = vsel %vm808_vm2, %v7024_v60, -inf }
 0x458   : > { %v2389_v58 = vpop.xlane.xlu0 %2388  ;;  %v5511_v42 = vpop.f32.mrb[41].mxu0 }
 0x459   : > { %5960 = vpow2.f32 %v2503_v56  ;;  %v2475_v57 = vsub.f32 %v6863_v12, %v2389_v58  ;;  %v5517_v9 = vpop.f32.mrb[57].mxu1  ;;  %v1908_v40 = vpop.f32.mrb[42].mxu0  ;;  %v7035_v58 = vmul.f32 0.35355338, %v1713_v16 }
 0x45a   : > { %v1956_v25 = vpop.f32.mrb[58].mxu1  ;;  %v5512_v15 = vpop.f32.mrb[43].mxu0 }
 0x45b   : > { %v2511_v4 = vmul.f32 1.442695, %v2475_v57  ;;  %v5518_v43 = vpop.f32.mrb[59].mxu1  ;;  %v2429_v9 = vsel %vm808_vm2, %v7035_v58, -inf  ;;  %v7045_v25 = vmul.f32 0.35355338, %v1809_v8 }
 0x45c   : > { %v2386_v26 = vpop.xlane.xlu0 %2385 }
 0x45d   : > { %v2474_v20 = vsub.f32 %v6870_v31, %v2386_v26  ;;  %5962 = vpow2.f32 %v2511_v4  ;;  %v2435_v4 = vsel %vm808_vm2, %v7045_v25, -inf  ;;  %v7055_v26 = vmul.f32 0.35355338, %v1905_v28 }
 0x45e   : > { %v7020_v32 = vpop.eup %5956 }
 0x45f   : > { %v7022_v41 = vpop.eup %5958  ;;  %v2509_v42 = vmul.f32 1.442695, %v2474_v20  ;;  %v2570_v12 = vsel %vm808_vm2, %v7020_v32, 0.0  ;;  %v2441_v20 = vsel %vm808_vm2, %v7055_v26, -inf  ;;  %v2392_v28 = vpop.xlane.xlu1 %2391 }
 0x460   : > { %v2395_v56 = vpop.xlane.xlu0 %2394  ;;  %2571 = vadd.xlane.f32.xlu1 %v2570_v12  ;;  %v2573_v47 = vsel %vm808_vm2, %v7022_v41, 0.0 }
 0x461   : > { %5964 = vpow2.f32 %v2509_v42  ;;  %v2477_v38 = vsub.f32 %v6885_v17, %v2395_v56  ;;  %2574 = vadd.xlane.f32.xlu0 %v2573_v47  ;;  %v2476_v42 = vsub.f32 %v6883_v18, %v2392_v28 }
 0x463   : > { %v7031_v31 = vpop.eup %5960  ;;  %v2515_v39 = vmul.f32 1.442695, %v2477_v38 }
 0x464   : > { %2439 = vmax.xlane.f32.xlu1 %v2438_v27  ;;  %v2567_v57 = vsel %vm808_vm2, %v7031_v31, 0.0 }
 0x465   : > { %2568 = vadd.xlane.f32.xlu0 %v2567_v57  ;;  %5966 = vpow2.f32 %v2515_v39 }
 0x467   : > { %v7041_v40 = vpop.eup %5962 }
 0x468   : > { %v2579_v16 = vsel %vm808_vm2, %v7041_v40, 0.0 }
 0x469   : > { %2430 = vmax.xlane.f32.xlu0 %v2429_v9  ;;  %v2513_v9 = vmul.f32 1.442695, %v2476_v42 }
 0x46b   : > { %v7043_v17 = vpop.eup %5964  ;;  %5968 = vpow2.f32 %v2513_v9 }
 0x46c   : > { %v2576_v15 = vsel %vm808_vm2, %v7043_v17, 0.0 }
 0x46d   : > { %2580 = vadd.xlane.f32.xlu0 %v2579_v16  ;;  %2577 = vadd.xlane.f32.xlu1 %v2576_v15  ;;  %v2398_v16 = vpop.xlane.xlu1 %2397 }
 0x46f   : > { %v7053_v43 = vpop.eup %5966 }
 0x470   : > { %v2585_v8 = vsel %vm808_vm2, %v7053_v43, 0.0 }
 0x471   : > { %2436 = vmax.xlane.f32.xlu0 %v2435_v4 }
 0x475   : > { %2586 = vadd.xlane.f32.xlu0 %v2585_v8 }
 0x479   : > { %2442 = vmax.xlane.f32.xlu0 %v2441_v20 }
 0x47e   : > { %3960 = vrot.lane.b32.xlu1 %v6671_v6, %s6231_s16 }
 0x482   : > { %4008 = vrot.lane.b32.xlu1 %v6678_v10, %s6231_s16  ;;  %v2478_v10 = vsub.f32 %v6903_v52, %v2398_v16 }
 0x484   : > { %v2517_v28 = vmul.f32 1.442695, %v2478_v10 }
 0x486   : > { %4056 = vrot.lane.b32.xlu1 %v6680_v11, %s6231_s16  ;;  %5970 = vpow2.f32 %v2517_v28 }
 0x48f   : > { %3912 = vrot.lane.b32.xlu0 %v6669_v5, %s6231_s16 }
 0x498   : > { %v2001_v12 = vpop.f32.mrb[44].mxu0  ;;  %v2049_v56 = vpop.f32.mrb[60].mxu1 }
 0x499   : > { %v5523_v47 = vpop.f32.mrb[45].mxu0  ;;  %v5529_v38 = vpop.f32.mrb[61].mxu1  ;;  %v7080_v10 = vmul.f32 0.35355338, %v2049_v56 }
 0x49a   : > { %v2004_v39 = vpop.f32.mrb[46].mxu0  ;;  %v2052_v27 = vpop.f32.mrb[62].mxu1  ;;  %v7072_v47 = vmul.f32 0.35355338, %v7016_v35  ;;  %v7074_v38 = vmul.f32 0.35355338, %v2001_v12 }
 0x49b   : > { %v5524_v57 = vpop.f32.mrb[47].mxu0  ;;  %v5530_v6 = vpop.f32.mrb[63].mxu1 }
 0x49c   : > { %v2444_v52 = vsel %vm808_vm2, %v7072_v47, -inf  ;;  %v7078_v27 = vpop.eup %5968 }
 0x49d   : > { %v2582_v12 = vsel %vm808_vm2, %v7078_v27, 0.0 }
 0x4a0   : > { %v2097_v11 = vpop.f32.mrb[48].mxu0 }
 0x4a1   : > { %v2145_v15 = vpop.f32.mrb[64].mxu1  ;;  %v5535_v4 = vpop.f32.mrb[49].mxu0 }
 0x4a2   : > { %v5541_v5 = vpop.f32.mrb[65].mxu1  ;;  %v2100_v8 = vpop.f32.mrb[50].mxu0  ;;  %v7082_v4 = vmul.f32 0.35355338, %v2097_v11 }
 0x4a3   : > { %v2148_v20 = vpop.f32.mrb[66].mxu1  ;;  %v5536_v18 = vpop.f32.mrb[51].mxu0  ;;  %v2447_v5 = vsel %vm808_vm2, %v7074_v38, -inf }
 0x4a4   : > { %v5542_v48 = vpop.f32.mrb[67].mxu1  ;;  %v2450_v18 = vsel %vm808_vm2, %v7080_v10, -inf }
 0x4a9   : > { %v2193_v42 = vpop.f32.mrb[52].mxu0  ;;  %v2241_v39 = vpop.f32.mrb[68].mxu1 }
 0x4aa   : > { %v5547_v57 = vpop.f32.mrb[53].mxu0  ;;  %v5553_v6 = vpop.f32.mrb[69].mxu1  ;;  %2445 = vmax.xlane.f32.xlu1 %v2444_v52  ;;  %v7090_v28 = vmul.f32 0.35355338, %v2193_v42  ;;  %v7098_v42 = vmul.f32 0.35355338, %v2145_v15 }
 0x4ab   : > { %v2196_v9 = vpop.f32.mrb[54].mxu0  ;;  %v2244_v16 = vpop.f32.mrb[70].mxu1  ;;  %v2453_v6 = vsel %vm808_vm2, %v7082_v4, -inf }
 0x4ac   : > { %v5548_v48 = vpop.f32.mrb[55].mxu0  ;;  %v5554_v35 = vpop.f32.mrb[71].mxu1  ;;  %v2456_v15 = vsel %vm808_vm2, %v7098_v42, -inf }
 0x4ad   : > { %v7096_v9 = vpop.eup %5970 }
 0x4ae   : > { %2583 = vadd.xlane.f32.xlu1 %v2582_v12  ;;  %2448 = vmax.xlane.f32.xlu0 %v2447_v5 }
 0x4b0   : > { %v2404_v8 = vpop.xlane.xlu1 %2403  ;;  %v2401_v20 = vpop.xlane.xlu0 %2400 }
 0x4b1   : > { %v2480_v56 = vsub.f32 %v6947_v24, %v2404_v8  ;;  %v2289_v52 = vpop.f32.mrb[56].mxu0  ;;  %v2337_v11 = vpop.f32.mrb[72].mxu1  ;;  %v2479_v57 = vsub.f32 %v6945_v13, %v2401_v20  ;;  %v2588_v13 = vsel %vm808_vm2, %v7096_v9, 0.0  ;;  %v2459_v20 = vsel %vm808_vm2, %v7090_v28, -inf }
 0x4b2   : > { %v5559_v16 = vpop.f32.mrb[57].mxu0  ;;  %v5565_v48 = vpop.f32.mrb[73].mxu1  ;;  %2451 = vmax.xlane.f32.xlu1 %v2450_v18  ;;  %2454 = vmax.xlane.f32.xlu0 %v2453_v6  ;;  %v7100_v33 = vmul.f32 0.35355338, %v2337_v11 }
 0x4b3   : > { %v2519_v35 = vmul.f32 1.442695, %v2479_v57  ;;  %v2292_v12 = vpop.f32.mrb[58].mxu0  ;;  %v2340_v5 = vpop.f32.mrb[74].mxu1  ;;  %v2521_v30 = vmul.f32 1.442695, %v2480_v56 }
 0x4b4   : > { %v5560_v24 = vpop.f32.mrb[59].mxu0  ;;  %v5566_v8 = vpop.f32.mrb[75].mxu1  ;;  %v7108_v56 = vmul.f32 0.35355338, %v2241_v39  ;;  %v2468_v16 = vsel %vm808_vm2, %v7100_v33, -inf }
 0x4b5   : > { %5972 = vpow2.f32 %v2519_v35  ;;  %v7114_v12 = vmul.f32 0.35355338, %v2289_v52 }
 0x4b6   : > { %2589 = vadd.xlane.f32.xlu1 %v2588_v13  ;;  %2460 = vmax.xlane.f32.xlu0 %v2459_v20  ;;  %5974 = vpow2.f32 %v2521_v30  ;;  %v2462_v30 = vsel %vm808_vm2, %v7108_v56, -inf }
 0x4b7   : > { %v2465_v8 = vsel %vm808_vm2, %v7114_v12, -inf }
 0x4b8   : > { %v2410_v18 = vpop.xlane.xlu1 %2409  ;;  %v2407_v57 = vpop.xlane.xlu0 %2406 }
 0x4b9   : > { %v2482_v11 = vsub.f32 %v6959_v19, %v2410_v18  ;;  %v2481_v6 = vsub.f32 %v6957_v22, %v2407_v57 }
 0x4ba   : > { %2457 = vmax.xlane.f32.xlu1 %v2456_v15  ;;  %2469 = vmax.xlane.f32.xlu0 %v2468_v16 }
 0x4bb   : > { %v2525_v48 = vmul.f32 1.442695, %v2482_v11  ;;  %v2523_v35 = vmul.f32 1.442695, %v2481_v6 }
 0x4bd   : > { %5976 = vpow2.f32 %v2525_v48 }
 0x4be   : > { %5978 = vpow2.f32 %v2523_v35  ;;  %2463 = vmax.xlane.f32.xlu1 %v2462_v30 }
 0x4bf   : > { %v7118_v39 = vpop.eup %5972 }
 0x4c0   : > { %v2416_v19 = vpop.xlane.xlu1 %2415  ;;  %v2413_v5 = vpop.xlane.xlu0 %2412  ;;  %v2591_v52 = vsel %vm808_vm2, %v7118_v39, 0.0 }
 0x4c1   : > { %v2484_v22 = vsub.f32 %v6971_v55, %v2416_v19  ;;  %v2483_v24 = vsub.f32 %v6969_v54, %v2413_v5  ;;  %v7126_v13 = vpop.eup %5974  ;;  %2592 = vadd.xlane.f32.xlu0 %v2591_v52 }
 0x4c2   : > { %2466 = vmax.xlane.f32.xlu1 %v2465_v8  ;;  %v2594_v57 = vsel %vm808_vm2, %v7126_v13, 0.0 }
 0x4c3   : > { %v2529_v20 = vmul.f32 1.442695, %v2484_v22  ;;  %v2527_v18 = vmul.f32 1.442695, %v2483_v24 }
 0x4c5   : > { %5980 = vpow2.f32 %v2529_v20 }
 0x4c6   : > { %5982 = vpow2.f32 %v2527_v18  ;;  %2595 = vadd.xlane.f32.xlu1 %v2594_v57 }
 0x4c7   : > { %v7130_v55 = vpop.eup %5976 }
 0x4c8   : > { %v7132_v54 = vpop.eup %5978  ;;  %v2422_v15 = vpop.xlane.xlu1 %2421  ;;  %v2600_v6 = vsel %vm808_vm2, %v7130_v55, 0.0 }
 0x4c9   : > { %v2419_v11 = vpop.xlane.xlu0 %2418  ;;  %v2486_v16 = vsub.f32 %v6983_v45, %v2422_v15  ;;  %2601 = vadd.xlane.f32.xlu0 %v2600_v6  ;;  %v2597_v35 = vsel %vm808_vm2, %v7132_v54, 0.0 }
 0x4ca   : > { %v2485_v48 = vsub.f32 %v6981_v21, %v2419_v11  ;;  %2598 = vadd.xlane.f32.xlu1 %v2597_v35 }
 0x4cb   : > { %v2533_v30 = vmul.f32 1.442695, %v2486_v16 }
 0x4cc   : > { %v2531_v19 = vmul.f32 1.442695, %v2485_v48 }
 0x4cd   : > { %5984 = vpow2.f32 %v2533_v30 }
 0x4ce   : > { %5986 = vpow2.f32 %v2531_v19 }
 0x4cf   : > { %v7140_v5 = vpop.eup %5980 }
 0x4d0   : > { %v7142_v22 = vpop.eup %5982  ;;  %v2428_v24 = vpop.xlane.xlu1 %2427  ;;  %v2606_v45 = vsel %vm808_vm2, %v7140_v5, 0.0 }
 0x4d1   : > { %v2425_v8 = vpop.xlane.xlu0 %2424  ;;  %v2488_v21 = vsub.f32 %v6995_v36, %v2428_v24  ;;  %2607 = vadd.xlane.f32.xlu0 %v2606_v45  ;;  %v2603_v20 = vsel %vm808_vm2, %v7142_v22, 0.0 }
 0x4d2   : > { %v2487_v52 = vsub.f32 %v6993_v53, %v2425_v8  ;;  %2604 = vadd.xlane.f32.xlu1 %v2603_v20 }
 0x4d3   : > { %v2537_v18 = vmul.f32 1.442695, %v2488_v21 }
 0x4d4   : > { %v2535_v57 = vmul.f32 1.442695, %v2487_v52 }
 0x4d5   : > { %5988 = vpow2.f32 %v2537_v18 }
 0x4d6   : > { %5990 = vpow2.f32 %v2535_v57 }
 0x4d7   : > { %v7150_v15 = vpop.eup %5984 }
 0x4d8   : > { %v7152_v11 = vpop.eup %5986  ;;  %v2434_v6 = vpop.xlane.xlu1 %2433  ;;  %v2612_v16 = vsel %vm808_vm2, %v7150_v15, 0.0 }
 0x4d9   : > { %v2490_v36 = vsub.f32 %v7005_v23, %v2434_v6  ;;  %2613 = vadd.xlane.f32.xlu0 %v2612_v16  ;;  %v2609_v53 = vsel %vm808_vm2, %v7152_v11, 0.0 }
 0x4da   : > { %2610 = vadd.xlane.f32.xlu1 %v2609_v53 }
 0x4db   : > { %v2541_v48 = vmul.f32 1.442695, %v2490_v36 }
 0x4dd   : > { %5992 = vpow2.f32 %v2541_v48 }
 0x4df   : > { %v7159_v35 = vpop.eup %5988 }
 0x4e0   : > { %v7161_v30 = vpop.eup %5990  ;;  %v2618_v19 = vsel %vm808_vm2, %v7159_v35, 0.0 }
 0x4e1   : > { %2619 = vadd.xlane.f32.xlu0 %v2618_v19  ;;  %v2615_v24 = vsel %vm808_vm2, %v7161_v30, 0.0 }
 0x4e2   : > { %2616 = vadd.xlane.f32.xlu1 %v2615_v24 }
 0x4e7   : > { %v7167_v23 = vpop.eup %5992 }
 0x4e8   : > { %v2624_v8 = vsel %vm808_vm2, %v7167_v23, 0.0 }
 0x4e9   : > { %2625 = vadd.xlane.f32.xlu0 %v2624_v8 }
 0x4ed   : > { %v2572_v45 = vpop.xlane.xlu1 %2571 }
 0x4ee   : > { %5994 = vrcp.f32 %v2572_v45  ;;  %v2575_v21 = vpop.xlane.xlu0 %2574 }
 0x4f1   : > { %v2440_v52 = vpop.xlane.xlu1 %2439 }
 0x4f2   : > { %v2492_v20 = vsub.f32 %v7024_v60, %v2440_v52  ;;  %v2569_v18 = vpop.xlane.xlu0 %2568  ;;  %v2910_v60 = vsel %vm2764_vm3, %v6925_v59, 0 }
 0x4f3   : > { %5996 = vrcp.f32 %v2569_v18 }
 0x4f4   : > { %v2545_v57 = vmul.f32 1.442695, %v2492_v20 }
 0x4f6   : > { %5998 = vpow2.f32 %v2545_v57  ;;  %v2431_v6 = vpop.xlane.xlu0 %2430 }
 0x4f7   : > { %6000 = vrcp.f32 %v2575_v21  ;;  %v2489_v16 = vsub.f32 %v7035_v58, %v2431_v6  ;;  %v7816_v58 = vmov 0.0  }
 0x4f8   : > { %v5995_v36 = vpop.eup %5994 }
 0x4f9   : > { %v2696_v53 = vmul.f32 %v5995_v36, %v7020_v32  ;;  %v2539_v48 = vmul.f32 1.442695, %v2489_v16 }
 0x4fa   : > { %v2578_v19 = vpop.xlane.xlu1 %2577  ;;  %v2581_v24 = vpop.xlane.xlu0 %2580 }
 0x4fb   : > { %6002 = vpow2.f32 %v2539_v48  ;;  %v2728_v8 = vpack.c.bf16 %v2696_v53, %v2696_v53 }
 0x4fc   : > { %6004 = vrcp.f32 %v2578_v19 }
 0x4fd   : > { %v5997_v45 = vpop.eup %5996  ;;  %5576 = vmatmul.mubr.msk.bf16.vlgmr.msra.gmra.mrb[76].mxu1 %vm808_vm2, %v2728_v8  ;;  %6006 = vrcp.f32 %v2581_v24 }
 0x4fe   : > { %v2695_v52 = vmul.f32 %v5997_v45, %v7031_v31  ;;  %5586 = vmatpush3.bf16.msra.mxu1 %v2910_v60  ;;  %v2437_v21 = vpop.xlane.xlu0 %2436  ;;  %5587 = vmatprep.mubr.msk.bf16.mxu1 %vm6227_vm1, %v7816_v58  ;;  %v2862_v31 = vsel %vm2764_vm3, %v6927_v61, 0 }
 0x4ff   : > { %v2491_v32 = vsub.f32 %v7045_v25, %v2437_v21  ;;  %5597 = vmatprep.subr.bf16.mxu1 %v7816_v58  ;;  %v3006_v21 = vsel %vm2764_vm3, %v6929_v62, 0 }
 0x500   : > { %v7182_v20 = vpop.eup %5998  ;;  %v2727_v18 = vpack.c.bf16 %v2695_v52, %v2695_v52 }
 0x501   : > { %v6001_v57 = vpop.eup %6000  ;;  %v2543_v6 = vmul.f32 1.442695, %v2491_v32  ;;  %v2630_v59 = vsel %vm808_vm2, %v7182_v20, 0.0 }
 0x502   : > { %5570 = vmatmul.mubr.msk.bf16.vlgmr.msra.gmra.mrb[60].mxu0 %vm808_vm2, %v2727_v18  ;;  %v2587_v16 = vpop.xlane.xlu0 %2586  ;;  %2631 = vadd.xlane.f32.xlu0 %v2630_v59  ;;  %v2697_v25 = vmul.f32 %v6001_v57, %v7022_v41  ;;  %v2958_v41 = vsel %vm2764_vm3, %v6931_v49, 0 }
 0x503   : > { %6008 = vpow2.f32 %v2543_v6  ;;  %5580 = vmatpush3.bf16.msra.mxu0 %v2862_v31  ;;  %5581 = vmatprep.mubr.msk.bf16.mxu0 %vm6227_vm1, %v7816_v58 }
 0x504   : > { %5591 = vmatprep.subr.bf16.mxu0 %v7816_v58  ;;  %6010 = vrcp.f32 %v2587_v16  ;;  %v2729_v8 = vpack.c.bf16 %v2697_v25, %v2697_v25 }
 0x505   : > { %v7193_v36 = vpop.eup %6002 }
 0x506   : > { %v6005_v53 = vpop.eup %6004  ;;  %v2443_v48 = vpop.xlane.xlu0 %2442  ;;  %v2621_v61 = vsel %vm808_vm2, %v7193_v36, 0.0 }
 0x507   : > { %v2698_v19 = vmul.f32 %v6005_v53, %v7043_v17  ;;  %v2493_v24 = vsub.f32 %v7055_v26, %v2443_v48  ;;  %2622 = vadd.xlane.f32.xlu1 %v2621_v61  ;;  %v6007_v45 = vpop.eup %6006 }
 0x508   : > { %v2699_v17 = vmul.f32 %v6007_v45, %v7041_v40  ;;  %v3054_v40 = vsel %vm2764_vm3, %v6935_v0, 0  ;;  %v3150_v0 = vsel %vm2764_vm3, %v6939_v2, 0 }
 0x509   : > { %v2547_v60 = vmul.f32 1.442695, %v2493_v24  ;;  %v2730_v52 = vpack.c.bf16 %v2698_v19, %v2698_v19 }
 0x50a   : > { %5582 = vmatmul.mubr.msk.bf16.vlgmr.msra.gmra.mrb[64].mxu0 %vm808_vm2, %v2729_v8  ;;  %v2731_v49 = vpack.c.bf16 %v2699_v17, %v2699_v17  ;;  %v7239_v25 = vpop.permute.xlu0 %3912 }
 0x50b   : > { %6012 = vpow2.f32 %v2547_v60  ;;  %5588 = vmatmul.mubr.msk.bf16.vlgmr.msra.gmra.mrb[80].mxu1 %vm808_vm2, %v2730_v52  ;;  %5592 = vmatpush3.bf16.msra.mxu0 %v2958_v41 }
 0x50c   : > { %5598 = vmatpush3.bf16.msra.mxu1 %v3006_v21  ;;  %5593 = vmatprep.mubr.msk.bf16.mxu0 %vm6227_vm1, %v7816_v58 }
 0x50d   : > { %v7208_v26 = vpop.eup %6008  ;;  %5603 = vmatprep.subr.bf16.mxu0 %v7816_v58  ;;  %5599 = vmatprep.mubr.msk.bf16.mxu1 %vm6227_vm1, %v7816_v58 }
 0x50e   : > { %v2627_v62 = vsel %vm808_vm2, %v7208_v26, 0.0  ;;  %5609 = vmatprep.subr.bf16.mxu1 %v7816_v58  ;;  %v6011_v32 = vpop.eup %6010 }
 0x50f   : > { %2628 = vadd.xlane.f32.xlu1 %v2627_v62  ;;  %v2701_v18 = vmul.f32 %v6011_v32, %v7053_v43  ;;  %v7233_v43 = vpop.permute.xlu1 %3960 }
 0x511   : > { %v2733_v59 = vpack.c.bf16 %v2701_v18, %v2701_v18 }
 0x512   : > { %5594 = vmatmul.mubr.msk.bf16.vlgmr.msra.gmra.mrb[68].mxu0 %vm808_vm2, %v2731_v49 }
 0x513   : > { %5604 = vmatpush3.bf16.msra.mxu0 %v3054_v40  ;;  %5605 = vmatprep.mubr.msk.bf16.mxu0 %vm6227_vm1, %v7816_v58  ;;  %v7235_v31 = vpop.permute.xlu1 %4008 }
 0x514   : > { %5615 = vmatprep.subr.bf16.mxu0 %v7816_v58 }
 0x515   : > { %v7223_v57 = vpop.eup %6012 }
 0x516   : > { %v2633_v6 = vsel %vm808_vm2, %v7223_v57, 0.0 }
 0x517   : > { %2634 = vadd.xlane.f32.xlu1 %v2633_v6  ;;  %v7237_v16 = vpop.permute.xlu1 %4056 }
 0x51a   : > { %5606 = vmatmul.mubr.msk.bf16.vlgmr.msra.gmra.mrb[72].mxu0 %vm808_vm2, %v2733_v59 }
 0x51b   : > { %5616 = vmatpush3.bf16.msra.mxu0 %v3150_v0  ;;  %5617 = vmatprep.mubr.msk.bf16.mxu0 %vm6227_vm1, %v7816_v58 }
 0x51c   : > { %5627 = vmatprep.subr.bf16.mxu0 %v7816_v58 }
 0x537   : > { %v2446_v53 = vpop.xlane.xlu1 %2445 }
 0x538   : > { %v2494_v48 = vsub.f32 %v7072_v47, %v2446_v53 }
 0x53a   : > { %v2549_v2 = vmul.f32 1.442695, %v2494_v48 }
 0x53b   : > { %v2584_v61 = vpop.xlane.xlu1 %2583  ;;  %v2449_v19 = vpop.xlane.xlu0 %2448 }
 0x53c   : > { %6014 = vpow2.f32 %v2549_v2  ;;  %v2495_v24 = vsub.f32 %v7074_v38, %v2449_v19  ;;  %v3102_v2 = vsel %vm2764_vm3, %v6933_v63, 0 }
 0x53d   : > { %6016 = vrcp.f32 %v2584_v61 }
 0x53e   : > { %v2551_v8 = vmul.f32 1.442695, %v2495_v24 }
 0x53f   : > { %v2452_v45 = vpop.xlane.xlu1 %2451  ;;  %v2455_v60 = vpop.xlane.xlu0 %2454 }
 0x540   : > { %6018 = vpow2.f32 %v2551_v8  ;;  %v2496_v52 = vsub.f32 %v7080_v10, %v2452_v45  ;;  %v2497_v41 = vsub.f32 %v7082_v4, %v2455_v60 }
 0x542   : > { %v2553_v21 = vmul.f32 1.442695, %v2496_v52  ;;  %v2555_v17 = vmul.f32 1.442695, %v2497_v41  ;;  %v3198_v41 = vsel %vm2764_vm3, %v6937_v1, 0 }
 0x543   : > { %v2590_v62 = vpop.xlane.xlu1 %2589  ;;  %v7245_v47 = vpop.xlane.xlu0 %2460 }
 0x544   : > { %6020 = vpow2.f32 %v2553_v21 }
 0x545   : > { %6022 = vpow2.f32 %v2555_v17 }
 0x546   : > { %v7247_v49 = vpop.eup %6014  ;;  %6024 = vrcp.f32 %v2590_v62 }
 0x547   : > { %v6017_v38 = vpop.eup %6016  ;;  %v2458_v32 = vpop.xlane.xlu1 %2457  ;;  %v2636_v40 = vsel %vm808_vm2, %v7247_v49, 0.0 }
 0x548   : > { %v2700_v18 = vmul.f32 %v6017_v38, %v7078_v27  ;;  %v2498_v10 = vsub.f32 %v7098_v42, %v2458_v32  ;;  %2637 = vadd.xlane.f32.xlu0 %v2636_v40  ;;  %v7255_v0 = vpop.xlane.xlu0 %2469 }
 0x54a   : > { %v7253_v4 = vpop.eup %6018  ;;  %v2557_v6 = vmul.f32 1.442695, %v2498_v10  ;;  %v2732_v59 = vpack.c.bf16 %v2700_v18, %v2700_v18 }
 0x54b   : > { %v7257_v53 = vpop.xlane.xlu1 %2463  ;;  %v2639_v48 = vsel %vm808_vm2, %v7253_v4, 0.0 }
 0x54c   : > { %6026 = vpow2.f32 %v2557_v6  ;;  %5600 = vmatmul.mubr.msk.bf16.vlgmr.msra.gmra.mrb[84].mxu1 %vm808_vm2, %v2732_v59  ;;  %2640 = vadd.xlane.f32.xlu1 %v2639_v48  ;;  %v3246_v6 = vsel %vm2764_vm3, %v6943_v7, 0 }
 0x54d   : > { %5610 = vmatpush3.bf16.msra.mxu1 %v3102_v2  ;;  %5611 = vmatprep.mubr.msk.bf16.mxu1 %vm6227_vm1, %v7816_v58 }
 0x54e   : > { %v7266_v27 = vpop.eup %6020  ;;  %5621 = vmatprep.subr.bf16.mxu1 %v7816_v58  ;;  %v2593_v19 = vpop.xlane.xlu0 %2592 }
 0x54f   : > { %v7269_v42 = vpop.eup %6022  ;;  %v7271_v61 = vpop.xlane.xlu1 %2466  ;;  %v2642_v63 = vsel %vm808_vm2, %v7266_v27, 0.0  ;;  %6028 = vrcp.f32 %v2593_v19 }
 0x550   : > { %v6025_v24 = vpop.eup %6024  ;;  %2643 = vadd.xlane.f32.xlu0 %v2642_v63  ;;  %v2645_v8 = vsel %vm808_vm2, %v7269_v42, 0.0 }
 0x551   : > { %v2702_v45 = vmul.f32 %v6025_v24, %v7096_v9  ;;  %2646 = vadd.xlane.f32.xlu1 %v2645_v8  ;;  %v3342_v8 = vsel %vm2764_vm3, %v7003_v46, 0 }
 0x553   : > { %v2734_v60 = vpack.c.bf16 %v2702_v45, %v2702_v45  ;;  %v2596_v52 = vpop.xlane.xlu1 %2595 }
 0x554   : > { %6030 = vrcp.f32 %v2596_v52 }
 0x555   : > { %5612 = vmatmul.mubr.msk.bf16.vlgmr.msra.gmra.mrb[88].mxu1 %vm808_vm2, %v2734_v60  ;;  %v3390_v60 = vsel %vm2764_vm3, %v7001_v44, 0  ;;  %v2499_v44 = vsub.f32 %v7090_v28, %v7245_v47  ;;  %v2501_v28 = vsub.f32 %v7114_v12, %v7271_v61 }
 0x556   : > { %v7281_v21 = vpop.eup %6026  ;;  %5622 = vmatpush3.bf16.msra.mxu1 %v3198_v41  ;;  %v2602_v17 = vpop.xlane.xlu0 %2601  ;;  %5623 = vmatprep.mubr.msk.bf16.mxu1 %vm6227_vm1, %v7816_v58 }
 0x557   : > { %v2599_v62 = vpop.xlane.xlu1 %2598  ;;  %v2648_v9 = vsel %vm808_vm2, %v7281_v21, 0.0  ;;  %5633 = vmatprep.subr.bf16.mxu1 %v7816_v58  ;;  %v2563_v12 = vmul.f32 1.442695, %v2501_v28 }
 0x558   : > { %6032 = vrcp.f32 %v2599_v62  ;;  %2649 = vadd.xlane.f32.xlu0 %v2648_v9 }
 0x559   : > { %6034 = vrcp.f32 %v2602_v17  ;;  %v6029_v1 = vpop.eup %6028 }
 0x55a   : > { %v2703_v38 = vmul.f32 %v6029_v1, %v7118_v39  ;;  %v2559_v1 = vmul.f32 1.442695, %v2499_v44  ;;  %v7821_v44 = vld [vmem:[#allocation16_spill] sm:$0xff] }
 0x55c   : > { %v2735_v32 = vpack.c.bf16 %v2703_v38, %v2703_v38 }
 0x55e   : > { %v2608_v40 = vpop.xlane.xlu0 %2607  ;;  %v6031_v18 = vpop.eup %6030  ;;  %5618 = vmatmul.mubr.msk.bf16.vlgmr.msra.gmra.mrb[76].mxu0 %vm808_vm2, %v2735_v32 }
 0x55f   : > { %v2605_v10 = vpop.xlane.xlu1 %2604  ;;  %v2704_v59 = vmul.f32 %v6031_v18, %v7126_v13  ;;  %5628 = vmatpush3.bf16.msra.mxu0 %v3246_v6  ;;  %5629 = vmatprep.mubr.msk.bf16.mxu0 %vm6227_vm1, %v7816_v58  ;;  %v3294_v13 = vsel %vm2764_vm3, %v6941_v3, 0  ;;  %v3582_v18 = vsel %vm2764_vm3, %v6965_v50, 0 }
 0x560   : > { %6036 = vrcp.f32 %v2605_v10  ;;  %5639 = vmatprep.subr.bf16.mxu0 %v7816_v58 }
 0x561   : > { %6038 = vrcp.f32 %v2608_v40  ;;  %v2736_v39 = vpack.c.bf16 %v2704_v59, %v2704_v59 }
 0x562   : > { %v6033_v48 = vpop.eup %6032  ;;  %4152 = vrot.lane.b32.xlu1 %v6701_v37, %s6231_s16 }
 0x563   : > { %v6035_v2 = vpop.eup %6034  ;;  %v2705_v7 = vmul.f32 %v6033_v48, %v7132_v54  ;;  %5624 = vmatmul.mubr.msk.bf16.vlgmr.msra.gmra.mrb[92].mxu1 %vm808_vm2, %v2736_v39 }
 0x564   : > { %5634 = vmatpush3.bf16.msra.mxu1 %v3294_v13  ;;  %5635 = vmatprep.mubr.msk.bf16.mxu1 %vm6227_vm1, %v7816_v58  ;;  %v2706_v63 = vmul.f32 %v6035_v2, %v7130_v55 }
 0x565   : > { %v2737_v19 = vpack.c.bf16 %v2705_v7, %v2705_v7  ;;  %5645 = vmatprep.subr.bf16.mxu1 %v7816_v58 }
 0x566   : > { %v2614_v24 = vpop.xlane.xlu0 %2613  ;;  %v2738_v54 = vpack.c.bf16 %v2706_v63, %v2706_v63 }
 0x567   : > { %v2611_v37 = vpop.xlane.xlu1 %2610  ;;  %5630 = vmatmul.mubr.msk.bf16.vlgmr.msra.gmra.mrb[80].mxu0 %vm808_vm2, %v2737_v19 }
 0x568   : > { %6040 = vrcp.f32 %v2611_v37  ;;  %5640 = vmatpush3.bf16.msra.mxu0 %v3342_v8  ;;  %5641 = vmatprep.mubr.msk.bf16.mxu0 %vm6227_vm1, %v7816_v58  ;;  %v7819_v37 = vld [vmem:[#allocation18_spill] sm:$0xff] }
 0x569   : > { %6042 = vrcp.f32 %v2614_v24  ;;  %5651 = vmatprep.subr.bf16.mxu0 %v7816_v58  ;;  %v3774_v8 = vsel %vm2764_vm3, %v7819_v37, 0 }
 0x56a   : > { %v6037_v3 = vpop.eup %6036 }
 0x56b   : > { %v6039_v55 = vpop.eup %6038  ;;  %v2707_v45 = vmul.f32 %v6037_v3, %v7142_v22  ;;  %5636 = vmatmul.mubr.msk.bf16.vlgmr.msra.gmra.mrb[96].mxu1 %vm808_vm2, %v2738_v54  ;;  %v3438_v22 = vsel %vm2764_vm3, %v6955_v14, 0  ;;  %v3486_v14 = vsel %vm2764_vm3, %v6953_v51, 0  ;;  %v3534_v51 = vsel %vm2764_vm3, %v6967_v29, 0 }
 0x56c   : > { %5646 = vmatpush3.bf16.msra.mxu1 %v3390_v60  ;;  %5647 = vmatprep.mubr.msk.bf16.mxu1 %vm6227_vm1, %v7816_v58  ;;  %v2708_v52 = vmul.f32 %v6039_v55, %v7140_v5 }
 0x56d   : > { %v2739_v46 = vpack.c.bf16 %v2707_v45, %v2707_v45  ;;  %5657 = vmatprep.subr.bf16.mxu1 %v7816_v58 }
 0x56e   : > { %4104 = vrot.lane.b32.xlu0 %v6699_v34, %s6231_s16  ;;  %v2620_v41 = vpop.xlane.xlu0 %2619  ;;  %v2740_v34 = vpack.c.bf16 %v2708_v52, %v2708_v52  ;;  %v7820_v52 = vld [vmem:[#allocation13_spill] sm:$0xff] }
 0x56f   : > { %v2617_v17 = vpop.xlane.xlu1 %2616  ;;  %5642 = vmatmul.mubr.msk.bf16.vlgmr.msra.gmra.mrb[84].mxu0 %vm808_vm2, %v2739_v46 }
 0x570   : > { %6044 = vrcp.f32 %v2617_v17  ;;  %5652 = vmatpush3.bf16.msra.mxu0 %v3438_v22  ;;  %5653 = vmatprep.mubr.msk.bf16.mxu0 %vm6227_vm1, %v7816_v58 }
 0x571   : > { %6046 = vrcp.f32 %v2620_v41  ;;  %5663 = vmatprep.subr.bf16.mxu0 %v7816_v58 }
 0x572   : > { %v6041_v5 = vpop.eup %6040  ;;  %6048 = vpow2.f32 %v2559_v1  ;;  %v7823_v1 = vld [vmem:[#allocation12_spill] sm:$0xff] }
 0x573   : > { %v6043_v62 = vpop.eup %6042  ;;  %v2709_v9 = vmul.f32 %v6041_v5, %v7152_v11  ;;  %5648 = vmatmul.mubr.msk.bf16.vlgmr.msra.gmra.mrb[100].mxu1 %vm808_vm2, %v2740_v34  ;;  %v2500_v11 = vsub.f32 %v7108_v56, %v7257_v53  ;;  %v2502_v56 = vsub.f32 %v7100_v33, %v7255_v0  ;;  %v7817_v33 = vld [vmem:[#allocation15_spill] sm:$0xff]  ;;  %v3870_v5 = vsel %vm2764_vm3, %v7821_v44, 0 }
 0x574   : > { %5658 = vmatpush3.bf16.msra.mxu1 %v3486_v14  ;;  %5659 = vmatprep.mubr.msk.bf16.mxu1 %vm6227_vm1, %v7816_v58  ;;  %v2710_v38 = vmul.f32 %v6043_v62, %v7150_v15  ;;  %v7822_v62 = vld [vmem:[#allocation19_spill] sm:$0xff] }
 0x575   : > { %v2741_v47 = vpack.c.bf16 %v2709_v9, %v2709_v9  ;;  %5669 = vmatprep.subr.bf16.mxu1 %v7816_v58  ;;  %v2561_v53 = vmul.f32 1.442695, %v2500_v11  ;;  %v2565_v59 = vmul.f32 1.442695, %v2502_v56  ;;  %v3726_v9 = vsel %vm2764_vm3, %v7822_v62, 0 }
 0x576   : > { %v2626_v32 = vpop.xlane.xlu0 %2625  ;;  %v2742_v15 = vpack.c.bf16 %v2710_v38, %v2710_v38  ;;  %v7824_v38 = vld [vmem:[#allocation17_spill] sm:$0xff] }
 0x577   : > { %5654 = vmatmul.mubr.msk.bf16.vlgmr.msra.gmra.mrb[88].mxu0 %vm808_vm2, %v2741_v47  ;;  %6050 = vrcp.f32 %v2626_v32  ;;  %v3822_v32 = vsel %vm2764_vm3, %v7824_v38, 0 }
 0x578   : > { %5664 = vmatpush3.bf16.msra.mxu0 %v3534_v51  ;;  %5665 = vmatprep.mubr.msk.bf16.mxu0 %vm6227_vm1, %v7816_v58  ;;  %6052 = vpow2.f32 %v2563_v12 }
 0x579   : > { %5675 = vmatprep.subr.bf16.mxu0 %v7816_v58  ;;  %6054 = vpow2.f32 %v2561_v53 }
 0x57a   : > { %v6045_v61 = vpop.eup %6044  ;;  %6056 = vpow2.f32 %v2565_v59 }
 0x57b   : > { %v6047_v40 = vpop.eup %6046  ;;  %v2711_v29 = vmul.f32 %v6045_v61, %v7161_v30  ;;  %5660 = vmatmul.mubr.msk.bf16.vlgmr.msra.gmra.mrb[104].mxu1 %vm808_vm2, %v2742_v15  ;;  %v3630_v30 = vsel %vm2764_vm3, %v7817_v33, 0  ;;  %v3918_v61 = vsel %vm2764_vm3, %v7239_v25, 0 }
 0x57c   : > { %5670 = vmatpush3.bf16.msra.mxu1 %v3582_v18  ;;  %5671 = vmatprep.mubr.msk.bf16.mxu1 %vm6227_vm1, %v7816_v58  ;;  %v2712_v6 = vmul.f32 %v6047_v40, %v7159_v35  ;;  %v7363_v50 = vpop.eup %6048  ;;  %v7818_v35 = vld [vmem:[#allocation14_spill] sm:$0xff] }
 0x57d   : > { %v2743_v10 = vpack.c.bf16 %v2711_v29, %v2711_v29  ;;  %5681 = vmatprep.subr.bf16.mxu1 %v7816_v58  ;;  %v3678_v39 = vsel %vm2764_vm3, %v7818_v35, 0  ;;  %v2651_v2 = vsel %vm808_vm2, %v7363_v50, 0.0 }
 0x57e   : > { %v2744_v0 = vpack.c.bf16 %v2712_v6, %v2712_v6 }
 0x57f   : > { %5666 = vmatmul.mubr.msk.bf16.vlgmr.msra.gmra.mrb[92].mxu0 %vm808_vm2, %v2743_v10 }
 0x580   : > { %5676 = vmatpush3.bf16.msra.mxu0 %v3630_v30  ;;  %5677 = vmatprep.mubr.msk.bf16.mxu0 %vm6227_vm1, %v7816_v58 }
 0x581   : > { %5687 = vmatprep.subr.bf16.mxu0 %v7816_v58  ;;  %v6051_v48 = vpop.eup %6050 }
 0x582   : > { %v7373_v7 = vpop.eup %6052  ;;  %v2714_v13 = vmul.f32 %v6051_v48, %v7167_v23 }
 0x583   : > { %5672 = vmatmul.mubr.msk.bf16.vlgmr.msra.gmra.mrb[108].mxu1 %vm808_vm2, %v2744_v0  ;;  %v7377_v19 = vpop.eup %6054  ;;  %v2657_v63 = vsel %vm808_vm2, %v7373_v7, 0.0 }
 0x584   : > { %5682 = vmatpush3.bf16.msra.mxu1 %v3678_v39  ;;  %5683 = vmatprep.mubr.msk.bf16.mxu1 %vm6227_vm1, %v7816_v58  ;;  %v2746_v24 = vpack.c.bf16 %v2714_v13, %v2714_v13  ;;  %v2654_v3 = vsel %vm808_vm2, %v7377_v19, 0.0  ;;  %v7386_v54 = vpop.eup %6056 }
 0x585   : > { %5693 = vmatprep.subr.bf16.mxu1 %v7816_v58  ;;  %v2660_v55 = vsel %vm808_vm2, %v7386_v54, 0.0 }
 0x586   : > { %2652 = vadd.xlane.f32.xlu1 %v2651_v2 }
 0x58a   : > { %2658 = vadd.xlane.f32.xlu1 %v2657_v63 }
 0x58b   : > { %5684 = vmatmul.mubr.msk.bf16.vlgmr.msra.gmra.mrb[112].mxu1 %vm808_vm2, %v2746_v24 }
 0x58c   : > { %5694 = vmatpush3.bf16.msra.mxu1 %v3774_v8  ;;  %5695 = vmatprep.mubr.msk.bf16.mxu1 %vm6227_vm1, %v7816_v58 }
 0x58d   : > { %2655 = vadd.xlane.f32.xlu0 %v2654_v3  ;;  %5705 = vmatprep.subr.bf16.mxu1 %v7816_v58  ;;  %v3966_v3 = vsel %vm2764_vm3, %v7233_v43, 0 }
 0x58f   : > { %v2632_v23 = vpop.xlane.xlu0 %2631 }
 0x590   : > { %6058 = vrcp.f32 %v2632_v23 }
 0x591   : > { %2661 = vadd.xlane.f32.xlu0 %v2660_v55 }
 0x594   : > { %v2623_v45 = vpop.xlane.xlu1 %2622 }
 0x595   : > { %6060 = vrcp.f32 %v2623_v45 }
 0x59a   : > { %v6059_v60 = vpop.eup %6058 }
 0x59b   : > { %v2716_v46 = vmul.f32 %v6059_v60, %v7182_v20  ;;  %4248 = vrot.lane.b32.xlu1 %v7820_v52, %s6231_s16 }
 0x59c   : > { %v2629_v41 = vpop.xlane.xlu1 %2628 }
 0x59d   : > { %6062 = vrcp.f32 %v2629_v41  ;;  %v2748_v17 = vpack.c.bf16 %v2716_v46, %v2716_v46 }
 0x59f   : > { %v6061_v22 = vpop.eup %6060  ;;  %5696 = vmatmul.mubr.msk.bf16.vlgmr.msra.gmra.mrb[116].mxu1 %vm808_vm2, %v2748_v17 }
 0x5a0   : > { %v2713_v34 = vmul.f32 %v6061_v22, %v7193_v36  ;;  %5706 = vmatpush3.bf16.msra.mxu1 %v3870_v5  ;;  %5707 = vmatprep.mubr.msk.bf16.mxu1 %vm6227_vm1, %v7816_v58  ;;  %v4062_v5 = vsel %vm2764_vm3, %v7237_v16, 0 }
 0x5a1   : > { %5717 = vmatprep.subr.bf16.mxu1 %v7816_v58 }
 0x5a2   : > { %v2745_v20 = vpack.c.bf16 %v2713_v34, %v2713_v34 }
 0x5a4   : > { %v2635_v14 = vpop.xlane.xlu1 %2634  ;;  %5678 = vmatmul.mubr.msk.bf16.vlgmr.msra.gmra.mrb[96].mxu0 %vm808_vm2, %v2745_v20 }
 0x5a5   : > { %6064 = vrcp.f32 %v2635_v14  ;;  %5688 = vmatpush3.bf16.msra.mxu0 %v3726_v9  ;;  %5689 = vmatprep.mubr.msk.bf16.mxu0 %vm6227_vm1, %v7816_v58 }
 0x5a6   : > { %5699 = vmatprep.subr.bf16.mxu0 %v7816_v58 }
 0x5a7   : > { %v6063_v36 = vpop.eup %6062  ;;  %4200 = vrot.lane.b32.xlu0 %v7823_v1, %s6231_s16  ;;  %s6158_s16 = sshll.u32 %s6235_s19, 4  ;;  %s6159_s16 = int_to_ptr.vmem [resolvable:$false] %s6158_s16 }
 0x5a8   : > { %v2715_v28 = vmul.f32 %v6063_v36, %v7208_v26 }
 0x5aa   : > { %v2747_v47 = vpack.c.bf16 %v2715_v28, %v2715_v28 }
 0x5ac   : > { %5690 = vmatmul.mubr.msk.bf16.vlgmr.msra.gmra.mrb[100].mxu0 %vm808_vm2, %v2747_v47 }
 0x5ad   : > { %5700 = vmatpush3.bf16.msra.mxu0 %v3822_v32  ;;  %5701 = vmatprep.mubr.msk.bf16.mxu0 %vm6227_vm1, %v7816_v58 }
 0x5ae   : > { %5711 = vmatprep.subr.bf16.mxu0 %v7816_v58 }
 0x5af   : > { %v6065_v11 = vpop.eup %6064 }
 0x5b0   : > { %v2717_v51 = vmul.f32 %v6065_v11, %v7223_v57 }
 0x5b2   : > { %v2749_v12 = vpack.c.bf16 %v2717_v51, %v2717_v51 }
 0x5b4   : > { %5702 = vmatmul.mubr.msk.bf16.vlgmr.msra.gmra.mrb[104].mxu0 %vm808_vm2, %v2749_v12 }
 0x5b5   : > { %5712 = vmatpush3.bf16.msra.mxu0 %v3918_v61  ;;  %5713 = vmatprep.mubr.msk.bf16.mxu0 %vm6227_vm1, %v7816_v58 }
 0x5b6   : > { %5723 = vmatprep.subr.bf16.mxu0 %v7816_v58 }
 0x5d0   : > { %v7425_v26 = vpop.f32.mrb[76].mxu1 }
 0x5d1   : > { %v5577_v15 = vpop.f32.mrb[77].mxu1 }
 0x5d2   : > { %v2853_v40 = vpop.f32.mrb[78].mxu1 }
 0x5d3   : > { %v5578_v56 = vpop.f32.mrb[79].mxu1 }
 0x5d5   : > { %v7427_v53 = vpop.f32.mrb[60].mxu0  ;;  %v2638_v57 = vpop.xlane.xlu0 %2637 }
 0x5d6   : > { %6066 = vrcp.f32 %v2638_v57  ;;  %v5571_v29 = vpop.f32.mrb[61].mxu0 }
 0x5d7   : > { %v2805_v18 = vpop.f32.mrb[62].mxu0 }
 0x5d8   : > { %v5572_v25 = vpop.f32.mrb[63].mxu0 }
 0x5d9   : > { %v2641_v10 = vpop.xlane.xlu1 %2640 }
 0x5da   : > { %6068 = vrcp.f32 %v2641_v10 }
 0x5dd   : > { %v7429_v6 = vpop.f32.mrb[64].mxu0  ;;  %v2644_v59 = vpop.xlane.xlu0 %2643 }
 0x5de   : > { %v7431_v33 = vpop.f32.mrb[80].mxu1  ;;  %v2647_v30 = vpop.xlane.xlu1 %2646  ;;  %6070 = vrcp.f32 %v2644_v59 }
 0x5df   : > { %6072 = vrcp.f32 %v2647_v30  ;;  %v5583_v0 = vpop.f32.mrb[65].mxu0  ;;  %v5589_v48 = vpop.f32.mrb[81].mxu1 }
 0x5e0   : > { %v6067_v35 = vpop.eup %6066  ;;  %v2901_v39 = vpop.f32.mrb[66].mxu0 }
 0x5e1   : > { %v2949_v2 = vpop.f32.mrb[82].mxu1  ;;  %v2718_v13 = vmul.f32 %v6067_v35, %v7247_v49  ;;  %v5584_v63 = vpop.f32.mrb[67].mxu0 }
 0x5e2   : > { %v5590_v24 = vpop.f32.mrb[83].mxu1  ;;  %v4153_v36 = vpop.permute.xlu1 %4152 }
 0x5e3   : > { %v2750_v37 = vpack.c.bf16 %v2718_v13, %v2718_v13  ;;  %v4158_v28 = vsel %vm2764_vm3, %v4153_v36, 0 }
 0x5e4   : > { %v6069_v8 = vpop.eup %6068 }
 0x5e5   : > { %v2719_v23 = vmul.f32 %v6069_v8, %v7253_v4  ;;  %v7437_v55 = vpop.f32.mrb[68].mxu0  ;;  %5708 = vmatmul.mubr.msk.bf16.vlgmr.msra.gmra.mrb[120].mxu1 %vm808_vm2, %v2750_v37  ;;  %v2650_v45 = vpop.xlane.xlu0 %2649  ;;  %v4014_v4 = vsel %vm2764_vm3, %v7235_v31, 0 }
 0x5e6   : > { %5718 = vmatpush3.bf16.msra.mxu1 %v3966_v3  ;;  %6074 = vrcp.f32 %v2650_v45  ;;  %v5595_v60 = vpop.f32.mrb[69].mxu0  ;;  %5719 = vmatprep.mubr.msk.bf16.mxu1 %vm6227_vm1, %v7816_v58 }
 0x5e7   : > { %v2997_v49 = vpop.f32.mrb[70].mxu0  ;;  %v2751_v46 = vpack.c.bf16 %v2719_v23, %v2719_v23  ;;  %5729 = vmatprep.subr.bf16.mxu1 %v7816_v58 }
 0x5e8   : > { %v6071_v52 = vpop.eup %6070  ;;  %v5596_v41 = vpop.f32.mrb[71].mxu0 }
 0x5e9   : > { %v6073_v43 = vpop.eup %6072  ;;  %v2720_v17 = vmul.f32 %v6071_v52, %v7266_v27  ;;  %5714 = vmatmul.mubr.msk.bf16.vlgmr.msra.gmra.mrb[108].mxu0 %vm808_vm2, %v2751_v46  ;;  %v4105_v31 = vpop.permute.xlu0 %4104 }
 0x5ea   : > { %5724 = vmatpush3.bf16.msra.mxu0 %v4014_v4  ;;  %5725 = vmatprep.mubr.msk.bf16.mxu0 %vm6227_vm1, %v7816_v58  ;;  %v2721_v22 = vmul.f32 %v6073_v43, %v7269_v42  ;;  %v4110_v16 = vsel %vm2764_vm3, %v4105_v31, 0 }
 0x5eb   : > { %v2752_v44 = vpack.c.bf16 %v2720_v17, %v2720_v17  ;;  %5735 = vmatprep.subr.bf16.mxu0 %v7816_v58 }
 0x5ec   : > { %v2753_v62 = vpack.c.bf16 %v2721_v22, %v2721_v22 }
 0x5ed   : > { %v7453_v34 = vpop.f32.mrb[72].mxu0  ;;  %5720 = vmatmul.mubr.msk.bf16.vlgmr.msra.gmra.mrb[124].mxu1 %vm808_vm2, %v2752_v44 }
 0x5ee   : > { %5730 = vmatpush3.bf16.msra.mxu1 %v4062_v5  ;;  %v5607_v27 = vpop.f32.mrb[73].mxu0  ;;  %5731 = vmatprep.mubr.msk.bf16.mxu1 %vm6227_vm1, %v7816_v58 }
 0x5ef   : > { %v3093_v20 = vpop.f32.mrb[74].mxu0  ;;  %5741 = vmatprep.subr.bf16.mxu1 %v7816_v58 }
 0x5f0   : > { %v6075_v42 = vpop.eup %6074  ;;  %v5608_v9 = vpop.f32.mrb[75].mxu0 }
 0x5f1   : > { %v2722_v14 = vmul.f32 %v6075_v42, %v7281_v21  ;;  %5726 = vmatmul.mubr.msk.bf16.vlgmr.msra.gmra.mrb[112].mxu0 %vm808_vm2, %v2753_v62 }
 0x5f2   : > { %5736 = vmatpush3.bf16.msra.mxu0 %v4110_v16  ;;  %5737 = vmatprep.mubr.msk.bf16.mxu0 %vm6227_vm1, %v7816_v58 }
 0x5f3   : > { %v2754_v1 = vpack.c.bf16 %v2722_v14, %v2722_v14  ;;  %5747 = vmatprep.subr.bf16.mxu0 %v7816_v58 }
 0x5f5   : > { %5732 = vmatmul.mubr.msk.bf16.vlgmr.msra.gmra.mrb[128].mxu1 %vm808_vm2, %v2754_v1 }
 0x5f6   : > { %5742 = vmatpush3.bf16.msra.mxu1 %v4158_v28  ;;  %5743 = vmatprep.mubr.msk.bf16.mxu1 %vm6227_vm1, %v7816_v58 }
 0x5f7   : > { %5753 = vmatprep.subr.bf16.mxu1 %v7816_v58 }
 0x613   : > { %v2653_v21 = vpop.xlane.xlu1 %2652 }
 0x614   : > { %6076 = vrcp.f32 %v2653_v21 }
 0x617   : > { %v2659_v47 = vpop.xlane.xlu1 %2658 }
 0x618   : > { %6078 = vrcp.f32 %v2659_v47 }
 0x61a   : > { %v2656_v38 = vpop.xlane.xlu0 %2655 }
 0x61b   : > { %6080 = vrcp.f32 %v2656_v38  ;;  %v4249_v59 = vpop.permute.xlu1 %4248 }
 0x61c   : > { %v4254_v2 = vsel %vm2764_vm3, %v4249_v59, 0 }
 0x61e   : > { %v6077_v32 = vpop.eup %6076  ;;  %v2662_v11 = vpop.xlane.xlu0 %2661 }
 0x61f   : > { %v2723_v51 = vmul.f32 %v6077_v32, %v7363_v50  ;;  %v7471_v12 = vpop.f32.mrb[84].mxu1  ;;  %6082 = vrcp.f32 %v2662_v11 }
 0x620   : > { %v5601_v61 = vpop.f32.mrb[85].mxu1 }
 0x621   : > { %v3045_v15 = vpop.f32.mrb[86].mxu1  ;;  %v2755_v40 = vpack.c.bf16 %v2723_v51, %v2723_v51 }
 0x622   : > { %v6079_v56 = vpop.eup %6078  ;;  %v5602_v57 = vpop.f32.mrb[87].mxu1 }
 0x623   : > { %v4201_v29 = vpop.permute.xlu0 %4200  ;;  %5738 = vmatmul.mubr.msk.bf16.vlgmr.msra.gmra.mrb[116].mxu0 %vm808_vm2, %v2755_v40  ;;  %v2725_v50 = vmul.f32 %v6079_v56, %v7373_v7 }
 0x624   : > { %v4206_v18 = vsel %vm2764_vm3, %v4201_v29, 0  ;;  %5749 = vmatprep.mubr.msk.bf16.mxu0 %vm6227_vm1, %v7816_v58 }
 0x625   : > { %5748 = vmatpush3.bf16.msra.mxu0 %v4206_v18  ;;  %v6081_v25 = vpop.eup %6080  ;;  %v2757_v39 = vpack.c.bf16 %v2725_v50, %v2725_v50 }
 0x626   : > { %v2724_v10 = vmul.f32 %v6081_v25, %v7377_v19 }
 0x628   : > { %v7479_v30 = vpop.f32.mrb[88].mxu1  ;;  %v2756_v0 = vpack.c.bf16 %v2724_v10, %v2724_v10 }
 0x629   : > { %v6083_v48 = vpop.eup %6082  ;;  %v5613_v35 = vpop.f32.mrb[89].mxu1 }
 0x62a   : > { %v3141_v13 = vpop.f32.mrb[90].mxu1  ;;  %5744 = vmatmul.mubr.msk.bf16.vlgmr.msra.gmra.mrb[132].mxu1 %vm808_vm2, %v2756_v0  ;;  %v2726_v7 = vmul.f32 %v6083_v48, %v7386_v54 }
 0x62b   : > { %v5614_v63 = vpop.f32.mrb[91].mxu1  ;;  %5750 = vmatmul.mubr.msk.bf16.vlgmr.msra.gmra.mrb[120].mxu0 %vm808_vm2, %v2757_v39  ;;  %5754 = vmatpush3.bf16.msra.mxu1 %v4254_v2 }
 0x62c   : > { %5755 = vmatprep.mubr.msk.bf16.mxu1 %vm6227_vm1, %v7816_v58  ;;  %v2758_v19 = vpack.c.bf16 %v2726_v7, %v2726_v7 }
 0x631   : > { %v3186_v24 = vpop.f32.mrb[76].mxu0 }
 0x632   : > { %5756 = vmatmul.mubr.msk.bf16.vlgmr.msra.gmra.mrb[136].mxu1 %vm808_vm2, %v2758_v19  ;;  %v5619_v37 = vpop.f32.mrb[77].mxu0 }
 0x633   : > { %v3189_v8 = vpop.f32.mrb[78].mxu0 }
 0x634   : > { %v5620_v3 = vpop.f32.mrb[79].mxu0 }
 0x636   : > { %v3234_v23 = vpop.f32.mrb[92].mxu1 }
 0x637   : > { %v5866_v45 = vpack.i.bf16 %v3234_v23, %v3186_v24  ;;  %v5625_v60 = vpop.f32.mrb[93].mxu1 }
 0x638   : > { %v3237_v49 = vpop.f32.mrb[94].mxu1 }
 0x639   : > { %v5626_v46 = vpop.f32.mrb[95].mxu1  ;;  %5867 = vrot.lane.b32.xlu0 %v5866_v45, %s6232_s15 }
 0x63a   : > { %v3282_v52 = vpop.f32.mrb[80].mxu0 }
 0x63b   : > { %v5631_v54 = vpop.f32.mrb[81].mxu0 }
 0x63c   : > { %v3285_v41 = vpop.f32.mrb[82].mxu0 }
 0x63d   : > { %v5632_v43 = vpop.f32.mrb[83].mxu0 }
 0x63e   : > { %v3330_v58 = vpop.f32.mrb[96].mxu1 }
 0x63f   : > { %v5871_v4 = vpack.i.bf16 %v3330_v58, %v3282_v52  ;;  %v5637_v17 = vpop.f32.mrb[97].mxu1 }
 0x640   : > { %v3333_v22 = vpop.f32.mrb[98].mxu1 }
 0x641   : > { %5872 = vrot.lane.b32.xlu1 %v5871_v4, %s6232_s15  ;;  %v5638_v44 = vpop.f32.mrb[99].mxu1 }
 0x642   : > { %v3378_v5 = vpop.f32.mrb[84].mxu0 }
 0x643   : > { %v5643_v31 = vpop.f32.mrb[85].mxu0 }
 0x644   : > { %v3381_v27 = vpop.f32.mrb[86].mxu0  ;;  %v5928_v31 = vld [vmem:[%s7781_s5] sm:$0xff]  }
 0x645   : > { %v5644_v20 = vpop.f32.mrb[87].mxu0  ;;  %5759 = vmatprep.subr.bf16.mxu0 %v5928_v31 }
 0x646   : > { %v3426_v62 = vpop.f32.mrb[100].mxu1  ;;  %5760 = vmatpush3.bf16.msra.mxu0 %v5928_v31 }
 0x647   : > { %v5876_v42 = vpack.i.bf16 %v3426_v62, %v3378_v5  ;;  %v5649_v9 = vpop.f32.mrb[101].mxu1 }
 0x648   : > { %v3429_v14 = vpop.f32.mrb[102].mxu1 }
 0x649   : > { %5877 = vrot.lane.b32.xlu0 %v5876_v42, %s6232_s15  ;;  %v5650_v16 = vpop.f32.mrb[103].mxu1 }
 0x64a   : > { %v3474_v36 = vpop.f32.mrb[88].mxu0 }
 0x64b   : > { %v5655_v1 = vpop.f32.mrb[89].mxu0 }
 0x64c   : > { %v3477_v28 = vpop.f32.mrb[90].mxu0 }
 0x64d   : > { %v5656_v21 = vpop.f32.mrb[91].mxu0  ;;  %v5929_v28 = vld [vmem:[%s7781_s5 + $0x8] sm:$0xff]  }
 0x64e   : > { %v3522_v47 = vpop.f32.mrb[104].mxu1  ;;  %5761 = vmatprep.subr.bf16.mxu0 %v5929_v28 }
 0x64f   : > { %v5881_v38 = vpack.i.bf16 %v3522_v47, %v3474_v36  ;;  %v5661_v32 = vpop.f32.mrb[105].mxu1  ;;  %5762 = vmatpush3.bf16.msra.mxu0 %v5929_v28 }
 0x650   : > { %v3525_v11 = vpop.f32.mrb[106].mxu1 }
 0x651   : > { %5882 = vrot.lane.b32.xlu1 %v5881_v38, %s6232_s15  ;;  %v5662_v51 = vpop.f32.mrb[107].mxu1 }
 0x652   : > { %v3570_v61 = vpop.f32.mrb[92].mxu0 }
 0x653   : > { %v5667_v15 = vpop.f32.mrb[93].mxu0 }
 0x654   : > { %v3573_v40 = vpop.f32.mrb[94].mxu0 }
 0x655   : > { %v5668_v56 = vpop.f32.mrb[95].mxu0 }
 0x656   : > { %v3618_v57 = vpop.f32.mrb[108].mxu1 }
 0x657   : > { %v5886_v29 = vpack.i.bf16 %v3618_v57, %v3570_v61  ;;  %v5673_v18 = vpop.f32.mrb[109].mxu1 }
 0x658   : > { %v3621_v25 = vpop.f32.mrb[110].mxu1 }
 0x659   : > { %5887 = vrot.lane.b32.xlu0 %v5886_v29, %s6233_s24  ;;  %v5674_v50 = vpop.f32.mrb[111].mxu1 }
 0x65e   : > { %v3714_v10 = vpop.f32.mrb[112].mxu1 }
 0x65f   : > { %v5685_v59 = vpop.f32.mrb[113].mxu1 }
 0x660   : > { %v3717_v0 = vpop.f32.mrb[114].mxu1 }
 0x661   : > { %v5686_v48 = vpop.f32.mrb[115].mxu1 }
 0x672   : > { %v3810_v35 = vpop.f32.mrb[116].mxu1 }
 0x673   : > { %v5697_v39 = vpop.f32.mrb[117].mxu1 }
 0x674   : > { %v3813_v2 = vpop.f32.mrb[118].mxu1 }
 0x675   : > { %v5698_v13 = vpop.f32.mrb[119].mxu1 }
 0x677   : > { %v3666_v63 = vpop.f32.mrb[96].mxu0 }
 0x678   : > { %v5891_v7 = vpack.i.bf16 %v3714_v10, %v3666_v63  ;;  %v5679_v19 = vpop.f32.mrb[97].mxu0 }
 0x679   : > { %v3669_v24 = vpop.f32.mrb[98].mxu0 }
 0x67a   : > { %v5680_v37 = vpop.f32.mrb[99].mxu0  ;;  %5892 = vrot.lane.b32.xlu1 %v5891_v7, %s6233_s24 }
 0x67f   : > { %v3762_v8 = vpop.f32.mrb[100].mxu0 }
 0x680   : > { %v5901_v3 = vpack.i.bf16 %v3810_v35, %v3762_v8  ;;  %v5691_v23 = vpop.f32.mrb[101].mxu0 }
 0x681   : > { %v3765_v45 = vpop.f32.mrb[102].mxu0 }
 0x682   : > { %v5692_v60 = vpop.f32.mrb[103].mxu0 }
 0x687   : > { %v3858_v49 = vpop.f32.mrb[104].mxu0 }
 0x688   : > { %v5703_v46 = vpop.f32.mrb[105].mxu0 }
 0x689   : > { %v3861_v52 = vpop.f32.mrb[106].mxu0 }
 0x68a   : > { %v5704_v54 = vpop.f32.mrb[107].mxu0 }
 0x6ab   : > { %v7494_v41 = vpop.permute.xlu0 %5867 }
 0x6ac   : > { %v5869_v46 = vunpack.i.l.bf16 %v7494_v41 }
 0x6b3   : > { %v7507_v36 = vpop.permute.xlu1 %5872 }
 0x6b8   : > { %v3906_v43 = vpop.f32.mrb[120].mxu1 }
 0x6b9   : > { %v5911_v58 = vpack.i.bf16 %v3906_v43, %v3858_v49  ;;  %v5709_v4 = vpop.f32.mrb[121].mxu1  ;;  %v5870_v49 = vunpack.i.h.bf16 %v7494_v41 }
 0x6ba   : > { %v3909_v17 = vpop.f32.mrb[122].mxu1  ;;  %v4392_v4 = vsel %vm808_vm2, %v7427_v53, %v5869_v46 }
 0x6bb   : > { %v5710_v22 = vpop.f32.mrb[123].mxu1  ;;  %v5878_v44 = vpop.permute.xlu0 %5877 }
 0x6bc   : > { %v3954_v5 = vpop.f32.mrb[108].mxu0  ;;  %v5880_v27 = vunpack.i.h.bf16 %v5878_v44  ;;  %v5879_v20 = vunpack.i.l.bf16 %v5878_v44 }
 0x6bd   : > { %v5715_v62 = vpop.f32.mrb[109].mxu0 }
 0x6be   : > { %v3957_v42 = vpop.f32.mrb[110].mxu0  ;;  %v7501_v9 = vsel %vm808_vm2, %v7471_v12, %v5880_v27  ;;  %v7505_v14 = vsel %vm808_vm2, %v7437_v55, %v5879_v20  ;;  %v5875_v62 = vunpack.i.h.bf16 %v7507_v36 }
 0x6bf   : > { %v5716_v16 = vpop.f32.mrb[111].mxu0  ;;  %v5874_v42 = vunpack.i.l.bf16 %v7507_v36 }
 0x6c0   : > { %v4002_v1 = vpop.f32.mrb[124].mxu1 }
 0x6c1   : > { %v5896_v21 = vpack.i.bf16 %v4002_v1, %v3954_v5  ;;  %v5721_v47 = vpop.f32.mrb[125].mxu1  ;;  %v4395_v1 = vsel %vm808_vm2, %v7431_v33, %v5875_v62  ;;  %v4394_v28 = vsel %vm808_vm2, %v7429_v6, %v5874_v42  ;;  %v6120_v62 = vld [vmem:[%s6417_s18 + $0x20] sm:$0xff] }
 0x6c2   : > { %v4005_v38 = vpop.f32.mrb[126].mxu1 }
 0x6c3   : > { %5897 = vrot.lane.b32.xlu0 %v5896_v21, %s6234_s17  ;;  %v5722_v12 = vpop.f32.mrb[127].mxu1  ;;  %v5883_v55 = vpop.permute.xlu1 %5882 }
 0x6c4   : > { %v4050_v32 = vpop.f32.mrb[112].mxu0  ;;  %v5885_v11 = vunpack.i.h.bf16 %v5883_v55  ;;  %v5884_v51 = vunpack.i.l.bf16 %v5883_v55 }
 0x6c5   : > { %v5727_v61 = vpop.f32.mrb[113].mxu0 }
 0x6c6   : > { %v4053_v15 = vpop.f32.mrb[114].mxu0  ;;  %v7515_v40 = vsel %vm808_vm2, %v7479_v30, %v5885_v11  ;;  %v7519_v56 = vsel %vm808_vm2, %v7453_v34, %v5884_v51 }
 0x6c7   : > { %v5728_v57 = vpop.f32.mrb[115].mxu0  ;;  %5902 = vrot.lane.b32.xlu0 %v5901_v3, %s6233_s24 }
 0x6c8   : > { %v4098_v29 = vpop.f32.mrb[128].mxu1 }
 0x6c9   : > { %v5906_v18 = vpack.i.bf16 %v4098_v29, %v4050_v32  ;;  %v5733_v25 = vpop.f32.mrb[129].mxu1 }
 0x6ca   : > { %v4101_v50 = vpop.f32.mrb[130].mxu1 }
 0x6cb   : > { %5907 = vrot.lane.b32.xlu1 %v5906_v18, %s6234_s17  ;;  %v5734_v10 = vpop.f32.mrb[131].mxu1  ;;  %v5888_v60 = vpop.permute.xlu0 %5887 }
 0x6cc   : > { %v5890_v52 = vunpack.i.h.bf16 %v5888_v60  ;;  %v5889_v54 = vunpack.i.l.bf16 %v5888_v60 }
 0x6ce   : > { %v4401_v44 = vsel %vm4400_vm4, %v4392_v4, %v5889_v54 }
 0x6cf   : > { %5912 = vrot.lane.b32.xlu1 %v5911_v58, %s6233_s24  ;;  %v4393_v58 = vsel %vm808_vm2, %v7425_v26, %v5870_v49  ;;  %v6118_v49 = vld [vmem:[%s6417_s18 + $0x8] sm:$0xff]  ;;  %s458_s24 = scalar_lea.vmem [#allocation5], %s5058_s22 }
 0x6d0   : > { %v4402_v5 = vsel %vm4400_vm4, %v4393_v58, %v5890_v52  ;;  %s4978_s22 = sshll.u32 %s458_s24, 4  ;;  %s7729_s22 = int_to_ptr.vmem [resolvable:$true] %s4978_s22 }
 0x6d1   : > { %p6161_p8 = scmp.lt.s32.totalorder %s7729_s22, %s6159_s16 }
 0x6ec   : > { %v5893_v31 = vpop.permute.xlu1 %5892 }
 0x6ed   : > { %v5895_v26 = vunpack.i.h.bf16 %v5893_v31  ;;  %v5894_v16 = vunpack.i.l.bf16 %v5893_v31 }
 0x6ef   : > { %v4404_v38 = vsel %vm4400_vm4, %v4395_v1, %v5895_v26  ;;  %v4403_v12 = vsel %vm4400_vm4, %v4394_v28, %v5894_v16  ;;  %v6121_v16 = vld [vmem:[%s6417_s18 + $0x30] sm:$0xff]  ;;  %v6122_v1 = vld [vmem:[%s6417_s18 + $0x28] sm:$0xff] }
 0x6f6   : > { %v4146_v59 = vpop.f32.mrb[116].mxu0 }
 0x6f7   : > { %v5739_v0 = vpop.f32.mrb[117].mxu0 }
 0x6f8   : > { %v4149_v30 = vpop.f32.mrb[118].mxu0 }
 0x6f9   : > { %v5740_v48 = vpop.f32.mrb[119].mxu0 }
 0x6fd   : > { %v4194_v35 = vpop.f32.mrb[132].mxu1 }
 0x6fe   : > { %v5916_v39 = vpack.i.bf16 %v4194_v35, %v4146_v59  ;;  %v4242_v34 = vpop.f32.mrb[120].mxu0  ;;  %v5745_v2 = vpop.f32.mrb[133].mxu1 }
 0x6ff   : > { %v5751_v13 = vpop.f32.mrb[121].mxu0  ;;  %v4197_v63 = vpop.f32.mrb[134].mxu1 }
 0x700   : > { %v4245_v7 = vpop.f32.mrb[122].mxu0  ;;  %5917 = vrot.lane.b32.xlu0 %v5916_v39, %s6234_s17  ;;  %v5746_v19 = vpop.f32.mrb[135].mxu1  ;;  %v5165_v13 = vld [vmem:[%s7782_s6] ss:$0 sm:$0xff] }
 0x701   : > { %v5752_v24 = vpop.f32.mrb[123].mxu0 }
 0x705   : > { %v4290_v37 = vpop.f32.mrb[136].mxu1 }
 0x706   : > { %v5921_v8 = vpack.i.bf16 %v4290_v37, %v4242_v34  ;;  %v5757_v3 = vpop.f32.mrb[137].mxu1 }
 0x707   : > { %v4293_v23 = vpop.f32.mrb[138].mxu1 }
 0x708   : > { %v5758_v45 = vpop.f32.mrb[139].mxu1  ;;  %5922 = vrot.lane.b32.xlu1 %v5921_v8, %s6234_s17  ;;  %v6117_v23 = vld [vmem:[%s6417_s18 + $0x10] sm:$0xff]  ;;  %s6154_s17 = scalar_lea.vmem %s7729_s22, 1024 }
 0x709   : > { %p6155_p6 = scmp.ne.s32.totalorder %s7729_s22, %s6154_s17 }
 0x70b   : > { %p6156_p12 = pnand %p6155_p6, %p7825_p11 }
 0x70d   : > { %p6157_p13 = pneg %p6156_p12 }
 0x735   : > { %v5898_v43 = vpop.permute.xlu0 %5897 }
 0x736   : > { %v5900_v17 = vunpack.i.h.bf16 %v5898_v43  ;;  %v5899_v22 = vunpack.i.l.bf16 %v5898_v43  ;;  %v6119_v43 = vld [vmem:[%s6417_s18 + $0x18] sm:$0xff] }
 0x738   : > { %v4410_v41 = vsel %vm4409_vm5, %v4401_v44, %v5899_v22  ;;  %v4411_v27 = vsel %vm4409_vm5, %v4402_v5, %v5900_v17 }
 0x739   : > { %v4418_v20 = vpack.c.bf16 %v4411_v27, %v4410_v41  ;;  %v5903_v11 = vpop.permute.xlu0 %5902 }
 0x73a   : > { %v5905_v51 = vunpack.i.h.bf16 %v5903_v11  ;;  %v5904_v61 = vunpack.i.l.bf16 %v5903_v11 }
 0x73b   : > { %5763 = vmatprep.mubr.msk.bf16.mxu0 %vm472_vm0, %v4418_v20 }
 0x73c   : > { %v4405_v6 = vsel %vm4400_vm4, %v7505_v14, %v5904_v61  ;;  %v4406_v29 = vsel %vm4400_vm4, %v7501_v9, %v5905_v51 }
 0x73d   : > { %v5908_v53 = vpop.permute.xlu1 %5907 }
 0x73e   : > { %v5910_v21 = vunpack.i.h.bf16 %v5908_v53  ;;  %v5909_v47 = vunpack.i.l.bf16 %v5908_v53 }
 0x740   : > { %v4413_v55 = vsel %vm4409_vm5, %v4404_v38, %v5910_v21  ;;  %v4412_v36 = vsel %vm4409_vm5, %v4403_v12, %v5909_v47  ;;  %v6123_v47 = vld [vmem:[%s6417_s18 + $0x38] sm:$0xff] }
 0x741   : > { %v4419_v32 = vpack.c.bf16 %v4413_v55, %v4412_v36  ;;  %v5913_v18 = vpop.permute.xlu1 %5912 }
 0x742   : > { %v5915_v59 = vunpack.i.h.bf16 %v5913_v18  ;;  %v5914_v0 = vunpack.i.l.bf16 %v5913_v18 }
 0x743   : > { %5764 = vmatmul.mubr.msk.bf16.vlgmr.msra.gmra.mrb[124].mxu0 %vm472_vm0, %v4419_v32 }
 0x744   : > { %v4408_v14 = vsel %vm4400_vm4, %v7515_v40, %v5915_v59  ;;  %v4407_v9 = vsel %vm4400_vm4, %v7519_v56, %v5914_v0  ;;  %v6116_v56 = vld [vmem:[%s6417_s18] sm:$0xff]  ;;  %s6160_s18 = scalar_lea.vmem %s6159_s16, 2048 }
 0x745   : > { %p6162_p10 = scmp.lt.s32.totalorder %s6160_s18, %s6154_s17 }
 0x747   : > { %p6163_p0 = por %p6162_p10, %p6161_p8 }
 0x749   : > { %p6164_p2 = pnand %p6163_p0, %p6157_p13 }
 0x772   : > { %v5918_v33 = vpop.permute.xlu0 %5917 }
 0x773   : > { %v5920_v15 = vunpack.i.h.bf16 %v5918_v33  ;;  %v5919_v57 = vunpack.i.l.bf16 %v5918_v33 }
 0x775   : > { %v4414_v25 = vsel %vm4409_vm5, %v4405_v6, %v5919_v57  ;;  %v4415_v50 = vsel %vm4409_vm5, %v4406_v29, %v5920_v15 }
 0x776   : > { %v4420_v10 = vpack.c.bf16 %v4415_v50, %v4414_v25 }
 0x778   : > { %5767 = vmatprep.mubr.msk.bf16.mxu0 %vm472_vm0, %v4420_v10 }
 0x77a   : > { %v5923_v30 = vpop.permute.xlu1 %5922 }
 0x77b   : > { %v5925_v48 = vunpack.i.h.bf16 %v5923_v30  ;;  %v5924_v35 = vunpack.i.l.bf16 %v5923_v30 }
 0x77d   : > { %v4417_v39 = vsel %vm4409_vm5, %v4408_v14, %v5925_v48  ;;  %v4416_v34 = vsel %vm4409_vm5, %v4407_v9, %v5924_v35 }
 0x77e   : > { %v4421_v2 = vpack.c.bf16 %v4417_v39, %v4416_v34  ;;  %v5930_v39 = vld [vmem:[%s7785_s9] sm:$0xff]   ;;  %v5931_v34 = vld [vmem:[%s7785_s9 + $0x8] sm:$0xff]  }
 0x77f   : > { %5771 = vmatprep.subr.bf16.mxu1 %v5930_v39 }
 0x780   : > { %5768 = vmatmul.mubr.msk.bf16.gmra.mrb[128].mxu0 %vm472_vm0, %v4421_v2  ;;  %5772 = vmatpush3.bf16.msra.mxu1 %v5930_v39 }
 0x781   : > { %5773 = vmatprep.subr.bf16.mxu1 %v5931_v34 }
 0x784   : > { %5774 = vmatpush3.bf16.msra.mxu1 %v5931_v34 }
 0x816   : > { %v5765_v63 = vpop.f32.mrb[124].mxu0 }
 0x817   : > { %v4491_v7 = vpop.f32.mrb[125].mxu0  ;;  %v4500_v19 = vadd.f32 %v5765_v63, %v5165_v13 }
 0x818   : > { %v4492_v40 = vadd.f32 %v5165_v13, %v4491_v7  ;;  %v5766_v24 = vpop.f32.mrb[126].mxu0 }
 0x819   : > { %v4494_v37 = vpop.f32.mrb[127].mxu0  ;;  %v7569_v45 = vadd.f32 %v6117_v23, %v4500_v19  ;;  %v4503_v60 = vadd.f32 %v5766_v24, %v5165_v13 }
 0x81a   : > { %v7566_v8 = vadd.f32 %v6116_v56, %v4492_v40  ;;  %v4495_v3 = vadd.f32 %v5165_v13, %v4494_v37 }
 0x81b   : > { %v7579_v58 = vadd.f32 %v6119_v43, %v4503_v60  ;;  %v4538_v4 = vsel %vm472_vm0, %v7569_v45, 0.0 }
 0x81c   : > { %v7572_v46 = vadd.f32 %v6118_v49, %v4495_v3  ;;  %v4532_v52 = vsel %vm472_vm0, %v7566_v8, 0.0 }
 0x81d   : > { %4533 = vadd.xlane.f32.xlu0 %v4532_v52  ;;  %v4541_v17 = vsel %vm472_vm0, %v7579_v58, 0.0 }
 0x81e   : > { %v4535_v54 = vsel %vm472_vm0, %v7572_v46, 0.0 }
 0x81f   : > { %4536 = vadd.xlane.f32.xlu1 %v4535_v54 }
 0x821   : > { %4539 = vadd.xlane.f32.xlu0 %v4538_v4 }
 0x825   : > { %4542 = vadd.xlane.f32.xlu0 %v4541_v17 }
 0x853   : > { %v5769_v22 = vpop.f32.mrb[128].mxu0 }
 0x854   : > { %v4516_v44 = vadd.f32 %v5769_v22, %v5165_v13  ;;  %v4507_v5 = vpop.f32.mrb[129].mxu0 }
 0x855   : > { %v4508_v31 = vadd.f32 %v5165_v13, %v4507_v5  ;;  %v5770_v41 = vpop.f32.mrb[130].mxu0  ;;  %v5932_v5 = vld [vmem:[%s7787_s11] sm:$0xff]  }
 0x856   : > { %v4519_v27 = vadd.f32 %v5770_v41, %v5165_v13  ;;  %v4510_v20 = vpop.f32.mrb[131].mxu0  ;;  %v7589_v53 = vadd.f32 %v6121_v16, %v4516_v44  ;;  %5783 = vmatprep.subr.bf16.mxu0 %v5932_v5 }
 0x857   : > { %v7586_v42 = vadd.f32 %v6120_v62, %v4508_v31  ;;  %v4511_v26 = vadd.f32 %v5165_v13, %v4510_v20  ;;  %v5933_v31 = vld [vmem:[%s7787_s11 + $0x8] sm:$0xff]   ;;  %5784 = vmatpush3.bf16.msra.mxu0 %v5932_v5 }
 0x858   : > { %v7597_v38 = vadd.f32 %v6123_v47, %v4519_v27  ;;  %v4550_v55 = vsel %vm472_vm0, %v7589_v53, 0.0  ;;  %5785 = vmatprep.subr.bf16.mxu0 %v5933_v31 }
 0x859   : > { %v7592_v28 = vadd.f32 %v6122_v1, %v4511_v26  ;;  %v4544_v21 = vsel %vm472_vm0, %v7586_v42, 0.0 }
 0x85a   : > { %4545 = vadd.xlane.f32.xlu0 %v4544_v21  ;;  %v4553_v36 = vsel %vm472_vm0, %v7597_v38, 0.0 }
 0x85b   : > { %v4547_v12 = vsel %vm472_vm0, %v7592_v28, 0.0  ;;  %5786 = vmatpush3.bf16.msra.mxu0 %v5933_v31 }
 0x85c   : > { %4548 = vadd.xlane.f32.xlu1 %v4547_v12 }
 0x85e   : > { %4551 = vadd.xlane.f32.xlu0 %v4550_v55 }
 0x860   : > { %4554 = vadd.xlane.f32.xlu1 %v4553_v36 }
 0x8aa   : > { %v4534_v32 = vpop.xlane.xlu0 %4533 }
 0x8ab   : > { %v4556_v11 = vmul.f32 0.03125, %v4534_v32 }
 0x8ac   : > { %v4537_v51 = vpop.xlane.xlu1 %4536 }
 0x8ad   : > { %v7606_v61 = vsub.f32 %v7566_v8, %v4556_v11  ;;  %v4557_v33 = vmul.f32 0.03125, %v4537_v51  ;;  %v5172_v11 = vld [vmem:[%s7783_s7] ss:$0 sm:$0xff] }
 0x8ae   : > { %v4540_v15 = vpop.xlane.xlu0 %4539 }
 0x8af   : > { %v7609_v57 = vsub.f32 %v7572_v46, %v4557_v33  ;;  %v4558_v6 = vmul.f32 0.03125, %v4540_v15  ;;  %v4572_v29 = vmul.f32 %v7606_v61, %v7606_v61 }
 0x8b1   : > { %v7614_v18 = vsub.f32 %v7569_v45, %v4558_v6  ;;  %v4580_v25 = vsel %vm472_vm0, %v4572_v29, 0.0  ;;  %v4573_v50 = vmul.f32 %v7609_v57, %v7609_v57 }
 0x8b2   : > { %4581 = vadd.xlane.f32.xlu0 %v4580_v25  ;;  %v4543_v10 = vpop.xlane.xlu0 %4542  ;;  %v5173_v25 = vld [vmem:[%s7784_s8] ss:$0 sm:$0xff] }
 0x8b3   : > { %v4559_v59 = vmul.f32 0.03125, %v4543_v10  ;;  %v4583_v0 = vsel %vm472_vm0, %v4573_v50, 0.0  ;;  %v4574_v30 = vmul.f32 %v7614_v18, %v7614_v18 }
 0x8b4   : > { %4584 = vadd.xlane.f32.xlu1 %v4583_v0 }
 0x8b5   : > { %v7623_v48 = vsub.f32 %v7579_v58, %v4559_v59  ;;  %v4586_v35 = vsel %vm472_vm0, %v4574_v30, 0.0 }
 0x8b6   : > { %4587 = vadd.xlane.f32.xlu0 %v4586_v35 }
 0x8b7   : > { %v4575_v14 = vmul.f32 %v7623_v48, %v7623_v48 }
 0x8b9   : > { %v4589_v9 = vsel %vm472_vm0, %v4575_v14, 0.0 }
 0x8ba   : > { %4590 = vadd.xlane.f32.xlu1 %v4589_v9 }
 0x8e7   : > { %v4546_v2 = vpop.xlane.xlu0 %4545 }
 0x8e8   : > { %v4560_v13 = vmul.f32 0.03125, %v4546_v2 }
 0x8e9   : > { %v4549_v63 = vpop.xlane.xlu1 %4548 }
 0x8ea   : > { %v7636_v7 = vsub.f32 %v7586_v42, %v4560_v13  ;;  %v4561_v19 = vmul.f32 0.03125, %v4549_v63 }
 0x8eb   : > { %v4552_v40 = vpop.xlane.xlu0 %4551 }
 0x8ec   : > { %v7639_v24 = vsub.f32 %v7592_v28, %v4561_v19  ;;  %v4562_v37 = vmul.f32 0.03125, %v4552_v40  ;;  %v4576_v56 = vmul.f32 %v7636_v7, %v7636_v7 }
 0x8ed   : > { %v4555_v3 = vpop.xlane.xlu1 %4554 }
 0x8ee   : > { %v7644_v23 = vsub.f32 %v7589_v53, %v4562_v37  ;;  %v4563_v60 = vmul.f32 0.03125, %v4555_v3  ;;  %v4592_v49 = vsel %vm472_vm0, %v4576_v56, 0.0  ;;  %v4577_v52 = vmul.f32 %v7639_v24, %v7639_v24 }
 0x8ef   : > { %4593 = vadd.xlane.f32.xlu0 %v4592_v49 }
 0x8f0   : > { %v7650_v54 = vsub.f32 %v7597_v38, %v4563_v60  ;;  %v4595_v43 = vsel %vm472_vm0, %v4577_v52, 0.0  ;;  %v4578_v4 = vmul.f32 %v7644_v23, %v7644_v23 }
 0x8f1   : > { %4596 = vadd.xlane.f32.xlu1 %v4595_v43 }
 0x8f2   : > { %v4598_v17 = vsel %vm472_vm0, %v4578_v4, 0.0  ;;  %v4579_v22 = vmul.f32 %v7650_v54, %v7650_v54 }
 0x8f3   : > { %4599 = vadd.xlane.f32.xlu0 %v4598_v17 }
 0x8f4   : > { %v4601_v44 = vsel %vm472_vm0, %v4579_v22, 0.0 }
 0x8f5   : > { %4602 = vadd.xlane.f32.xlu1 %v4601_v44 }
 0x93f   : > { %v4582_v41 = vpop.xlane.xlu0 %4581 }
 0x940   : > { %v4604_v27 = vmul.f32 0.03125, %v4582_v41 }
 0x941   : > { %v4585_v20 = vpop.xlane.xlu1 %4584 }
 0x942   : > { %v4612_v62 = vadd.f32 1e-05, %v4604_v27  ;;  %v4605_v26 = vmul.f32 0.03125, %v4585_v20 }
 0x943   : > { %v4588_v16 = vpop.xlane.xlu0 %4587 }
 0x944   : > { %6084 = vrsqrt.f32 %v4612_v62  ;;  %v4613_v1 = vadd.f32 1e-05, %v4605_v26  ;;  %v4606_v21 = vmul.f32 0.03125, %v4588_v16 }
 0x946   : > { %6086 = vrsqrt.f32 %v4613_v1  ;;  %v4614_v47 = vadd.f32 1e-05, %v4606_v21 }
 0x947   : > { %v4591_v12 = vpop.xlane.xlu1 %4590 }
 0x948   : > { %6088 = vrsqrt.f32 %v4614_v47  ;;  %v4607_v55 = vmul.f32 0.03125, %v4591_v12  ;;  %v5937_v12 = vld [vmem:[%s7787_s11 + $0x28] sm:$0xff]  }
 0x94a   : > { %v4615_v36 = vadd.f32 1e-05, %v4607_v55  ;;  %v5938_v55 = vld [vmem:[%s7787_s11 + $0x30] sm:$0xff]  }
 0x94c   : > { %6090 = vrsqrt.f32 %v4615_v36  ;;  %v5939_v36 = vld [vmem:[%s7787_s11 + $0x38] sm:$0xff]  }
 0x94e   : > { %v6085_v32 = vpop.eup %6084 }
 0x94f   : > { %v4628_v51 = vmul.f32 %v6085_v32, %v7606_v61  ;;  %v5174_v32 = vld [vmem:[%s7786_s10] ss:$0 sm:$0xff] }
 0x950   : > { %v6087_v33 = vpop.eup %6086 }
 0x951   : > { %v4629_v15 = vmul.f32 %v6087_v33, %v7609_v57  ;;  %v4642_v6 = vmul.f32 %v5172_v11, %v4628_v51 }
 0x952   : > { %v6089_v29 = vpop.eup %6088 }
 0x953   : > { %v4630_v50 = vmul.f32 %v6089_v29, %v7614_v18  ;;  %v4643_v10 = vmul.f32 %v5172_v11, %v4629_v15  ;;  %v4656_v59 = vadd.f32 %v5173_v25, %v4642_v6 }
 0x955   : > { %v4657_v0 = vadd.f32 %v5173_v25, %v4643_v10  ;;  %v4644_v35 = vmul.f32 %v5172_v11, %v4630_v50 }
 0x956   : > { %v6091_v30 = vpop.eup %6090 }
 0x957   : > { %v4631_v14 = vmul.f32 %v6091_v30, %v7623_v48  ;;  %v4664_v9 = vpack.c.bf16 %v4657_v0, %v4656_v59  ;;  %v4658_v57 = vadd.f32 %v5173_v25, %v4644_v35 }
 0x959   : > { %v4645_v61 = vmul.f32 %v5172_v11, %v4631_v14  ;;  %5775 = vmatprep.mubr.msk.bf16.mxu1 %vm472_vm0, %v4664_v9 }
 0x95b   : > { %v4659_v39 = vadd.f32 %v5173_v25, %v4645_v61 }
 0x95d   : > { %v4665_v34 = vpack.c.bf16 %v4659_v39, %v4658_v57 }
 0x95f   : > { %5776 = vmatmul.mubr.msk.bf16.vlgmr.msra.gmra.mrb[140].mxu1 %vm472_vm0, %v4665_v34 }
 0x97c   : > { %v4594_v2 = vpop.xlane.xlu0 %4593 }
 0x97d   : > { %v4608_v13 = vmul.f32 0.03125, %v4594_v2 }
 0x97e   : > { %v4597_v63 = vpop.xlane.xlu1 %4596 }
 0x97f   : > { %v4616_v18 = vadd.f32 1e-05, %v4608_v13  ;;  %v4609_v19 = vmul.f32 0.03125, %v4597_v63 }
 0x980   : > { %v4600_v40 = vpop.xlane.xlu0 %4599 }
 0x981   : > { %6092 = vrsqrt.f32 %v4616_v18  ;;  %v4617_v37 = vadd.f32 1e-05, %v4609_v19  ;;  %v4610_v56 = vmul.f32 0.03125, %v4600_v40 }
 0x982   : > { %v4603_v3 = vpop.xlane.xlu1 %4602 }
 0x983   : > { %6094 = vrsqrt.f32 %v4617_v37  ;;  %v4618_v48 = vadd.f32 1e-05, %v4610_v56  ;;  %v4611_v60 = vmul.f32 0.03125, %v4603_v3 }
 0x985   : > { %6096 = vrsqrt.f32 %v4618_v48  ;;  %v4619_v49 = vadd.f32 1e-05, %v4611_v60 }
 0x987   : > { %6098 = vrsqrt.f32 %v4619_v49 }
 0x98b   : > { %v6093_v52 = vpop.eup %6092 }
 0x98c   : > { %v4632_v43 = vmul.f32 %v6093_v52, %v7636_v7 }
 0x98d   : > { %v6095_v4 = vpop.eup %6094 }
 0x98e   : > { %v4633_v17 = vmul.f32 %v6095_v4, %v7639_v24  ;;  %v4646_v22 = vmul.f32 %v5172_v11, %v4632_v43  ;;  %v5934_v24 = vld [vmem:[%s7787_s11 + $0x10] sm:$0xff]  }
 0x98f   : > { %v6097_v44 = vpop.eup %6096  ;;  %5787 = vmatprep.subr.bf16.mxu0 %v5934_v24 }
 0x990   : > { %v4634_v5 = vmul.f32 %v6097_v44, %v7644_v23  ;;  %v4647_v31 = vmul.f32 %v5172_v11, %v4633_v17  ;;  %v4660_v20 = vadd.f32 %v5173_v25, %v4646_v22  ;;  %5788 = vmatpush3.bf16.msra.mxu0 %v5934_v24  ;;  %v5935_v23 = vld [vmem:[%s7787_s11 + $0x18] sm:$0xff]  }
 0x991   : > { %v6099_v41 = vpop.eup %6098  ;;  %5789 = vmatprep.subr.bf16.mxu0 %v5935_v23 }
 0x992   : > { %v4635_v27 = vmul.f32 %v6099_v41, %v7650_v54  ;;  %v4661_v62 = vadd.f32 %v5173_v25, %v4647_v31  ;;  %v4648_v26 = vmul.f32 %v5172_v11, %v4634_v5  ;;  %v5936_v54 = vld [vmem:[%s7787_s11 + $0x20] sm:$0xff]  }
 0x994   : > { %v4666_v16 = vpack.c.bf16 %v4661_v62, %v4660_v20  ;;  %v4649_v1 = vmul.f32 %v5172_v11, %v4635_v27  ;;  %v4662_v21 = vadd.f32 %v5173_v25, %v4648_v26  ;;  %5790 = vmatpush3.bf16.msra.mxu0 %v5935_v23 }
 0x995   : > { %5791 = vmatprep.subr.bf16.mxu0 %v5936_v54 }
 0x996   : > { %5779 = vmatprep.mubr.msk.bf16.mxu1 %vm472_vm0, %v4666_v16  ;;  %v4663_v7 = vadd.f32 %v5173_v25, %v4649_v1 }
 0x998   : > { %v4667_v47 = vpack.c.bf16 %v4663_v7, %v4662_v21  ;;  %5792 = vmatpush3.bf16.msra.mxu0 %v5936_v54 }
 0x999   : > { %5793 = vmatprep.subr.bf16.mxu0 %v5937_v12 }
 0x99a   : > { %5780 = vmatmul.mubr.msk.bf16.gmra.mrb[144].mxu1 %vm472_vm0, %v4667_v47 }
 0x99c   : > { %5794 = vmatpush3.bf16.msra.mxu0 %v5937_v12 }
 0x99d   : > { %5795 = vmatprep.subr.bf16.mxu0 %v5938_v55 }
 0x9a0   : > { %5796 = vmatpush3.bf16.msra.mxu0 %v5938_v55 }
 0x9a1   : > { %5797 = vmatprep.subr.bf16.mxu0 %v5939_v36 }
 0x9a4   : > { %5798 = vmatpush3.bf16.msra.mxu0 %v5939_v36 }
 0xa32   : > { %v5777_v11 = vpop.f32.mrb[140].mxu1 }
 0xa33   : > { %v4746_v51 = vadd.f32 %v5777_v11, %v5174_v32  ;;  %v4737_v33 = vpop.f32.mrb[141].mxu1 }
 0xa34   : > { %v4738_v15 = vadd.f32 %v5174_v32, %v4737_v33  ;;  %v5778_v6 = vpop.f32.mrb[142].mxu1 }
 0xa35   : > { %v4778_v29 = vmul.f32 0.70710677, %v4746_v51  ;;  %v4749_v25 = vadd.f32 %v5778_v6, %v5174_v32  ;;  %v4740_v50 = vpop.f32.mrb[143].mxu1  ;;  %v4770_v34 = vmul.f32 0.5, %v4746_v51  ;;  %v5181_v6 = vld [vmem:[%s7788_s12] ss:$0 sm:$0xff] }
 0xa36   : > { %v4776_v10 = vmul.f32 0.70710677, %v4738_v15  ;;  %v4741_v59 = vadd.f32 %v5174_v32, %v4740_v50  ;;  %v4768_v63 = vmul.f32 0.5, %v4738_v15 }
 0xa37   : > { %6100 = verf.f32 %v4778_v29  ;;  %v4779_v0 = vmul.f32 0.70710677, %v4749_v25  ;;  %v4771_v2 = vmul.f32 0.5, %v4749_v25 }
 0xa38   : > { %6102 = verf.f32 %v4776_v10  ;;  %v4777_v30 = vmul.f32 0.70710677, %v4741_v59  ;;  %v4769_v18 = vmul.f32 0.5, %v4741_v59 }
 0xa39   : > { %6104 = verf.f32 %v4779_v0 }
 0xa3a   : > { %6106 = verf.f32 %v4777_v30 }
 0xa41   : > { %v6101_v35 = vpop.eup %6100 }
 0xa42   : > { %v6103_v14 = vpop.eup %6102  ;;  %v4794_v9 = vadd.f32 1.0, %v6101_v35 }
 0xa43   : > { %v6105_v61 = vpop.eup %6104  ;;  %v4792_v57 = vadd.f32 1.0, %v6103_v14 }
 0xa44   : > { %v6107_v39 = vpop.eup %6106  ;;  %v4795_v13 = vadd.f32 1.0, %v6105_v61  ;;  %v4802_v40 = vmul.f32 %v4794_v9, %v4770_v34 }
 0xa45   : > { %v4793_v19 = vadd.f32 1.0, %v6107_v39  ;;  %v4800_v56 = vmul.f32 %v4792_v57, %v4768_v63 }
 0xa46   : > { %v4803_v37 = vmul.f32 %v4795_v13, %v4771_v2 }
 0xa47   : > { %v4801_v3 = vmul.f32 %v4793_v19, %v4769_v18 }
 0xa48   : > { %v4809_v48 = vpack.c.bf16 %v4803_v37, %v4802_v40 }
 0xa49   : > { %v4808_v60 = vpack.c.bf16 %v4801_v3, %v4800_v56 }
 0xa4b   : > { %5799 = vmatprep.mubr.bf16.mxu0 %v4808_v60 }
 0xa4c   : > { %5800 = vmatmul.mubr.bf16.vlgmr.msra.gmra.mrb[132].mxu0 %v4809_v48 }
 0xa6d   : > { %v5781_v49 = vpop.f32.mrb[144].mxu1 }
 0xa6e   : > { %v4762_v52 = vadd.f32 %v5781_v49, %v5174_v32  ;;  %v4753_v43 = vpop.f32.mrb[145].mxu1 }
 0xa6f   : > { %v4754_v4 = vadd.f32 %v5174_v32, %v4753_v43  ;;  %v5782_v17 = vpop.f32.mrb[146].mxu1 }
 0xa70   : > { %v4782_v22 = vmul.f32 0.70710677, %v4762_v52  ;;  %v4765_v44 = vadd.f32 %v5782_v17, %v5174_v32  ;;  %v4756_v5 = vpop.f32.mrb[147].mxu1  ;;  %v4774_v47 = vmul.f32 0.5, %v4762_v52 }
 0xa71   : > { %v4780_v31 = vmul.f32 0.70710677, %v4754_v4  ;;  %v4757_v41 = vadd.f32 %v5174_v32, %v4756_v5  ;;  %v4772_v54 = vmul.f32 0.5, %v4754_v4 }
 0xa72   : > { %6108 = verf.f32 %v4782_v22  ;;  %v4783_v27 = vmul.f32 0.70710677, %v4765_v44  ;;  %v4775_v24 = vmul.f32 0.5, %v4765_v44 }
 0xa73   : > { %6110 = verf.f32 %v4780_v31  ;;  %v4781_v20 = vmul.f32 0.70710677, %v4757_v41  ;;  %v4773_v12 = vmul.f32 0.5, %v4757_v41 }
 0xa74   : > { %6112 = verf.f32 %v4783_v27 }
 0xa75   : > { %6114 = verf.f32 %v4781_v20 }
 0xa7c   : > { %v6109_v62 = vpop.eup %6108 }
 0xa7d   : > { %v6111_v26 = vpop.eup %6110  ;;  %v4798_v16 = vadd.f32 1.0, %v6109_v62 }
 0xa7e   : > { %v6113_v1 = vpop.eup %6112  ;;  %v4796_v21 = vadd.f32 1.0, %v6111_v26 }
 0xa7f   : > { %v6115_v7 = vpop.eup %6114  ;;  %v4799_v23 = vadd.f32 1.0, %v6113_v1  ;;  %v4806_v36 = vmul.f32 %v4798_v16, %v4774_v47 }
 0xa80   : > { %v4797_v55 = vadd.f32 1.0, %v6115_v7  ;;  %v4804_v11 = vmul.f32 %v4796_v21, %v4772_v54 }
 0xa81   : > { %v4807_v32 = vmul.f32 %v4799_v23, %v4775_v24 }
 0xa82   : > { %v4805_v51 = vmul.f32 %v4797_v55, %v4773_v12 }
 0xa83   : > { %v4811_v33 = vpack.c.bf16 %v4807_v32, %v4806_v36 }
 0xa84   : > { %v4810_v15 = vpack.c.bf16 %v4805_v51, %v4804_v11 }
 0xa86   : > { %5803 = vmatprep.mubr.bf16.mxu0 %v4810_v15 }
 0xa87   : > { %5804 = vmatmul.mubr.bf16.gmra.mrb[136].mxu0 %v4811_v33 }
 0xb1f   : > { %v5801_v29 = vpop.f32.mrb[132].mxu0 }
 0xb20   : > { %v4926_v25 = vadd.f32 %v5801_v29, %v5181_v6  ;;  %v4917_v50 = vpop.f32.mrb[133].mxu0 }
 0xb21   : > { %v4918_v10 = vadd.f32 %v5181_v6, %v4917_v50  ;;  %v5802_v59 = vpop.f32.mrb[134].mxu0 }
 0xb22   : > { %v4950_v0 = vadd.f32 %v4926_v25, %v7569_v45  ;;  %v4929_v30 = vadd.f32 %v5802_v59, %v5181_v6  ;;  %v4920_v35 = vpop.f32.mrb[135].mxu0 }
 0xb23   : > { %v4948_v14 = vadd.f32 %v4918_v10, %v7566_v8  ;;  %v4921_v9 = vadd.f32 %v5181_v6, %v4920_v35 }
 0xb24   : > { %4958 = vst.msk [vmem:[%s458_s24 + $0x10] sm:$0xff] %vm472_vm0, %v4950_v0  ;;  %v4951_v61 = vadd.f32 %v4929_v30, %v7579_v58 }
 0xb25   : > { %4956 = vst.msk [vmem:[%s458_s24] sm:$0xff] %vm472_vm0, %v4948_v14  ;;  %v4949_v57 = vadd.f32 %v4921_v9, %v7572_v46 }
 0xb26   : > { %4959 = vst.msk [vmem:[%s458_s24 + $0x18] sm:$0xff] %vm472_vm0, %v4951_v61 }
 0xb27   : > { %4957 = vst.msk [vmem:[%s458_s24 + $0x8] sm:$0xff] %vm472_vm0, %v4949_v57 }
 0xb5a   : > { %v5805_v45 = vpop.f32.mrb[136].mxu0 }
 0xb5b   : > { %v4942_v39 = vadd.f32 %v5805_v45, %v5181_v6  ;;  %v4933_v34 = vpop.f32.mrb[137].mxu0 }
 0xb5c   : > { %v4934_v2 = vadd.f32 %v5181_v6, %v4933_v34  ;;  %v5806_v8 = vpop.f32.mrb[138].mxu0 }
 0xb5d   : > { %v4954_v13 = vadd.f32 %v4942_v39, %v7589_v53  ;;  %v4945_v63 = vadd.f32 %v5806_v8, %v5181_v6  ;;  %v4936_v58 = vpop.f32.mrb[139].mxu0 }
 0xb5e   : > { %v4952_v18 = vadd.f32 %v4934_v2, %v7586_v42  ;;  %v4937_v46 = vadd.f32 %v5181_v6, %v4936_v58 }
 0xb5f   : > { %4962 = vst.msk [vmem:[%s458_s24 + $0x30] sm:$0xff] %vm472_vm0, %v4954_v13  ;;  %v4955_v19 = vadd.f32 %v4945_v63, %v7597_v38 }
 0xb60   : > { %4960 = vst.msk [vmem:[%s458_s24 + $0x20] sm:$0xff] %vm472_vm0, %v4952_v18  ;;  %v4953_v53 = vadd.f32 %v4937_v46, %v7592_v28 }
 0xb61   : > { %4963 = vst.msk [vmem:[%s458_s24 + $0x38] sm:$0xff] %vm472_vm0, %v4955_v19 }
 0xb62   : > { %4961 = vst.msk [vmem:[%s458_s24 + $0x28] sm:$0xff] %vm472_vm0, %v4953_v53 }
 0xb63   : > { %6167 = shalt.err (!%p6164_p2)
}
 0xb64   : > { %s6168_s24 = scalar_lea.hbm %s7725_s14, 1024  ;;  %s6172_s27 = scalar_lea.hbm %s7789_s13, 2048 }
 0xb65   : > { %p6169_p4 = scmp.ne.s32.totalorder %s7725_s14, %s6168_s24  ;;  %p6173_p9 = scmp.lt.u32.totalorder %s7725_s14, %s7789_s13 }
 0xb66   : > { %p6174_p1 = scmp.lt.u32.totalorder %s6172_s27, %s6168_s24  ;;  %p6176_p6 = scmp.lt.u32.totalorder %s6168_s24, %s7725_s14 }
 0xb67   : > { %p6170_p5 = pnand %p6169_p4, %p7825_p11 }
 0xb68   : > { %p6175_p3 = por %p6174_p1, %p6173_p9 }
 0xb69   : > { %p6171_p7 = pneg %p6170_p5 }
 0xb6a   : > { %p6177_p12 = por %p6176_p6, %p6175_p3 }
 0xb6c   : > { %p6178_p13 = pnand %p6177_p12, %p6171_p7 }
 0xb6e   : > { %6181 = shalt.err (!%p6178_p13)
}
 0xb6f   : > { %s6236_s17 = smov 128  }
 0xb70   : > { %5809 = dma.vmem_to_hbm [thread:$0]  (%p7825_p11), %s7729_s22, 1024, %s7725_s14, %s4965_s29, %s6236_s17, %s6236_s17, %s6232_s15  }
 0xb71 PF: > { %s7826_s18 = sld [smem:[#allocation8_spill]]  ;;  %p7827_p8 = scmp.ne.s32.totalorder %s7806_s21, 0 }
 0xb72   : > { %p7828_p10 = scmp.ge.s32.totalorder %s6220_s28, 2 }
 0xb74   : > { %p5816_p0 = pnand %p7828_p10, %p7827_p8 }
 0xb77   : > { %s4993_s23 = sand.u32 1, %s7826_s18  }
 0xb78   : > { %s4994_s24 = scalar_lea.sflag [#allocation4], %s4993_s23 }
 0xb79   : > { %6203 = dma.done.wait (!%p5816_p0), %s4994_s24, 1024  }
 0xb7a   : > { %6205 = vsyncadd (!%p5816_p0), %s4994_s24, 4294966272  ;;  %s7829_s28 = sld [smem:[#allocation10_spill]]  ;;  %s7830_s20 = sld [smem:[#allocation9_spill]] }
 0xb7b   : > { %s7831_s27 = sld [smem:[#allocation11_spill]]  ;;  %s7832_s25 = smov %s6212_s26 }
 0xb80   : > { %p26_p2 = scmp.ge.s32.totalorder %s7829_s28, 4   ;;  %s7833_s26 = smov %s7830_s20 }
 0xb82   :  { %28 = sbr.rel (!%p26_p2) target bundleno = 5 (0x5), region = 117 }
 0xb89   :  { %4999 = vsyncpa [#allocation3], 1 }
 0xb8a   :  { %5001 = vsyncpa [#allocation3 + $0x1], 1 }
 0xb8b   :  { %5002 = vsyncpa [#allocation4], 1 }
 0xb8c   :  { %5004 = vsyncpa [#allocation4 + $0x1], 1 }

// kernel: tpu_custom_call.1
= control target key start
LH: loop header
LB: loop body
LE: loop exit
PB: predicated region body
PF: predicated region fallthrough
CT: control target
= control target key end

     0   :  { %18 = vsyncpa [#allocation3], 0  ;;  %s7776_s0 = inlined_call_operand.hbm [shape: f32[16,8,32], index: 0, kind: input, shape index: {}]   ;;  %s7777_s1 = inlined_call_operand.vmem [shape: f32[1,32], index: 1, kind: input, shape index: {}]   ;;  %s7778_s2 = inlined_call_operand.vmem [shape: f32[1,32], index: 2, kind: input, shape index: {}]   ;;  %s7779_s3 = inlined_call_operand.vmem [shape: bf16[32,96], index: 3, kind: input, shape index: {}]   ;;  %s7780_s4 = inlined_call_operand.vmem [shape: f32[1,96], index: 4, kind: input, shape index: {}]   ;;  %s7781_s5 = inlined_call_operand.vmem [shape: bf16[32,32], index: 5, kind: input, shape index: {}]   ;;  %s7782_s6 = inlined_call_operand.vmem [shape: f32[1,32], index: 6, kind: input, shape index: {}]   ;;  %s7783_s7 = inlined_call_operand.vmem [shape: f32[1,32], index: 7, kind: input, shape index: {}]   ;;  %s7784_s8 = inlined_call_operand.vmem [shape: f32[1,32], index: 8, kind: input, shape index: {}]   ;;  %s7785_s9 = inlined_call_operand.vmem [shape: bf16[32,128], index: 9, kind: input, shape index: {}]   ;;  %s7786_s10 = inlined_call_operand.vmem [shape: f32[1,128], index: 10, kind: input, shape index: {}]   ;;  %s7787_s11 = inlined_call_operand.vmem [shape: bf16[128,32], index: 11, kind: input, shape index: {}]   ;;  %s7788_s12 = inlined_call_operand.vmem [shape: f32[1,32], index: 12, kind: input, shape index: {}]   ;;  %s7789_s13 = inlined_call_operand.hbm [shape: f32[16,8,32], index: 13, kind: output, shape index: {}]  }
   0x1   :  { %20 = vsyncpa [#allocation3 + $0x1], 0 }
   0x2   :  { %21 = vsyncpa [#allocation4], 0 }
   0x3   :  { %23 = vsyncpa [#allocation4 + $0x1], 0  ;;  %s6307_s25 = smov 0   ;;  %s6309_s26 = smov 0  }
   0x4   :  { %s6311_s27 = smov 0   ;;  %s6313_s28 = smov 0  }
   0x5 LB: > { %7799 = sst [smem:[#allocation8_spill]] %s6208_s25  ;;  %s6328_s29 = sadd.s32 4294967295, %s6220_s28   ;;  %s6220_s28 = sphi %s6313_s28, %s7829_s28   ;;  %s6216_s27 = sphi %s6311_s27, %s7831_s27   ;;  %s6212_s26 = sphi %s6309_s26, %s7833_s26   ;;  %s6208_s25 = sphi %s6307_s25, %s7832_s25  }
   0x6   : > { %7800 = sst [smem:[#allocation9_spill]] %s6216_s27  ;;  %s5051_s30 = sadd.s32 4294967294, %s6220_s28  }
   0x7   : > { %s6332_s14 = sadd.s32 1, %s6220_s28   ;;  %s36_s15 = sadd.s32 1, %s6216_s27 }
   0x8   : > { %7801 = sst [smem:[#allocation10_spill]] %s6332_s14  ;;  %s33_s16 = ssub.s32 %s6220_s28, %s6332_s14 }
   0x9   : > { %p43_p0 = scmp.ne.s32.totalorder %s6216_s27, %s6212_s26  ;;  %p34_p1 = scmp.eq.s32.totalorder %s33_s16, 0 }
   0xa   : > { %p44_p2 = scmp.eq.s32.totalorder %s6220_s28, 0  ;;  %p49_p3 = scmp.ne.s32.totalorder %s6212_s26, %s6208_s25 }
   0xb   : > { %p50_p4 = scmp.eq.s32.totalorder %s6328_s29, 0  ;;  %p325_p7 = scmp.eq.s32.totalorder %s6328_s29, 1 }
   0xc   : > { %s6344_s17 = scalar_select %p34_p1, %s6216_s27, %s36_s15  }
   0xd   : > { %p6346_p5 = por %p44_p2, %p43_p0  ;;  %p6350_p6 = por %p50_p4, %p49_p3 }
   0xe   : > { %7802 = sst [smem:[#allocation11_spill]] %s6344_s17  ;;  %p331_p8 = scmp.eq.s32.totalorder %s5051_s30, 1 }
   0xf   : > { %p5819_p10 = scmp.lt.s32.totalorder %s6220_s28, 2  ;;  %p6357_p11 = por %p325_p7, %p43_p0 }
  0x10   : > { %p6361_p12 = por %p331_p8, %p49_p3  ;;  %s387_s22 = sand.u32 1, %s6216_s27  }
  0x11   : > { %s7805_s20 = scalar_select %p6357_p11, 1, 0 }
  0x12   : > { %s7806_s21 = scalar_select %p6361_p12, 1, 0 }
  0x13   : > { %s5195_s23 = sshll.u32 %s6220_s28, 10  ;;  %s5054_s24 = sshll.u32 %s387_s22, 6 }
  0x14   : > { %s6370_s17 = scalar_lea.hbm %s7776_s0, %s5195_s23  ;;  %s391_s30 = scalar_lea.vmem [#allocation2], %s5054_s24 }
  0x15   : > { %s398_s14 = sshll.u32 %s391_s30, 4  ;;  %p6374_p13 = pnand %p5819_p10, %p6346_p5  ;;  %s6378_s14 = int_to_ptr.vmem [resolvable:$true] %s398_s14 }
  0x16   : > { %s6380_s27 = scalar_lea.sflag [#allocation3], %s387_s22  ;;  %s6124_s15 = scalar_lea.hbm %s6370_s17, 1024 }
  0x17   : > { %p6125_p0 = scmp.ne.s32.totalorder %s6370_s17, %s6124_s15  ;;  %p6126_p1 = pneg %p6374_p13 }
  0x18   : > { %s6129_s24 = scalar_lea.hbm %s7776_s0, 2048  ;;  %p6130_p4 = scmp.lt.u32.totalorder %s6370_s17, %s7776_s0 }
  0x19   : > { %p6127_p2 = pnand %p6126_p1, %p6125_p0  ;;  %p6131_p5 = scmp.lt.u32.totalorder %s6129_s24, %s6124_s15 }
  0x1a   : > { %p6133_p8 = scmp.lt.u32.totalorder %s6124_s15, %s6370_s17 }
  0x1b   : > { %p6128_p3 = pneg %p6127_p2  ;;  %p6132_p7 = por %p6131_p5, %p6130_p4 }
  0x1d   : > { %p6134_p10 = por %p6133_p8, %p6132_p7 }
  0x1f   : > { %p6135_p9 = pnand %p6134_p10, %p6128_p3 }
  0x21   : > { %6138 = shalt.err (!%p6135_p9)
}
  0x22   : > { %s6139_s22 = scalar_lea.vmem %s6378_s14, 1024  ;;  %s6222_s23 = smov [#allocation2]  }
  0x23   : > { %p6140_p0 = scmp.ne.s32.totalorder %s6378_s14, %s6139_s22  ;;  %s6144_s18 = sshll.u32 %s6222_s23, 4  ;;  %s6145_s18 = int_to_ptr.vmem [resolvable:$false] %s6144_s18 }
  0x24   : > { %s6146_s16 = scalar_lea.vmem %s6145_s18, 2048  ;;  %p6147_p11 = scmp.lt.s32.totalorder %s6378_s14, %s6145_s18 }
  0x25   : > { %p6142_p2 = pnand %p6140_p0, %p6126_p1  ;;  %p6148_p4 = scmp.lt.s32.totalorder %s6146_s16, %s6139_s22 }
  0x27   : > { %p6143_p12 = pneg %p6142_p2  ;;  %p6149_p5 = por %p6148_p4, %p6147_p11 }
  0x29   : > { %p6150_p7 = pnand %p6149_p5, %p6143_p12 }
  0x2b   : > { %6153 = shalt.err (!%p6150_p7)
}
  0x2c   : > { %s6223_s15 = smov 128   ;;  %s6224_s24 = smov 8  }
  0x2d   : > { %5814 = dma.hbm_to_vmem [thread:$0]  (!%p6374_p13), %s6370_s17, 1024, %s6378_s14, %s6380_s27, %s6223_s15, %s6223_s15, %s6224_s24  }
  0x2e   : > { %p5057_p9 = scmp.ge.s32.totalorder %s6220_s28, 1  ;;  %p406_p1 = scmp.lt.s32.totalorder %s6220_s28, 3 }
  0x30   : > { %p407_p3 = pnand %p5057_p9, %p406_p1 }
  0x32   : > { %410 = sbr.rel (%p407_p3) target bundleno = 2929 (0xb71), region = 72 }
  0x39   : > { %s6411_s30 = sand.u32 1, %s6212_s26  }
  0x3a   : > { %s5058_s22 = sshll.u32 %s6411_s30, 6  ;;  %s413_s23 = scalar_lea.sflag [#allocation3], %s6411_s30 }
  0x3b   : > { %s6417_s18 = scalar_lea.vmem [#allocation2], %s5058_s22 }
  0x3c   : > { %6199 = dma.done.wait (%p6350_p6), %s413_s23, 1024  }
  0x3d   : > { %6201 = vsyncadd (%p6350_p6), %s413_s23, 4294966272  ;;  %vm472_vm0 = vcmask 261120   ;;  %v462_v0 = vld [vmem:[%s6417_s18] sm:$0xff]  ;;  %v464_v1 = vld [vmem:[%s6417_s18 + $0x10] sm:$0xff]  ;;  %s6225_s27 = smov 120   ;;  %vm6227_vm1 = vmmov 0  }
  0x3e   : > { %v463_v2 = vld [vmem:[%s6417_s18 + $0x8] sm:$0xff]  ;;  %v473_v3 = vsel %vm472_vm0, %v462_v0, 0.0  ;;  %v479_v4 = vsel %vm472_vm0, %v464_v1, 0.0  ;;  %v465_v5 = vld [vmem:[%s6417_s18 + $0x18] sm:$0xff]  ;;  %v466_v6 = vld [vmem:[%s6417_s18 + $0x20] sm:$0xff]  ;;  %s6228_s14 = smov 112  }
  0x3f   : > { %v467_v7 = vld [vmem:[%s6417_s18 + $0x28] sm:$0xff]  ;;  %474 = vadd.xlane.f32.xlu0 %v473_v3  ;;  %480 = vadd.xlane.f32.xlu1 %v479_v4  ;;  %v476_v8 = vsel %vm472_vm0, %v463_v2, 0.0  ;;  %v482_v9 = vsel %vm472_vm0, %v465_v5, 0.0  ;;  %v485_v10 = vsel %vm472_vm0, %v466_v6, 0.0  ;;  %v468_v12 = vld [vmem:[%s6417_s18 + $0x30] sm:$0xff]  ;;  %v469_v13 = vld [vmem:[%s6417_s18 + $0x38] sm:$0xff] }
  0x40   : > { %v488_v11 = vsel %vm472_vm0, %v467_v7, 0.0  ;;  %v491_v14 = vsel %vm472_vm0, %v468_v12, 0.0  ;;  %v494_v15 = vsel %vm472_vm0, %v469_v13, 0.0  ;;  %v5926_v56 = vld [vmem:[%s7779_s3] sm:$0xff]   ;;  %v5927_v57 = vld [vmem:[%s7779_s3 + $0x8] sm:$0xff]   ;;  %s6229_s17 = smov 96  }
  0x41   : > { %5363 = vmatprep.subr.bf16.mxu1 %v5926_v56  ;;  %s6230_s19 = smov 104   ;;  %vm808_vm2 = vcmask 64512   ;;  %s6231_s16 = smov 64   ;;  %vm2764_vm3 = vcmask 1043456   ;;  %vm4400_vm4 = vcmask 130048   ;;  %vm4409_vm5 = vcmask 195584  }
  0x42   : > { %5364 = vmatpush3.bf16.msra.mxu1 %v5926_v56  ;;  %s6232_s15 = smov 8   ;;  %s6233_s24 = smov 16  }
  0x43   : > { %477 = vadd.xlane.f32.xlu0 %v476_v8  ;;  %483 = vadd.xlane.f32.xlu1 %v482_v9  ;;  %s5204_s23 = sshll.u32 %s6328_s29, 10  ;;  %s4965_s29 = scalar_lea.sflag [#allocation4], %s6411_s30 }
  0x44   : > { %5365 = vmatprep.subr.bf16.mxu1 %v5927_v57  ;;  %p7825_p11 = scmp.ne.s32.totalorder %s7805_s20, 0 }
  0x46   : > { %5366 = vmatpush3.bf16.msra.mxu1 %v5927_v57 }
  0x47   : > { %486 = vadd.xlane.f32.xlu0 %v485_v10  ;;  %489 = vadd.xlane.f32.xlu1 %v488_v11 }
  0x4b   : > { %492 = vadd.xlane.f32.xlu0 %v491_v14  ;;  %495 = vadd.xlane.f32.xlu1 %v494_v15 }
  0xcc   : > { %v475_v16 = vpop.xlane.xlu0 %474  ;;  %v481_v17 = vpop.xlane.xlu1 %480 }
  0xcd   : > { %v498_v18 = vmul.f32 0.03125, %v475_v16  ;;  %v500_v19 = vmul.f32 0.03125, %v481_v17 }
  0xcf   : > { %v6439_v20 = vsub.f32 %v462_v0, %v498_v18  ;;  %v6441_v21 = vsub.f32 %v464_v1, %v500_v19  ;;  %v5060_v19 = vld [vmem:[%s7777_s1] ss:$0 sm:$0xff] }
  0xd0   : > { %v478_v22 = vpop.xlane.xlu0 %477  ;;  %v484_v23 = vpop.xlane.xlu1 %483 }
  0xd1   : > { %v499_v24 = vmul.f32 0.03125, %v478_v22  ;;  %v501_v25 = vmul.f32 0.03125, %v484_v23  ;;  %v514_v26 = vmul.f32 %v6439_v20, %v6439_v20  ;;  %v516_v27 = vmul.f32 %v6441_v21, %v6441_v21 }
  0xd3   : > { %v6447_v28 = vsub.f32 %v463_v2, %v499_v24  ;;  %v6449_v29 = vsub.f32 %v465_v5, %v501_v25  ;;  %v522_v30 = vsel %vm472_vm0, %v514_v26, 0.0  ;;  %v528_v33 = vsel %vm472_vm0, %v516_v27, 0.0  ;;  %v5061_v27 = vld [vmem:[%s7778_s2] ss:$0 sm:$0xff] }
  0xd4   : > { %523 = vadd.xlane.f32.xlu0 %v522_v30  ;;  %v487_v31 = vpop.xlane.xlu0 %486  ;;  %v490_v32 = vpop.xlane.xlu1 %489 }
  0xd5   : > { %v502_v34 = vmul.f32 0.03125, %v487_v31  ;;  %v503_v35 = vmul.f32 0.03125, %v490_v32  ;;  %v515_v36 = vmul.f32 %v6447_v28, %v6447_v28  ;;  %v517_v37 = vmul.f32 %v6449_v29, %v6449_v29 }
  0xd7   : > { %v6457_v38 = vsub.f32 %v466_v6, %v502_v34  ;;  %v6459_v39 = vsub.f32 %v467_v7, %v503_v35  ;;  %v525_v40 = vsel %vm472_vm0, %v515_v36, 0.0  ;;  %v531_v43 = vsel %vm472_vm0, %v517_v37, 0.0 }
  0xd8   : > { %529 = vadd.xlane.f32.xlu0 %v528_v33  ;;  %526 = vadd.xlane.f32.xlu1 %v525_v40  ;;  %v493_v41 = vpop.xlane.xlu0 %492  ;;  %v496_v42 = vpop.xlane.xlu1 %495 }
  0xd9   : > { %v504_v44 = vmul.f32 0.03125, %v493_v41  ;;  %v505_v45 = vmul.f32 0.03125, %v496_v42  ;;  %v518_v46 = vmul.f32 %v6457_v38, %v6457_v38  ;;  %v519_v47 = vmul.f32 %v6459_v39, %v6459_v39 }
  0xdb   : > { %v6467_v48 = vsub.f32 %v468_v12, %v504_v44  ;;  %v6469_v49 = vsub.f32 %v469_v13, %v505_v45  ;;  %v534_v50 = vsel %vm472_vm0, %v518_v46, 0.0  ;;  %v537_v51 = vsel %vm472_vm0, %v519_v47, 0.0 }
  0xdc   : > { %532 = vadd.xlane.f32.xlu1 %v531_v43  ;;  %535 = vadd.xlane.f32.xlu0 %v534_v50 }
  0xdd   : > { %v520_v52 = vmul.f32 %v6467_v48, %v6467_v48  ;;  %v521_v53 = vmul.f32 %v6469_v49, %v6469_v49 }
  0xdf   : > { %v540_v54 = vsel %vm472_vm0, %v520_v52, 0.0  ;;  %v543_v55 = vsel %vm472_vm0, %v521_v53, 0.0 }
  0xe0   : > { %538 = vadd.xlane.f32.xlu1 %v537_v51  ;;  %541 = vadd.xlane.f32.xlu0 %v540_v54 }
  0xe4   : > { %544 = vadd.xlane.f32.xlu1 %v543_v55 }
 0x161   : > { %v524_v58 = vpop.xlane.xlu0 %523 }
 0x162   : > { %v546_v59 = vmul.f32 0.03125, %v524_v58  ;;  %v5062_v58 = vld [vmem:[%s7780_s4] ss:$0 sm:$0xff] }
 0x164   : > { %v554_v60 = vadd.f32 1e-05, %v546_v59 }
 0x165   : > { %v527_v61 = vpop.xlane.xlu1 %526  ;;  %v530_v62 = vpop.xlane.xlu0 %529 }
 0x166   : > { %5940 = vrsqrt.f32 %v554_v60  ;;  %v547_v63 = vmul.f32 0.03125, %v527_v61  ;;  %v548_v0 = vmul.f32 0.03125, %v530_v62 }
 0x168   : > { %v555_v1 = vadd.f32 1e-05, %v547_v63  ;;  %v556_v2 = vadd.f32 1e-05, %v548_v0 }
 0x169   : > { %v533_v3 = vpop.xlane.xlu1 %532  ;;  %v536_v4 = vpop.xlane.xlu0 %535 }
 0x16a   : > { %5942 = vrsqrt.f32 %v555_v1  ;;  %v549_v5 = vmul.f32 0.03125, %v533_v3  ;;  %v550_v6 = vmul.f32 0.03125, %v536_v4  ;;  %v7795_v4 = vmov 0.0  }
 0x16b   : > { %5944 = vrsqrt.f32 %v556_v2  ;;  %5375 = vmatprep.subr.bf16.mxu1 %v7795_v4  ;;  %5387 = vmatprep.subr.bf16.mxu0 %v7795_v4 }
 0x16c   : > { %v557_v7 = vadd.f32 1e-05, %v549_v5  ;;  %v558_v8 = vadd.f32 1e-05, %v550_v6  ;;  %5389 = vmatprep.mubr.msk.bf16.mxu0 %vm6227_vm1, %v7795_v4 }
 0x16d   : > { %v539_v9 = vpop.xlane.xlu1 %538  ;;  %v542_v10 = vpop.xlane.xlu0 %541 }
 0x16e   : > { %5946 = vrsqrt.f32 %v557_v7  ;;  %v551_v11 = vmul.f32 0.03125, %v539_v9  ;;  %v552_v12 = vmul.f32 0.03125, %v542_v10 }
 0x16f   : > { %5948 = vrsqrt.f32 %v558_v8 }
 0x170   : > { %v5941_v13 = vpop.eup %5940  ;;  %v559_v14 = vadd.f32 1e-05, %v551_v11  ;;  %v560_v15 = vadd.f32 1e-05, %v552_v12 }
 0x171   : > { %v545_v16 = vpop.xlane.xlu1 %544  ;;  %v570_v17 = vmul.f32 %v5941_v13, %v6439_v20 }
 0x172   : > { %5950 = vrsqrt.f32 %v559_v14  ;;  %v553_v18 = vmul.f32 0.03125, %v545_v16 }
 0x173   : > { %5952 = vrsqrt.f32 %v560_v15  ;;  %v584_v26 = vmul.f32 %v5060_v19, %v570_v17 }
 0x174   : > { %v5943_v22 = vpop.eup %5942  ;;  %v561_v23 = vadd.f32 1e-05, %v553_v18 }
 0x175   : > { %v5945_v24 = vpop.eup %5944  ;;  %v571_v25 = vmul.f32 %v5943_v22, %v6447_v28  ;;  %v598_v33 = vadd.f32 %v5061_v27, %v584_v26 }
 0x176   : > { %5954 = vrsqrt.f32 %v561_v23  ;;  %v572_v20 = vmul.f32 %v5945_v24, %v6441_v21 }
 0x177   : > { %v585_v30 = vmul.f32 %v5060_v19, %v571_v25 }
 0x178   : > { %v5947_v31 = vpop.eup %5946  ;;  %v586_v36 = vmul.f32 %v5060_v19, %v572_v20 }
 0x179   : > { %v5949_v32 = vpop.eup %5948  ;;  %v599_v34 = vadd.f32 %v5061_v27, %v585_v30  ;;  %v573_v35 = vmul.f32 %v5947_v31, %v6449_v29 }
 0x17a   : > { %v574_v37 = vmul.f32 %v5949_v32, %v6457_v38  ;;  %v600_v43 = vadd.f32 %v5061_v27, %v586_v36 }
 0x17b   : > { %v606_v40 = vpack.c.bf16 %v599_v34, %v598_v33  ;;  %v587_v28 = vmul.f32 %v5060_v19, %v573_v35 }
 0x17c   : > { %v5951_v41 = vpop.eup %5950  ;;  %v588_v45 = vmul.f32 %v5060_v19, %v574_v37 }
 0x17d   : > { %v5953_v42 = vpop.eup %5952  ;;  %5367 = vmatprep.mubr.msk.bf16.mxu1 %vm472_vm0, %v606_v40  ;;  %v601_v44 = vadd.f32 %v5061_v27, %v587_v28  ;;  %v575_v21 = vmul.f32 %v5951_v41, %v6459_v39 }
 0x17e   : > { %v576_v46 = vmul.f32 %v5953_v42, %v6467_v48  ;;  %v602_v29 = vadd.f32 %v5061_v27, %v588_v45 }
 0x17f   : > { %v607_v47 = vpack.c.bf16 %v601_v44, %v600_v43  ;;  %v589_v50 = vmul.f32 %v5060_v19, %v575_v21 }
 0x180   : > { %v5955_v51 = vpop.eup %5954  ;;  %v590_v53 = vmul.f32 %v5060_v19, %v576_v46 }
 0x181   : > { %5368 = vmatmul.mubr.msk.bf16.vlgmr.msra.gmra.mrb[0].mxu1 %vm472_vm0, %v607_v47  ;;  %v603_v38 = vadd.f32 %v5061_v27, %v589_v50  ;;  %v577_v52 = vmul.f32 %v5955_v51, %v6469_v49 }
 0x182   : > { %v604_v56 = vadd.f32 %v5061_v27, %v590_v53 }
 0x183   : > { %v608_v54 = vpack.c.bf16 %v603_v38, %v602_v29  ;;  %v591_v55 = vmul.f32 %v5060_v19, %v577_v52 }
 0x185   : > { %5371 = vmatprep.mubr.msk.bf16.mxu1 %vm472_vm0, %v608_v54  ;;  %v605_v57 = vadd.f32 %v5061_v27, %v591_v55 }
 0x187   : > { %v609_v39 = vpack.c.bf16 %v605_v57, %v604_v56 }
 0x189   : > { %5372 = vmatmul.mubr.msk.bf16.gmra.mrb[4].mxu1 %vm472_vm0, %v609_v39 }
 0x18a   : > { %5377 = vmatprep.mubr.msk.bf16.mxu1 %vm6227_vm1, %v7795_v4 }
 0x254   : > { %v5369_v48 = vpop.f32.mrb[0].mxu1 }
 0x255   : > { %v679_v59 = vpop.f32.mrb[1].mxu1  ;;  %v688_v61 = vadd.f32 %v5369_v48, %v5062_v58 }
 0x256   : > { %v5370_v60 = vpop.f32.mrb[2].mxu1  ;;  %v680_v63 = vadd.f32 %v5062_v58, %v679_v59 }
 0x257   : > { %v691_v62 = vadd.f32 %v5370_v60, %v5062_v58  ;;  %v682_v49 = vpop.f32.mrb[3].mxu1  ;;  %v6529_v18 = vpack.c.bf16 %v688_v61, %v688_v61 }
 0x258   : > { %v683_v0 = vadd.f32 %v5062_v58, %v682_v49  ;;  %v6515_v14 = vpack.c.bf16 %v680_v63, %v680_v63 }
 0x259   : > { %v711_v1 = vpack.c.bf16 %v691_v62, %v688_v61  ;;  %v6519_v15 = vpack.c.bf16 %v691_v62, %v691_v62 }
 0x25a   : > { %v710_v2 = vpack.c.bf16 %v683_v0, %v680_v63  ;;  %v6521_v16 = vpack.c.bf16 %v683_v0, %v683_v0 }
 0x25b   : > { %720 = vrot.lane.b32.xlu1 %v711_v1, %s6225_s27 }
 0x25c   : > { %718 = vrot.lane.b32.xlu0 %v710_v2, %s6225_s27  ;;  %v5373_v3 = vpop.f32.mrb[4].mxu1 }
 0x25d   : > { %v695_v5 = vpop.f32.mrb[5].mxu1  ;;  %v704_v7 = vadd.f32 %v5373_v3, %v5062_v58 }
 0x25e   : > { %v5374_v6 = vpop.f32.mrb[6].mxu1  ;;  %v696_v10 = vadd.f32 %v5062_v58, %v695_v5 }
 0x25f   : > { %v707_v8 = vadd.f32 %v5374_v6, %v5062_v58  ;;  %v698_v9 = vpop.f32.mrb[7].mxu1  ;;  %v6543_v23 = vpack.c.bf16 %v704_v7, %v704_v7 }
 0x260   : > { %v699_v11 = vadd.f32 %v5062_v58, %v698_v9  ;;  %v6527_v17 = vpack.c.bf16 %v696_v10, %v696_v10 }
 0x261   : > { %v6508_v12 = vpack.c.bf16 %v707_v8, %v704_v7  ;;  %v6535_v19 = vpack.c.bf16 %v707_v8, %v707_v8 }
 0x262   : > { %v712_v13 = vpack.c.bf16 %v699_v11, %v696_v10  ;;  %v6537_v22 = vpack.c.bf16 %v699_v11, %v699_v11 }
 0x263   : > { %724 = vrot.lane.b32.xlu0 %v6508_v12, %s6225_s27 }
 0x264   : > { %722 = vrot.lane.b32.xlu1 %v712_v13, %s6225_s27 }
 0x267   : > { %726 = vrot.lane.b32.xlu0 %v710_v2, %s6228_s14 }
 0x268   : > { %806 = vrot.lane.b32.xlu1 %v6515_v14, %s6229_s17 }
 0x26b   : > { %951 = vrot.lane.b32.xlu0 %v6519_v15, %s6229_s17 }
 0x26c   : > { %855 = vrot.lane.b32.xlu1 %v6521_v16, %s6229_s17 }
 0x26f   : > { %999 = vrot.lane.b32.xlu0 %v6527_v17, %s6229_s17 }
 0x270   : > { %903 = vrot.lane.b32.xlu1 %v6529_v18, %s6229_s17 }
 0x273   : > { %730 = vrot.lane.b32.xlu0 %v712_v13, %s6228_s14 }
 0x274   : > { %728 = vrot.lane.b32.xlu1 %v711_v1, %s6228_s14 }
 0x277   : > { %1143 = vrot.lane.b32.xlu0 %v6535_v19, %s6229_s17 }
 0x278   : > { %1047 = vrot.lane.b32.xlu1 %v6537_v22, %s6229_s17 }
 0x27c   : > { %1095 = vrot.lane.b32.xlu1 %v6543_v23, %s6229_s17 }
 0x280   : > { %732 = vrot.lane.b32.xlu1 %v6508_v12, %s6228_s14  ;;  %s7725_s14 = scalar_lea.hbm %s7789_s13, %s5204_s23 }
 0x2cd   : > { %v721_v27 = vpop.permute.xlu1 %720 }
 0x2ce   : > { %v719_v24 = vpop.permute.xlu0 %718  ;;  %v6556_v20 = vcombine.low %v721_v27, %v721_v27  ;;  %v6561_v32 = vcombine.high %v721_v27, %v721_v27 }
 0x2cf   : > { %v6548_v25 = vcombine.low %v719_v24, %v719_v24  ;;  %v6550_v26 = vcombine.high %v719_v24, %v719_v24 }
 0x2d1   : > { %1239 = vrot.lane.b32.xlu1 %v6550_v26, %s6229_s17  ;;  %1191 = vrot.lane.b32.xlu0 %v6548_v25, %s6229_s17 }
 0x2d5   : > { %1287 = vrot.lane.b32.xlu1 %v6556_v20, %s6229_s17  ;;  %734 = vrot.lane.b32.xlu0 %v710_v2, %s6230_s19  ;;  %v725_v30 = vpop.permute.xlu0 %724 }
 0x2d6   : > { %v723_v31 = vpop.permute.xlu1 %722  ;;  %v6576_v28 = vcombine.low %v725_v30, %v725_v30  ;;  %v6581_v43 = vcombine.high %v725_v30, %v725_v30 }
 0x2d7   : > { %v6566_v35 = vcombine.low %v723_v31, %v723_v31  ;;  %v6568_v36 = vcombine.high %v723_v31, %v723_v31 }
 0x2d9   : > { %736 = vrot.lane.b32.xlu1 %v711_v1, %s6230_s19  ;;  %1335 = vrot.lane.b32.xlu0 %v6561_v32, %s6229_s17  ;;  %v727_v33 = vpop.permute.xlu0 %726 }
 0x2da   : > { %v807_v34 = vpop.permute.xlu1 %806  ;;  %v6594_v47 = vcombine.low %v727_v33, %v727_v33  ;;  %v6596_v50 = vcombine.high %v727_v33, %v727_v33 }
 0x2db   : > { %v813_v37 = vsel %vm808_vm2, %v807_v34, 0 }
 0x2dc   : > { %5376 = vmatpush3.bf16.xpose.msra.mxu1 %v813_v37 }
 0x2dd   : > { %1431 = vrot.lane.b32.xlu1 %v6568_v36, %s6229_s17  ;;  %1383 = vrot.lane.b32.xlu0 %v6566_v35, %s6229_s17  ;;  %v952_v41 = vpop.permute.xlu0 %951 }
 0x2de   : > { %v856_v40 = vpop.permute.xlu1 %855  ;;  %5381 = vmatprep.subr.bf16.mxu1 %v7795_v4  ;;  %v957_v29 = vsel %vm808_vm2, %v952_v41, 0 }
 0x2df   : > { %v861_v44 = vsel %vm808_vm2, %v856_v40, 0 }
 0x2e1   : > { %738 = vrot.lane.b32.xlu0 %v712_v13, %s6230_s19  ;;  %1479 = vrot.lane.b32.xlu1 %v6576_v28, %s6229_s17  ;;  %v1000_v45 = vpop.permute.xlu0 %999 }
 0x2e2   : > { %v904_v42 = vpop.permute.xlu1 %903  ;;  %v1005_v38 = vsel %vm808_vm2, %v1000_v45, 0 }
 0x2e3   : > { %5378 = vmatmul.mubr.msk.bf16.vlgmr.msra.gmra.mrb[8].mxu1 %vm808_vm2, %v6515_v14  ;;  %v909_v21 = vsel %vm808_vm2, %v904_v42, 0 }
 0x2e4   : > { %5382 = vmatpush3.bf16.xpose.msra.mxu1 %v861_v44  ;;  %5388 = vmatpush3.bf16.xpose.msra.mxu0 %v909_v21 }
 0x2e5   : > { %1527 = vrot.lane.b32.xlu0 %v6581_v43, %s6229_s17  ;;  %740 = vrot.lane.b32.xlu1 %v6508_v12, %s6230_s19  ;;  %v731_v54 = vpop.permute.xlu0 %730  ;;  %s6235_s19 = smov [#allocation5]  }
 0x2e6   : > { %v729_v46 = vpop.permute.xlu1 %728  ;;  %5383 = vmatprep.mubr.msk.bf16.mxu1 %vm6227_vm1, %v7795_v4  ;;  %5393 = vmatprep.subr.bf16.mxu1 %v7795_v4  ;;  %v6621_v56 = vcombine.low %v731_v54, %v731_v54  ;;  %v6623_v57 = vcombine.high %v731_v54, %v731_v54 }
 0x2e7   : > { %5399 = vmatprep.subr.bf16.mxu0 %v7795_v4  ;;  %v6605_v52 = vcombine.low %v729_v46, %v729_v46  ;;  %v6607_v53 = vcombine.high %v729_v46, %v729_v46 }
 0x2e9   : > { %1623 = vrot.lane.b32.xlu1 %v6596_v50, %s6229_s17  ;;  %1575 = vrot.lane.b32.xlu0 %v6594_v47, %s6229_s17  ;;  %v1144_v61 = vpop.permute.xlu0 %1143 }
 0x2ea   : > { %v1048_v51 = vpop.permute.xlu1 %1047  ;;  %v1149_v62 = vsel %vm808_vm2, %v1144_v61, 0 }
 0x2eb   : > { %5384 = vmatmul.mubr.msk.bf16.vlgmr.msra.gmra.mrb[12].mxu1 %vm808_vm2, %v6521_v16  ;;  %5390 = vmatmul.mubr.msk.bf16.vlgmr.msra.gmra.mrb[0].mxu0 %vm808_vm2, %v6529_v18  ;;  %v1053_v48 = vsel %vm808_vm2, %v1048_v51, 0 }
 0x2ec   : > { %5394 = vmatpush3.bf16.xpose.msra.mxu1 %v957_v29  ;;  %5400 = vmatpush3.bf16.xpose.msra.mxu0 %v1005_v38 }
 0x2ed   : > { %1719 = vrot.lane.b32.xlu1 %v6607_v53, %s6229_s17  ;;  %1671 = vrot.lane.b32.xlu0 %v6605_v52, %s6229_s17 }
 0x2ee   : > { %v1096_v55 = vpop.permute.xlu1 %1095  ;;  %5395 = vmatprep.mubr.msk.bf16.mxu1 %vm6227_vm1, %v7795_v4  ;;  %5401 = vmatprep.mubr.msk.bf16.mxu0 %vm6227_vm1, %v7795_v4 }
 0x2ef   : > { %5405 = vmatprep.subr.bf16.mxu1 %v7795_v4  ;;  %5411 = vmatprep.subr.bf16.mxu0 %v7795_v4  ;;  %v1101_v58 = vsel %vm808_vm2, %v1096_v55, 0 }
 0x2f1   : > { %1815 = vrot.lane.b32.xlu1 %v6623_v57, %s6229_s17  ;;  %1767 = vrot.lane.b32.xlu0 %v6621_v56, %s6229_s17 }
 0x2f2   : > { %v733_v39 = vpop.permute.xlu1 %732 }
 0x2f3   : > { %v6633_v59 = vcombine.low %v733_v39, %v733_v39  ;;  %v6635_v60 = vcombine.high %v733_v39, %v733_v39  ;;  %5396 = vmatmul.mubr.msk.bf16.vlgmr.msra.gmra.mrb[16].mxu1 %vm808_vm2, %v6519_v15  ;;  %5402 = vmatmul.mubr.msk.bf16.vlgmr.msra.gmra.mrb[4].mxu0 %vm808_vm2, %v6527_v17 }
 0x2f4   : > { %5406 = vmatpush3.bf16.xpose.msra.mxu1 %v1053_v48  ;;  %5412 = vmatpush3.bf16.xpose.msra.mxu0 %v1101_v58 }
 0x2f5   : > { %1911 = vrot.lane.b32.xlu1 %v6635_v60, %s6229_s17  ;;  %1863 = vrot.lane.b32.xlu0 %v6633_v59, %s6229_s17 }
 0x2f6   : > { %5407 = vmatprep.mubr.msk.bf16.mxu1 %vm6227_vm1, %v7795_v4  ;;  %5413 = vmatprep.mubr.msk.bf16.mxu0 %vm6227_vm1, %v7795_v4 }
 0x2f7   : > { %5417 = vmatprep.subr.bf16.mxu1 %v7795_v4  ;;  %5423 = vmatprep.subr.bf16.mxu0 %v7795_v4 }
 0x2fb   : > { %5408 = vmatmul.mubr.msk.bf16.vlgmr.msra.gmra.mrb[20].mxu1 %vm808_vm2, %v6537_v22  ;;  %5414 = vmatmul.mubr.msk.bf16.vlgmr.msra.gmra.mrb[8].mxu0 %vm808_vm2, %v6543_v23 }
 0x2fc   : > { %5418 = vmatpush3.bf16.xpose.msra.mxu1 %v1149_v62  ;;  %5419 = vmatprep.mubr.msk.bf16.mxu1 %vm6227_vm1, %v7795_v4 }
 0x2fd   : > { %5429 = vmatprep.subr.bf16.mxu1 %v7795_v4  ;;  %5425 = vmatprep.mubr.msk.bf16.mxu0 %vm6227_vm1, %v7795_v4 }
 0x303   : > { %5420 = vmatmul.mubr.msk.bf16.vlgmr.msra.gmra.mrb[24].mxu1 %vm808_vm2, %v6535_v19 }
 0x304   : > { %5431 = vmatprep.mubr.msk.bf16.mxu1 %vm6227_vm1, %v7795_v4 }
 0x343   : > { %v1240_v49 = vpop.permute.xlu1 %1239  ;;  %v1192_v63 = vpop.permute.xlu0 %1191 }
 0x344   : > { %v1245_v0 = vsel %vm808_vm2, %v1240_v49, 0  ;;  %v1197_v1 = vsel %vm808_vm2, %v1192_v63, 0 }
 0x345   : > { %5424 = vmatpush3.bf16.xpose.msra.mxu0 %v1197_v1  ;;  %5430 = vmatpush3.bf16.xpose.msra.mxu1 %v1245_v0 }
 0x346   : > { %5435 = vmatprep.subr.bf16.mxu0 %v7795_v4  ;;  %5441 = vmatprep.subr.bf16.mxu1 %v7795_v4 }
 0x347   : > { %v1288_v2 = vpop.permute.xlu1 %1287  ;;  %v735_v3 = vpop.permute.xlu0 %734 }
 0x348   : > { %v6669_v5 = vcombine.low %v735_v3, %v735_v3  ;;  %v6671_v6 = vcombine.high %v735_v3, %v735_v3  ;;  %v1293_v9 = vsel %vm808_vm2, %v1288_v2, 0 }
 0x34a   : > { %2007 = vrot.lane.b32.xlu1 %v6671_v6, %s6229_s17  ;;  %1959 = vrot.lane.b32.xlu0 %v6669_v5, %s6229_s17 }
 0x34b   : > { %v737_v7 = vpop.permute.xlu1 %736  ;;  %v1336_v8 = vpop.permute.xlu0 %1335 }
 0x34c   : > { %v6678_v10 = vcombine.low %v737_v7, %v737_v7  ;;  %v6680_v11 = vcombine.high %v737_v7, %v737_v7  ;;  %v1341_v12 = vsel %vm808_vm2, %v1336_v8, 0  ;;  %5426 = vmatmul.mubr.msk.bf16.vlgmr.msra.gmra.mrb[12].mxu0 %vm808_vm2, %v6548_v25  ;;  %5432 = vmatmul.mubr.msk.bf16.vlgmr.msra.gmra.mrb[28].mxu1 %vm808_vm2, %v6550_v26 }
 0x34d   : > { %5436 = vmatpush3.bf16.xpose.msra.mxu0 %v1293_v9  ;;  %5442 = vmatpush3.bf16.xpose.msra.mxu1 %v1341_v12 }
 0x34e   : > { %2103 = vrot.lane.b32.xlu1 %v6680_v11, %s6229_s17  ;;  %2055 = vrot.lane.b32.xlu0 %v6678_v10, %s6229_s17 }
 0x34f   : > { %v1432_v13 = vpop.permute.xlu1 %1431  ;;  %v1384_v24 = vpop.permute.xlu0 %1383  ;;  %5437 = vmatprep.mubr.msk.bf16.mxu0 %vm6227_vm1, %v7795_v4  ;;  %5443 = vmatprep.mubr.msk.bf16.mxu1 %vm6227_vm1, %v7795_v4 }
 0x350   : > { %5447 = vmatprep.subr.bf16.mxu0 %v7795_v4  ;;  %5453 = vmatprep.subr.bf16.mxu1 %v7795_v4  ;;  %v1437_v31 = vsel %vm808_vm2, %v1432_v13, 0  ;;  %v1389_v33 = vsel %vm808_vm2, %v1384_v24, 0 }
 0x353   : > { %v1480_v27 = vpop.permute.xlu1 %1479  ;;  %v739_v30 = vpop.permute.xlu0 %738 }
 0x354   : > { %v6699_v34 = vcombine.low %v739_v30, %v739_v30  ;;  %v6701_v37 = vcombine.high %v739_v30, %v739_v30  ;;  %5438 = vmatmul.mubr.msk.bf16.vlgmr.msra.gmra.mrb[16].mxu0 %vm808_vm2, %v6556_v20  ;;  %5444 = vmatmul.mubr.msk.bf16.vlgmr.msra.gmra.mrb[32].mxu1 %vm808_vm2, %v6561_v32  ;;  %v1485_v21 = vsel %vm808_vm2, %v1480_v27, 0 }
 0x355   : > { %5448 = vmatpush3.bf16.xpose.msra.mxu0 %v1389_v33  ;;  %5454 = vmatpush3.bf16.xpose.msra.mxu1 %v1437_v31 }
 0x356   : > { %2199 = vrot.lane.b32.xlu1 %v6701_v37, %s6229_s17  ;;  %2151 = vrot.lane.b32.xlu0 %v6699_v34, %s6229_s17 }
 0x357   : > { %v741_v40 = vpop.permute.xlu1 %740  ;;  %5449 = vmatprep.mubr.msk.bf16.mxu0 %vm6227_vm1, %v7795_v4  ;;  %5455 = vmatprep.mubr.msk.bf16.mxu1 %vm6227_vm1, %v7795_v4  ;;  %v1528_v44 = vpop.permute.xlu0 %1527 }
 0x358   : > { %v6715_v41 = vcombine.low %v741_v40, %v741_v40  ;;  %v6717_v42 = vcombine.high %v741_v40, %v741_v40  ;;  %5459 = vmatprep.subr.bf16.mxu0 %v7795_v4  ;;  %5465 = vmatprep.subr.bf16.mxu1 %v7795_v4  ;;  %v1533_v45 = vsel %vm808_vm2, %v1528_v44, 0 }
 0x35a   : > { %7808 = vst [vmem:[#allocation12_spill] sm:$0xff] %v6715_v41  ;;  %7809 = vst [vmem:[#allocation13_spill] sm:$0xff] %v6717_v42  ;;  %2295 = vrot.lane.b32.xlu1 %v6717_v42, %s6229_s17  ;;  %2247 = vrot.lane.b32.xlu0 %v6715_v41, %s6229_s17  ;;  %s6234_s17 = smov 24  }
 0x35b   : > { %v1624_v46 = vpop.permute.xlu1 %1623  ;;  %v1576_v51 = vpop.permute.xlu0 %1575 }
 0x35c   : > { %5450 = vmatmul.mubr.msk.bf16.vlgmr.msra.gmra.mrb[20].mxu0 %vm808_vm2, %v6566_v35  ;;  %5456 = vmatmul.mubr.msk.bf16.vlgmr.msra.gmra.mrb[36].mxu1 %vm808_vm2, %v6568_v36 }
 0x35d   : > { %5460 = vmatpush3.bf16.xpose.msra.mxu0 %v1485_v21  ;;  %5466 = vmatpush3.bf16.xpose.msra.mxu1 %v1533_v45 }
 0x35e   : > { %2808 = vrot.lane.b32.xlu1 %v6521_v16, %s6231_s16  ;;  %2759 = vrot.lane.b32.xlu0 %v6515_v14, %s6231_s16  ;;  %v1629_v14 = vsel %vm808_vm2, %v1624_v46, 0  ;;  %v1581_v16 = vsel %vm808_vm2, %v1576_v51, 0 }
 0x35f   : > { %5461 = vmatprep.mubr.msk.bf16.mxu0 %vm6227_vm1, %v7795_v4  ;;  %5467 = vmatprep.mubr.msk.bf16.mxu1 %vm6227_vm1, %v7795_v4 }
 0x360   : > { %5471 = vmatprep.subr.bf16.mxu0 %v7795_v4  ;;  %5477 = vmatprep.subr.bf16.mxu1 %v7795_v4 }
 0x362   : > { %2904 = vrot.lane.b32.xlu1 %v6519_v15, %s6231_s16  ;;  %2856 = vrot.lane.b32.xlu0 %v6529_v18, %s6231_s16  ;;  %v1720_v15 = vpop.permute.xlu1 %1719  ;;  %v1672_v18 = vpop.permute.xlu0 %1671 }
 0x364   : > { %5462 = vmatmul.mubr.msk.bf16.vlgmr.msra.gmra.mrb[24].mxu0 %vm808_vm2, %v6576_v28  ;;  %5468 = vmatmul.mubr.msk.bf16.vlgmr.msra.gmra.mrb[40].mxu1 %vm808_vm2, %v6581_v43 }
 0x365   : > { %5472 = vmatpush3.bf16.xpose.msra.mxu0 %v1581_v16  ;;  %5478 = vmatpush3.bf16.xpose.msra.mxu1 %v1629_v14 }
 0x366   : > { %3000 = vrot.lane.b32.xlu1 %v6537_v22, %s6231_s16  ;;  %2952 = vrot.lane.b32.xlu0 %v6527_v17, %s6231_s16  ;;  %v1725_v17 = vsel %vm808_vm2, %v1720_v15, 0  ;;  %v1677_v22 = vsel %vm808_vm2, %v1672_v18, 0 }
 0x367   : > { %5473 = vmatprep.mubr.msk.bf16.mxu0 %vm6227_vm1, %v7795_v4  ;;  %5479 = vmatprep.mubr.msk.bf16.mxu1 %vm6227_vm1, %v7795_v4 }
 0x368   : > { %5483 = vmatprep.subr.bf16.mxu0 %v7795_v4  ;;  %5489 = vmatprep.subr.bf16.mxu1 %v7795_v4 }
 0x36a   : > { %3096 = vrot.lane.b32.xlu1 %v6535_v19, %s6231_s16  ;;  %3048 = vrot.lane.b32.xlu0 %v6543_v23, %s6231_s16  ;;  %v1816_v19 = vpop.permute.xlu1 %1815  ;;  %v1768_v23 = vpop.permute.xlu0 %1767 }
 0x36c   : > { %5474 = vmatmul.mubr.msk.bf16.vlgmr.msra.gmra.mrb[28].mxu0 %vm808_vm2, %v6594_v47  ;;  %5480 = vmatmul.mubr.msk.bf16.vlgmr.msra.gmra.mrb[44].mxu1 %vm808_vm2, %v6596_v50 }
 0x36d   : > { %5484 = vmatpush3.bf16.xpose.msra.mxu0 %v1677_v22  ;;  %5490 = vmatpush3.bf16.xpose.msra.mxu1 %v1725_v17 }
 0x36e   : > { %3192 = vrot.lane.b32.xlu1 %v6550_v26, %s6231_s16  ;;  %3144 = vrot.lane.b32.xlu0 %v6548_v25, %s6231_s16  ;;  %v1821_v25 = vsel %vm808_vm2, %v1816_v19, 0  ;;  %v1773_v26 = vsel %vm808_vm2, %v1768_v23, 0 }
 0x36f   : > { %5485 = vmatprep.mubr.msk.bf16.mxu0 %vm6227_vm1, %v7795_v4  ;;  %5491 = vmatprep.mubr.msk.bf16.mxu1 %vm6227_vm1, %v7795_v4 }
 0x370   : > { %5495 = vmatprep.subr.bf16.mxu0 %v7795_v4  ;;  %5501 = vmatprep.subr.bf16.mxu1 %v7795_v4 }
 0x372   : > { %3288 = vrot.lane.b32.xlu1 %v6561_v32, %s6231_s16  ;;  %3240 = vrot.lane.b32.xlu0 %v6556_v20, %s6231_s16  ;;  %v1912_v20 = vpop.permute.xlu1 %1911  ;;  %v1864_v32 = vpop.permute.xlu0 %1863 }
 0x374   : > { %5486 = vmatmul.mubr.msk.bf16.vlgmr.msra.gmra.mrb[32].mxu0 %vm808_vm2, %v6605_v52  ;;  %5492 = vmatmul.mubr.msk.bf16.vlgmr.msra.gmra.mrb[48].mxu1 %vm808_vm2, %v6607_v53 }
 0x375   : > { %5496 = vmatpush3.bf16.xpose.msra.mxu0 %v1773_v26  ;;  %5502 = vmatpush3.bf16.xpose.msra.mxu1 %v1821_v25 }
 0x376   : > { %3480 = vrot.lane.b32.xlu1 %v6581_v43, %s6231_s16  ;;  %3432 = vrot.lane.b32.xlu0 %v6576_v28, %s6231_s16  ;;  %v1917_v28 = vsel %vm808_vm2, %v1912_v20, 0  ;;  %v1869_v43 = vsel %vm808_vm2, %v1864_v32, 0 }
 0x377   : > { %5497 = vmatprep.mubr.msk.bf16.mxu0 %vm6227_vm1, %v7795_v4  ;;  %5503 = vmatprep.mubr.msk.bf16.mxu1 %vm6227_vm1, %v7795_v4 }
 0x378   : > { %5507 = vmatprep.subr.bf16.mxu0 %v7795_v4  ;;  %5513 = vmatprep.subr.bf16.mxu1 %v7795_v4 }
 0x37a   : > { %3576 = vrot.lane.b32.xlu1 %v6596_v50, %s6231_s16  ;;  %3528 = vrot.lane.b32.xlu0 %v6594_v47, %s6231_s16 }
 0x37c   : > { %5498 = vmatmul.mubr.msk.bf16.vlgmr.msra.gmra.mrb[36].mxu0 %vm808_vm2, %v6621_v56  ;;  %5504 = vmatmul.mubr.msk.bf16.vlgmr.msra.gmra.mrb[52].mxu1 %vm808_vm2, %v6623_v57 }
 0x37d   : > { %5508 = vmatpush3.bf16.xpose.msra.mxu0 %v1869_v43  ;;  %5514 = vmatpush3.bf16.xpose.msra.mxu1 %v1917_v28 }
 0x37e   : > { %3672 = vrot.lane.b32.xlu1 %v6607_v53, %s6231_s16  ;;  %3624 = vrot.lane.b32.xlu0 %v6605_v52, %s6231_s16 }
 0x37f   : > { %5509 = vmatprep.mubr.msk.bf16.mxu0 %vm6227_vm1, %v7795_v4  ;;  %5515 = vmatprep.mubr.msk.bf16.mxu1 %vm6227_vm1, %v7795_v4 }
 0x380   : > { %5519 = vmatprep.subr.bf16.mxu0 %v7795_v4  ;;  %5525 = vmatprep.subr.bf16.mxu1 %v7795_v4 }
 0x382   : > { %3864 = vrot.lane.b32.xlu1 %v6635_v60, %s6231_s16  ;;  %3816 = vrot.lane.b32.xlu0 %v6633_v59, %s6231_s16 }
 0x384   : > { %5510 = vmatmul.mubr.msk.bf16.vlgmr.msra.gmra.mrb[40].mxu0 %vm808_vm2, %v6633_v59  ;;  %5516 = vmatmul.mubr.msk.bf16.vlgmr.msra.gmra.mrb[56].mxu1 %vm808_vm2, %v6635_v60 }
 0x385   : > { %5521 = vmatprep.mubr.msk.bf16.mxu0 %vm6227_vm1, %v7795_v4  ;;  %5527 = vmatprep.mubr.msk.bf16.mxu1 %vm6227_vm1, %v7795_v4 }
 0x386   : > { %3384 = vrot.lane.b32.xlu1 %v6568_v36, %s6231_s16  ;;  %3336 = vrot.lane.b32.xlu0 %v6566_v35, %s6231_s16 }
 0x38a   : > { %3768 = vrot.lane.b32.xlu1 %v6623_v57, %s6231_s16  ;;  %3720 = vrot.lane.b32.xlu0 %v6621_v56, %s6231_s16 }
 0x3b6   : > { %v849_v47 = vpop.f32.mrb[8].mxu1 }
 0x3b7   : > { %v5379_v50 = vpop.f32.mrb[9].mxu1  ;;  %v6849_v60 = vmul.f32 0.35355338, %v849_v47 }
 0x3b8   : > { %v852_v29 = vpop.f32.mrb[10].mxu1 }
 0x3b9   : > { %v5380_v38 = vpop.f32.mrb[11].mxu1  ;;  %v2375_v3 = vsel %vm808_vm2, %v6849_v60, -inf }
 0x3bc   : > { %v2008_v52 = vpop.permute.xlu1 %2007  ;;  %v1960_v53 = vpop.permute.xlu0 %1959 }
 0x3bd   : > { %v2013_v54 = vsel %vm808_vm2, %v2008_v52, 0  ;;  %v1965_v55 = vsel %vm808_vm2, %v1960_v53, 0 }
 0x3be   : > { %v897_v36 = vpop.f32.mrb[12].mxu1  ;;  %v945_v39 = vpop.f32.mrb[0].mxu0  ;;  %5520 = vmatpush3.bf16.xpose.msra.mxu0 %v1965_v55  ;;  %5526 = vmatpush3.bf16.xpose.msra.mxu1 %v2013_v54 }
 0x3bf   : > { %v6843_v35 = vmul.f32 0.35355338, %v897_v36  ;;  %v6845_v57 = vmul.f32 0.35355338, %v945_v39  ;;  %v5385_v48 = vpop.f32.mrb[13].mxu1  ;;  %v5391_v56 = vpop.f32.mrb[1].mxu0  ;;  %5531 = vmatprep.subr.bf16.mxu0 %v7795_v4  ;;  %5537 = vmatprep.subr.bf16.mxu1 %v7795_v4 }
 0x3c0   : > { %v900_v58 = vpop.f32.mrb[14].mxu1  ;;  %v948_v59 = vpop.f32.mrb[2].mxu0 }
 0x3c1   : > { %v2056_v61 = vpop.permute.xlu0 %2055  ;;  %v2378_v62 = vsel %vm808_vm2, %v6843_v35, -inf  ;;  %v2381_v49 = vsel %vm808_vm2, %v6845_v57, -inf  ;;  %v5386_v63 = vpop.f32.mrb[15].mxu1 }
 0x3c2   : > { %v5392_v0 = vpop.f32.mrb[3].mxu0  ;;  %2379 = vmax.xlane.f32.xlu1 %v2378_v62  ;;  %2382 = vmax.xlane.f32.xlu0 %v2381_v49  ;;  %v2104_v1 = vpop.permute.xlu1 %2103  ;;  %v2061_v2 = vsel %vm808_vm2, %v2056_v61, 0 }
 0x3c3   : > { %v2109_v7 = vsel %vm808_vm2, %v2104_v1, 0 }
 0x3c5   : > { %5522 = vmatmul.mubr.msk.bf16.vlgmr.msra.gmra.mrb[44].mxu0 %vm808_vm2, %v6669_v5  ;;  %5528 = vmatmul.mubr.msk.bf16.vlgmr.msra.gmra.mrb[60].mxu1 %vm808_vm2, %v6671_v6 }
 0x3c6   : > { %v993_v8 = vpop.f32.mrb[16].mxu1  ;;  %v1041_v9 = vpop.f32.mrb[4].mxu0  ;;  %2376 = vmax.xlane.f32.xlu0 %v2375_v3  ;;  %5532 = vmatpush3.bf16.xpose.msra.mxu0 %v2061_v2 }
 0x3c7   : > { %v6863_v12 = vmul.f32 0.35355338, %v1041_v9  ;;  %5538 = vmatpush3.bf16.xpose.msra.mxu1 %v2109_v7  ;;  %v5397_v13 = vpop.f32.mrb[17].mxu1  ;;  %v5403_v24 = vpop.f32.mrb[5].mxu0  ;;  %5533 = vmatprep.mubr.msk.bf16.mxu0 %vm6227_vm1, %v7795_v4  ;;  %v6870_v31 = vmul.f32 0.35355338, %v993_v8 }
 0x3c8   : > { %v996_v27 = vpop.f32.mrb[18].mxu1  ;;  %v1044_v30 = vpop.f32.mrb[6].mxu0  ;;  %5539 = vmatprep.mubr.msk.bf16.mxu1 %vm6227_vm1, %v7795_v4  ;;  %5543 = vmatprep.subr.bf16.mxu0 %v7795_v4 }
 0x3c9   : > { %v2387_v33 = vsel %vm808_vm2, %v6863_v12, -inf  ;;  %5549 = vmatprep.subr.bf16.mxu1 %v7795_v4  ;;  %v5398_v40 = vpop.f32.mrb[19].mxu1  ;;  %v5404_v44 = vpop.f32.mrb[7].mxu0  ;;  %v2384_v46 = vsel %vm808_vm2, %v6870_v31, -inf }
 0x3ca   : > { %2388 = vmax.xlane.f32.xlu0 %v2387_v33  ;;  %v2200_v21 = vpop.permute.xlu1 %2199  ;;  %v2152_v45 = vpop.permute.xlu0 %2151 }
 0x3cb   : > { %v2205_v51 = vsel %vm808_vm2, %v2200_v21, 0  ;;  %v2157_v14 = vsel %vm808_vm2, %v2152_v45, 0 }
 0x3cd   : > { %5534 = vmatmul.mubr.msk.bf16.vlgmr.msra.gmra.mrb[48].mxu0 %vm808_vm2, %v6678_v10 }
 0x3ce   : > { %5540 = vmatmul.mubr.msk.bf16.vlgmr.msra.gmra.mrb[64].mxu1 %vm808_vm2, %v6680_v11  ;;  %v1089_v16 = vpop.f32.mrb[20].mxu1  ;;  %v1137_v15 = vpop.f32.mrb[8].mxu0  ;;  %2385 = vmax.xlane.f32.xlu0 %v2384_v46 }
 0x3cf   : > { %v6883_v18 = vmul.f32 0.35355338, %v1089_v16  ;;  %v6885_v17 = vmul.f32 0.35355338, %v1137_v15  ;;  %5544 = vmatpush3.bf16.xpose.msra.mxu0 %v2157_v14  ;;  %5550 = vmatpush3.bf16.xpose.msra.mxu1 %v2205_v51  ;;  %v5409_v22 = vpop.f32.mrb[21].mxu1  ;;  %v5415_v19 = vpop.f32.mrb[9].mxu0 }
 0x3d0   : > { %v1092_v23 = vpop.f32.mrb[22].mxu1  ;;  %v1140_v25 = vpop.f32.mrb[10].mxu0  ;;  %5545 = vmatprep.mubr.msk.bf16.mxu0 %vm6227_vm1, %v7795_v4  ;;  %5551 = vmatprep.mubr.msk.bf16.mxu1 %vm6227_vm1, %v7795_v4 }
 0x3d1   : > { %v2390_v26 = vsel %vm808_vm2, %v6883_v18, -inf  ;;  %v2393_v20 = vsel %vm808_vm2, %v6885_v17, -inf  ;;  %5555 = vmatprep.subr.bf16.mxu0 %v7795_v4  ;;  %5561 = vmatprep.subr.bf16.mxu1 %v7795_v4  ;;  %v5410_v32 = vpop.f32.mrb[23].mxu1  ;;  %v5416_v28 = vpop.f32.mrb[11].mxu0 }
 0x3d2   : > { %2391 = vmax.xlane.f32.xlu1 %v2390_v26  ;;  %2394 = vmax.xlane.f32.xlu0 %v2393_v20  ;;  %v2296_v43 = vpop.permute.xlu1 %2295  ;;  %v2248_v47 = vpop.permute.xlu0 %2247 }
 0x3d3   : > { %v2301_v50 = vsel %vm808_vm2, %v2296_v43, 0  ;;  %v2253_v29 = vsel %vm808_vm2, %v2248_v47, 0 }
 0x3d6   : > { %5546 = vmatmul.mubr.msk.bf16.vlgmr.msra.gmra.mrb[52].mxu0 %vm808_vm2, %v6699_v34  ;;  %5552 = vmatmul.mubr.msk.bf16.vlgmr.msra.gmra.mrb[68].mxu1 %vm808_vm2, %v6701_v37  ;;  %v1185_v38 = vpop.f32.mrb[24].mxu1  ;;  %v2809_v39 = vpop.permute.xlu1 %2808 }
 0x3d7   : > { %v6903_v52 = vmul.f32 0.35355338, %v1185_v38  ;;  %5556 = vmatpush3.bf16.xpose.msra.mxu0 %v2253_v29  ;;  %5562 = vmatpush3.bf16.xpose.msra.mxu1 %v2301_v50  ;;  %v5421_v53 = vpop.f32.mrb[25].mxu1  ;;  %v2760_v48 = vpop.permute.xlu0 %2759  ;;  %v2814_v56 = vsel %vm2764_vm3, %v2809_v39, 0 }
 0x3d8   : > { %v1188_v54 = vpop.f32.mrb[26].mxu1  ;;  %5557 = vmatprep.mubr.msk.bf16.mxu0 %vm6227_vm1, %v7795_v4  ;;  %5563 = vmatprep.mubr.msk.bf16.mxu1 %vm6227_vm1, %v7795_v4  ;;  %v2766_v58 = vsel %vm2764_vm3, %v2760_v48, 0 }
 0x3d9   : > { %v2396_v55 = vsel %vm808_vm2, %v6903_v52, -inf  ;;  %5567 = vmatprep.subr.bf16.mxu0 %v7795_v4  ;;  %5573 = vmatprep.subr.bf16.mxu1 %v7795_v4  ;;  %v5422_v36 = vpop.f32.mrb[27].mxu1 }
 0x3da   : > { %2397 = vmax.xlane.f32.xlu1 %v2396_v55  ;;  %v6925_v59 = vpop.permute.xlu1 %2904 }
 0x3db   : > { %v6927_v61 = vpop.permute.xlu0 %2856 }
 0x3de   : > { %5558 = vmatmul.mubr.msk.bf16.vlgmr.msra.gmra.mrb[56].mxu0 %vm808_vm2, %v6715_v41  ;;  %5564 = vmatmul.mubr.msk.bf16.vlgmr.msra.gmra.mrb[72].mxu1 %vm808_vm2, %v6717_v42  ;;  %v6929_v62 = vpop.permute.xlu1 %3000 }
 0x3df   : > { %5568 = vmatpush3.bf16.msra.mxu0 %v2766_v58  ;;  %5574 = vmatpush3.bf16.msra.mxu1 %v2814_v56  ;;  %v6931_v49 = vpop.permute.xlu0 %2952 }
 0x3e0   : > { %5575 = vmatprep.mubr.msk.bf16.mxu1 %vm6227_vm1, %v7795_v4  ;;  %5585 = vmatprep.subr.bf16.mxu1 %v7795_v4 }
 0x3e1   : > { %5569 = vmatprep.mubr.msk.bf16.mxu0 %vm6227_vm1, %v7795_v4  ;;  %5579 = vmatprep.subr.bf16.mxu0 %v7795_v4 }
 0x3e2   : > { %v6933_v63 = vpop.permute.xlu1 %3096 }
 0x3e3   : > { %v6935_v0 = vpop.permute.xlu0 %3048 }
 0x3e6   : > { %v6937_v1 = vpop.permute.xlu1 %3192 }
 0x3e7   : > { %v6939_v2 = vpop.permute.xlu0 %3144 }
 0x3ea   : > { %v6941_v3 = vpop.permute.xlu1 %3288 }
 0x3eb   : > { %v6943_v7 = vpop.permute.xlu0 %3240 }
 0x3ee   : > { %v6953_v51 = vpop.permute.xlu1 %3480 }
 0x3ef   : > { %v6955_v14 = vpop.permute.xlu0 %3432 }
 0x3f2   : > { %v6965_v50 = vpop.permute.xlu1 %3576 }
 0x3f3   : > { %v6967_v29 = vpop.permute.xlu0 %3528 }
 0x41f   : > { %v1233_v8 = vpop.f32.mrb[12].mxu0  ;;  %v1281_v9 = vpop.f32.mrb[28].mxu1 }
 0x420   : > { %v6945_v13 = vmul.f32 0.35355338, %v1233_v8  ;;  %v6947_v24 = vmul.f32 0.35355338, %v1281_v9  ;;  %v5427_v27 = vpop.f32.mrb[13].mxu0  ;;  %v5433_v30 = vpop.f32.mrb[29].mxu1 }
 0x421   : > { %v1236_v33 = vpop.f32.mrb[14].mxu0  ;;  %v1284_v40 = vpop.f32.mrb[30].mxu1 }
 0x422   : > { %v5428_v44 = vpop.f32.mrb[15].mxu0  ;;  %v5434_v21 = vpop.f32.mrb[31].mxu1  ;;  %v2402_v45 = vsel %vm808_vm2, %v6947_v24, -inf  ;;  %v2399_v46 = vsel %vm808_vm2, %v6945_v13, -inf }
 0x423   : > { %2403 = vmax.xlane.f32.xlu1 %v2402_v45  ;;  %2400 = vmax.xlane.f32.xlu0 %v2399_v46  ;;  %v6977_v30 = vpop.permute.xlu1 %3672  ;;  %v6979_v33 = vpop.permute.xlu0 %3624 }
 0x424   : > { %7810 = vst [vmem:[#allocation14_spill] sm:$0xff] %v6977_v30  ;;  %7811 = vst [vmem:[#allocation15_spill] sm:$0xff] %v6979_v33 }
 0x427   : > { %v1329_v16 = vpop.f32.mrb[16].mxu0  ;;  %v1377_v15 = vpop.f32.mrb[32].mxu1 }
 0x428   : > { %v6957_v22 = vmul.f32 0.35355338, %v1329_v16  ;;  %v6959_v19 = vmul.f32 0.35355338, %v1377_v15  ;;  %v5439_v23 = vpop.f32.mrb[17].mxu0  ;;  %v5445_v25 = vpop.f32.mrb[33].mxu1 }
 0x429   : > { %v1332_v26 = vpop.f32.mrb[18].mxu0  ;;  %v1380_v20 = vpop.f32.mrb[34].mxu1 }
 0x42a   : > { %v5440_v32 = vpop.f32.mrb[19].mxu0  ;;  %v5446_v28 = vpop.f32.mrb[35].mxu1  ;;  %v2408_v43 = vsel %vm808_vm2, %v6959_v19, -inf  ;;  %v2405_v47 = vsel %vm808_vm2, %v6957_v22, -inf }
 0x42b   : > { %2409 = vmax.xlane.f32.xlu1 %v2408_v43  ;;  %2406 = vmax.xlane.f32.xlu0 %v2405_v47  ;;  %v6989_v28 = vpop.permute.xlu1 %3864  ;;  %v6991_v43 = vpop.permute.xlu0 %3816 }
 0x42c   : > { %7812 = vst [vmem:[#allocation16_spill] sm:$0xff] %v6989_v28  ;;  %7813 = vst [vmem:[#allocation17_spill] sm:$0xff] %v6991_v43 }
 0x42f   : > { %v1425_v38 = vpop.f32.mrb[20].mxu0  ;;  %v1473_v53 = vpop.f32.mrb[36].mxu1 }
 0x430   : > { %v6969_v54 = vmul.f32 0.35355338, %v1425_v38  ;;  %v6971_v55 = vmul.f32 0.35355338, %v1473_v53  ;;  %v5451_v36 = vpop.f32.mrb[21].mxu0  ;;  %v5457_v39 = vpop.f32.mrb[37].mxu1 }
 0x431   : > { %v1428_v48 = vpop.f32.mrb[22].mxu0  ;;  %v1476_v56 = vpop.f32.mrb[38].mxu1 }
 0x432   : > { %v5452_v58 = vpop.f32.mrb[23].mxu0  ;;  %v5458_v8 = vpop.f32.mrb[39].mxu1  ;;  %v2414_v9 = vsel %vm808_vm2, %v6971_v55, -inf  ;;  %v2411_v27 = vsel %vm808_vm2, %v6969_v54, -inf }
 0x433   : > { %2415 = vmax.xlane.f32.xlu1 %v2414_v9  ;;  %2412 = vmax.xlane.f32.xlu0 %v2411_v27 }
 0x437   : > { %v1521_v40 = vpop.f32.mrb[24].mxu0  ;;  %v1569_v44 = vpop.f32.mrb[40].mxu1 }
 0x438   : > { %v6981_v21 = vmul.f32 0.35355338, %v1521_v40  ;;  %v6983_v45 = vmul.f32 0.35355338, %v1569_v44  ;;  %v5463_v46 = vpop.f32.mrb[25].mxu0  ;;  %v5469_v16 = vpop.f32.mrb[41].mxu1 }
 0x439   : > { %v1524_v15 = vpop.f32.mrb[26].mxu0  ;;  %v1572_v23 = vpop.f32.mrb[42].mxu1 }
 0x43a   : > { %v5464_v25 = vpop.f32.mrb[27].mxu0  ;;  %v5470_v26 = vpop.f32.mrb[43].mxu1  ;;  %v2417_v20 = vsel %vm808_vm2, %v6981_v21, -inf  ;;  %v2420_v32 = vsel %vm808_vm2, %v6983_v45, -inf }
 0x43b   : > { %2418 = vmax.xlane.f32.xlu0 %v2417_v20  ;;  %2421 = vmax.xlane.f32.xlu1 %v2420_v32  ;;  %v7001_v44 = vpop.permute.xlu1 %3384  ;;  %v7003_v46 = vpop.permute.xlu0 %3336 }
 0x43f   : > { %v1617_v47 = vpop.f32.mrb[28].mxu0  ;;  %v1665_v38 = vpop.f32.mrb[44].mxu1 }
 0x440   : > { %v6993_v53 = vmul.f32 0.35355338, %v1617_v47  ;;  %v6995_v36 = vmul.f32 0.35355338, %v1665_v38  ;;  %v5475_v39 = vpop.f32.mrb[29].mxu0  ;;  %v5481_v48 = vpop.f32.mrb[45].mxu1 }
 0x441   : > { %v1620_v56 = vpop.f32.mrb[30].mxu0  ;;  %v1668_v58 = vpop.f32.mrb[46].mxu1 }
 0x442   : > { %v5476_v8 = vpop.f32.mrb[31].mxu0  ;;  %v5482_v9 = vpop.f32.mrb[47].mxu1  ;;  %v2426_v27 = vsel %vm808_vm2, %v6995_v36, -inf  ;;  %v2423_v40 = vsel %vm808_vm2, %v6993_v53, -inf }
 0x443   : > { %2427 = vmax.xlane.f32.xlu1 %v2426_v27  ;;  %2424 = vmax.xlane.f32.xlu0 %v2423_v40  ;;  %v7009_v48 = vpop.permute.xlu1 %3768  ;;  %v7011_v56 = vpop.permute.xlu0 %3720 }
 0x444   : > { %7814 = vst [vmem:[#allocation18_spill] sm:$0xff] %v7009_v48  ;;  %7815 = vst [vmem:[#allocation19_spill] sm:$0xff] %v7011_v56 }
 0x447   : > { %v1713_v16 = vpop.f32.mrb[32].mxu0  ;;  %v1761_v15 = vpop.f32.mrb[48].mxu1 }
 0x448   : > { %v7005_v23 = vmul.f32 0.35355338, %v1761_v15  ;;  %v5487_v25 = vpop.f32.mrb[33].mxu0  ;;  %v5493_v26 = vpop.f32.mrb[49].mxu1 }
 0x449   : > { %v1716_v20 = vpop.f32.mrb[34].mxu0  ;;  %v1764_v32 = vpop.f32.mrb[50].mxu1 }
 0x44a   : > { %v5488_v47 = vpop.f32.mrb[35].mxu0  ;;  %v5494_v38 = vpop.f32.mrb[51].mxu1  ;;  %v2432_v39 = vsel %vm808_vm2, %v7005_v23, -inf }
 0x44b   : > { %2433 = vmax.xlane.f32.xlu1 %v2432_v39 }
 0x44f   : > { %v2380_v58 = vpop.xlane.xlu1 %2379  ;;  %v1809_v8 = vpop.f32.mrb[36].mxu0 }
 0x450   : > { %v2472_v9 = vsub.f32 %v6843_v35, %v2380_v58  ;;  %v1857_v27 = vpop.f32.mrb[52].mxu1  ;;  %v2383_v40 = vpop.xlane.xlu0 %2382 }
 0x451   : > { %v2473_v15 = vsub.f32 %v6845_v57, %v2383_v40  ;;  %v5499_v25 = vpop.f32.mrb[37].mxu0  ;;  %v5505_v26 = vpop.f32.mrb[53].mxu1 }
 0x452   : > { %v2505_v20 = vmul.f32 1.442695, %v2472_v9  ;;  %v1812_v32 = vpop.f32.mrb[38].mxu0  ;;  %v1860_v47 = vpop.f32.mrb[54].mxu1 }
 0x453   : > { %v2507_v38 = vmul.f32 1.442695, %v2473_v15  ;;  %v5500_v4 = vpop.f32.mrb[39].mxu0  ;;  %v5506_v43 = vpop.f32.mrb[55].mxu1 }
 0x454   : > { %5956 = vpow2.f32 %v2505_v20  ;;  %v2377_v39 = vpop.xlane.xlu0 %2376 }
 0x455   : > { %5958 = vpow2.f32 %v2507_v38  ;;  %v2471_v41 = vsub.f32 %v6849_v60, %v2377_v39  ;;  %v7024_v60 = vmul.f32 0.35355338, %v1857_v27 }
 0x457   : > { %v2503_v56 = vmul.f32 1.442695, %v2471_v41  ;;  %v1905_v28 = vpop.f32.mrb[40].mxu0  ;;  %v7016_v35 = vpop.f32.mrb[56].mxu1  ;;  %v2438_v27 = vsel %vm808_vm2, %v7024_v60, -inf }
 0x458   : > { %v2389_v58 = vpop.xlane.xlu0 %2388  ;;  %v5511_v42 = vpop.f32.mrb[41].mxu0 }
 0x459   : > { %5960 = vpow2.f32 %v2503_v56  ;;  %v2475_v57 = vsub.f32 %v6863_v12, %v2389_v58  ;;  %v5517_v9 = vpop.f32.mrb[57].mxu1  ;;  %v1908_v40 = vpop.f32.mrb[42].mxu0  ;;  %v7035_v58 = vmul.f32 0.35355338, %v1713_v16 }
 0x45a   : > { %v1956_v25 = vpop.f32.mrb[58].mxu1  ;;  %v5512_v15 = vpop.f32.mrb[43].mxu0 }
 0x45b   : > { %v2511_v4 = vmul.f32 1.442695, %v2475_v57  ;;  %v5518_v43 = vpop.f32.mrb[59].mxu1  ;;  %v2429_v9 = vsel %vm808_vm2, %v7035_v58, -inf  ;;  %v7045_v25 = vmul.f32 0.35355338, %v1809_v8 }
 0x45c   : > { %v2386_v26 = vpop.xlane.xlu0 %2385 }
 0x45d   : > { %v2474_v20 = vsub.f32 %v6870_v31, %v2386_v26  ;;  %5962 = vpow2.f32 %v2511_v4  ;;  %v2435_v4 = vsel %vm808_vm2, %v7045_v25, -inf  ;;  %v7055_v26 = vmul.f32 0.35355338, %v1905_v28 }
 0x45e   : > { %v7020_v32 = vpop.eup %5956 }
 0x45f   : > { %v7022_v41 = vpop.eup %5958  ;;  %v2509_v42 = vmul.f32 1.442695, %v2474_v20  ;;  %v2570_v12 = vsel %vm808_vm2, %v7020_v32, 0.0  ;;  %v2441_v20 = vsel %vm808_vm2, %v7055_v26, -inf  ;;  %v2392_v28 = vpop.xlane.xlu1 %2391 }
 0x460   : > { %v2395_v56 = vpop.xlane.xlu0 %2394  ;;  %2571 = vadd.xlane.f32.xlu1 %v2570_v12  ;;  %v2573_v47 = vsel %vm808_vm2, %v7022_v41, 0.0 }
 0x461   : > { %5964 = vpow2.f32 %v2509_v42  ;;  %v2477_v38 = vsub.f32 %v6885_v17, %v2395_v56  ;;  %2574 = vadd.xlane.f32.xlu0 %v2573_v47  ;;  %v2476_v42 = vsub.f32 %v6883_v18, %v2392_v28 }
 0x463   : > { %v7031_v31 = vpop.eup %5960  ;;  %v2515_v39 = vmul.f32 1.442695, %v2477_v38 }
 0x464   : > { %2439 = vmax.xlane.f32.xlu1 %v2438_v27  ;;  %v2567_v57 = vsel %vm808_vm2, %v7031_v31, 0.0 }
 0x465   : > { %2568 = vadd.xlane.f32.xlu0 %v2567_v57  ;;  %5966 = vpow2.f32 %v2515_v39 }
 0x467   : > { %v7041_v40 = vpop.eup %5962 }
 0x468   : > { %v2579_v16 = vsel %vm808_vm2, %v7041_v40, 0.0 }
 0x469   : > { %2430 = vmax.xlane.f32.xlu0 %v2429_v9  ;;  %v2513_v9 = vmul.f32 1.442695, %v2476_v42 }
 0x46b   : > { %v7043_v17 = vpop.eup %5964  ;;  %5968 = vpow2.f32 %v2513_v9 }
 0x46c   : > { %v2576_v15 = vsel %vm808_vm2, %v7043_v17, 0.0 }
 0x46d   : > { %2580 = vadd.xlane.f32.xlu0 %v2579_v16  ;;  %2577 = vadd.xlane.f32.xlu1 %v2576_v15  ;;  %v2398_v16 = vpop.xlane.xlu1 %2397 }
 0x46f   : > { %v7053_v43 = vpop.eup %5966 }
 0x470   : > { %v2585_v8 = vsel %vm808_vm2, %v7053_v43, 0.0 }
 0x471   : > { %2436 = vmax.xlane.f32.xlu0 %v2435_v4 }
 0x475   : > { %2586 = vadd.xlane.f32.xlu0 %v2585_v8 }
 0x479   : > { %2442 = vmax.xlane.f32.xlu0 %v2441_v20 }
 0x47e   : > { %3960 = vrot.lane.b32.xlu1 %v6671_v6, %s6231_s16 }
 0x482   : > { %4008 = vrot.lane.b32.xlu1 %v6678_v10, %s6231_s16  ;;  %v2478_v10 = vsub.f32 %v6903_v52, %v2398_v16 }
 0x484   : > { %v2517_v28 = vmul.f32 1.442695, %v2478_v10 }
 0x486   : > { %4056 = vrot.lane.b32.xlu1 %v6680_v11, %s6231_s16  ;;  %5970 = vpow2.f32 %v2517_v28 }
 0x48f   : > { %3912 = vrot.lane.b32.xlu0 %v6669_v5, %s6231_s16 }
 0x498   : > { %v2001_v12 = vpop.f32.mrb[44].mxu0  ;;  %v2049_v56 = vpop.f32.mrb[60].mxu1 }
 0x499   : > { %v5523_v47 = vpop.f32.mrb[45].mxu0  ;;  %v5529_v38 = vpop.f32.mrb[61].mxu1  ;;  %v7080_v10 = vmul.f32 0.35355338, %v2049_v56 }
 0x49a   : > { %v2004_v39 = vpop.f32.mrb[46].mxu0  ;;  %v2052_v27 = vpop.f32.mrb[62].mxu1  ;;  %v7072_v47 = vmul.f32 0.35355338, %v7016_v35  ;;  %v7074_v38 = vmul.f32 0.35355338, %v2001_v12 }
 0x49b   : > { %v5524_v57 = vpop.f32.mrb[47].mxu0  ;;  %v5530_v6 = vpop.f32.mrb[63].mxu1 }
 0x49c   : > { %v2444_v52 = vsel %vm808_vm2, %v7072_v47, -inf  ;;  %v7078_v27 = vpop.eup %5968 }
 0x49d   : > { %v2582_v12 = vsel %vm808_vm2, %v7078_v27, 0.0 }
 0x4a0   : > { %v2097_v11 = vpop.f32.mrb[48].mxu0 }
 0x4a1   : > { %v2145_v15 = vpop.f32.mrb[64].mxu1  ;;  %v5535_v4 = vpop.f32.mrb[49].mxu0 }
 0x4a2   : > { %v5541_v5 = vpop.f32.mrb[65].mxu1  ;;  %v2100_v8 = vpop.f32.mrb[50].mxu0  ;;  %v7082_v4 = vmul.f32 0.35355338, %v2097_v11 }
 0x4a3   : > { %v2148_v20 = vpop.f32.mrb[66].mxu1  ;;  %v5536_v18 = vpop.f32.mrb[51].mxu0  ;;  %v2447_v5 = vsel %vm808_vm2, %v7074_v38, -inf }
 0x4a4   : > { %v5542_v48 = vpop.f32.mrb[67].mxu1  ;;  %v2450_v18 = vsel %vm808_vm2, %v7080_v10, -inf }
 0x4a9   : > { %v2193_v42 = vpop.f32.mrb[52].mxu0  ;;  %v2241_v39 = vpop.f32.mrb[68].mxu1 }
 0x4aa   : > { %v5547_v57 = vpop.f32.mrb[53].mxu0  ;;  %v5553_v6 = vpop.f32.mrb[69].mxu1  ;;  %2445 = vmax.xlane.f32.xlu1 %v2444_v52  ;;  %v7090_v28 = vmul.f32 0.35355338, %v2193_v42  ;;  %v7098_v42 = vmul.f32 0.35355338, %v2145_v15 }
 0x4ab   : > { %v2196_v9 = vpop.f32.mrb[54].mxu0  ;;  %v2244_v16 = vpop.f32.mrb[70].mxu1  ;;  %v2453_v6 = vsel %vm808_vm2, %v7082_v4, -inf }
 0x4ac   : > { %v5548_v48 = vpop.f32.mrb[55].mxu0  ;;  %v5554_v35 = vpop.f32.mrb[71].mxu1  ;;  %v2456_v15 = vsel %vm808_vm2, %v7098_v42, -inf }
 0x4ad   : > { %v7096_v9 = vpop.eup %5970 }
 0x4ae   : > { %2583 = vadd.xlane.f32.xlu1 %v2582_v12  ;;  %2448 = vmax.xlane.f32.xlu0 %v2447_v5 }
 0x4b0   : > { %v2404_v8 = vpop.xlane.xlu1 %2403  ;;  %v2401_v20 = vpop.xlane.xlu0 %2400 }
 0x4b1   : > { %v2480_v56 = vsub.f32 %v6947_v24, %v2404_v8  ;;  %v2289_v52 = vpop.f32.mrb[56].mxu0  ;;  %v2337_v11 = vpop.f32.mrb[72].mxu1  ;;  %v2479_v57 = vsub.f32 %v6945_v13, %v2401_v20  ;;  %v2588_v13 = vsel %vm808_vm2, %v7096_v9, 0.0  ;;  %v2459_v20 = vsel %vm808_vm2, %v7090_v28, -inf }
 0x4b2   : > { %v5559_v16 = vpop.f32.mrb[57].mxu0  ;;  %v5565_v48 = vpop.f32.mrb[73].mxu1  ;;  %2451 = vmax.xlane.f32.xlu1 %v2450_v18  ;;  %2454 = vmax.xlane.f32.xlu0 %v2453_v6  ;;  %v7100_v33 = vmul.f32 0.35355338, %v2337_v11 }
 0x4b3   : > { %v2519_v35 = vmul.f32 1.442695, %v2479_v57  ;;  %v2292_v12 = vpop.f32.mrb[58].mxu0  ;;  %v2340_v5 = vpop.f32.mrb[74].mxu1  ;;  %v2521_v30 = vmul.f32 1.442695, %v2480_v56 }
 0x4b4   : > { %v5560_v24 = vpop.f32.mrb[59].mxu0  ;;  %v5566_v8 = vpop.f32.mrb[75].mxu1  ;;  %v7108_v56 = vmul.f32 0.35355338, %v2241_v39  ;;  %v2468_v16 = vsel %vm808_vm2, %v7100_v33, -inf }
 0x4b5   : > { %5972 = vpow2.f32 %v2519_v35  ;;  %v7114_v12 = vmul.f32 0.35355338, %v2289_v52 }
 0x4b6   : > { %2589 = vadd.xlane.f32.xlu1 %v2588_v13  ;;  %2460 = vmax.xlane.f32.xlu0 %v2459_v20  ;;  %5974 = vpow2.f32 %v2521_v30  ;;  %v2462_v30 = vsel %vm808_vm2, %v7108_v56, -inf }
 0x4b7   : > { %v2465_v8 = vsel %vm808_vm2, %v7114_v12, -inf }
 0x4b8   : > { %v2410_v18 = vpop.xlane.xlu1 %2409  ;;  %v2407_v57 = vpop.xlane.xlu0 %2406 }
 0x4b9   : > { %v2482_v11 = vsub.f32 %v6959_v19, %v2410_v18  ;;  %v2481_v6 = vsub.f32 %v6957_v22, %v2407_v57 }
 0x4ba   : > { %2457 = vmax.xlane.f32.xlu1 %v2456_v15  ;;  %2469 = vmax.xlane.f32.xlu0 %v2468_v16 }
 0x4bb   : > { %v2525_v48 = vmul.f32 1.442695, %v2482_v11  ;;  %v2523_v35 = vmul.f32 1.442695, %v2481_v6 }
 0x4bd   : > { %5976 = vpow2.f32 %v2525_v48 }
 0x4be   : > { %5978 = vpow2.f32 %v2523_v35  ;;  %2463 = vmax.xlane.f32.xlu1 %v2462_v30 }
 0x4bf   : > { %v7118_v39 = vpop.eup %5972 }
 0x4c0   : > { %v2416_v19 = vpop.xlane.xlu1 %2415  ;;  %v2413_v5 = vpop.xlane.xlu0 %2412  ;;  %v2591_v52 = vsel %vm808_vm2, %v7118_v39, 0.0 }
 0x4c1   : > { %v2484_v22 = vsub.f32 %v6971_v55, %v2416_v19  ;;  %v2483_v24 = vsub.f32 %v6969_v54, %v2413_v5  ;;  %v7126_v13 = vpop.eup %5974  ;;  %2592 = vadd.xlane.f32.xlu0 %v2591_v52 }
 0x4c2   : > { %2466 = vmax.xlane.f32.xlu1 %v2465_v8  ;;  %v2594_v57 = vsel %vm808_vm2, %v7126_v13, 0.0 }
 0x4c3   : > { %v2529_v20 = vmul.f32 1.442695, %v2484_v22  ;;  %v2527_v18 = vmul.f32 1.442695, %v2483_v24 }
 0x4c5   : > { %5980 = vpow2.f32 %v2529_v20 }
 0x4c6   : > { %5982 = vpow2.f32 %v2527_v18  ;;  %2595 = vadd.xlane.f32.xlu1 %v2594_v57 }
 0x4c7   : > { %v7130_v55 = vpop.eup %5976 }
 0x4c8   : > { %v7132_v54 = vpop.eup %5978  ;;  %v2422_v15 = vpop.xlane.xlu1 %2421  ;;  %v2600_v6 = vsel %vm808_vm2, %v7130_v55, 0.0 }
 0x4c9   : > { %v2419_v11 = vpop.xlane.xlu0 %2418  ;;  %v2486_v16 = vsub.f32 %v6983_v45, %v2422_v15  ;;  %2601 = vadd.xlane.f32.xlu0 %v2600_v6  ;;  %v2597_v35 = vsel %vm808_vm2, %v7132_v54, 0.0 }
 0x4ca   : > { %v2485_v48 = vsub.f32 %v6981_v21, %v2419_v11  ;;  %2598 = vadd.xlane.f32.xlu1 %v2597_v35 }
 0x4cb   : > { %v2533_v30 = vmul.f32 1.442695, %v2486_v16 }
 0x4cc   : > { %v2531_v19 = vmul.f32 1.442695, %v2485_v48 }
 0x4cd   : > { %5984 = vpow2.f32 %v2533_v30 }
 0x4ce   : > { %5986 = vpow2.f32 %v2531_v19 }
 0x4cf   : > { %v7140_v5 = vpop.eup %5980 }
 0x4d0   : > { %v7142_v22 = vpop.eup %5982  ;;  %v2428_v24 = vpop.xlane.xlu1 %2427  ;;  %v2606_v45 = vsel %vm808_vm2, %v7140_v5, 0.0 }
 0x4d1   : > { %v2425_v8 = vpop.xlane.xlu0 %2424  ;;  %v2488_v21 = vsub.f32 %v6995_v36, %v2428_v24  ;;  %2607 = vadd.xlane.f32.xlu0 %v2606_v45  ;;  %v2603_v20 = vsel %vm808_vm2, %v7142_v22, 0.0 }
 0x4d2   : > { %v2487_v52 = vsub.f32 %v6993_v53, %v2425_v8  ;;  %2604 = vadd.xlane.f32.xlu1 %v2603_v20 }
 0x4d3   : > { %v2537_v18 = vmul.f32 1.442695, %v2488_v21 }
 0x4d4   : > { %v2535_v57 = vmul.f32 1.442695, %v2487_v52 }
 0x4d5   : > { %5988 = vpow2.f32 %v2537_v18 }
 0x4d6   : > { %5990 = vpow2.f32 %v2535_v57 }
 0x4d7   : > { %v7150_v15 = vpop.eup %5984 }
 0x4d8   : > { %v7152_v11 = vpop.eup %5986  ;;  %v2434_v6 = vpop.xlane.xlu1 %2433  ;;  %v2612_v16 = vsel %vm808_vm2, %v7150_v15, 0.0 }
 0x4d9   : > { %v2490_v36 = vsub.f32 %v7005_v23, %v2434_v6  ;;  %2613 = vadd.xlane.f32.xlu0 %v2612_v16  ;;  %v2609_v53 = vsel %vm808_vm2, %v7152_v11, 0.0 }
 0x4da   : > { %2610 = vadd.xlane.f32.xlu1 %v2609_v53 }
 0x4db   : > { %v2541_v48 = vmul.f32 1.442695, %v2490_v36 }
 0x4dd   : > { %5992 = vpow2.f32 %v2541_v48 }
 0x4df   : > { %v7159_v35 = vpop.eup %5988 }
 0x4e0   : > { %v7161_v30 = vpop.eup %5990  ;;  %v2618_v19 = vsel %vm808_vm2, %v7159_v35, 0.0 }
 0x4e1   : > { %2619 = vadd.xlane.f32.xlu0 %v2618_v19  ;;  %v2615_v24 = vsel %vm808_vm2, %v7161_v30, 0.0 }
 0x4e2   : > { %2616 = vadd.xlane.f32.xlu1 %v2615_v24 }
 0x4e7   : > { %v7167_v23 = vpop.eup %5992 }
 0x4e8   : > { %v2624_v8 = vsel %vm808_vm2, %v7167_v23, 0.0 }
 0x4e9   : > { %2625 = vadd.xlane.f32.xlu0 %v2624_v8 }
 0x4ed   : > { %v2572_v45 = vpop.xlane.xlu1 %2571 }
 0x4ee   : > { %5994 = vrcp.f32 %v2572_v45  ;;  %v2575_v21 = vpop.xlane.xlu0 %2574 }
 0x4f1   : > { %v2440_v52 = vpop.xlane.xlu1 %2439 }
 0x4f2   : > { %v2492_v20 = vsub.f32 %v7024_v60, %v2440_v52  ;;  %v2569_v18 = vpop.xlane.xlu0 %2568  ;;  %v2910_v60 = vsel %vm2764_vm3, %v6925_v59, 0 }
 0x4f3   : > { %5996 = vrcp.f32 %v2569_v18 }
 0x4f4   : > { %v2545_v57 = vmul.f32 1.442695, %v2492_v20 }
 0x4f6   : > { %5998 = vpow2.f32 %v2545_v57  ;;  %v2431_v6 = vpop.xlane.xlu0 %2430 }
 0x4f7   : > { %6000 = vrcp.f32 %v2575_v21  ;;  %v2489_v16 = vsub.f32 %v7035_v58, %v2431_v6  ;;  %v7816_v58 = vmov 0.0  }
 0x4f8   : > { %v5995_v36 = vpop.eup %5994 }
 0x4f9   : > { %v2696_v53 = vmul.f32 %v5995_v36, %v7020_v32  ;;  %v2539_v48 = vmul.f32 1.442695, %v2489_v16 }
 0x4fa   : > { %v2578_v19 = vpop.xlane.xlu1 %2577  ;;  %v2581_v24 = vpop.xlane.xlu0 %2580 }
 0x4fb   : > { %6002 = vpow2.f32 %v2539_v48  ;;  %v2728_v8 = vpack.c.bf16 %v2696_v53, %v2696_v53 }
 0x4fc   : > { %6004 = vrcp.f32 %v2578_v19 }
 0x4fd   : > { %v5997_v45 = vpop.eup %5996  ;;  %5576 = vmatmul.mubr.msk.bf16.vlgmr.msra.gmra.mrb[76].mxu1 %vm808_vm2, %v2728_v8  ;;  %6006 = vrcp.f32 %v2581_v24 }
 0x4fe   : > { %v2695_v52 = vmul.f32 %v5997_v45, %v7031_v31  ;;  %5586 = vmatpush3.bf16.msra.mxu1 %v2910_v60  ;;  %v2437_v21 = vpop.xlane.xlu0 %2436  ;;  %5587 = vmatprep.mubr.msk.bf16.mxu1 %vm6227_vm1, %v7816_v58  ;;  %v2862_v31 = vsel %vm2764_vm3, %v6927_v61, 0 }
 0x4ff   : > { %v2491_v32 = vsub.f32 %v7045_v25, %v2437_v21  ;;  %5597 = vmatprep.subr.bf16.mxu1 %v7816_v58  ;;  %v3006_v21 = vsel %vm2764_vm3, %v6929_v62, 0 }
 0x500   : > { %v7182_v20 = vpop.eup %5998  ;;  %v2727_v18 = vpack.c.bf16 %v2695_v52, %v2695_v52 }
 0x501   : > { %v6001_v57 = vpop.eup %6000  ;;  %v2543_v6 = vmul.f32 1.442695, %v2491_v32  ;;  %v2630_v59 = vsel %vm808_vm2, %v7182_v20, 0.0 }
 0x502   : > { %5570 = vmatmul.mubr.msk.bf16.vlgmr.msra.gmra.mrb[60].mxu0 %vm808_vm2, %v2727_v18  ;;  %v2587_v16 = vpop.xlane.xlu0 %2586  ;;  %2631 = vadd.xlane.f32.xlu0 %v2630_v59  ;;  %v2697_v25 = vmul.f32 %v6001_v57, %v7022_v41  ;;  %v2958_v41 = vsel %vm2764_vm3, %v6931_v49, 0 }
 0x503   : > { %6008 = vpow2.f32 %v2543_v6  ;;  %5580 = vmatpush3.bf16.msra.mxu0 %v2862_v31  ;;  %5581 = vmatprep.mubr.msk.bf16.mxu0 %vm6227_vm1, %v7816_v58 }
 0x504   : > { %5591 = vmatprep.subr.bf16.mxu0 %v7816_v58  ;;  %6010 = vrcp.f32 %v2587_v16  ;;  %v2729_v8 = vpack.c.bf16 %v2697_v25, %v2697_v25 }
 0x505   : > { %v7193_v36 = vpop.eup %6002 }
 0x506   : > { %v6005_v53 = vpop.eup %6004  ;;  %v2443_v48 = vpop.xlane.xlu0 %2442  ;;  %v2621_v61 = vsel %vm808_vm2, %v7193_v36, 0.0 }
 0x507   : > { %v2698_v19 = vmul.f32 %v6005_v53, %v7043_v17  ;;  %v2493_v24 = vsub.f32 %v7055_v26, %v2443_v48  ;;  %2622 = vadd.xlane.f32.xlu1 %v2621_v61  ;;  %v6007_v45 = vpop.eup %6006 }
 0x508   : > { %v2699_v17 = vmul.f32 %v6007_v45, %v7041_v40  ;;  %v3054_v40 = vsel %vm2764_vm3, %v6935_v0, 0  ;;  %v3150_v0 = vsel %vm2764_vm3, %v6939_v2, 0 }
 0x509   : > { %v2547_v60 = vmul.f32 1.442695, %v2493_v24  ;;  %v2730_v52 = vpack.c.bf16 %v2698_v19, %v2698_v19 }
 0x50a   : > { %5582 = vmatmul.mubr.msk.bf16.vlgmr.msra.gmra.mrb[64].mxu0 %vm808_vm2, %v2729_v8  ;;  %v2731_v49 = vpack.c.bf16 %v2699_v17, %v2699_v17  ;;  %v7239_v25 = vpop.permute.xlu0 %3912 }
 0x50b   : > { %6012 = vpow2.f32 %v2547_v60  ;;  %5588 = vmatmul.mubr.msk.bf16.vlgmr.msra.gmra.mrb[80].mxu1 %vm808_vm2, %v2730_v52  ;;  %5592 = vmatpush3.bf16.msra.mxu0 %v2958_v41 }
 0x50c   : > { %5598 = vmatpush3.bf16.msra.mxu1 %v3006_v21  ;;  %5593 = vmatprep.mubr.msk.bf16.mxu0 %vm6227_vm1, %v7816_v58 }
 0x50d   : > { %v7208_v26 = vpop.eup %6008  ;;  %5603 = vmatprep.subr.bf16.mxu0 %v7816_v58  ;;  %5599 = vmatprep.mubr.msk.bf16.mxu1 %vm6227_vm1, %v7816_v58 }
 0x50e   : > { %v2627_v62 = vsel %vm808_vm2, %v7208_v26, 0.0  ;;  %5609 = vmatprep.subr.bf16.mxu1 %v7816_v58  ;;  %v6011_v32 = vpop.eup %6010 }
 0x50f   : > { %2628 = vadd.xlane.f32.xlu1 %v2627_v62  ;;  %v2701_v18 = vmul.f32 %v6011_v32, %v7053_v43  ;;  %v7233_v43 = vpop.permute.xlu1 %3960 }
 0x511   : > { %v2733_v59 = vpack.c.bf16 %v2701_v18, %v2701_v18 }
 0x512   : > { %5594 = vmatmul.mubr.msk.bf16.vlgmr.msra.gmra.mrb[68].mxu0 %vm808_vm2, %v2731_v49 }
 0x513   : > { %5604 = vmatpush3.bf16.msra.mxu0 %v3054_v40  ;;  %5605 = vmatprep.mubr.msk.bf16.mxu0 %vm6227_vm1, %v7816_v58  ;;  %v7235_v31 = vpop.permute.xlu1 %4008 }
 0x514   : > { %5615 = vmatprep.subr.bf16.mxu0 %v7816_v58 }
 0x515   : > { %v7223_v57 = vpop.eup %6012 }
 0x516   : > { %v2633_v6 = vsel %vm808_vm2, %v7223_v57, 0.0 }
 0x517   : > { %2634 = vadd.xlane.f32.xlu1 %v2633_v6  ;;  %v7237_v16 = vpop.permute.xlu1 %4056 }
 0x51a   : > { %5606 = vmatmul.mubr.msk.bf16.vlgmr.msra.gmra.mrb[72].mxu0 %vm808_vm2, %v2733_v59 }
 0x51b   : > { %5616 = vmatpush3.bf16.msra.mxu0 %v3150_v0  ;;  %5617 = vmatprep.mubr.msk.bf16.mxu0 %vm6227_vm1, %v7816_v58 }
 0x51c   : > { %5627 = vmatprep.subr.bf16.mxu0 %v7816_v58 }
 0x537   : > { %v2446_v53 = vpop.xlane.xlu1 %2445 }
 0x538   : > { %v2494_v48 = vsub.f32 %v7072_v47, %v2446_v53 }
 0x53a   : > { %v2549_v2 = vmul.f32 1.442695, %v2494_v48 }
 0x53b   : > { %v2584_v61 = vpop.xlane.xlu1 %2583  ;;  %v2449_v19 = vpop.xlane.xlu0 %2448 }
 0x53c   : > { %6014 = vpow2.f32 %v2549_v2  ;;  %v2495_v24 = vsub.f32 %v7074_v38, %v2449_v19  ;;  %v3102_v2 = vsel %vm2764_vm3, %v6933_v63, 0 }
 0x53d   : > { %6016 = vrcp.f32 %v2584_v61 }
 0x53e   : > { %v2551_v8 = vmul.f32 1.442695, %v2495_v24 }
 0x53f   : > { %v2452_v45 = vpop.xlane.xlu1 %2451  ;;  %v2455_v60 = vpop.xlane.xlu0 %2454 }
 0x540   : > { %6018 = vpow2.f32 %v2551_v8  ;;  %v2496_v52 = vsub.f32 %v7080_v10, %v2452_v45  ;;  %v2497_v41 = vsub.f32 %v7082_v4, %v2455_v60 }
 0x542   : > { %v2553_v21 = vmul.f32 1.442695, %v2496_v52  ;;  %v2555_v17 = vmul.f32 1.442695, %v2497_v41  ;;  %v3198_v41 = vsel %vm2764_vm3, %v6937_v1, 0 }
 0x543   : > { %v2590_v62 = vpop.xlane.xlu1 %2589  ;;  %v7245_v47 = vpop.xlane.xlu0 %2460 }
 0x544   : > { %6020 = vpow2.f32 %v2553_v21 }
 0x545   : > { %6022 = vpow2.f32 %v2555_v17 }
 0x546   : > { %v7247_v49 = vpop.eup %6014  ;;  %6024 = vrcp.f32 %v2590_v62 }
 0x547   : > { %v6017_v38 = vpop.eup %6016  ;;  %v2458_v32 = vpop.xlane.xlu1 %2457  ;;  %v2636_v40 = vsel %vm808_vm2, %v7247_v49, 0.0 }
 0x548   : > { %v2700_v18 = vmul.f32 %v6017_v38, %v7078_v27  ;;  %v2498_v10 = vsub.f32 %v7098_v42, %v2458_v32  ;;  %2637 = vadd.xlane.f32.xlu0 %v2636_v40  ;;  %v7255_v0 = vpop.xlane.xlu0 %2469 }
 0x54a   : > { %v7253_v4 = vpop.eup %6018  ;;  %v2557_v6 = vmul.f32 1.442695, %v2498_v10  ;;  %v2732_v59 = vpack.c.bf16 %v2700_v18, %v2700_v18 }
 0x54b   : > { %v7257_v53 = vpop.xlane.xlu1 %2463  ;;  %v2639_v48 = vsel %vm808_vm2, %v7253_v4, 0.0 }
 0x54c   : > { %6026 = vpow2.f32 %v2557_v6  ;;  %5600 = vmatmul.mubr.msk.bf16.vlgmr.msra.gmra.mrb[84].mxu1 %vm808_vm2, %v2732_v59  ;;  %2640 = vadd.xlane.f32.xlu1 %v2639_v48  ;;  %v3246_v6 = vsel %vm2764_vm3, %v6943_v7, 0 }
 0x54d   : > { %5610 = vmatpush3.bf16.msra.mxu1 %v3102_v2  ;;  %5611 = vmatprep.mubr.msk.bf16.mxu1 %vm6227_vm1, %v7816_v58 }
 0x54e   : > { %v7266_v27 = vpop.eup %6020  ;;  %5621 = vmatprep.subr.bf16.mxu1 %v7816_v58  ;;  %v2593_v19 = vpop.xlane.xlu0 %2592 }
 0x54f   : > { %v7269_v42 = vpop.eup %6022  ;;  %v7271_v61 = vpop.xlane.xlu1 %2466  ;;  %v2642_v63 = vsel %vm808_vm2, %v7266_v27, 0.0  ;;  %6028 = vrcp.f32 %v2593_v19 }
 0x550   : > { %v6025_v24 = vpop.eup %6024  ;;  %2643 = vadd.xlane.f32.xlu0 %v2642_v63  ;;  %v2645_v8 = vsel %vm808_vm2, %v7269_v42, 0.0 }
 0x551   : > { %v2702_v45 = vmul.f32 %v6025_v24, %v7096_v9  ;;  %2646 = vadd.xlane.f32.xlu1 %v2645_v8  ;;  %v3342_v8 = vsel %vm2764_vm3, %v7003_v46, 0 }
 0x553   : > { %v2734_v60 = vpack.c.bf16 %v2702_v45, %v2702_v45  ;;  %v2596_v52 = vpop.xlane.xlu1 %2595 }
 0x554   : > { %6030 = vrcp.f32 %v2596_v52 }
 0x555   : > { %5612 = vmatmul.mubr.msk.bf16.vlgmr.msra.gmra.mrb[88].mxu1 %vm808_vm2, %v2734_v60  ;;  %v3390_v60 = vsel %vm2764_vm3, %v7001_v44, 0  ;;  %v2499_v44 = vsub.f32 %v7090_v28, %v7245_v47  ;;  %v2501_v28 = vsub.f32 %v7114_v12, %v7271_v61 }
 0x556   : > { %v7281_v21 = vpop.eup %6026  ;;  %5622 = vmatpush3.bf16.msra.mxu1 %v3198_v41  ;;  %v2602_v17 = vpop.xlane.xlu0 %2601  ;;  %5623 = vmatprep.mubr.msk.bf16.mxu1 %vm6227_vm1, %v7816_v58 }
 0x557   : > { %v2599_v62 = vpop.xlane.xlu1 %2598  ;;  %v2648_v9 = vsel %vm808_vm2, %v7281_v21, 0.0  ;;  %5633 = vmatprep.subr.bf16.mxu1 %v7816_v58  ;;  %v2563_v12 = vmul.f32 1.442695, %v2501_v28 }
 0x558   : > { %6032 = vrcp.f32 %v2599_v62  ;;  %2649 = vadd.xlane.f32.xlu0 %v2648_v9 }
 0x559   : > { %6034 = vrcp.f32 %v2602_v17  ;;  %v6029_v1 = vpop.eup %6028 }
 0x55a   : > { %v2703_v38 = vmul.f32 %v6029_v1, %v7118_v39  ;;  %v2559_v1 = vmul.f32 1.442695, %v2499_v44  ;;  %v7821_v44 = vld [vmem:[#allocation16_spill] sm:$0xff] }
 0x55c   : > { %v2735_v32 = vpack.c.bf16 %v2703_v38, %v2703_v38 }
 0x55e   : > { %v2608_v40 = vpop.xlane.xlu0 %2607  ;;  %v6031_v18 = vpop.eup %6030  ;;  %5618 = vmatmul.mubr.msk.bf16.vlgmr.msra.gmra.mrb[76].mxu0 %vm808_vm2, %v2735_v32 }
 0x55f   : > { %v2605_v10 = vpop.xlane.xlu1 %2604  ;;  %v2704_v59 = vmul.f32 %v6031_v18, %v7126_v13  ;;  %5628 = vmatpush3.bf16.msra.mxu0 %v3246_v6  ;;  %5629 = vmatprep.mubr.msk.bf16.mxu0 %vm6227_vm1, %v7816_v58  ;;  %v3294_v13 = vsel %vm2764_vm3, %v6941_v3, 0  ;;  %v3582_v18 = vsel %vm2764_vm3, %v6965_v50, 0 }
 0x560   : > { %6036 = vrcp.f32 %v2605_v10  ;;  %5639 = vmatprep.subr.bf16.mxu0 %v7816_v58 }
 0x561   : > { %6038 = vrcp.f32 %v2608_v40  ;;  %v2736_v39 = vpack.c.bf16 %v2704_v59, %v2704_v59 }
 0x562   : > { %v6033_v48 = vpop.eup %6032  ;;  %4152 = vrot.lane.b32.xlu1 %v6701_v37, %s6231_s16 }
 0x563   : > { %v6035_v2 = vpop.eup %6034  ;;  %v2705_v7 = vmul.f32 %v6033_v48, %v7132_v54  ;;  %5624 = vmatmul.mubr.msk.bf16.vlgmr.msra.gmra.mrb[92].mxu1 %vm808_vm2, %v2736_v39 }
 0x564   : > { %5634 = vmatpush3.bf16.msra.mxu1 %v3294_v13  ;;  %5635 = vmatprep.mubr.msk.bf16.mxu1 %vm6227_vm1, %v7816_v58  ;;  %v2706_v63 = vmul.f32 %v6035_v2, %v7130_v55 }
 0x565   : > { %v2737_v19 = vpack.c.bf16 %v2705_v7, %v2705_v7  ;;  %5645 = vmatprep.subr.bf16.mxu1 %v7816_v58 }
 0x566   : > { %v2614_v24 = vpop.xlane.xlu0 %2613  ;;  %v2738_v54 = vpack.c.bf16 %v2706_v63, %v2706_v63 }
 0x567   : > { %v2611_v37 = vpop.xlane.xlu1 %2610  ;;  %5630 = vmatmul.mubr.msk.bf16.vlgmr.msra.gmra.mrb[80].mxu0 %vm808_vm2, %v2737_v19 }
 0x568   : > { %6040 = vrcp.f32 %v2611_v37  ;;  %5640 = vmatpush3.bf16.msra.mxu0 %v3342_v8  ;;  %5641 = vmatprep.mubr.msk.bf16.mxu0 %vm6227_vm1, %v7816_v58  ;;  %v7819_v37 = vld [vmem:[#allocation18_spill] sm:$0xff] }
 0x569   : > { %6042 = vrcp.f32 %v2614_v24  ;;  %5651 = vmatprep.subr.bf16.mxu0 %v7816_v58  ;;  %v3774_v8 = vsel %vm2764_vm3, %v7819_v37, 0 }
 0x56a   : > { %v6037_v3 = vpop.eup %6036 }
 0x56b   : > { %v6039_v55 = vpop.eup %6038  ;;  %v2707_v45 = vmul.f32 %v6037_v3, %v7142_v22  ;;  %5636 = vmatmul.mubr.msk.bf16.vlgmr.msra.gmra.mrb[96].mxu1 %vm808_vm2, %v2738_v54  ;;  %v3438_v22 = vsel %vm2764_vm3, %v6955_v14, 0  ;;  %v3486_v14 = vsel %vm2764_vm3, %v6953_v51, 0  ;;  %v3534_v51 = vsel %vm2764_vm3, %v6967_v29, 0 }
 0x56c   : > { %5646 = vmatpush3.bf16.msra.mxu1 %v3390_v60  ;;  %5647 = vmatprep.mubr.msk.bf16.mxu1 %vm6227_vm1, %v7816_v58  ;;  %v2708_v52 = vmul.f32 %v6039_v55, %v7140_v5 }
 0x56d   : > { %v2739_v46 = vpack.c.bf16 %v2707_v45, %v2707_v45  ;;  %5657 = vmatprep.subr.bf16.mxu1 %v7816_v58 }
 0x56e   : > { %4104 = vrot.lane.b32.xlu0 %v6699_v34, %s6231_s16  ;;  %v2620_v41 = vpop.xlane.xlu0 %2619  ;;  %v2740_v34 = vpack.c.bf16 %v2708_v52, %v2708_v52  ;;  %v7820_v52 = vld [vmem:[#allocation13_spill] sm:$0xff] }
 0x56f   : > { %v2617_v17 = vpop.xlane.xlu1 %2616  ;;  %5642 = vmatmul.mubr.msk.bf16.vlgmr.msra.gmra.mrb[84].mxu0 %vm808_vm2, %v2739_v46 }
 0x570   : > { %6044 = vrcp.f32 %v2617_v17  ;;  %5652 = vmatpush3.bf16.msra.mxu0 %v3438_v22  ;;  %5653 = vmatprep.mubr.msk.bf16.mxu0 %vm6227_vm1, %v7816_v58 }
 0x571   : > { %6046 = vrcp.f32 %v2620_v41  ;;  %5663 = vmatprep.subr.bf16.mxu0 %v7816_v58 }
 0x572   : > { %v6041_v5 = vpop.eup %6040  ;;  %6048 = vpow2.f32 %v2559_v1  ;;  %v7823_v1 = vld [vmem:[#allocation12_spill] sm:$0xff] }
 0x573   : > { %v6043_v62 = vpop.eup %6042  ;;  %v2709_v9 = vmul.f32 %v6041_v5, %v7152_v11  ;;  %5648 = vmatmul.mubr.msk.bf16.vlgmr.msra.gmra.mrb[100].mxu1 %vm808_vm2, %v2740_v34  ;;  %v2500_v11 = vsub.f32 %v7108_v56, %v7257_v53  ;;  %v2502_v56 = vsub.f32 %v7100_v33, %v7255_v0  ;;  %v7817_v33 = vld [vmem:[#allocation15_spill] sm:$0xff]  ;;  %v3870_v5 = vsel %vm2764_vm3, %v7821_v44, 0 }
 0x574   : > { %5658 = vmatpush3.bf16.msra.mxu1 %v3486_v14  ;;  %5659 = vmatprep.mubr.msk.bf16.mxu1 %vm6227_vm1, %v7816_v58  ;;  %v2710_v38 = vmul.f32 %v6043_v62, %v7150_v15  ;;  %v7822_v62 = vld [vmem:[#allocation19_spill] sm:$0xff] }
 0x575   : > { %v2741_v47 = vpack.c.bf16 %v2709_v9, %v2709_v9  ;;  %5669 = vmatprep.subr.bf16.mxu1 %v7816_v58  ;;  %v2561_v53 = vmul.f32 1.442695, %v2500_v11  ;;  %v2565_v59 = vmul.f32 1.442695, %v2502_v56  ;;  %v3726_v9 = vsel %vm2764_vm3, %v7822_v62, 0 }
 0x576   : > { %v2626_v32 = vpop.xlane.xlu0 %2625  ;;  %v2742_v15 = vpack.c.bf16 %v2710_v38, %v2710_v38  ;;  %v7824_v38 = vld [vmem:[#allocation17_spill] sm:$0xff] }
 0x577   : > { %5654 = vmatmul.mubr.msk.bf16.vlgmr.msra.gmra.mrb[88].mxu0 %vm808_vm2, %v2741_v47  ;;  %6050 = vrcp.f32 %v2626_v32  ;;  %v3822_v32 = vsel %vm2764_vm3, %v7824_v38, 0 }
 0x578   : > { %5664 = vmatpush3.bf16.msra.mxu0 %v3534_v51  ;;  %5665 = vmatprep.mubr.msk.bf16.mxu0 %vm6227_vm1, %v7816_v58  ;;  %6052 = vpow2.f32 %v2563_v12 }
 0x579   : > { %5675 = vmatprep.subr.bf16.mxu0 %v7816_v58  ;;  %6054 = vpow2.f32 %v2561_v53 }
 0x57a   : > { %v6045_v61 = vpop.eup %6044  ;;  %6056 = vpow2.f32 %v2565_v59 }
 0x57b   : > { %v6047_v40 = vpop.eup %6046  ;;  %v2711_v29 = vmul.f32 %v6045_v61, %v7161_v30  ;;  %5660 = vmatmul.mubr.msk.bf16.vlgmr.msra.gmra.mrb[104].mxu1 %vm808_vm2, %v2742_v15  ;;  %v3630_v30 = vsel %vm2764_vm3, %v7817_v33, 0  ;;  %v3918_v61 = vsel %vm2764_vm3, %v7239_v25, 0 }
 0x57c   : > { %5670 = vmatpush3.bf16.msra.mxu1 %v3582_v18  ;;  %5671 = vmatprep.mubr.msk.bf16.mxu1 %vm6227_vm1, %v7816_v58  ;;  %v2712_v6 = vmul.f32 %v6047_v40, %v7159_v35  ;;  %v7363_v50 = vpop.eup %6048  ;;  %v7818_v35 = vld [vmem:[#allocation14_spill] sm:$0xff] }
 0x57d   : > { %v2743_v10 = vpack.c.bf16 %v2711_v29, %v2711_v29  ;;  %5681 = vmatprep.subr.bf16.mxu1 %v7816_v58  ;;  %v3678_v39 = vsel %vm2764_vm3, %v7818_v35, 0  ;;  %v2651_v2 = vsel %vm808_vm2, %v7363_v50, 0.0 }
 0x57e   : > { %v2744_v0 = vpack.c.bf16 %v2712_v6, %v2712_v6 }
 0x57f   : > { %5666 = vmatmul.mubr.msk.bf16.vlgmr.msra.gmra.mrb[92].mxu0 %vm808_vm2, %v2743_v10 }
 0x580   : > { %5676 = vmatpush3.bf16.msra.mxu0 %v3630_v30  ;;  %5677 = vmatprep.mubr.msk.bf16.mxu0 %vm6227_vm1, %v7816_v58 }
 0x581   : > { %5687 = vmatprep.subr.bf16.mxu0 %v7816_v58  ;;  %v6051_v48 = vpop.eup %6050 }
 0x582   : > { %v7373_v7 = vpop.eup %6052  ;;  %v2714_v13 = vmul.f32 %v6051_v48, %v7167_v23 }
 0x583   : > { %5672 = vmatmul.mubr.msk.bf16.vlgmr.msra.gmra.mrb[108].mxu1 %vm808_vm2, %v2744_v0  ;;  %v7377_v19 = vpop.eup %6054  ;;  %v2657_v63 = vsel %vm808_vm2, %v7373_v7, 0.0 }
 0x584   : > { %5682 = vmatpush3.bf16.msra.mxu1 %v3678_v39  ;;  %5683 = vmatprep.mubr.msk.bf16.mxu1 %vm6227_vm1, %v7816_v58  ;;  %v2746_v24 = vpack.c.bf16 %v2714_v13, %v2714_v13  ;;  %v2654_v3 = vsel %vm808_vm2, %v7377_v19, 0.0  ;;  %v7386_v54 = vpop.eup %6056 }
 0x585   : > { %5693 = vmatprep.subr.bf16.mxu1 %v7816_v58  ;;  %v2660_v55 = vsel %vm808_vm2, %v7386_v54, 0.0 }
 0x586   : > { %2652 = vadd.xlane.f32.xlu1 %v2651_v2 }
 0x58a   : > { %2658 = vadd.xlane.f32.xlu1 %v2657_v63 }
 0x58b   : > { %5684 = vmatmul.mubr.msk.bf16.vlgmr.msra.gmra.mrb[112].mxu1 %vm808_vm2, %v2746_v24 }
 0x58c   : > { %5694 = vmatpush3.bf16.msra.mxu1 %v3774_v8  ;;  %5695 = vmatprep.mubr.msk.bf16.mxu1 %vm6227_vm1, %v7816_v58 }
 0x58d   : > { %2655 = vadd.xlane.f32.xlu0 %v2654_v3  ;;  %5705 = vmatprep.subr.bf16.mxu1 %v7816_v58  ;;  %v3966_v3 = vsel %vm2764_vm3, %v7233_v43, 0 }
 0x58f   : > { %v2632_v23 = vpop.xlane.xlu0 %2631 }
 0x590   : > { %6058 = vrcp.f32 %v2632_v23 }
 0x591   : > { %2661 = vadd.xlane.f32.xlu0 %v2660_v55 }
 0x594   : > { %v2623_v45 = vpop.xlane.xlu1 %2622 }
 0x595   : > { %6060 = vrcp.f32 %v2623_v45 }
 0x59a   : > { %v6059_v60 = vpop.eup %6058 }
 0x59b   : > { %v2716_v46 = vmul.f32 %v6059_v60, %v7182_v20  ;;  %4248 = vrot.lane.b32.xlu1 %v7820_v52, %s6231_s16 }
 0x59c   : > { %v2629_v41 = vpop.xlane.xlu1 %2628 }
 0x59d   : > { %6062 = vrcp.f32 %v2629_v41  ;;  %v2748_v17 = vpack.c.bf16 %v2716_v46, %v2716_v46 }
 0x59f   : > { %v6061_v22 = vpop.eup %6060  ;;  %5696 = vmatmul.mubr.msk.bf16.vlgmr.msra.gmra.mrb[116].mxu1 %vm808_vm2, %v2748_v17 }
 0x5a0   : > { %v2713_v34 = vmul.f32 %v6061_v22, %v7193_v36  ;;  %5706 = vmatpush3.bf16.msra.mxu1 %v3870_v5  ;;  %5707 = vmatprep.mubr.msk.bf16.mxu1 %vm6227_vm1, %v7816_v58  ;;  %v4062_v5 = vsel %vm2764_vm3, %v7237_v16, 0 }
 0x5a1   : > { %5717 = vmatprep.subr.bf16.mxu1 %v7816_v58 }
 0x5a2   : > { %v2745_v20 = vpack.c.bf16 %v2713_v34, %v2713_v34 }
 0x5a4   : > { %v2635_v14 = vpop.xlane.xlu1 %2634  ;;  %5678 = vmatmul.mubr.msk.bf16.vlgmr.msra.gmra.mrb[96].mxu0 %vm808_vm2, %v2745_v20 }
 0x5a5   : > { %6064 = vrcp.f32 %v2635_v14  ;;  %5688 = vmatpush3.bf16.msra.mxu0 %v3726_v9  ;;  %5689 = vmatprep.mubr.msk.bf16.mxu0 %vm6227_vm1, %v7816_v58 }
 0x5a6   : > { %5699 = vmatprep.subr.bf16.mxu0 %v7816_v58 }
 0x5a7   : > { %v6063_v36 = vpop.eup %6062  ;;  %4200 = vrot.lane.b32.xlu0 %v7823_v1, %s6231_s16  ;;  %s6158_s16 = sshll.u32 %s6235_s19, 4  ;;  %s6159_s16 = int_to_ptr.vmem [resolvable:$false] %s6158_s16 }
 0x5a8   : > { %v2715_v28 = vmul.f32 %v6063_v36, %v7208_v26 }
 0x5aa   : > { %v2747_v47 = vpack.c.bf16 %v2715_v28, %v2715_v28 }
 0x5ac   : > { %5690 = vmatmul.mubr.msk.bf16.vlgmr.msra.gmra.mrb[100].mxu0 %vm808_vm2, %v2747_v47 }
 0x5ad   : > { %5700 = vmatpush3.bf16.msra.mxu0 %v3822_v32  ;;  %5701 = vmatprep.mubr.msk.bf16.mxu0 %vm6227_vm1, %v7816_v58 }
 0x5ae   : > { %5711 = vmatprep.subr.bf16.mxu0 %v7816_v58 }
 0x5af   : > { %v6065_v11 = vpop.eup %6064 }
 0x5b0   : > { %v2717_v51 = vmul.f32 %v6065_v11, %v7223_v57 }
 0x5b2   : > { %v2749_v12 = vpack.c.bf16 %v2717_v51, %v2717_v51 }
 0x5b4   : > { %5702 = vmatmul.mubr.msk.bf16.vlgmr.msra.gmra.mrb[104].mxu0 %vm808_vm2, %v2749_v12 }
 0x5b5   : > { %5712 = vmatpush3.bf16.msra.mxu0 %v3918_v61  ;;  %5713 = vmatprep.mubr.msk.bf16.mxu0 %vm6227_vm1, %v7816_v58 }
 0x5b6   : > { %5723 = vmatprep.subr.bf16.mxu0 %v7816_v58 }
 0x5d0   : > { %v7425_v26 = vpop.f32.mrb[76].mxu1 }
 0x5d1   : > { %v5577_v15 = vpop.f32.mrb[77].mxu1 }
 0x5d2   : > { %v2853_v40 = vpop.f32.mrb[78].mxu1 }
 0x5d3   : > { %v5578_v56 = vpop.f32.mrb[79].mxu1 }
 0x5d5   : > { %v7427_v53 = vpop.f32.mrb[60].mxu0  ;;  %v2638_v57 = vpop.xlane.xlu0 %2637 }
 0x5d6   : > { %6066 = vrcp.f32 %v2638_v57  ;;  %v5571_v29 = vpop.f32.mrb[61].mxu0 }
 0x5d7   : > { %v2805_v18 = vpop.f32.mrb[62].mxu0 }
 0x5d8   : > { %v5572_v25 = vpop.f32.mrb[63].mxu0 }
 0x5d9   : > { %v2641_v10 = vpop.xlane.xlu1 %2640 }
 0x5da   : > { %6068 = vrcp.f32 %v2641_v10 }
 0x5dd   : > { %v7429_v6 = vpop.f32.mrb[64].mxu0  ;;  %v2644_v59 = vpop.xlane.xlu0 %2643 }
 0x5de   : > { %v7431_v33 = vpop.f32.mrb[80].mxu1  ;;  %v2647_v30 = vpop.xlane.xlu1 %2646  ;;  %6070 = vrcp.f32 %v2644_v59 }
 0x5df   : > { %6072 = vrcp.f32 %v2647_v30  ;;  %v5583_v0 = vpop.f32.mrb[65].mxu0  ;;  %v5589_v48 = vpop.f32.mrb[81].mxu1 }
 0x5e0   : > { %v6067_v35 = vpop.eup %6066  ;;  %v2901_v39 = vpop.f32.mrb[66].mxu0 }
 0x5e1   : > { %v2949_v2 = vpop.f32.mrb[82].mxu1  ;;  %v2718_v13 = vmul.f32 %v6067_v35, %v7247_v49  ;;  %v5584_v63 = vpop.f32.mrb[67].mxu0 }
 0x5e2   : > { %v5590_v24 = vpop.f32.mrb[83].mxu1  ;;  %v4153_v36 = vpop.permute.xlu1 %4152 }
 0x5e3   : > { %v2750_v37 = vpack.c.bf16 %v2718_v13, %v2718_v13  ;;  %v4158_v28 = vsel %vm2764_vm3, %v4153_v36, 0 }
 0x5e4   : > { %v6069_v8 = vpop.eup %6068 }
 0x5e5   : > { %v2719_v23 = vmul.f32 %v6069_v8, %v7253_v4  ;;  %v7437_v55 = vpop.f32.mrb[68].mxu0  ;;  %5708 = vmatmul.mubr.msk.bf16.vlgmr.msra.gmra.mrb[120].mxu1 %vm808_vm2, %v2750_v37  ;;  %v2650_v45 = vpop.xlane.xlu0 %2649  ;;  %v4014_v4 = vsel %vm2764_vm3, %v7235_v31, 0 }
 0x5e6   : > { %5718 = vmatpush3.bf16.msra.mxu1 %v3966_v3  ;;  %6074 = vrcp.f32 %v2650_v45  ;;  %v5595_v60 = vpop.f32.mrb[69].mxu0  ;;  %5719 = vmatprep.mubr.msk.bf16.mxu1 %vm6227_vm1, %v7816_v58 }
 0x5e7   : > { %v2997_v49 = vpop.f32.mrb[70].mxu0  ;;  %v2751_v46 = vpack.c.bf16 %v2719_v23, %v2719_v23  ;;  %5729 = vmatprep.subr.bf16.mxu1 %v7816_v58 }
 0x5e8   : > { %v6071_v52 = vpop.eup %6070  ;;  %v5596_v41 = vpop.f32.mrb[71].mxu0 }
 0x5e9   : > { %v6073_v43 = vpop.eup %6072  ;;  %v2720_v17 = vmul.f32 %v6071_v52, %v7266_v27  ;;  %5714 = vmatmul.mubr.msk.bf16.vlgmr.msra.gmra.mrb[108].mxu0 %vm808_vm2, %v2751_v46  ;;  %v4105_v31 = vpop.permute.xlu0 %4104 }
 0x5ea   : > { %5724 = vmatpush3.bf16.msra.mxu0 %v4014_v4  ;;  %5725 = vmatprep.mubr.msk.bf16.mxu0 %vm6227_vm1, %v7816_v58  ;;  %v2721_v22 = vmul.f32 %v6073_v43, %v7269_v42  ;;  %v4110_v16 = vsel %vm2764_vm3, %v4105_v31, 0 }
 0x5eb   : > { %v2752_v44 = vpack.c.bf16 %v2720_v17, %v2720_v17  ;;  %5735 = vmatprep.subr.bf16.mxu0 %v7816_v58 }
 0x5ec   : > { %v2753_v62 = vpack.c.bf16 %v2721_v22, %v2721_v22 }
 0x5ed   : > { %v7453_v34 = vpop.f32.mrb[72].mxu0  ;;  %5720 = vmatmul.mubr.msk.bf16.vlgmr.msra.gmra.mrb[124].mxu1 %vm808_vm2, %v2752_v44 }
 0x5ee   : > { %5730 = vmatpush3.bf16.msra.mxu1 %v4062_v5  ;;  %v5607_v27 = vpop.f32.mrb[73].mxu0  ;;  %5731 = vmatprep.mubr.msk.bf16.mxu1 %vm6227_vm1, %v7816_v58 }
 0x5ef   : > { %v3093_v20 = vpop.f32.mrb[74].mxu0  ;;  %5741 = vmatprep.subr.bf16.mxu1 %v7816_v58 }
 0x5f0   : > { %v6075_v42 = vpop.eup %6074  ;;  %v5608_v9 = vpop.f32.mrb[75].mxu0 }
 0x5f1   : > { %v2722_v14 = vmul.f32 %v6075_v42, %v7281_v21  ;;  %5726 = vmatmul.mubr.msk.bf16.vlgmr.msra.gmra.mrb[112].mxu0 %vm808_vm2, %v2753_v62 }
 0x5f2   : > { %5736 = vmatpush3.bf16.msra.mxu0 %v4110_v16  ;;  %5737 = vmatprep.mubr.msk.bf16.mxu0 %vm6227_vm1, %v7816_v58 }
 0x5f3   : > { %v2754_v1 = vpack.c.bf16 %v2722_v14, %v2722_v14  ;;  %5747 = vmatprep.subr.bf16.mxu0 %v7816_v58 }
 0x5f5   : > { %5732 = vmatmul.mubr.msk.bf16.vlgmr.msra.gmra.mrb[128].mxu1 %vm808_vm2, %v2754_v1 }
 0x5f6   : > { %5742 = vmatpush3.bf16.msra.mxu1 %v4158_v28  ;;  %5743 = vmatprep.mubr.msk.bf16.mxu1 %vm6227_vm1, %v7816_v58 }
 0x5f7   : > { %5753 = vmatprep.subr.bf16.mxu1 %v7816_v58 }
 0x613   : > { %v2653_v21 = vpop.xlane.xlu1 %2652 }
 0x614   : > { %6076 = vrcp.f32 %v2653_v21 }
 0x617   : > { %v2659_v47 = vpop.xlane.xlu1 %2658 }
 0x618   : > { %6078 = vrcp.f32 %v2659_v47 }
 0x61a   : > { %v2656_v38 = vpop.xlane.xlu0 %2655 }
 0x61b   : > { %6080 = vrcp.f32 %v2656_v38  ;;  %v4249_v59 = vpop.permute.xlu1 %4248 }
 0x61c   : > { %v4254_v2 = vsel %vm2764_vm3, %v4249_v59, 0 }
 0x61e   : > { %v6077_v32 = vpop.eup %6076  ;;  %v2662_v11 = vpop.xlane.xlu0 %2661 }
 0x61f   : > { %v2723_v51 = vmul.f32 %v6077_v32, %v7363_v50  ;;  %v7471_v12 = vpop.f32.mrb[84].mxu1  ;;  %6082 = vrcp.f32 %v2662_v11 }
 0x620   : > { %v5601_v61 = vpop.f32.mrb[85].mxu1 }
 0x621   : > { %v3045_v15 = vpop.f32.mrb[86].mxu1  ;;  %v2755_v40 = vpack.c.bf16 %v2723_v51, %v2723_v51 }
 0x622   : > { %v6079_v56 = vpop.eup %6078  ;;  %v5602_v57 = vpop.f32.mrb[87].mxu1 }
 0x623   : > { %v4201_v29 = vpop.permute.xlu0 %4200  ;;  %5738 = vmatmul.mubr.msk.bf16.vlgmr.msra.gmra.mrb[116].mxu0 %vm808_vm2, %v2755_v40  ;;  %v2725_v50 = vmul.f32 %v6079_v56, %v7373_v7 }
 0x624   : > { %v4206_v18 = vsel %vm2764_vm3, %v4201_v29, 0  ;;  %5749 = vmatprep.mubr.msk.bf16.mxu0 %vm6227_vm1, %v7816_v58 }
 0x625   : > { %5748 = vmatpush3.bf16.msra.mxu0 %v4206_v18  ;;  %v6081_v25 = vpop.eup %6080  ;;  %v2757_v39 = vpack.c.bf16 %v2725_v50, %v2725_v50 }
 0x626   : > { %v2724_v10 = vmul.f32 %v6081_v25, %v7377_v19 }
 0x628   : > { %v7479_v30 = vpop.f32.mrb[88].mxu1  ;;  %v2756_v0 = vpack.c.bf16 %v2724_v10, %v2724_v10 }
 0x629   : > { %v6083_v48 = vpop.eup %6082  ;;  %v5613_v35 = vpop.f32.mrb[89].mxu1 }
 0x62a   : > { %v3141_v13 = vpop.f32.mrb[90].mxu1  ;;  %5744 = vmatmul.mubr.msk.bf16.vlgmr.msra.gmra.mrb[132].mxu1 %vm808_vm2, %v2756_v0  ;;  %v2726_v7 = vmul.f32 %v6083_v48, %v7386_v54 }
 0x62b   : > { %v5614_v63 = vpop.f32.mrb[91].mxu1  ;;  %5750 = vmatmul.mubr.msk.bf16.vlgmr.msra.gmra.mrb[120].mxu0 %vm808_vm2, %v2757_v39  ;;  %5754 = vmatpush3.bf16.msra.mxu1 %v4254_v2 }
 0x62c   : > { %5755 = vmatprep.mubr.msk.bf16.mxu1 %vm6227_vm1, %v7816_v58  ;;  %v2758_v19 = vpack.c.bf16 %v2726_v7, %v2726_v7 }
 0x631   : > { %v3186_v24 = vpop.f32.mrb[76].mxu0 }
 0x632   : > { %5756 = vmatmul.mubr.msk.bf16.vlgmr.msra.gmra.mrb[136].mxu1 %vm808_vm2, %v2758_v19  ;;  %v5619_v37 = vpop.f32.mrb[77].mxu0 }
 0x633   : > { %v3189_v8 = vpop.f32.mrb[78].mxu0 }
 0x634   : > { %v5620_v3 = vpop.f32.mrb[79].mxu0 }
 0x636   : > { %v3234_v23 = vpop.f32.mrb[92].mxu1 }
 0x637   : > { %v5866_v45 = vpack.i.bf16 %v3234_v23, %v3186_v24  ;;  %v5625_v60 = vpop.f32.mrb[93].mxu1 }
 0x638   : > { %v3237_v49 = vpop.f32.mrb[94].mxu1 }
 0x639   : > { %v5626_v46 = vpop.f32.mrb[95].mxu1  ;;  %5867 = vrot.lane.b32.xlu0 %v5866_v45, %s6232_s15 }
 0x63a   : > { %v3282_v52 = vpop.f32.mrb[80].mxu0 }
 0x63b   : > { %v5631_v54 = vpop.f32.mrb[81].mxu0 }
 0x63c   : > { %v3285_v41 = vpop.f32.mrb[82].mxu0 }
 0x63d   : > { %v5632_v43 = vpop.f32.mrb[83].mxu0 }
 0x63e   : > { %v3330_v58 = vpop.f32.mrb[96].mxu1 }
 0x63f   : > { %v5871_v4 = vpack.i.bf16 %v3330_v58, %v3282_v52  ;;  %v5637_v17 = vpop.f32.mrb[97].mxu1 }
 0x640   : > { %v3333_v22 = vpop.f32.mrb[98].mxu1 }
 0x641   : > { %5872 = vrot.lane.b32.xlu1 %v5871_v4, %s6232_s15  ;;  %v5638_v44 = vpop.f32.mrb[99].mxu1 }
 0x642   : > { %v3378_v5 = vpop.f32.mrb[84].mxu0 }
 0x643   : > { %v5643_v31 = vpop.f32.mrb[85].mxu0 }
 0x644   : > { %v3381_v27 = vpop.f32.mrb[86].mxu0  ;;  %v5928_v31 = vld [vmem:[%s7781_s5] sm:$0xff]  }
 0x645   : > { %v5644_v20 = vpop.f32.mrb[87].mxu0  ;;  %5759 = vmatprep.subr.bf16.mxu0 %v5928_v31 }
 0x646   : > { %v3426_v62 = vpop.f32.mrb[100].mxu1  ;;  %5760 = vmatpush3.bf16.msra.mxu0 %v5928_v31 }
 0x647   : > { %v5876_v42 = vpack.i.bf16 %v3426_v62, %v3378_v5  ;;  %v5649_v9 = vpop.f32.mrb[101].mxu1 }
 0x648   : > { %v3429_v14 = vpop.f32.mrb[102].mxu1 }
 0x649   : > { %5877 = vrot.lane.b32.xlu0 %v5876_v42, %s6232_s15  ;;  %v5650_v16 = vpop.f32.mrb[103].mxu1 }
 0x64a   : > { %v3474_v36 = vpop.f32.mrb[88].mxu0 }
 0x64b   : > { %v5655_v1 = vpop.f32.mrb[89].mxu0 }
 0x64c   : > { %v3477_v28 = vpop.f32.mrb[90].mxu0 }
 0x64d   : > { %v5656_v21 = vpop.f32.mrb[91].mxu0  ;;  %v5929_v28 = vld [vmem:[%s7781_s5 + $0x8] sm:$0xff]  }
 0x64e   : > { %v3522_v47 = vpop.f32.mrb[104].mxu1  ;;  %5761 = vmatprep.subr.bf16.mxu0 %v5929_v28 }
 0x64f   : > { %v5881_v38 = vpack.i.bf16 %v3522_v47, %v3474_v36  ;;  %v5661_v32 = vpop.f32.mrb[105].mxu1  ;;  %5762 = vmatpush3.bf16.msra.mxu0 %v5929_v28 }
 0x650   : > { %v3525_v11 = vpop.f32.mrb[106].mxu1 }
 0x651   : > { %5882 = vrot.lane.b32.xlu1 %v5881_v38, %s6232_s15  ;;  %v5662_v51 = vpop.f32.mrb[107].mxu1 }
 0x652   : > { %v3570_v61 = vpop.f32.mrb[92].mxu0 }
 0x653   : > { %v5667_v15 = vpop.f32.mrb[93].mxu0 }
 0x654   : > { %v3573_v40 = vpop.f32.mrb[94].mxu0 }
 0x655   : > { %v5668_v56 = vpop.f32.mrb[95].mxu0 }
 0x656   : > { %v3618_v57 = vpop.f32.mrb[108].mxu1 }
 0x657   : > { %v5886_v29 = vpack.i.bf16 %v3618_v57, %v3570_v61  ;;  %v5673_v18 = vpop.f32.mrb[109].mxu1 }
 0x658   : > { %v3621_v25 = vpop.f32.mrb[110].mxu1 }
 0x659   : > { %5887 = vrot.lane.b32.xlu0 %v5886_v29, %s6233_s24  ;;  %v5674_v50 = vpop.f32.mrb[111].mxu1 }
 0x65e   : > { %v3714_v10 = vpop.f32.mrb[112].mxu1 }
 0x65f   : > { %v5685_v59 = vpop.f32.mrb[113].mxu1 }
 0x660   : > { %v3717_v0 = vpop.f32.mrb[114].mxu1 }
 0x661   : > { %v5686_v48 = vpop.f32.mrb[115].mxu1 }
 0x672   : > { %v3810_v35 = vpop.f32.mrb[116].mxu1 }
 0x673   : > { %v5697_v39 = vpop.f32.mrb[117].mxu1 }
 0x674   : > { %v3813_v2 = vpop.f32.mrb[118].mxu1 }
 0x675   : > { %v5698_v13 = vpop.f32.mrb[119].mxu1 }
 0x677   : > { %v3666_v63 = vpop.f32.mrb[96].mxu0 }
 0x678   : > { %v5891_v7 = vpack.i.bf16 %v3714_v10, %v3666_v63  ;;  %v5679_v19 = vpop.f32.mrb[97].mxu0 }
 0x679   : > { %v3669_v24 = vpop.f32.mrb[98].mxu0 }
 0x67a   : > { %v5680_v37 = vpop.f32.mrb[99].mxu0  ;;  %5892 = vrot.lane.b32.xlu1 %v5891_v7, %s6233_s24 }
 0x67f   : > { %v3762_v8 = vpop.f32.mrb[100].mxu0 }
 0x680   : > { %v5901_v3 = vpack.i.bf16 %v3810_v35, %v3762_v8  ;;  %v5691_v23 = vpop.f32.mrb[101].mxu0 }
 0x681   : > { %v3765_v45 = vpop.f32.mrb[102].mxu0 }
 0x682   : > { %v5692_v60 = vpop.f32.mrb[103].mxu0 }
 0x687   : > { %v3858_v49 = vpop.f32.mrb[104].mxu0 }
 0x688   : > { %v5703_v46 = vpop.f32.mrb[105].mxu0 }
 0x689   : > { %v3861_v52 = vpop.f32.mrb[106].mxu0 }
 0x68a   : > { %v5704_v54 = vpop.f32.mrb[107].mxu0 }
 0x6ab   : > { %v7494_v41 = vpop.permute.xlu0 %5867 }
 0x6ac   : > { %v5869_v46 = vunpack.i.l.bf16 %v7494_v41 }
 0x6b3   : > { %v7507_v36 = vpop.permute.xlu1 %5872 }
 0x6b8   : > { %v3906_v43 = vpop.f32.mrb[120].mxu1 }
 0x6b9   : > { %v5911_v58 = vpack.i.bf16 %v3906_v43, %v3858_v49  ;;  %v5709_v4 = vpop.f32.mrb[121].mxu1  ;;  %v5870_v49 = vunpack.i.h.bf16 %v7494_v41 }
 0x6ba   : > { %v3909_v17 = vpop.f32.mrb[122].mxu1  ;;  %v4392_v4 = vsel %vm808_vm2, %v7427_v53, %v5869_v46 }
 0x6bb   : > { %v5710_v22 = vpop.f32.mrb[123].mxu1  ;;  %v5878_v44 = vpop.permute.xlu0 %5877 }
 0x6bc   : > { %v3954_v5 = vpop.f32.mrb[108].mxu0  ;;  %v5880_v27 = vunpack.i.h.bf16 %v5878_v44  ;;  %v5879_v20 = vunpack.i.l.bf16 %v5878_v44 }
 0x6bd   : > { %v5715_v62 = vpop.f32.mrb[109].mxu0 }
 0x6be   : > { %v3957_v42 = vpop.f32.mrb[110].mxu0  ;;  %v7501_v9 = vsel %vm808_vm2, %v7471_v12, %v5880_v27  ;;  %v7505_v14 = vsel %vm808_vm2, %v7437_v55, %v5879_v20  ;;  %v5875_v62 = vunpack.i.h.bf16 %v7507_v36 }
 0x6bf   : > { %v5716_v16 = vpop.f32.mrb[111].mxu0  ;;  %v5874_v42 = vunpack.i.l.bf16 %v7507_v36 }
 0x6c0   : > { %v4002_v1 = vpop.f32.mrb[124].mxu1 }
 0x6c1   : > { %v5896_v21 = vpack.i.bf16 %v4002_v1, %v3954_v5  ;;  %v5721_v47 = vpop.f32.mrb[125].mxu1  ;;  %v4395_v1 = vsel %vm808_vm2, %v7431_v33, %v5875_v62  ;;  %v4394_v28 = vsel %vm808_vm2, %v7429_v6, %v5874_v42  ;;  %v6120_v62 = vld [vmem:[%s6417_s18 + $0x20] sm:$0xff] }
 0x6c2   : > { %v4005_v38 = vpop.f32.mrb[126].mxu1 }
 0x6c3   : > { %5897 = vrot.lane.b32.xlu0 %v5896_v21, %s6234_s17  ;;  %v5722_v12 = vpop.f32.mrb[127].mxu1  ;;  %v5883_v55 = vpop.permute.xlu1 %5882 }
 0x6c4   : > { %v4050_v32 = vpop.f32.mrb[112].mxu0  ;;  %v5885_v11 = vunpack.i.h.bf16 %v5883_v55  ;;  %v5884_v51 = vunpack.i.l.bf16 %v5883_v55 }
 0x6c5   : > { %v5727_v61 = vpop.f32.mrb[113].mxu0 }
 0x6c6   : > { %v4053_v15 = vpop.f32.mrb[114].mxu0  ;;  %v7515_v40 = vsel %vm808_vm2, %v7479_v30, %v5885_v11  ;;  %v7519_v56 = vsel %vm808_vm2, %v7453_v34, %v5884_v51 }
 0x6c7   : > { %v5728_v57 = vpop.f32.mrb[115].mxu0  ;;  %5902 = vrot.lane.b32.xlu0 %v5901_v3, %s6233_s24 }
 0x6c8   : > { %v4098_v29 = vpop.f32.mrb[128].mxu1 }
 0x6c9   : > { %v5906_v18 = vpack.i.bf16 %v4098_v29, %v4050_v32  ;;  %v5733_v25 = vpop.f32.mrb[129].mxu1 }
 0x6ca   : > { %v4101_v50 = vpop.f32.mrb[130].mxu1 }
 0x6cb   : > { %5907 = vrot.lane.b32.xlu1 %v5906_v18, %s6234_s17  ;;  %v5734_v10 = vpop.f32.mrb[131].mxu1  ;;  %v5888_v60 = vpop.permute.xlu0 %5887 }
 0x6cc   : > { %v5890_v52 = vunpack.i.h.bf16 %v5888_v60  ;;  %v5889_v54 = vunpack.i.l.bf16 %v5888_v60 }
 0x6ce   : > { %v4401_v44 = vsel %vm4400_vm4, %v4392_v4, %v5889_v54 }
 0x6cf   : > { %5912 = vrot.lane.b32.xlu1 %v5911_v58, %s6233_s24  ;;  %v4393_v58 = vsel %vm808_vm2, %v7425_v26, %v5870_v49  ;;  %v6118_v49 = vld [vmem:[%s6417_s18 + $0x8] sm:$0xff]  ;;  %s458_s24 = scalar_lea.vmem [#allocation5], %s5058_s22 }
 0x6d0   : > { %v4402_v5 = vsel %vm4400_vm4, %v4393_v58, %v5890_v52  ;;  %s4978_s22 = sshll.u32 %s458_s24, 4  ;;  %s7729_s22 = int_to_ptr.vmem [resolvable:$true] %s4978_s22 }
 0x6d1   : > { %p6161_p8 = scmp.lt.s32.totalorder %s7729_s22, %s6159_s16 }
 0x6ec   : > { %v5893_v31 = vpop.permute.xlu1 %5892 }
 0x6ed   : > { %v5895_v26 = vunpack.i.h.bf16 %v5893_v31  ;;  %v5894_v16 = vunpack.i.l.bf16 %v5893_v31 }
 0x6ef   : > { %v4404_v38 = vsel %vm4400_vm4, %v4395_v1, %v5895_v26  ;;  %v4403_v12 = vsel %vm4400_vm4, %v4394_v28, %v5894_v16  ;;  %v6121_v16 = vld [vmem:[%s6417_s18 + $0x30] sm:$0xff]  ;;  %v6122_v1 = vld [vmem:[%s6417_s18 + $0x28] sm:$0xff] }
 0x6f6   : > { %v4146_v59 = vpop.f32.mrb[116].mxu0 }
 0x6f7   : > { %v5739_v0 = vpop.f32.mrb[117].mxu0 }
 0x6f8   : > { %v4149_v30 = vpop.f32.mrb[118].mxu0 }
 0x6f9   : > { %v5740_v48 = vpop.f32.mrb[119].mxu0 }
 0x6fd   : > { %v4194_v35 = vpop.f32.mrb[132].mxu1 }
 0x6fe   : > { %v5916_v39 = vpack.i.bf16 %v4194_v35, %v4146_v59  ;;  %v4242_v34 = vpop.f32.mrb[120].mxu0  ;;  %v5745_v2 = vpop.f32.mrb[133].mxu1 }
 0x6ff   : > { %v5751_v13 = vpop.f32.mrb[121].mxu0  ;;  %v4197_v63 = vpop.f32.mrb[134].mxu1 }
 0x700   : > { %v4245_v7 = vpop.f32.mrb[122].mxu0  ;;  %5917 = vrot.lane.b32.xlu0 %v5916_v39, %s6234_s17  ;;  %v5746_v19 = vpop.f32.mrb[135].mxu1  ;;  %v5165_v13 = vld [vmem:[%s7782_s6] ss:$0 sm:$0xff] }
 0x701   : > { %v5752_v24 = vpop.f32.mrb[123].mxu0 }
 0x705   : > { %v4290_v37 = vpop.f32.mrb[136].mxu1 }
 0x706   : > { %v5921_v8 = vpack.i.bf16 %v4290_v37, %v4242_v34  ;;  %v5757_v3 = vpop.f32.mrb[137].mxu1 }
 0x707   : > { %v4293_v23 = vpop.f32.mrb[138].mxu1 }
 0x708   : > { %v5758_v45 = vpop.f32.mrb[139].mxu1  ;;  %5922 = vrot.lane.b32.xlu1 %v5921_v8, %s6234_s17  ;;  %v6117_v23 = vld [vmem:[%s6417_s18 + $0x10] sm:$0xff]  ;;  %s6154_s17 = scalar_lea.vmem %s7729_s22, 1024 }
 0x709   : > { %p6155_p6 = scmp.ne.s32.totalorder %s7729_s22, %s6154_s17 }
 0x70b   : > { %p6156_p12 = pnand %p6155_p6, %p7825_p11 }
 0x70d   : > { %p6157_p13 = pneg %p6156_p12 }
 0x735   : > { %v5898_v43 = vpop.permute.xlu0 %5897 }
 0x736   : > { %v5900_v17 = vunpack.i.h.bf16 %v5898_v43  ;;  %v5899_v22 = vunpack.i.l.bf16 %v5898_v43  ;;  %v6119_v43 = vld [vmem:[%s6417_s18 + $0x18] sm:$0xff] }
 0x738   : > { %v4410_v41 = vsel %vm4409_vm5, %v4401_v44, %v5899_v22  ;;  %v4411_v27 = vsel %vm4409_vm5, %v4402_v5, %v5900_v17 }
 0x739   : > { %v4418_v20 = vpack.c.bf16 %v4411_v27, %v4410_v41  ;;  %v5903_v11 = vpop.permute.xlu0 %5902 }
 0x73a   : > { %v5905_v51 = vunpack.i.h.bf16 %v5903_v11  ;;  %v5904_v61 = vunpack.i.l.bf16 %v5903_v11 }
 0x73b   : > { %5763 = vmatprep.mubr.msk.bf16.mxu0 %vm472_vm0, %v4418_v20 }
 0x73c   : > { %v4405_v6 = vsel %vm4400_vm4, %v7505_v14, %v5904_v61  ;;  %v4406_v29 = vsel %vm4400_vm4, %v7501_v9, %v5905_v51 }
 0x73d   : > { %v5908_v53 = vpop.permute.xlu1 %5907 }
 0x73e   : > { %v5910_v21 = vunpack.i.h.bf16 %v5908_v53  ;;  %v5909_v47 = vunpack.i.l.bf16 %v5908_v53 }
 0x740   : > { %v4413_v55 = vsel %vm4409_vm5, %v4404_v38, %v5910_v21  ;;  %v4412_v36 = vsel %vm4409_vm5, %v4403_v12, %v5909_v47  ;;  %v6123_v47 = vld [vmem:[%s6417_s18 + $0x38] sm:$0xff] }
 0x741   : > { %v4419_v32 = vpack.c.bf16 %v4413_v55, %v4412_v36  ;;  %v5913_v18 = vpop.permute.xlu1 %5912 }
 0x742   : > { %v5915_v59 = vunpack.i.h.bf16 %v5913_v18  ;;  %v5914_v0 = vunpack.i.l.bf16 %v5913_v18 }
 0x743   : > { %5764 = vmatmul.mubr.msk.bf16.vlgmr.msra.gmra.mrb[124].mxu0 %vm472_vm0, %v4419_v32 }
 0x744   : > { %v4408_v14 = vsel %vm4400_vm4, %v7515_v40, %v5915_v59  ;;  %v4407_v9 = vsel %vm4400_vm4, %v7519_v56, %v5914_v0  ;;  %v6116_v56 = vld [vmem:[%s6417_s18] sm:$0xff]  ;;  %s6160_s18 = scalar_lea.vmem %s6159_s16, 2048 }
 0x745   : > { %p6162_p10 = scmp.lt.s32.totalorder %s6160_s18, %s6154_s17 }
 0x747   : > { %p6163_p0 = por %p6162_p10, %p6161_p8 }
 0x749   : > { %p6164_p2 = pnand %p6163_p0, %p6157_p13 }
 0x772   : > { %v5918_v33 = vpop.permute.xlu0 %5917 }
 0x773   : > { %v5920_v15 = vunpack.i.h.bf16 %v5918_v33  ;;  %v5919_v57 = vunpack.i.l.bf16 %v5918_v33 }
 0x775   : > { %v4414_v25 = vsel %vm4409_vm5, %v4405_v6, %v5919_v57  ;;  %v4415_v50 = vsel %vm4409_vm5, %v4406_v29, %v5920_v15 }
 0x776   : > { %v4420_v10 = vpack.c.bf16 %v4415_v50, %v4414_v25 }
 0x778   : > { %5767 = vmatprep.mubr.msk.bf16.mxu0 %vm472_vm0, %v4420_v10 }
 0x77a   : > { %v5923_v30 = vpop.permute.xlu1 %5922 }
 0x77b   : > { %v5925_v48 = vunpack.i.h.bf16 %v5923_v30  ;;  %v5924_v35 = vunpack.i.l.bf16 %v5923_v30 }
 0x77d   : > { %v4417_v39 = vsel %vm4409_vm5, %v4408_v14, %v5925_v48  ;;  %v4416_v34 = vsel %vm4409_vm5, %v4407_v9, %v5924_v35 }
 0x77e   : > { %v4421_v2 = vpack.c.bf16 %v4417_v39, %v4416_v34  ;;  %v5930_v39 = vld [vmem:[%s7785_s9] sm:$0xff]   ;;  %v5931_v34 = vld [vmem:[%s7785_s9 + $0x8] sm:$0xff]  }
 0x77f   : > { %5771 = vmatprep.subr.bf16.mxu1 %v5930_v39 }
 0x780   : > { %5768 = vmatmul.mubr.msk.bf16.gmra.mrb[128].mxu0 %vm472_vm0, %v4421_v2  ;;  %5772 = vmatpush3.bf16.msra.mxu1 %v5930_v39 }
 0x781   : > { %5773 = vmatprep.subr.bf16.mxu1 %v5931_v34 }
 0x784   : > { %5774 = vmatpush3.bf16.msra.mxu1 %v5931_v34 }
 0x816   : > { %v5765_v63 = vpop.f32.mrb[124].mxu0 }
 0x817   : > { %v4491_v7 = vpop.f32.mrb[125].mxu0  ;;  %v4500_v19 = vadd.f32 %v5765_v63, %v5165_v13 }
 0x818   : > { %v4492_v40 = vadd.f32 %v5165_v13, %v4491_v7  ;;  %v5766_v24 = vpop.f32.mrb[126].mxu0 }
 0x819   : > { %v4494_v37 = vpop.f32.mrb[127].mxu0  ;;  %v7569_v45 = vadd.f32 %v6117_v23, %v4500_v19  ;;  %v4503_v60 = vadd.f32 %v5766_v24, %v5165_v13 }
 0x81a   : > { %v7566_v8 = vadd.f32 %v6116_v56, %v4492_v40  ;;  %v4495_v3 = vadd.f32 %v5165_v13, %v4494_v37 }
 0x81b   : > { %v7579_v58 = vadd.f32 %v6119_v43, %v4503_v60  ;;  %v4538_v4 = vsel %vm472_vm0, %v7569_v45, 0.0 }
 0x81c   : > { %v7572_v46 = vadd.f32 %v6118_v49, %v4495_v3  ;;  %v4532_v52 = vsel %vm472_vm0, %v7566_v8, 0.0 }
 0x81d   : > { %4533 = vadd.xlane.f32.xlu0 %v4532_v52  ;;  %v4541_v17 = vsel %vm472_vm0, %v7579_v58, 0.0 }
 0x81e   : > { %v4535_v54 = vsel %vm472_vm0, %v7572_v46, 0.0 }
 0x81f   : > { %4536 = vadd.xlane.f32.xlu1 %v4535_v54 }
 0x821   : > { %4539 = vadd.xlane.f32.xlu0 %v4538_v4 }
 0x825   : > { %4542 = vadd.xlane.f32.xlu0 %v4541_v17 }
 0x853   : > { %v5769_v22 = vpop.f32.mrb[128].mxu0 }
 0x854   : > { %v4516_v44 = vadd.f32 %v5769_v22, %v5165_v13  ;;  %v4507_v5 = vpop.f32.mrb[129].mxu0 }
 0x855   : > { %v4508_v31 = vadd.f32 %v5165_v13, %v4507_v5  ;;  %v5770_v41 = vpop.f32.mrb[130].mxu0  ;;  %v5932_v5 = vld [vmem:[%s7787_s11] sm:$0xff]  }
 0x856   : > { %v4519_v27 = vadd.f32 %v5770_v41, %v5165_v13  ;;  %v4510_v20 = vpop.f32.mrb[131].mxu0  ;;  %v7589_v53 = vadd.f32 %v6121_v16, %v4516_v44  ;;  %5783 = vmatprep.subr.bf16.mxu0 %v5932_v5 }
 0x857   : > { %v7586_v42 = vadd.f32 %v6120_v62, %v4508_v31  ;;  %v4511_v26 = vadd.f32 %v5165_v13, %v4510_v20  ;;  %v5933_v31 = vld [vmem:[%s7787_s11 + $0x8] sm:$0xff]   ;;  %5784 = vmatpush3.bf16.msra.mxu0 %v5932_v5 }
 0x858   : > { %v7597_v38 = vadd.f32 %v6123_v47, %v4519_v27  ;;  %v4550_v55 = vsel %vm472_vm0, %v7589_v53, 0.0  ;;  %5785 = vmatprep.subr.bf16.mxu0 %v5933_v31 }
 0x859   : > { %v7592_v28 = vadd.f32 %v6122_v1, %v4511_v26  ;;  %v4544_v21 = vsel %vm472_vm0, %v7586_v42, 0.0 }
 0x85a   : > { %4545 = vadd.xlane.f32.xlu0 %v4544_v21  ;;  %v4553_v36 = vsel %vm472_vm0, %v7597_v38, 0.0 }
 0x85b   : > { %v4547_v12 = vsel %vm472_vm0, %v7592_v28, 0.0  ;;  %5786 = vmatpush3.bf16.msra.mxu0 %v5933_v31 }
 0x85c   : > { %4548 = vadd.xlane.f32.xlu1 %v4547_v12 }
 0x85e   : > { %4551 = vadd.xlane.f32.xlu0 %v4550_v55 }
 0x860   : > { %4554 = vadd.xlane.f32.xlu1 %v4553_v36 }
 0x8aa   : > { %v4534_v32 = vpop.xlane.xlu0 %4533 }
 0x8ab   : > { %v4556_v11 = vmul.f32 0.03125, %v4534_v32 }
 0x8ac   : > { %v4537_v51 = vpop.xlane.xlu1 %4536 }
 0x8ad   : > { %v7606_v61 = vsub.f32 %v7566_v8, %v4556_v11  ;;  %v4557_v33 = vmul.f32 0.03125, %v4537_v51  ;;  %v5172_v11 = vld [vmem:[%s7783_s7] ss:$0 sm:$0xff] }
 0x8ae   : > { %v4540_v15 = vpop.xlane.xlu0 %4539 }
 0x8af   : > { %v7609_v57 = vsub.f32 %v7572_v46, %v4557_v33  ;;  %v4558_v6 = vmul.f32 0.03125, %v4540_v15  ;;  %v4572_v29 = vmul.f32 %v7606_v61, %v7606_v61 }
 0x8b1   : > { %v7614_v18 = vsub.f32 %v7569_v45, %v4558_v6  ;;  %v4580_v25 = vsel %vm472_vm0, %v4572_v29, 0.0  ;;  %v4573_v50 = vmul.f32 %v7609_v57, %v7609_v57 }
 0x8b2   : > { %4581 = vadd.xlane.f32.xlu0 %v4580_v25  ;;  %v4543_v10 = vpop.xlane.xlu0 %4542  ;;  %v5173_v25 = vld [vmem:[%s7784_s8] ss:$0 sm:$0xff] }
 0x8b3   : > { %v4559_v59 = vmul.f32 0.03125, %v4543_v10  ;;  %v4583_v0 = vsel %vm472_vm0, %v4573_v50, 0.0  ;;  %v4574_v30 = vmul.f32 %v7614_v18, %v7614_v18 }
 0x8b4   : > { %4584 = vadd.xlane.f32.xlu1 %v4583_v0 }
 0x8b5   : > { %v7623_v48 = vsub.f32 %v7579_v58, %v4559_v59  ;;  %v4586_v35 = vsel %vm472_vm0, %v4574_v30, 0.0 }
 0x8b6   : > { %4587 = vadd.xlane.f32.xlu0 %v4586_v35 }
 0x8b7   : > { %v4575_v14 = vmul.f32 %v7623_v48, %v7623_v48 }
 0x8b9   : > { %v4589_v9 = vsel %vm472_vm0, %v4575_v14, 0.0 }
 0x8ba   : > { %4590 = vadd.xlane.f32.xlu1 %v4589_v9 }
 0x8e7   : > { %v4546_v2 = vpop.xlane.xlu0 %4545 }
 0x8e8   : > { %v4560_v13 = vmul.f32 0.03125, %v4546_v2 }
 0x8e9   : > { %v4549_v63 = vpop.xlane.xlu1 %4548 }
 0x8ea   : > { %v7636_v7 = vsub.f32 %v7586_v42, %v4560_v13  ;;  %v4561_v19 = vmul.f32 0.03125, %v4549_v63 }
 0x8eb   : > { %v4552_v40 = vpop.xlane.xlu0 %4551 }
 0x8ec   : > { %v7639_v24 = vsub.f32 %v7592_v28, %v4561_v19  ;;  %v4562_v37 = vmul.f32 0.03125, %v4552_v40  ;;  %v4576_v56 = vmul.f32 %v7636_v7, %v7636_v7 }
 0x8ed   : > { %v4555_v3 = vpop.xlane.xlu1 %4554 }
 0x8ee   : > { %v7644_v23 = vsub.f32 %v7589_v53, %v4562_v37  ;;  %v4563_v60 = vmul.f32 0.03125, %v4555_v3  ;;  %v4592_v49 = vsel %vm472_vm0, %v4576_v56, 0.0  ;;  %v4577_v52 = vmul.f32 %v7639_v24, %v7639_v24 }
 0x8ef   : > { %4593 = vadd.xlane.f32.xlu0 %v4592_v49 }
 0x8f0   : > { %v7650_v54 = vsub.f32 %v7597_v38, %v4563_v60  ;;  %v4595_v43 = vsel %vm472_vm0, %v4577_v52, 0.0  ;;  %v4578_v4 = vmul.f32 %v7644_v23, %v7644_v23 }
 0x8f1   : > { %4596 = vadd.xlane.f32.xlu1 %v4595_v43 }
 0x8f2   : > { %v4598_v17 = vsel %vm472_vm0, %v4578_v4, 0.0  ;;  %v4579_v22 = vmul.f32 %v7650_v54, %v7650_v54 }
 0x8f3   : > { %4599 = vadd.xlane.f32.xlu0 %v4598_v17 }
 0x8f4   : > { %v4601_v44 = vsel %vm472_vm0, %v4579_v22, 0.0 }
 0x8f5   : > { %4602 = vadd.xlane.f32.xlu1 %v4601_v44 }
 0x93f   : > { %v4582_v41 = vpop.xlane.xlu0 %4581 }
 0x940   : > { %v4604_v27 = vmul.f32 0.03125, %v4582_v41 }
 0x941   : > { %v4585_v20 = vpop.xlane.xlu1 %4584 }
 0x942   : > { %v4612_v62 = vadd.f32 1e-05, %v4604_v27  ;;  %v4605_v26 = vmul.f32 0.03125, %v4585_v20 }
 0x943   : > { %v4588_v16 = vpop.xlane.xlu0 %4587 }
 0x944   : > { %6084 = vrsqrt.f32 %v4612_v62  ;;  %v4613_v1 = vadd.f32 1e-05, %v4605_v26  ;;  %v4606_v21 = vmul.f32 0.03125, %v4588_v16 }
 0x946   : > { %6086 = vrsqrt.f32 %v4613_v1  ;;  %v4614_v47 = vadd.f32 1e-05, %v4606_v21 }
 0x947   : > { %v4591_v12 = vpop.xlane.xlu1 %4590 }
 0x948   : > { %6088 = vrsqrt.f32 %v4614_v47  ;;  %v4607_v55 = vmul.f32 0.03125, %v4591_v12  ;;  %v5937_v12 = vld [vmem:[%s7787_s11 + $0x28] sm:$0xff]  }
 0x94a   : > { %v4615_v36 = vadd.f32 1e-05, %v4607_v55  ;;  %v5938_v55 = vld [vmem:[%s7787_s11 + $0x30] sm:$0xff]  }
 0x94c   : > { %6090 = vrsqrt.f32 %v4615_v36  ;;  %v5939_v36 = vld [vmem:[%s7787_s11 + $0x38] sm:$0xff]  }
 0x94e   : > { %v6085_v32 = vpop.eup %6084 }
 0x94f   : > { %v4628_v51 = vmul.f32 %v6085_v32, %v7606_v61  ;;  %v5174_v32 = vld [vmem:[%s7786_s10] ss:$0 sm:$0xff] }
 0x950   : > { %v6087_v33 = vpop.eup %6086 }
 0x951   : > { %v4629_v15 = vmul.f32 %v6087_v33, %v7609_v57  ;;  %v4642_v6 = vmul.f32 %v5172_v11, %v4628_v51 }
 0x952   : > { %v6089_v29 = vpop.eup %6088 }
 0x953   : > { %v4630_v50 = vmul.f32 %v6089_v29, %v7614_v18  ;;  %v4643_v10 = vmul.f32 %v5172_v11, %v4629_v15  ;;  %v4656_v59 = vadd.f32 %v5173_v25, %v4642_v6 }
 0x955   : > { %v4657_v0 = vadd.f32 %v5173_v25, %v4643_v10  ;;  %v4644_v35 = vmul.f32 %v5172_v11, %v4630_v50 }
 0x956   : > { %v6091_v30 = vpop.eup %6090 }
 0x957   : > { %v4631_v14 = vmul.f32 %v6091_v30, %v7623_v48  ;;  %v4664_v9 = vpack.c.bf16 %v4657_v0, %v4656_v59  ;;  %v4658_v57 = vadd.f32 %v5173_v25, %v4644_v35 }
 0x959   : > { %v4645_v61 = vmul.f32 %v5172_v11, %v4631_v14  ;;  %5775 = vmatprep.mubr.msk.bf16.mxu1 %vm472_vm0, %v4664_v9 }
 0x95b   : > { %v4659_v39 = vadd.f32 %v5173_v25, %v4645_v61 }
 0x95d   : > { %v4665_v34 = vpack.c.bf16 %v4659_v39, %v4658_v57 }
 0x95f   : > { %5776 = vmatmul.mubr.msk.bf16.vlgmr.msra.gmra.mrb[140].mxu1 %vm472_vm0, %v4665_v34 }
 0x97c   : > { %v4594_v2 = vpop.xlane.xlu0 %4593 }
 0x97d   : > { %v4608_v13 = vmul.f32 0.03125, %v4594_v2 }
 0x97e   : > { %v4597_v63 = vpop.xlane.xlu1 %4596 }
 0x97f   : > { %v4616_v18 = vadd.f32 1e-05, %v4608_v13  ;;  %v4609_v19 = vmul.f32 0.03125, %v4597_v63 }
 0x980   : > { %v4600_v40 = vpop.xlane.xlu0 %4599 }
 0x981   : > { %6092 = vrsqrt.f32 %v4616_v18  ;;  %v4617_v37 = vadd.f32 1e-05, %v4609_v19  ;;  %v4610_v56 = vmul.f32 0.03125, %v4600_v40 }
 0x982   : > { %v4603_v3 = vpop.xlane.xlu1 %4602 }
 0x983   : > { %6094 = vrsqrt.f32 %v4617_v37  ;;  %v4618_v48 = vadd.f32 1e-05, %v4610_v56  ;;  %v4611_v60 = vmul.f32 0.03125, %v4603_v3 }
 0x985   : > { %6096 = vrsqrt.f32 %v4618_v48  ;;  %v4619_v49 = vadd.f32 1e-05, %v4611_v60 }
 0x987   : > { %6098 = vrsqrt.f32 %v4619_v49 }
 0x98b   : > { %v6093_v52 = vpop.eup %6092 }
 0x98c   : > { %v4632_v43 = vmul.f32 %v6093_v52, %v7636_v7 }
 0x98d   : > { %v6095_v4 = vpop.eup %6094 }
 0x98e   : > { %v4633_v17 = vmul.f32 %v6095_v4, %v7639_v24  ;;  %v4646_v22 = vmul.f32 %v5172_v11, %v4632_v43  ;;  %v5934_v24 = vld [vmem:[%s7787_s11 + $0x10] sm:$0xff]  }
 0x98f   : > { %v6097_v44 = vpop.eup %6096  ;;  %5787 = vmatprep.subr.bf16.mxu0 %v5934_v24 }
 0x990   : > { %v4634_v5 = vmul.f32 %v6097_v44, %v7644_v23  ;;  %v4647_v31 = vmul.f32 %v5172_v11, %v4633_v17  ;;  %v4660_v20 = vadd.f32 %v5173_v25, %v4646_v22  ;;  %5788 = vmatpush3.bf16.msra.mxu0 %v5934_v24  ;;  %v5935_v23 = vld [vmem:[%s7787_s11 + $0x18] sm:$0xff]  }
 0x991   : > { %v6099_v41 = vpop.eup %6098  ;;  %5789 = vmatprep.subr.bf16.mxu0 %v5935_v23 }
 0x992   : > { %v4635_v27 = vmul.f32 %v6099_v41, %v7650_v54  ;;  %v4661_v62 = vadd.f32 %v5173_v25, %v4647_v31  ;;  %v4648_v26 = vmul.f32 %v5172_v11, %v4634_v5  ;;  %v5936_v54 = vld [vmem:[%s7787_s11 + $0x20] sm:$0xff]  }
 0x994   : > { %v4666_v16 = vpack.c.bf16 %v4661_v62, %v4660_v20  ;;  %v4649_v1 = vmul.f32 %v5172_v11, %v4635_v27  ;;  %v4662_v21 = vadd.f32 %v5173_v25, %v4648_v26  ;;  %5790 = vmatpush3.bf16.msra.mxu0 %v5935_v23 }
 0x995   : > { %5791 = vmatprep.subr.bf16.mxu0 %v5936_v54 }
 0x996   : > { %5779 = vmatprep.mubr.msk.bf16.mxu1 %vm472_vm0, %v4666_v16  ;;  %v4663_v7 = vadd.f32 %v5173_v25, %v4649_v1 }
 0x998   : > { %v4667_v47 = vpack.c.bf16 %v4663_v7, %v4662_v21  ;;  %5792 = vmatpush3.bf16.msra.mxu0 %v5936_v54 }
 0x999   : > { %5793 = vmatprep.subr.bf16.mxu0 %v5937_v12 }
 0x99a   : > { %5780 = vmatmul.mubr.msk.bf16.gmra.mrb[144].mxu1 %vm472_vm0, %v4667_v47 }
 0x99c   : > { %5794 = vmatpush3.bf16.msra.mxu0 %v5937_v12 }
 0x99d   : > { %5795 = vmatprep.subr.bf16.mxu0 %v5938_v55 }
 0x9a0   : > { %5796 = vmatpush3.bf16.msra.mxu0 %v5938_v55 }
 0x9a1   : > { %5797 = vmatprep.subr.bf16.mxu0 %v5939_v36 }
 0x9a4   : > { %5798 = vmatpush3.bf16.msra.mxu0 %v5939_v36 }
 0xa32   : > { %v5777_v11 = vpop.f32.mrb[140].mxu1 }
 0xa33   : > { %v4746_v51 = vadd.f32 %v5777_v11, %v5174_v32  ;;  %v4737_v33 = vpop.f32.mrb[141].mxu1 }
 0xa34   : > { %v4738_v15 = vadd.f32 %v5174_v32, %v4737_v33  ;;  %v5778_v6 = vpop.f32.mrb[142].mxu1 }
 0xa35   : > { %v4778_v29 = vmul.f32 0.70710677, %v4746_v51  ;;  %v4749_v25 = vadd.f32 %v5778_v6, %v5174_v32  ;;  %v4740_v50 = vpop.f32.mrb[143].mxu1  ;;  %v4770_v34 = vmul.f32 0.5, %v4746_v51  ;;  %v5181_v6 = vld [vmem:[%s7788_s12] ss:$0 sm:$0xff] }
 0xa36   : > { %v4776_v10 = vmul.f32 0.70710677, %v4738_v15  ;;  %v4741_v59 = vadd.f32 %v5174_v32, %v4740_v50  ;;  %v4768_v63 = vmul.f32 0.5, %v4738_v15 }
 0xa37   : > { %6100 = verf.f32 %v4778_v29  ;;  %v4779_v0 = vmul.f32 0.70710677, %v4749_v25  ;;  %v4771_v2 = vmul.f32 0.5, %v4749_v25 }
 0xa38   : > { %6102 = verf.f32 %v4776_v10  ;;  %v4777_v30 = vmul.f32 0.70710677, %v4741_v59  ;;  %v4769_v18 = vmul.f32 0.5, %v4741_v59 }
 0xa39   : > { %6104 = verf.f32 %v4779_v0 }
 0xa3a   : > { %6106 = verf.f32 %v4777_v30 }
 0xa41   : > { %v6101_v35 = vpop.eup %6100 }
 0xa42   : > { %v6103_v14 = vpop.eup %6102  ;;  %v4794_v9 = vadd.f32 1.0, %v6101_v35 }
 0xa43   : > { %v6105_v61 = vpop.eup %6104  ;;  %v4792_v57 = vadd.f32 1.0, %v6103_v14 }
 0xa44   : > { %v6107_v39 = vpop.eup %6106  ;;  %v4795_v13 = vadd.f32 1.0, %v6105_v61  ;;  %v4802_v40 = vmul.f32 %v4794_v9, %v4770_v34 }
 0xa45   : > { %v4793_v19 = vadd.f32 1.0, %v6107_v39  ;;  %v4800_v56 = vmul.f32 %v4792_v57, %v4768_v63 }
 0xa46   : > { %v4803_v37 = vmul.f32 %v4795_v13, %v4771_v2 }
 0xa47   : > { %v4801_v3 = vmul.f32 %v4793_v19, %v4769_v18 }
 0xa48   : > { %v4809_v48 = vpack.c.bf16 %v4803_v37, %v4802_v40 }
 0xa49   : > { %v4808_v60 = vpack.c.bf16 %v4801_v3, %v4800_v56 }
 0xa4b   : > { %5799 = vmatprep.mubr.bf16.mxu0 %v4808_v60 }
 0xa4c   : > { %5800 = vmatmul.mubr.bf16.vlgmr.msra.gmra.mrb[132].mxu0 %v4809_v48 }
 0xa6d   : > { %v5781_v49 = vpop.f32.mrb[144].mxu1 }
 0xa6e   : > { %v4762_v52 = vadd.f32 %v5781_v49, %v5174_v32  ;;  %v4753_v43 = vpop.f32.mrb[145].mxu1 }
 0xa6f   : > { %v4754_v4 = vadd.f32 %v5174_v32, %v4753_v43  ;;  %v5782_v17 = vpop.f32.mrb[146].mxu1 }
 0xa70   : > { %v4782_v22 = vmul.f32 0.70710677, %v4762_v52  ;;  %v4765_v44 = vadd.f32 %v5782_v17, %v5174_v32  ;;  %v4756_v5 = vpop.f32.mrb[147].mxu1  ;;  %v4774_v47 = vmul.f32 0.5, %v4762_v52 }
 0xa71   : > { %v4780_v31 = vmul.f32 0.70710677, %v4754_v4  ;;  %v4757_v41 = vadd.f32 %v5174_v32, %v4756_v5  ;;  %v4772_v54 = vmul.f32 0.5, %v4754_v4 }
 0xa72   : > { %6108 = verf.f32 %v4782_v22  ;;  %v4783_v27 = vmul.f32 0.70710677, %v4765_v44  ;;  %v4775_v24 = vmul.f32 0.5, %v4765_v44 }
 0xa73   : > { %6110 = verf.f32 %v4780_v31  ;;  %v4781_v20 = vmul.f32 0.70710677, %v4757_v41  ;;  %v4773_v12 = vmul.f32 0.5, %v4757_v41 }
 0xa74   : > { %6112 = verf.f32 %v4783_v27 }
 0xa75   : > { %6114 = verf.f32 %v4781_v20 }
 0xa7c   : > { %v6109_v62 = vpop.eup %6108 }
 0xa7d   : > { %v6111_v26 = vpop.eup %6110  ;;  %v4798_v16 = vadd.f32 1.0, %v6109_v62 }
 0xa7e   : > { %v6113_v1 = vpop.eup %6112  ;;  %v4796_v21 = vadd.f32 1.0, %v6111_v26 }
 0xa7f   : > { %v6115_v7 = vpop.eup %6114  ;;  %v4799_v23 = vadd.f32 1.0, %v6113_v1  ;;  %v4806_v36 = vmul.f32 %v4798_v16, %v4774_v47 }
 0xa80   : > { %v4797_v55 = vadd.f32 1.0, %v6115_v7  ;;  %v4804_v11 = vmul.f32 %v4796_v21, %v4772_v54 }
 0xa81   : > { %v4807_v32 = vmul.f32 %v4799_v23, %v4775_v24 }
 0xa82   : > { %v4805_v51 = vmul.f32 %v4797_v55, %v4773_v12 }
 0xa83   : > { %v4811_v33 = vpack.c.bf16 %v4807_v32, %v4806_v36 }
 0xa84   : > { %v4810_v15 = vpack.c.bf16 %v4805_v51, %v4804_v11 }
 0xa86   : > { %5803 = vmatprep.mubr.bf16.mxu0 %v4810_v15 }
 0xa87   : > { %5804 = vmatmul.mubr.bf16.gmra.mrb[136].mxu0 %v4811_v33 }
 0xb1f   : > { %v5801_v29 = vpop.f32.mrb[132].mxu0 }
 0xb20   : > { %v4926_v25 = vadd.f32 %v5801_v29, %v5181_v6  ;;  %v4917_v50 = vpop.f32.mrb[133].mxu0 }
 0xb21   : > { %v4918_v10 = vadd.f32 %v5181_v6, %v4917_v50  ;;  %v5802_v59 = vpop.f32.mrb[134].mxu0 }
 0xb22   : > { %v4950_v0 = vadd.f32 %v4926_v25, %v7569_v45  ;;  %v4929_v30 = vadd.f32 %v5802_v59, %v5181_v6  ;;  %v4920_v35 = vpop.f32.mrb[135].mxu0 }
 0xb23   : > { %v4948_v14 = vadd.f32 %v4918_v10, %v7566_v8  ;;  %v4921_v9 = vadd.f32 %v5181_v6, %v4920_v35 }
 0xb24   : > { %4958 = vst.msk [vmem:[%s458_s24 + $0x10] sm:$0xff] %vm472_vm0, %v4950_v0  ;;  %v4951_v61 = vadd.f32 %v4929_v30, %v7579_v58 }
 0xb25   : > { %4956 = vst.msk [vmem:[%s458_s24] sm:$0xff] %vm472_vm0, %v4948_v14  ;;  %v4949_v57 = vadd.f32 %v4921_v9, %v7572_v46 }
 0xb26   : > { %4959 = vst.msk [vmem:[%s458_s24 + $0x18] sm:$0xff] %vm472_vm0, %v4951_v61 }
 0xb27   : > { %4957 = vst.msk [vmem:[%s458_s24 + $0x8] sm:$0xff] %vm472_vm0, %v4949_v57 }
 0xb5a   : > { %v5805_v45 = vpop.f32.mrb[136].mxu0 }
 0xb5b   : > { %v4942_v39 = vadd.f32 %v5805_v45, %v5181_v6  ;;  %v4933_v34 = vpop.f32.mrb[137].mxu0 }
 0xb5c   : > { %v4934_v2 = vadd.f32 %v5181_v6, %v4933_v34  ;;  %v5806_v8 = vpop.f32.mrb[138].mxu0 }
 0xb5d   : > { %v4954_v13 = vadd.f32 %v4942_v39, %v7589_v53  ;;  %v4945_v63 = vadd.f32 %v5806_v8, %v5181_v6  ;;  %v4936_v58 = vpop.f32.mrb[139].mxu0 }
 0xb5e   : > { %v4952_v18 = vadd.f32 %v4934_v2, %v7586_v42  ;;  %v4937_v46 = vadd.f32 %v5181_v6, %v4936_v58 }
 0xb5f   : > { %4962 = vst.msk [vmem:[%s458_s24 + $0x30] sm:$0xff] %vm472_vm0, %v4954_v13  ;;  %v4955_v19 = vadd.f32 %v4945_v63, %v7597_v38 }
 0xb60   : > { %4960 = vst.msk [vmem:[%s458_s24 + $0x20] sm:$0xff] %vm472_vm0, %v4952_v18  ;;  %v4953_v53 = vadd.f32 %v4937_v46, %v7592_v28 }
 0xb61   : > { %4963 = vst.msk [vmem:[%s458_s24 + $0x38] sm:$0xff] %vm472_vm0, %v4955_v19 }
 0xb62   : > { %4961 = vst.msk [vmem:[%s458_s24 + $0x28] sm:$0xff] %vm472_vm0, %v4953_v53 }
 0xb63   : > { %6167 = shalt.err (!%p6164_p2)
}
 0xb64   : > { %s6168_s24 = scalar_lea.hbm %s7725_s14, 1024  ;;  %s6172_s27 = scalar_lea.hbm %s7789_s13, 2048 }
 0xb65   : > { %p6169_p4 = scmp.ne.s32.totalorder %s7725_s14, %s6168_s24  ;;  %p6173_p9 = scmp.lt.u32.totalorder %s7725_s14, %s7789_s13 }
 0xb66   : > { %p6174_p1 = scmp.lt.u32.totalorder %s6172_s27, %s6168_s24  ;;  %p6176_p6 = scmp.lt.u32.totalorder %s6168_s24, %s7725_s14 }
 0xb67   : > { %p6170_p5 = pnand %p6169_p4, %p7825_p11 }
 0xb68   : > { %p6175_p3 = por %p6174_p1, %p6173_p9 }
 0xb69   : > { %p6171_p7 = pneg %p6170_p5 }
 0xb6a   : > { %p6177_p12 = por %p6176_p6, %p6175_p3 }
 0xb6c   : > { %p6178_p13 = pnand %p6177_p12, %p6171_p7 }
 0xb6e   : > { %6181 = shalt.err (!%p6178_p13)
}
 0xb6f   : > { %s6236_s17 = smov 128  }
 0xb70   : > { %5809 = dma.vmem_to_hbm [thread:$0]  (%p7825_p11), %s7729_s22, 1024, %s7725_s14, %s4965_s29, %s6236_s17, %s6236_s17, %s6232_s15  }
 0xb71 PF: > { %s7826_s18 = sld [smem:[#allocation8_spill]]  ;;  %p7827_p8 = scmp.ne.s32.totalorder %s7806_s21, 0 }
 0xb72   : > { %p7828_p10 = scmp.ge.s32.totalorder %s6220_s28, 2 }
 0xb74   : > { %p5816_p0 = pnand %p7828_p10, %p7827_p8 }
 0xb77   : > { %s4993_s23 = sand.u32 1, %s7826_s18  }
 0xb78   : > { %s4994_s24 = scalar_lea.sflag [#allocation4], %s4993_s23 }
 0xb79   : > { %6203 = dma.done.wait (!%p5816_p0), %s4994_s24, 1024  }
 0xb7a   : > { %6205 = vsyncadd (!%p5816_p0), %s4994_s24, 4294966272  ;;  %s7829_s28 = sld [smem:[#allocation10_spill]]  ;;  %s7830_s20 = sld [smem:[#allocation9_spill]] }
 0xb7b   : > { %s7831_s27 = sld [smem:[#allocation11_spill]]  ;;  %s7832_s25 = smov %s6212_s26 }
 0xb80   : > { %p26_p2 = scmp.ge.s32.totalorder %s7829_s28, 4   ;;  %s7833_s26 = smov %s7830_s20 }
 0xb82   :  { %28 = sbr.rel (!%p26_p2) target bundleno = 5 (0x5), region = 117 }
 0xb89   :  { %4999 = vsyncpa [#allocation3], 1 }
 0xb8a   :  { %5001 = vsyncpa [#allocation3 + $0x1], 1 }
 0xb8b   :  { %5002 = vsyncpa [#allocation4], 1 }
 0xb8c   :  { %5004 = vsyncpa [#allocation4 + $0x1], 1 }

</bundles_post_ra>
